<compile_context>
chip_gen: v5e
topology: v5e:2x2
jax: 0.10.0
libtpu: 0.0.40
codegen_flags: <defaults>
</compile_context>

<pallas_src>
import functools
import math

import jax
import jax.numpy as jnp
from jax.experimental import pallas as pl
from jax.experimental.pallas import tpu as pltpu

_INV_SQRT2 = 0.7071067811865476
_SQRT_2_OVER_PI = 0.7978845608028654


def _pose_regressor_kernel(xt_ref, w1t_ref, b1_ref, w2t_ref, b2_ref, ot_ref,
                           *, approx_gelu):
    # xt:  (D, TB)      x^T batch tile (streamed over the grid)
    # w1t: (CH, D)      fc_h.weight              -- VMEM-resident across steps
    # b1:  (CH, 1)      fc_h.bias (f32)          -- resident
    # w2t: (OUT8, CH)   fc_o.weight, 8-row pad   -- resident
    # b2:  (OUT8, 1)    fc_o.bias, 8-row pad     -- resident
    # ot:  (OUT8, TB)   y^T tile (batch on the lane axis -> lane-dense stores)
    xt = xt_ref[...].astype(w1t_ref.dtype)
    # h^T = W1 @ x^T + b1 : (CH, TB), f32 accumulation on the MXU.
    h = jnp.dot(w1t_ref[...], xt, preferred_element_type=jnp.float32) + b1_ref[...]
    if approx_gelu:
        # tanh-approx GELU: transcendental goes to the EUP slot (co-issues
        # with MXU/VPU); use only when the looser tolerance is acceptable.
        h = 0.5 * h * (1.0 + jnp.tanh(_SQRT_2_OVER_PI * (h + 0.044715 * h * h * h)))
    else:
        # Exact erf GELU (f32), matching torch.nn.functional.gelu's default.
        h = 0.5 * h * (1.0 + jax.lax.erf(h * _INV_SQRT2))
    # y^T = W2 @ h^T + b2 : (OUT8, TB).
    y = jnp.dot(w2t_ref[...], h.astype(w2t_ref.dtype),
                preferred_element_type=jnp.float32) + b2_ref[...]
    ot_ref[...] = y.astype(ot_ref.dtype)


def _round_up(x, m):
    return ((x + m - 1) // m) * m


def _choose_batch_tile(B):
    """Batch tile = lane dim of both GEMMs: keep it a multiple of 256 on
    v6e/v7x (2x256^2 MXU) and 128 on v5e; large enough to amortize the
    ~0.35us/step overhead, small enough to stay well under scoped VMEM."""
    try:
        kind = jax.devices()[0].device_kind.lower()
    except Exception:
        kind = ""
    is_v5 = "v5" in kind
    lane_mult = 128 if is_v5 else 256
    max_tb = 512 if is_v5 else 1024
    if "v7" in kind and B > lane_mult:
        # v7x has 2 TensorCores/chip: aim for >= 2 balanced tiles.
        target = _round_up(-(-B // 2), lane_mult)
    else:
        target = _round_up(B, lane_mult)
    return max(lane_mult, min(max_tb, target))


def prepare_pose_regressor_params(fc_h_w, fc_h_b, fc_o_w, fc_o_b, *,
                                  dot_dtype=jnp.float32):
    """One-time host-side prep (hoisted out of the per-call path):
    pad fc_o to 8 output rows (sublane granularity), reshape biases to
    columns, and cast the matmul weights to dot_dtype (bf16 for the fast MXU
    path; biases / GELU stay f32)."""
    ch, _ = fc_h_w.shape
    out_dim = fc_o_w.shape[0]
    out8 = _round_up(max(out_dim, 1), 8)
    w2t = jnp.pad(fc_o_w, ((0, out8 - out_dim), (0, 0))).astype(dot_dtype)
    b2 = jnp.pad(fc_o_b, (0, out8 - out_dim)).reshape(out8, 1).astype(jnp.float32)
    return {
        "w1t": fc_h_w.astype(dot_dtype),          # (CH, D)
        "b1": fc_h_b.reshape(ch, 1).astype(jnp.float32),
        "w2t": w2t,                                # (OUT8, CH)
        "b2": b2,                                  # (OUT8, 1)
        "out_dim": out_dim,
    }


def pose_regressor(x, params, *, batch_tile=None, approx_gelu=False):
    """Fused fc_h -> GELU -> fc_o.  x: (B, decoder_dim) -> (B, output_dim)."""
    B, D = x.shape
    w1t, b1, w2t, b2 = params["w1t"], params["b1"], params["w2t"], params["b2"]
    out_dim = params["out_dim"]
    CH = w1t.shape[0]
    OUT8 = w2t.shape[0]
    assert w1t.shape[1] == D, "decoder_dim mismatch between x and fc_h.weight"

    TB = _choose_batch_tile(B) if batch_tile is None else _round_up(batch_tile, 128)
    if TB >= B:
        TB = B  # single full-extent block: exact, no ragged handling needed
    n_tiles = pl.cdiv(B, TB)

    # Tiny (D x B) transpose keeps the module's (B, D) interface; the big
    # activations (h) never leave VMEM.
    xt = x.T

    yT = pl.pallas_call(
        functools.partial(_pose_regressor_kernel, approx_gelu=approx_gelu),
        out_shape=jax.ShapeDtypeStruct((OUT8, B), jnp.float32),
        grid_spec=pltpu.PrefetchScalarGridSpec(
            num_scalar_prefetch=0,
            grid=(n_tiles,),
            in_specs=[
                pl.BlockSpec((D, TB), lambda i: (0, i)),      # x^T tile (streamed)
                # Weights/biases are grid-invariant -> one DMA, VMEM-resident.
                # TODO(synk): pipeline_mode=pl.Buffered(1) on these four specs
                # would drop their redundant second pipeline buffer.
                pl.BlockSpec((CH, D), lambda i: (0, 0)),      # fc_h.weight
                pl.BlockSpec((CH, 1), lambda i: (0, 0)),      # fc_h.bias
                pl.BlockSpec((OUT8, CH), lambda i: (0, 0)),   # fc_o.weight (8-row pad)
                pl.BlockSpec((OUT8, 1), lambda i: (0, 0)),    # fc_o.bias  (8-row pad)
            ],
            out_specs=pl.BlockSpec((OUT8, TB), lambda i: (0, i)),
        ),
        compiler_params=pltpu.CompilerParams(
            # TODO(synk): verify "parallel" shards the batch grid across v7x's
            # two TensorCores; otherwise switch to CORE_PARALLEL / core_map.
            dimension_semantics=("parallel",),
        ),
    )(xt, w1t, b1, w2t, b2)

    # (OUT8, B) -> (B, out_dim): an 8xB f32 slab, negligible HBM traffic.
    return yT[:out_dim, :].T


# ----------------------------------------------------------------------------
# Parameter init (torch layout) + pure-JAX reference
# ----------------------------------------------------------------------------

def init_pose_regressor_params(key, decoder_dim, output_dim, ch=1024):
    """Torch-equivalent init: xavier_uniform_ on weights (out, in) and the
    nn.Linear default U(-1/sqrt(fan_in), 1/sqrt(fan_in)) on biases."""
    k1, k2, k3, k4 = jax.random.split(key, 4)
    bw1 = math.sqrt(6.0 / (decoder_dim + ch))
    fc_h_w = jax.random.uniform(k1, (ch, decoder_dim), jnp.float32, -bw1, bw1)
    bb1 = 1.0 / math.sqrt(decoder_dim)
    fc_h_b = jax.random.uniform(k2, (ch,), jnp.float32, -bb1, bb1)
    bw2 = math.sqrt(6.0 / (ch + output_dim))
    fc_o_w = jax.random.uniform(k3, (output_dim, ch), jnp.float32, -bw2, bw2)
    bb2 = 1.0 / math.sqrt(ch)
    fc_o_b = jax.random.uniform(k4, (output_dim,), jnp.float32, -bb2, bb2)
    return fc_h_w, fc_h_b, fc_o_w, fc_o_b


def _reference(x, fc_h_w, fc_h_b, fc_o_w, fc_o_b):
    h = x @ fc_h_w.T + fc_h_b
    h = 0.5 * h * (1.0 + jax.lax.erf(h * _INV_SQRT2))
    return h @ fc_o_w.T + fc_o_b


if __name__ == "__main__":
    DECODER_DIM = 32
    OUTPUT_DIM = 7  # e.g. 3-DoF translation + 4-DoF quaternion

    key = jax.random.PRNGKey(0)
    kx, kp, kx2 = jax.random.split(key, 3)
    raw = init_pose_regressor_params(kp, DECODER_DIM, OUTPUT_DIM)
    params_f32 = prepare_pose_regressor_params(*raw)                         # exact path
    params_bf16 = prepare_pose_regressor_params(*raw, dot_dtype=jnp.bfloat16)  # MXU path

    # Small batch: single full-extent block (TB == B).
    B = 8
    x = jax.random.normal(kx, (B, DECODER_DIM), dtype=jnp.float32)
    y = jax.block_until_ready(pose_regressor(x, params_f32))
    y_ref = _reference(x, *raw)
    assert y.shape == (B, OUTPUT_DIM)
    assert jnp.allclose(y, y_ref, rtol=1e-5, atol=1e-5), "mismatch (f32, B=8)"

    # Larger batch, default tile heuristic (single step on all generations).
    B2 = 300
    x2 = jax.random.normal(kx2, (B2, DECODER_DIM), dtype=jnp.float32)
    y2 = jax.block_until_ready(pose_regressor(x2, params_f32))
    y2_ref = _reference(x2, *raw)
    assert y2.shape == (B2, OUTPUT_DIM)
    assert jnp.allclose(y2, y2_ref, rtol=1e-5, atol=1e-5), "mismatch (f32, B=300)"

    # Multi-tile grid with a Pallas-masked ragged last tile (300 = 2*128 + 44).
    y2t = jax.block_until_ready(pose_regressor(x2, params_f32, batch_tile=128))
    assert jnp.allclose(y2t, y2_ref, rtol=1e-5, atol=1e-5), "mismatch (f32, tiled)"

    # Gated bf16 MXU path: f32 accumulation, looser tolerance vs f32 reference.
    y2b = jax.block_until_ready(pose_regressor(x2, params_bf16, batch_tile=128))
    assert y2b.shape == (B2, OUTPUT_DIM)
    assert jnp.allclose(y2b, y2_ref, rtol=2e-2, atol=2e-2), "mismatch (bf16)"

    print("KERNEL_OK")
</pallas_src>

<mosaic_0001>
module attributes {stable_mosaic.version = 11 : i64} {
  func.func @_pose_regressor_kernel(%arg0: i32, %arg1: memref<32x8xf32, #tpu.memory_space<vmem>>, %arg2: memref<1024x32xf32, #tpu.memory_space<vmem>>, %arg3: memref<1024x1xf32, #tpu.memory_space<vmem>>, %arg4: memref<8x1024xf32, #tpu.memory_space<vmem>>, %arg5: memref<8x1xf32, #tpu.memory_space<vmem>>, %arg6: memref<8x8xf32, #tpu.memory_space<vmem>>) attributes {dimension_semantics = [#tpu.dimension_semantics<parallel>], iteration_bounds = array<i64: 1>, scalar_prefetch = 0 : i64, scratch_operands = 0 : i64, tpu.core_type = #tpu.core_type<tc>, window_params = [{transform_indices = @transform_0, window_bounds = array<i64: 32, 8>}, {pipeline_mode = #tpu.pipeline_mode<synchronous>, transform_indices = @transform_1, window_bounds = array<i64: 1024, 32>}, {pipeline_mode = #tpu.pipeline_mode<synchronous>, transform_indices = @transform_2, window_bounds = array<i64: 1024, 1>}, {pipeline_mode = #tpu.pipeline_mode<synchronous>, transform_indices = @transform_3, window_bounds = array<i64: 8, 1024>}, {pipeline_mode = #tpu.pipeline_mode<synchronous>, transform_indices = @transform_4, window_bounds = array<i64: 8, 1>}, {transform_indices = @transform_5, window_bounds = array<i64: 8, 8>}]} {
    %c0 = arith.constant 0 : index
    %c0_0 = arith.constant 0 : index
    %0 = vector.load %arg1[%c0, %c0_0] : memref<32x8xf32, #tpu.memory_space<vmem>>, vector<32x8xf32>
    %c0_1 = arith.constant 0 : index
    %c0_2 = arith.constant 0 : index
    %1 = vector.load %arg2[%c0_1, %c0_2] : memref<1024x32xf32, #tpu.memory_space<vmem>>, vector<1024x32xf32>
    %cst = arith.constant dense<0.000000e+00> : vector<1024x8xf32>
    %2 = tpu.matmul %1, %0, %cst {dimension_numbers = #tpu.dot_dimension_numbers<[1], [0], [0], [1], [0, 0, 1, 1], [], []>} : vector<1024x32xf32>, vector<32x8xf32>, vector<1024x8xf32> -> vector<1024x8xf32>
    %c0_3 = arith.constant 0 : index
    %c0_4 = arith.constant 0 : index
    %3 = vector.load %arg3[%c0_3, %c0_4] : memref<1024x1xf32, #tpu.memory_space<vmem>>, vector<1024x1xf32>
    %4 = vector.broadcast %3 : vector<1024x1xf32> to vector<1024x8xf32>
    %5 = arith.addf %2, %4 : vector<1024x8xf32>
    %cst_5 = arith.constant 5.000000e-01 : f32
    %6 = vector.broadcast %cst_5 : f32 to vector<1024x8xf32>
    %7 = arith.mulf %6, %5 : vector<1024x8xf32>
    %cst_6 = arith.constant 0.707106769 : f32
    %8 = vector.broadcast %cst_6 : f32 to vector<1024x8xf32>
    %9 = arith.mulf %5, %8 : vector<1024x8xf32>
    %10 = math.erf %9 : vector<1024x8xf32>
    %cst_7 = arith.constant 1.000000e+00 : f32
    %11 = vector.broadcast %cst_7 : f32 to vector<1024x8xf32>
    %12 = arith.addf %11, %10 : vector<1024x8xf32>
    %13 = arith.mulf %7, %12 : vector<1024x8xf32>
    %c0_8 = arith.constant 0 : index
    %c0_9 = arith.constant 0 : index
    %14 = vector.load %arg4[%c0_8, %c0_9] : memref<8x1024xf32, #tpu.memory_space<vmem>>, vector<8x1024xf32>
    %cst_10 = arith.constant dense<0.000000e+00> : vector<8x8xf32>
    %15 = tpu.matmul %14, %13, %cst_10 {dimension_numbers = #tpu.dot_dimension_numbers<[1], [0], [0], [1], [0, 0, 1, 1], [], []>} : vector<8x1024xf32>, vector<1024x8xf32>, vector<8x8xf32> -> vector<8x8xf32>
    %c0_11 = arith.constant 0 : index
    %c0_12 = arith.constant 0 : index
    %16 = vector.load %arg5[%c0_11, %c0_12] : memref<8x1xf32, #tpu.memory_space<vmem>>, vector<8x1xf32>
    %17 = vector.broadcast %16 : vector<8x1xf32> to vector<8x8xf32>
    %18 = arith.addf %15, %17 : vector<8x8xf32>
    %c0_13 = arith.constant 0 : index
    %c0_14 = arith.constant 0 : index
    %19 = vector.load %arg6[%c0_13, %c0_14] : memref<8x8xf32, #tpu.memory_space<vmem>>, vector<8x8xf32>
    tpu.vector_store %arg6[%c0_13, %c0_14], %18 {strides = array<i32>} : memref<8x8xf32, #tpu.memory_space<vmem>>, vector<8x8xf32>,
    return
  }
  func.func @transform_0(%arg0: i32) -> (i32, i32) {
    %c0_i32 = arith.constant 0 : i32
    %c0_i32_0 = arith.constant 0 : i32
    return %c0_i32, %arg0 : i32, i32
  }
  func.func @transform_1(%arg0: i32) -> (i32, i32) {
    %c0_i32 = arith.constant 0 : i32
    %c0_i32_0 = arith.constant 0 : i32
    %c0_i32_1 = arith.constant 0 : i32
    return %c0_i32, %c0_i32_0 : i32, i32
  }
  func.func @transform_2(%arg0: i32) -> (i32, i32) {
    %c0_i32 = arith.constant 0 : i32
    %c0_i32_0 = arith.constant 0 : i32
    %c0_i32_1 = arith.constant 0 : i32
    return %c0_i32, %c0_i32_0 : i32, i32
  }
  func.func @transform_3(%arg0: i32) -> (i32, i32) {
    %c0_i32 = arith.constant 0 : i32
    %c0_i32_0 = arith.constant 0 : i32
    %c0_i32_1 = arith.constant 0 : i32
    return %c0_i32, %c0_i32_0 : i32, i32
  }
  func.func @transform_4(%arg0: i32) -> (i32, i32) {
    %c0_i32 = arith.constant 0 : i32
    %c0_i32_0 = arith.constant 0 : i32
    %c0_i32_1 = arith.constant 0 : i32
    return %c0_i32, %c0_i32_0 : i32, i32
  }
  func.func @transform_5(%arg0: i32) -> (i32, i32) {
    %c0_i32 = arith.constant 0 : i32
    %c0_i32_0 = arith.constant 0 : i32
    return %c0_i32, %arg0 : i32, i32
  }
}

</mosaic_0001>

<bundles_post_ra>
// kernel: tpu_custom_call.1
= control target key start
LH: loop header
LB: loop body
LE: loop exit
PB: predicated region body
PF: predicated region fallthrough
CT: control target
= control target key end

     0   :  { %v8086_v1 = vmov 0   ;;  %vm921_vm0 = vcmask 261120   ;;  %s15812_s0 = inlined_call_operand.vmem [shape: f32[32,8], index: 0, kind: input, shape index: {}]   ;;  %s15813_s1 = inlined_call_operand.vmem [shape: f32[1024,32], index: 1, kind: input, shape index: {}]   ;;  %s15814_s2 = inlined_call_operand.vmem [shape: f32[1024,1], index: 2, kind: input, shape index: {}]   ;;  %s15815_s3 = inlined_call_operand.vmem [shape: f32[8,1024], index: 3, kind: input, shape index: {}]   ;;  %s15816_s4 = inlined_call_operand.vmem [shape: f32[8,1], index: 4, kind: input, shape index: {}]   ;;  %s15817_s5 = inlined_call_operand.hbm [shape: f32[8,8], index: 5, kind: output, shape index: {}]  }
   0x1   :  { %v24_v0 = vld [vmem:[%s15812_s0 + $0x18] sm:$0xff]  ;;  %7803 = vset.pattern.permute.xlu2 %v8086_v1  ;;  %7802 = vset.pattern.permute.xlu1 %v8086_v1  ;;  %v157_v2 = vld [vmem:[%s15814_s2 + $0x20] sm:$0xff]  ;;  %v155_v3 = vld [vmem:[%s15814_s2 + $0x10] sm:$0xff] }
   0x2   :  { %7801 = vset.pattern.permute.xlu0 %v8086_v1  ;;  %1318 = vmatpush.msra.mxu0 %v24_v0  ;;  %v153_v4 = vld [vmem:[%s15814_s2] sm:$0xff]  ;;  %v23_v5 = vld [vmem:[%s15812_s0 + $0x10] sm:$0xff]  ;;  %v22_v6 = vld [vmem:[%s15812_s0 + $0x8] sm:$0xff] }
   0x3   :  { %7787 = vmatpush.msra.mxu1 %v24_v0  ;;  %7789 = vmatpush.msra.mxu3 %v24_v0  ;;  %v21_v7 = vld [vmem:[%s15812_s0] sm:$0xff]  ;;  %v119_v10 = vld [vmem:[%s15813_s1 + $0x2f0] sm:$0xff]  ;;  %v158_v11 = vld [vmem:[%s15814_s2 + $0x28] sm:$0xff] }
   0x4   :  { %303 = vperm.xlu2 %7803, %v157_v2   ;;  %293 = vperm.xlu1 %7802, %v155_v3   ;;  %v25_v8 = vld [vmem:[%s15813_s1] sm:$0xff]  ;;  %v156_v12 = vld [vmem:[%s15814_s2 + $0x18] sm:$0xff]  ;;  %v154_v13 = vld [vmem:[%s15814_s2 + $0x8] sm:$0xff] }
   0x5   :  { %283 = vperm.xlu0 %7801, %v153_v4   ;;  %1319 = vmatpush.msra.mxu0 %v23_v5  ;;  %v65_v9 = vld [vmem:[%s15813_s1 + $0x140] sm:$0xff] }
   0x6   :  { %7790 = vmatpush.msra.mxu1 %v23_v5  ;;  %7792 = vmatpush.msra.mxu3 %v23_v5 }
   0x7   :  { %1320 = vmatpush.msra.mxu0 %v22_v6  ;;  %7788 = vmatpush.msra.mxu2 %v24_v0 }
   0x8   :  { %7793 = vmatpush.msra.mxu1 %v22_v6  ;;  %7795 = vmatpush.msra.mxu3 %v22_v6 }
   0x9   :  { %1321 = vmatpush.msra.mxu0 %v21_v7  ;;  %7791 = vmatpush.msra.mxu2 %v23_v5 }
   0xa   :  { %7796 = vmatpush.msra.mxu1 %v21_v7  ;;  %7798 = vmatpush.msra.mxu3 %v21_v7 }
   0xb   :  { %7531 = vmatmul.msk.f32.vlgmr.msra.gmra.mxu0 %vm921_vm0, %v25_v8  ;;  %7571 = vmatmul.msk.f32.vlgmr.msra.gmra.mxu1 %vm921_vm0, %v65_v9 }
   0xc   :  { %7625 = vmatmul.msk.f32.vlgmr.msra.gmra.mxu3 %vm921_vm0, %v119_v10  ;;  %308 = vperm.xlu2 %7803, %v158_v11  }
   0xd   :  { %298 = vperm.xlu1 %7802, %v156_v12   ;;  %288 = vperm.xlu0 %7801, %v154_v13  }
   0xe   :  { %10 = vsyncpa [#allocation3], 0  ;;  %7794 = vmatpush.msra.mxu2 %v22_v6  ;;  %v94_v14 = vld [vmem:[%s15813_s1 + $0x228] sm:$0xff]  ;;  %v120_v17 = vld [vmem:[%s15813_s1 + $0x2f8] sm:$0xff]  ;;  %s8087_s8 = smov [#allocation2]   ;;  %s7522_s10 = sshll.u32 %s15817_s5, 4  ;;  %s7523_s10 = int_to_ptr.hbm [resolvable:$true] %s7522_s10 }
   0xf   :  { %v26_v15 = vld [vmem:[%s15813_s1 + $0x8] sm:$0xff]  ;;  %v161_v18 = vld [vmem:[%s15814_s2 + $0x40] sm:$0xff]  ;;  %v160_v19 = vld [vmem:[%s15814_s2 + $0x38] sm:$0xff] }
  0x10   :  { %v66_v16 = vld [vmem:[%s15813_s1 + $0x148] sm:$0xff]  ;;  %7797 = vmatpush.msra.mxu2 %v21_v7  ;;  %v159_v20 = vld [vmem:[%s15814_s2 + $0x30] sm:$0xff]  ;;  %v121_v24 = vld [vmem:[%s15813_s1 + $0x300] sm:$0xff] }
  0x11   :  { %7600 = vmatmul.msk.f32.vlgmr.msra.gmra.mxu2 %vm921_vm0, %v94_v14  ;;  %v95_v21 = vld [vmem:[%s15813_s1 + $0x230] sm:$0xff]  ;;  %v164_v25 = vld [vmem:[%s15814_s2 + $0x58] sm:$0xff]  ;;  %v162_v27 = vld [vmem:[%s15814_s2 + $0x48] sm:$0xff] }
  0x12   :  { %v27_v22 = vld [vmem:[%s15813_s1 + $0x10] sm:$0xff]  ;;  %v96_v28 = vld [vmem:[%s15813_s1 + $0x238] sm:$0xff]  ;;  %v122_v31 = vld [vmem:[%s15813_s1 + $0x308] sm:$0xff] }
  0x13   :  { %7532 = vmatmul.msk.f32.gmra.mxu0 %vm921_vm0, %v26_v15  ;;  %7572 = vmatmul.msk.f32.gmra.mxu1 %vm921_vm0, %v66_v16  ;;  %v67_v23 = vld [vmem:[%s15813_s1 + $0x150] sm:$0xff]  ;;  %v28_v29 = vld [vmem:[%s15813_s1 + $0x18] sm:$0xff]  ;;  %v166_v33 = vld [vmem:[%s15814_s2 + $0x68] sm:$0xff] }
  0x14   :  { %7626 = vmatmul.msk.f32.gmra.mxu3 %vm921_vm0, %v120_v17  ;;  %323 = vperm.xlu2 %7803, %v161_v18   ;;  %v163_v26 = vld [vmem:[%s15814_s2 + $0x50] sm:$0xff]  ;;  %v68_v30 = vld [vmem:[%s15813_s1 + $0x158] sm:$0xff]  ;;  %v165_v34 = vld [vmem:[%s15814_s2 + $0x60] sm:$0xff] }
  0x15   :  { %318 = vperm.xlu1 %7802, %v160_v19   ;;  %313 = vperm.xlu0 %7801, %v159_v20   ;;  %v167_v32 = vld [vmem:[%s15814_s2 + $0x70] sm:$0xff]  ;;  %v97_v35 = vld [vmem:[%s15813_s1 + $0x240] sm:$0xff]  ;;  %v170_v39 = vld [vmem:[%s15814_s2 + $0x88] sm:$0xff] }
  0x16   :  { %v29_v36 = vld [vmem:[%s15813_s1 + $0x20] sm:$0xff]  ;;  %v123_v38 = vld [vmem:[%s15813_s1 + $0x310] sm:$0xff]  ;;  %v168_v41 = vld [vmem:[%s15814_s2 + $0x78] sm:$0xff] }
  0x17   :  { %v69_v37 = vld [vmem:[%s15813_s1 + $0x160] sm:$0xff]  ;;  %v98_v42 = vld [vmem:[%s15813_s1 + $0x248] sm:$0xff]  ;;  %v124_v45 = vld [vmem:[%s15813_s1 + $0x318] sm:$0xff] }
  0x18   :  { %v169_v40 = vld [vmem:[%s15814_s2 + $0x80] sm:$0xff]  ;;  %v30_v43 = vld [vmem:[%s15813_s1 + $0x28] sm:$0xff]  ;;  %v172_v47 = vld [vmem:[%s15814_s2 + $0x98] sm:$0xff] }
  0x19   :  { %7601 = vmatmul.msk.f32.gmra.mxu2 %vm921_vm0, %v95_v21  ;;  %v70_v44 = vld [vmem:[%s15813_s1 + $0x168] sm:$0xff]  ;;  %v173_v46 = vld [vmem:[%s15814_s2 + $0xa0] sm:$0xff]  ;;  %v171_v48 = vld [vmem:[%s15814_s2 + $0x90] sm:$0xff] }
  0x1a   :  { %v99_v49 = vld [vmem:[%s15813_s1 + $0x250] sm:$0xff]  ;;  %v125_v52 = vld [vmem:[%s15813_s1 + $0x320] sm:$0xff]  ;;  %v176_v53 = vld [vmem:[%s15814_s2 + $0xb8] sm:$0xff] }
  0x1b   :  { %7533 = vmatmul.msk.f32.gmra.mxu0 %vm921_vm0, %v27_v22  ;;  %7573 = vmatmul.msk.f32.gmra.mxu1 %vm921_vm0, %v67_v23  ;;  %v31_v50 = vld [vmem:[%s15813_s1 + $0x30] sm:$0xff]  ;;  %v174_v55 = vld [vmem:[%s15814_s2 + $0xa8] sm:$0xff]  ;;  %v100_v56 = vld [vmem:[%s15813_s1 + $0x258] sm:$0xff] }
  0x1c   :  { %7627 = vmatmul.msk.f32.gmra.mxu3 %vm921_vm0, %v121_v24  ;;  %338 = vperm.xlu2 %7803, %v164_v25   ;;  %v71_v51 = vld [vmem:[%s15813_s1 + $0x170] sm:$0xff]  ;;  %v32_v57 = vld [vmem:[%s15813_s1 + $0x38] sm:$0xff]  ;;  %v126_v59 = vld [vmem:[%s15813_s1 + $0x328] sm:$0xff] }
  0x1d   :  { %333 = vperm.xlu1 %7802, %v163_v26   ;;  %328 = vperm.xlu0 %7801, %v162_v27   ;;  %v175_v54 = vld [vmem:[%s15814_s2 + $0xb0] sm:$0xff]  ;;  %v72_v58 = vld [vmem:[%s15813_s1 + $0x178] sm:$0xff]  ;;  %v178_v61 = vld [vmem:[%s15814_s2 + $0xc8] sm:$0xff] }
  0x1e   :  { %v179_v60 = vld [vmem:[%s15814_s2 + $0xd0] sm:$0xff]  ;;  %v177_v62 = vld [vmem:[%s15814_s2 + $0xc0] sm:$0xff]  ;;  %v182_v3 = vld [vmem:[%s15814_s2 + $0xe8] sm:$0xff] }
  0x1f   :  { %v101_v63 = vld [vmem:[%s15813_s1 + $0x260] sm:$0xff]  ;;  %v127_v2 = vld [vmem:[%s15813_s1 + $0x330] sm:$0xff]  ;;  %v180_v5 = vld [vmem:[%s15814_s2 + $0xd8] sm:$0xff] }
  0x20   :  { %v33_v0 = vld [vmem:[%s15813_s1 + $0x40] sm:$0xff]  ;;  %v102_v6 = vld [vmem:[%s15813_s1 + $0x268] sm:$0xff]  ;;  %v128_v9 = vld [vmem:[%s15813_s1 + $0x338] sm:$0xff] }
  0x21   :  { %7602 = vmatmul.msk.f32.gmra.mxu2 %vm921_vm0, %v96_v28  ;;  %v73_v1 = vld [vmem:[%s15813_s1 + $0x180] sm:$0xff]  ;;  %v34_v7 = vld [vmem:[%s15813_s1 + $0x48] sm:$0xff]  ;;  %v184_v11 = vld [vmem:[%s15814_s2 + $0xf8] sm:$0xff] }
  0x22   :  { %v181_v4 = vld [vmem:[%s15814_s2 + $0xe0] sm:$0xff]  ;;  %v74_v8 = vld [vmem:[%s15813_s1 + $0x188] sm:$0xff]  ;;  %v183_v12 = vld [vmem:[%s15814_s2 + $0xf0] sm:$0xff] }
  0x23   :  { %7534 = vmatmul.msk.f32.gmra.mxu0 %vm921_vm0, %v28_v29  ;;  %7574 = vmatmul.msk.f32.gmra.mxu1 %vm921_vm0, %v68_v30  ;;  %v185_v10 = vld [vmem:[%s15814_s2 + $0x100] sm:$0xff]  ;;  %v103_v13 = vld [vmem:[%s15813_s1 + $0x270] sm:$0xff]  ;;  %v188_v17 = vld [vmem:[%s15814_s2 + $0x118] sm:$0xff] }
  0x24   :  { %7628 = vmatmul.msk.f32.gmra.mxu3 %vm921_vm0, %v122_v31  ;;  %353 = vperm.xlu2 %7803, %v167_v32   ;;  %v35_v14 = vld [vmem:[%s15813_s1 + $0x50] sm:$0xff]  ;;  %v129_v16 = vld [vmem:[%s15813_s1 + $0x340] sm:$0xff]  ;;  %v186_v19 = vld [vmem:[%s15814_s2 + $0x108] sm:$0xff] }
  0x25   :  { %348 = vperm.xlu1 %7802, %v166_v33   ;;  %343 = vperm.xlu0 %7801, %v165_v34   ;;  %v75_v15 = vld [vmem:[%s15813_s1 + $0x190] sm:$0xff]  ;;  %v104_v21 = vld [vmem:[%s15813_s1 + $0x278] sm:$0xff]  ;;  %v130_v24 = vld [vmem:[%s15813_s1 + $0x348] sm:$0xff] }
  0x26   :  { %v187_v18 = vld [vmem:[%s15814_s2 + $0x110] sm:$0xff]  ;;  %v36_v22 = vld [vmem:[%s15813_s1 + $0x58] sm:$0xff]  ;;  %v190_v26 = vld [vmem:[%s15814_s2 + $0x128] sm:$0xff] }
  0x27   :  { %v76_v23 = vld [vmem:[%s15813_s1 + $0x198] sm:$0xff]  ;;  %v191_v25 = vld [vmem:[%s15814_s2 + $0x130] sm:$0xff]  ;;  %v189_v27 = vld [vmem:[%s15814_s2 + $0x120] sm:$0xff] }
  0x28   :  { %v105_v29 = vld [vmem:[%s15813_s1 + $0x280] sm:$0xff]  ;;  %v131_v32 = vld [vmem:[%s15813_s1 + $0x350] sm:$0xff]  ;;  %v194_v33 = vld [vmem:[%s15814_s2 + $0x148] sm:$0xff] }
  0x29   :  { %7603 = vmatmul.msk.f32.gmra.mxu2 %vm921_vm0, %v97_v35  ;;  %v37_v30 = vld [vmem:[%s15813_s1 + $0x60] sm:$0xff]  ;;  %v192_v35 = vld [vmem:[%s15814_s2 + $0x138] sm:$0xff] }
  0x2a   :  { %v77_v31 = vld [vmem:[%s15813_s1 + $0x1a0] sm:$0xff] }
  0x2b   :  { %7535 = vmatmul.msk.f32.gmra.mxu0 %vm921_vm0, %v29_v36  ;;  %7575 = vmatmul.msk.f32.gmra.mxu1 %vm921_vm0, %v69_v37  ;;  %v193_v34 = vld [vmem:[%s15814_s2 + $0x140] sm:$0xff]  ;;  %v106_v37 = vld [vmem:[%s15813_s1 + $0x288] sm:$0xff] }
  0x2c   :  { %7629 = vmatmul.msk.f32.gmra.mxu3 %vm921_vm0, %v123_v38  ;;  %368 = vperm.xlu2 %7803, %v170_v39   ;;  %v38_v38 = vld [vmem:[%s15813_s1 + $0x68] sm:$0xff] }
  0x2d   :  { %363 = vperm.xlu1 %7802, %v169_v40   ;;  %358 = vperm.xlu0 %7801, %v168_v41   ;;  %v78_v39 = vld [vmem:[%s15813_s1 + $0x1a8] sm:$0xff]  ;;  %v132_v40 = vld [vmem:[%s15813_s1 + $0x358] sm:$0xff]  ;;  %v197_v41 = vld [vmem:[%s15814_s2 + $0x160] sm:$0xff] }
  0x31   :  { %7604 = vmatmul.msk.f32.gmra.mxu2 %vm921_vm0, %v98_v42  ;;  %v196_v42 = vld [vmem:[%s15814_s2 + $0x158] sm:$0xff] }
  0x33   :  { %7536 = vmatmul.msk.f32.gmra.mxu0 %vm921_vm0, %v30_v43  ;;  %7576 = vmatmul.msk.f32.gmra.mxu1 %vm921_vm0, %v70_v44  ;;  %v195_v43 = vld [vmem:[%s15814_s2 + $0x150] sm:$0xff] }
  0x34   :  { %7630 = vmatmul.msk.f32.gmra.mxu3 %vm921_vm0, %v124_v45  ;;  %383 = vperm.xlu2 %7803, %v173_v46   ;;  %v107_v46 = vld [vmem:[%s15813_s1 + $0x290] sm:$0xff] }
  0x35   :  { %378 = vperm.xlu1 %7802, %v172_v47   ;;  %373 = vperm.xlu0 %7801, %v171_v48   ;;  %v39_v48 = vld [vmem:[%s15813_s1 + $0x70] sm:$0xff] }
  0x39   :  { %7605 = vmatmul.msk.f32.gmra.mxu2 %vm921_vm0, %v99_v49  ;;  %v79_v49 = vld [vmem:[%s15813_s1 + $0x1b0] sm:$0xff] }
  0x3b   :  { %7537 = vmatmul.msk.f32.gmra.mxu0 %vm921_vm0, %v31_v50  ;;  %7577 = vmatmul.msk.f32.gmra.mxu1 %vm921_vm0, %v71_v51  ;;  %v133_v50 = vld [vmem:[%s15813_s1 + $0x360] sm:$0xff]  ;;  %v200_v51 = vld [vmem:[%s15814_s2 + $0x178] sm:$0xff] }
  0x3c   :  { %7631 = vmatmul.msk.f32.gmra.mxu3 %vm921_vm0, %v125_v52  ;;  %398 = vperm.xlu2 %7803, %v176_v53   ;;  %v199_v52 = vld [vmem:[%s15814_s2 + $0x170] sm:$0xff]  ;;  %v198_v53 = vld [vmem:[%s15814_s2 + $0x168] sm:$0xff] }
  0x3d   :  { %393 = vperm.xlu1 %7802, %v175_v54   ;;  %388 = vperm.xlu0 %7801, %v174_v55   ;;  %v108_v55 = vld [vmem:[%s15813_s1 + $0x298] sm:$0xff] }
  0x41   :  { %7606 = vmatmul.msk.f32.gmra.mxu2 %vm921_vm0, %v100_v56 }
  0x43   :  { %7538 = vmatmul.msk.f32.gmra.mxu0 %vm921_vm0, %v32_v57  ;;  %7578 = vmatmul.msk.f32.gmra.mxu1 %vm921_vm0, %v72_v58  ;;  %v40_v58 = vld [vmem:[%s15813_s1 + $0x78] sm:$0xff] }
  0x44   :  { %7632 = vmatmul.msk.f32.gmra.mxu3 %vm921_vm0, %v126_v59  ;;  %413 = vperm.xlu2 %7803, %v179_v60   ;;  %v80_v59 = vld [vmem:[%s15813_s1 + $0x1b8] sm:$0xff]  ;;  %v134_v60 = vld [vmem:[%s15813_s1 + $0x368] sm:$0xff] }
  0x45   :  { %408 = vperm.xlu1 %7802, %v178_v61   ;;  %403 = vperm.xlu0 %7801, %v177_v62   ;;  %v203_v61 = vld [vmem:[%s15814_s2 + $0x190] sm:$0xff]  ;;  %v202_v62 = vld [vmem:[%s15814_s2 + $0x188] sm:$0xff] }
  0x49   :  { %7607 = vmatmul.msk.f32.gmra.mxu2 %vm921_vm0, %v101_v63  ;;  %v201_v63 = vld [vmem:[%s15814_s2 + $0x180] sm:$0xff] }
  0x4b   :  { %7539 = vmatmul.msk.f32.gmra.mxu0 %vm921_vm0, %v33_v0  ;;  %7579 = vmatmul.msk.f32.gmra.mxu1 %vm921_vm0, %v73_v1  ;;  %v109_v1 = vld [vmem:[%s15813_s1 + $0x2a0] sm:$0xff] }
  0x4c   :  { %7633 = vmatmul.msk.f32.gmra.mxu3 %vm921_vm0, %v127_v2  ;;  %428 = vperm.xlu2 %7803, %v182_v3  }
  0x4d   :  { %423 = vperm.xlu1 %7802, %v181_v4   ;;  %418 = vperm.xlu0 %7801, %v180_v5   ;;  %v41_v5 = vld [vmem:[%s15813_s1 + $0x80] sm:$0xff] }
  0x51   :  { %7608 = vmatmul.msk.f32.gmra.mxu2 %vm921_vm0, %v102_v6  ;;  %v81_v6 = vld [vmem:[%s15813_s1 + $0x1c0] sm:$0xff] }
  0x53   :  { %7540 = vmatmul.msk.f32.gmra.mxu0 %vm921_vm0, %v34_v7  ;;  %7580 = vmatmul.msk.f32.gmra.mxu1 %vm921_vm0, %v74_v8  ;;  %v135_v7 = vld [vmem:[%s15813_s1 + $0x370] sm:$0xff]  ;;  %v206_v8 = vld [vmem:[%s15814_s2 + $0x1a8] sm:$0xff] }
  0x54   :  { %7634 = vmatmul.msk.f32.gmra.mxu3 %vm921_vm0, %v128_v9  ;;  %443 = vperm.xlu2 %7803, %v185_v10   ;;  %v205_v9 = vld [vmem:[%s15814_s2 + $0x1a0] sm:$0xff]  ;;  %v204_v10 = vld [vmem:[%s15814_s2 + $0x198] sm:$0xff] }
  0x55   :  { %438 = vperm.xlu1 %7802, %v184_v11   ;;  %433 = vperm.xlu0 %7801, %v183_v12   ;;  %v110_v12 = vld [vmem:[%s15813_s1 + $0x2a8] sm:$0xff] }
  0x59   :  { %7609 = vmatmul.msk.f32.gmra.mxu2 %vm921_vm0, %v103_v13 }
  0x5b   :  { %7541 = vmatmul.msk.f32.gmra.mxu0 %vm921_vm0, %v35_v14  ;;  %7581 = vmatmul.msk.f32.gmra.mxu1 %vm921_vm0, %v75_v15  ;;  %v42_v15 = vld [vmem:[%s15813_s1 + $0x88] sm:$0xff] }
  0x5c   :  { %7635 = vmatmul.msk.f32.gmra.mxu3 %vm921_vm0, %v129_v16  ;;  %458 = vperm.xlu2 %7803, %v188_v17   ;;  %v82_v16 = vld [vmem:[%s15813_s1 + $0x1c8] sm:$0xff] }
  0x5d   :  { %453 = vperm.xlu1 %7802, %v187_v18   ;;  %448 = vperm.xlu0 %7801, %v186_v19   ;;  %v136_v18 = vld [vmem:[%s15813_s1 + $0x378] sm:$0xff]  ;;  %v209_v19 = vld [vmem:[%s15814_s2 + $0x1c0] sm:$0xff] }
  0x5e   :  { %v8410_v20 = vpop.permute.xlu2 %303 }
  0x61   :  { %7610 = vmatmul.msk.f32.gmra.mxu2 %vm921_vm0, %v104_v21  ;;  %v208_v21 = vld [vmem:[%s15814_s2 + $0x1b8] sm:$0xff] }
  0x63   :  { %7542 = vmatmul.msk.f32.gmra.mxu0 %vm921_vm0, %v36_v22  ;;  %7582 = vmatmul.msk.f32.gmra.mxu1 %vm921_vm0, %v76_v23  ;;  %v207_v22 = vld [vmem:[%s15814_s2 + $0x1b0] sm:$0xff] }
  0x64   :  { %7636 = vmatmul.msk.f32.gmra.mxu3 %vm921_vm0, %v130_v24  ;;  %473 = vperm.xlu2 %7803, %v191_v25   ;;  %v111_v24 = vld [vmem:[%s15813_s1 + $0x2b0] sm:$0xff] }
  0x65   :  { %468 = vperm.xlu1 %7802, %v190_v26   ;;  %463 = vperm.xlu0 %7801, %v189_v27   ;;  %v43_v27 = vld [vmem:[%s15813_s1 + $0x90] sm:$0xff] }
  0x66   :  { %v8437_v28 = vpop.permute.xlu2 %308 }
  0x69   :  { %7611 = vmatmul.msk.f32.gmra.mxu2 %vm921_vm0, %v105_v29  ;;  %v83_v29 = vld [vmem:[%s15813_s1 + $0x1d0] sm:$0xff] }
  0x6b   :  { %7543 = vmatmul.msk.f32.gmra.mxu0 %vm921_vm0, %v37_v30  ;;  %7583 = vmatmul.msk.f32.gmra.mxu1 %vm921_vm0, %v77_v31  ;;  %v137_v31 = vld [vmem:[%s15813_s1 + $0x380] sm:$0xff] }
  0x6c   :  { %7637 = vmatmul.msk.f32.gmra.mxu3 %vm921_vm0, %v131_v32  ;;  %488 = vperm.xlu2 %7803, %v194_v33   ;;  %v212_v32 = vld [vmem:[%s15814_s2 + $0x1d8] sm:$0xff]  ;;  %v211_v33 = vld [vmem:[%s15814_s2 + $0x1d0] sm:$0xff] }
  0x6d   :  { %483 = vperm.xlu1 %7802, %v193_v34   ;;  %478 = vperm.xlu0 %7801, %v192_v35   ;;  %v210_v34 = vld [vmem:[%s15814_s2 + $0x1c8] sm:$0xff] }
  0x6e   :  { %v8464_v36 = vpop.permute.xlu2 %323 }
  0x71   :  { %7612 = vmatmul.msk.f32.gmra.mxu2 %vm921_vm0, %v106_v37  ;;  %v112_v37 = vld [vmem:[%s15813_s1 + $0x2b8] sm:$0xff] }
  0x73   :  { %7544 = vmatmul.msk.f32.gmra.mxu0 %vm921_vm0, %v38_v38  ;;  %7584 = vmatmul.msk.f32.gmra.mxu1 %vm921_vm0, %v78_v39  ;;  %v44_v39 = vld [vmem:[%s15813_s1 + $0x98] sm:$0xff] }
  0x74   :  { %7638 = vmatmul.msk.f32.gmra.mxu3 %vm921_vm0, %v132_v40  ;;  %503 = vperm.xlu2 %7803, %v197_v41   ;;  %v84_v40 = vld [vmem:[%s15813_s1 + $0x1d8] sm:$0xff] }
  0x75   :  { %498 = vperm.xlu1 %7802, %v196_v42   ;;  %493 = vperm.xlu0 %7801, %v195_v43   ;;  %v138_v43 = vld [vmem:[%s15813_s1 + $0x388] sm:$0xff] }
  0x76   :  { %v8491_v44 = vpop.permute.xlu2 %338  ;;  %v8493_v45 = vpop.permute.xlu1 %293 }
  0x77   :  { %v8498_v47 = vpop.permute.xlu0 %283 }
  0x79   :  { %7613 = vmatmul.msk.f32.gmra.mxu2 %vm921_vm0, %v107_v46  ;;  %v215_v46 = vld [vmem:[%s15814_s2 + $0x1f0] sm:$0xff] }
  0x7b   :  { %7545 = vmatmul.msk.f32.gmra.mxu0 %vm921_vm0, %v39_v48  ;;  %7585 = vmatmul.msk.f32.gmra.mxu1 %vm921_vm0, %v79_v49  ;;  %v214_v48 = vld [vmem:[%s15814_s2 + $0x1e8] sm:$0xff]  ;;  %v213_v49 = vld [vmem:[%s15814_s2 + $0x1e0] sm:$0xff] }
  0x7c   :  { %7639 = vmatmul.msk.f32.gmra.mxu3 %vm921_vm0, %v133_v50  ;;  %518 = vperm.xlu2 %7803, %v200_v51   ;;  %v113_v51 = vld [vmem:[%s15813_s1 + $0x2c0] sm:$0xff] }
  0x7d   :  { %513 = vperm.xlu1 %7802, %v199_v52   ;;  %508 = vperm.xlu0 %7801, %v198_v53   ;;  %v45_v53 = vld [vmem:[%s15813_s1 + $0xa0] sm:$0xff] }
  0x7e   :  { %v8522_v54 = vpop.permute.xlu2 %353 }
  0x7f   :  { %15972 = vst [vmem:[#allocation5_spill] sm:$0xff] %v8522_v54  ;;  %v8527_v56 = vpop.permute.xlu1 %298  ;;  %v8529_v57 = vpop.permute.xlu0 %288 }
  0x81   :  { %7614 = vmatmul.msk.f32.gmra.mxu2 %vm921_vm0, %v108_v55  ;;  %v85_v55 = vld [vmem:[%s15813_s1 + $0x1e0] sm:$0xff] }
  0x83   :  { %7546 = vmatmul.msk.f32.gmra.mxu0 %vm921_vm0, %v40_v58  ;;  %7586 = vmatmul.msk.f32.gmra.mxu1 %vm921_vm0, %v80_v59  ;;  %v139_v59 = vld [vmem:[%s15813_s1 + $0x390] sm:$0xff] }
  0x84   :  { %7640 = vmatmul.msk.f32.gmra.mxu3 %vm921_vm0, %v134_v60  ;;  %533 = vperm.xlu2 %7803, %v203_v61   ;;  %v218_v60 = vld [vmem:[%s15814_s2 + $0x208] sm:$0xff]  ;;  %v217_v61 = vld [vmem:[%s15814_s2 + $0x200] sm:$0xff] }
  0x85   :  { %528 = vperm.xlu1 %7802, %v202_v62   ;;  %523 = vperm.xlu0 %7801, %v201_v63   ;;  %v216_v62 = vld [vmem:[%s15814_s2 + $0x1f8] sm:$0xff] }
  0x86   :  { %v8553_v0 = vpop.permute.xlu2 %368 }
  0x87   :  { %15973 = vst [vmem:[#allocation6_spill] sm:$0xff] %v8553_v0  ;;  %v8558_v2 = vpop.permute.xlu1 %318  ;;  %v8560_v3 = vpop.permute.xlu0 %313 }
  0x88   :  { %v8562_v4 = vpop.f32.mrf.mxu1 }
  0x89   :  { %7615 = vmatmul.msk.f32.gmra.mxu2 %vm921_vm0, %v109_v1 }
  0x8b   :  { %7547 = vmatmul.msk.f32.gmra.mxu0 %vm921_vm0, %v41_v5  ;;  %7587 = vmatmul.msk.f32.gmra.mxu1 %vm921_vm0, %v81_v6  ;;  %v114_v5 = vld [vmem:[%s15813_s1 + $0x2c8] sm:$0xff] }
  0x8c   :  { %7641 = vmatmul.msk.f32.gmra.mxu3 %vm921_vm0, %v135_v7  ;;  %548 = vperm.xlu2 %7803, %v206_v8   ;;  %v46_v7 = vld [vmem:[%s15813_s1 + $0xa8] sm:$0xff] }
  0x8d   :  { %543 = vperm.xlu1 %7802, %v205_v9   ;;  %538 = vperm.xlu0 %7801, %v204_v10   ;;  %v86_v8 = vld [vmem:[%s15813_s1 + $0x1e8] sm:$0xff]  ;;  %v140_v10 = vld [vmem:[%s15813_s1 + $0x398] sm:$0xff] }
  0x8e   :  { %v8586_v11 = vpop.permute.xlu2 %383 }
  0x8f   :  { %15974 = vst [vmem:[#allocation7_spill] sm:$0xff] %v8586_v11  ;;  %v8591_v13 = vpop.permute.xlu1 %333  ;;  %v8593_v14 = vpop.permute.xlu0 %328 }
  0x90   :  { %v8601_v17 = vpop.f32.mrf.mxu1 }
  0x91   :  { %7616 = vmatmul.msk.f32.gmra.mxu2 %vm921_vm0, %v110_v12  ;;  %v221_v12 = vld [vmem:[%s15814_s2 + $0x220] sm:$0xff] }
  0x93   :  { %7548 = vmatmul.msk.f32.gmra.mxu0 %vm921_vm0, %v42_v15  ;;  %7588 = vmatmul.msk.f32.gmra.mxu1 %vm921_vm0, %v82_v16  ;;  %v220_v15 = vld [vmem:[%s15814_s2 + $0x218] sm:$0xff]  ;;  %v219_v16 = vld [vmem:[%s15814_s2 + $0x210] sm:$0xff] }
  0x94   :  { %7642 = vmatmul.msk.f32.gmra.mxu3 %vm921_vm0, %v136_v18  ;;  %563 = vperm.xlu2 %7803, %v209_v19  }
  0x95   :  { %558 = vperm.xlu1 %7802, %v208_v21   ;;  %553 = vperm.xlu0 %7801, %v207_v22   ;;  %v115_v21 = vld [vmem:[%s15813_s1 + $0x2d0] sm:$0xff] }
  0x96   :  { %v8619_v23 = vpop.permute.xlu2 %398 }
  0x97   :  { %15975 = vst [vmem:[#allocation8_spill] sm:$0xff] %v8619_v23  ;;  %v8624_v25 = vpop.permute.xlu1 %348  ;;  %v8626_v26 = vpop.permute.xlu0 %343 }
  0x98   :  { %v8634_v30 = vpop.f32.mrf.mxu1 }
  0x99   :  { %7617 = vmatmul.msk.f32.gmra.mxu2 %vm921_vm0, %v111_v24  ;;  %v47_v24 = vld [vmem:[%s15813_s1 + $0xb0] sm:$0xff] }
  0x9b   :  { %7549 = vmatmul.msk.f32.gmra.mxu0 %vm921_vm0, %v43_v27  ;;  %7589 = vmatmul.msk.f32.gmra.mxu1 %vm921_vm0, %v83_v29  ;;  %v87_v27 = vld [vmem:[%s15813_s1 + $0x1f0] sm:$0xff] }
  0x9c   :  { %7643 = vmatmul.msk.f32.gmra.mxu3 %vm921_vm0, %v137_v31  ;;  %578 = vperm.xlu2 %7803, %v212_v32   ;;  %v141_v31 = vld [vmem:[%s15813_s1 + $0x3a0] sm:$0xff]  ;;  %v224_v32 = vld [vmem:[%s15814_s2 + $0x238] sm:$0xff] }
  0x9d   :  { %573 = vperm.xlu1 %7802, %v211_v33   ;;  %568 = vperm.xlu0 %7801, %v210_v34   ;;  %v223_v33 = vld [vmem:[%s15814_s2 + $0x230] sm:$0xff]  ;;  %v222_v34 = vld [vmem:[%s15814_s2 + $0x228] sm:$0xff] }
  0x9e   :  { %v8652_v35 = vpop.permute.xlu2 %413 }
  0x9f   :  { %15976 = vst [vmem:[#allocation9_spill] sm:$0xff] %v8652_v35  ;;  %v8657_v38 = vpop.permute.xlu1 %363  ;;  %v8665_v41 = vpop.permute.xlu0 %358 }
  0xa0   :  { %15977 = vst [vmem:[#allocation10_spill] sm:$0xff] %v8657_v38  ;;  %v8667_v42 = vpop.f32.mrf.mxu1 }
  0xa1   :  { %15978 = vst [vmem:[#allocation11_spill] sm:$0xff] %v8665_v41  ;;  %7618 = vmatmul.msk.f32.gmra.mxu2 %vm921_vm0, %v112_v37 }
  0xa3   :  { %7550 = vmatmul.msk.f32.gmra.mxu0 %vm921_vm0, %v44_v39  ;;  %7590 = vmatmul.msk.f32.gmra.mxu1 %vm921_vm0, %v84_v40  ;;  %v116_v39 = vld [vmem:[%s15813_s1 + $0x2d8] sm:$0xff] }
  0xa4   :  { %7644 = vmatmul.msk.f32.gmra.mxu3 %vm921_vm0, %v138_v43  ;;  %593 = vperm.xlu2 %7803, %v215_v46   ;;  %v48_v46 = vld [vmem:[%s15813_s1 + $0xb8] sm:$0xff] }
  0xa5   :  { %588 = vperm.xlu1 %7802, %v214_v48   ;;  %583 = vperm.xlu0 %7801, %v213_v49   ;;  %v88_v48 = vld [vmem:[%s15813_s1 + $0x1f8] sm:$0xff]  ;;  %v8797_v49 = vpop.f32.mrf.mxu0 }
  0xa6   :  { %v8685_v50 = vpop.permute.xlu2 %428 }
  0xa7   :  { %15979 = vst [vmem:[#allocation12_spill] sm:$0xff] %v8685_v50  ;;  %v8690_v52 = vpop.permute.xlu1 %378  ;;  %v8713_v63 = vpop.permute.xlu0 %373 }
  0xa8   :  { %15980 = vst [vmem:[#allocation13_spill] sm:$0xff] %v8690_v52  ;;  %v8698_v58 = vpop.f32.mrf.mxu1 }
  0xa9   :  { %7619 = vmatmul.msk.f32.gmra.mxu2 %vm921_vm0, %v113_v51  ;;  %15981 = vst [vmem:[#allocation14_spill] sm:$0xff] %v8713_v63 }
  0xab   :  { %7551 = vmatmul.msk.f32.gmra.mxu0 %vm921_vm0, %v45_v53  ;;  %7591 = vmatmul.msk.f32.gmra.mxu1 %vm921_vm0, %v85_v55  ;;  %v142_v53 = vld [vmem:[%s15813_s1 + $0x3a8] sm:$0xff]  ;;  %v227_v55 = vld [vmem:[%s15814_s2 + $0x250] sm:$0xff] }
  0xac   :  { %7645 = vmatmul.msk.f32.gmra.mxu3 %vm921_vm0, %v139_v59  ;;  %608 = vperm.xlu2 %7803, %v218_v60   ;;  %v8808_v59 = vpop.f32.mrf.mxu3  ;;  %v226_v60 = vld [vmem:[%s15814_s2 + $0x248] sm:$0xff] }
  0xad   :  { %603 = vperm.xlu1 %7802, %v217_v61   ;;  %598 = vperm.xlu0 %7801, %v216_v62   ;;  %15990 = vst [vmem:[#allocation23_spill] sm:$0xff] %v8808_v59  ;;  %v225_v61 = vld [vmem:[%s15814_s2 + $0x240] sm:$0xff] }
  0xae   :  { %v8718_v1 = vpop.permute.xlu2 %443 }
  0xaf   :  { %15982 = vst [vmem:[#allocation15_spill] sm:$0xff] %v8718_v1  ;;  %v8723_v6 = vpop.permute.xlu1 %393  ;;  %v8749_v18 = vpop.permute.xlu0 %388  ;;  %v244_v1 = vld [vmem:[%s15814_s2 + $0x2d8] sm:$0xff] }
  0xb0   :  { %15983 = vst [vmem:[#allocation16_spill] sm:$0xff] %v8723_v6  ;;  %v8731_v9 = vpop.f32.mrf.mxu1 }
  0xb1   :  { %7620 = vmatmul.msk.f32.gmra.mxu2 %vm921_vm0, %v114_v5  ;;  %15984 = vst [vmem:[#allocation17_spill] sm:$0xff] %v8749_v18  ;;  %v117_v5 = vld [vmem:[%s15813_s1 + $0x2e0] sm:$0xff] }
  0xb3   :  { %7552 = vmatmul.msk.f32.gmra.mxu0 %vm921_vm0, %v46_v7  ;;  %7592 = vmatmul.msk.f32.gmra.mxu1 %vm921_vm0, %v86_v8 }
  0xb4   :  { %7646 = vmatmul.msk.f32.gmra.mxu3 %vm921_vm0, %v140_v10  ;;  %623 = vperm.xlu2 %7803, %v221_v12   ;;  %v49_v10 = vld [vmem:[%s15813_s1 + $0xc0] sm:$0xff] }
  0xb5   :  { %618 = vperm.xlu1 %7802, %v220_v15   ;;  %613 = vperm.xlu0 %7801, %v219_v16   ;;  %v89_v12 = vld [vmem:[%s15813_s1 + $0x200] sm:$0xff]  ;;  %v143_v16 = vld [vmem:[%s15813_s1 + $0x3b0] sm:$0xff] }
  0xb6   :  { %v8751_v19 = vpop.permute.xlu2 %458 }
  0xb7   :  { %15985 = vst [vmem:[#allocation18_spill] sm:$0xff] %v8751_v19  ;;  %v8756_v22 = vpop.permute.xlu1 %408  ;;  %v8787_v40 = vpop.permute.xlu0 %403  ;;  %v93_v19 = vld [vmem:[%s15813_s1 + $0x220] sm:$0xff] }
  0xb8   :  { %15986 = vst [vmem:[#allocation19_spill] sm:$0xff] %v8756_v22  ;;  %v8764_v29 = vpop.f32.mrf.mxu1  ;;  %v263_v22 = vld [vmem:[%s15814_s2 + $0x370] sm:$0xff] }
  0xb9   :  { %7621 = vmatmul.msk.f32.gmra.mxu2 %vm921_vm0, %v115_v21  ;;  %15988 = vst [vmem:[#allocation21_spill] sm:$0xff] %v8787_v40 }
  0xbb   :  { %7553 = vmatmul.msk.f32.gmra.mxu0 %vm921_vm0, %v47_v24  ;;  %7593 = vmatmul.msk.f32.gmra.mxu1 %vm921_vm0, %v87_v27  ;;  %v229_v24 = vld [vmem:[%s15814_s2 + $0x260] sm:$0xff]  ;;  %v228_v27 = vld [vmem:[%s15814_s2 + $0x258] sm:$0xff] }
  0xbc   :  { %7647 = vmatmul.msk.f32.gmra.mxu3 %vm921_vm0, %v141_v31  ;;  %638 = vperm.xlu2 %7803, %v224_v32   ;;  %v8850_v31 = vpop.f32.mrf.mxu0  ;;  %v8854_v32 = vpop.f32.mrf.mxu3 }
  0xbd   :  { %633 = vperm.xlu1 %7802, %v223_v33   ;;  %628 = vperm.xlu0 %7801, %v222_v34   ;;  %15994 = vst [vmem:[#allocation27_spill] sm:$0xff] %v8854_v32  ;;  %v118_v34 = vld [vmem:[%s15813_s1 + $0x2e8] sm:$0xff] }
  0xbe   :  { %v8782_v37 = vpop.permute.xlu2 %473 }
  0xbf   :  { %15987 = vst [vmem:[#allocation20_spill] sm:$0xff] %v8782_v37  ;;  %v8789_v43 = vpop.permute.xlu1 %423  ;;  %v8833_v15 = vpop.permute.xlu0 %418 }
  0xc0   :  { %15989 = vst [vmem:[#allocation22_spill] sm:$0xff] %v8789_v43  ;;  %v8799_v51 = vpop.f32.mrf.mxu1 }
  0xc1   :  { %7622 = vmatmul.msk.f32.gmra.mxu2 %vm921_vm0, %v116_v39  ;;  %15992 = vst [vmem:[#allocation25_spill] sm:$0xff] %v8833_v15 }
  0xc3   :  { %7554 = vmatmul.msk.f32.gmra.mxu0 %vm921_vm0, %v48_v46  ;;  %7594 = vmatmul.msk.f32.gmra.mxu1 %vm921_vm0, %v88_v48  ;;  %v50_v48 = vld [vmem:[%s15813_s1 + $0xc8] sm:$0xff] }
  0xc4   :  { %7648 = vmatmul.msk.f32.gmra.mxu3 %vm921_vm0, %v142_v53  ;;  %653 = vperm.xlu2 %7803, %v227_v55   ;;  %v90_v53 = vld [vmem:[%s15813_s1 + $0x208] sm:$0xff]  ;;  %v8871_v55 = vpop.f32.mrf.mxu2 }
  0xc5   :  { %648 = vperm.xlu1 %7802, %v226_v60   ;;  %643 = vperm.xlu0 %7801, %v225_v61   ;;  %15996 = vst [vmem:[#allocation29_spill] sm:$0xff] %v8871_v55  ;;  %v144_v60 = vld [vmem:[%s15813_s1 + $0x3b8] sm:$0xff] }
  0xc6   :  { %v489_v62 = vpop.permute.xlu2 %488  ;;  %v232_v61 = vld [vmem:[%s15814_s2 + $0x278] sm:$0xff] }
  0xc7   :  { %v8823_v7 = vadd.f32 %v8601_v17, %v489_v62  ;;  %v8825_v8 = vpop.permute.xlu1 %438  ;;  %v230_v17 = vld [vmem:[%s15814_s2 + $0x268] sm:$0xff]  ;;  %v231_v62 = vld [vmem:[%s15814_s2 + $0x270] sm:$0xff] }
  0xc8   :  { %15991 = vst [vmem:[#allocation24_spill] sm:$0xff] %v8825_v8  ;;  %v8842_v21 = vpop.f32.mrf.mxu1 }
  0xc9   :  { %7623 = vmatmul.msk.f32.gmra.mxu2 %vm921_vm0, %v117_v5  ;;  %15993 = vst [vmem:[#allocation26_spill] sm:$0xff] %v8842_v21  ;;  %v8886_v5 = vpop.permute.xlu0 %433 }
  0xca   :  { %15997 = vst [vmem:[#allocation30_spill] sm:$0xff] %v8886_v5 }
  0xcb   :  { %7555 = vmatmul.msk.f32.gmra.mxu0 %vm921_vm0, %v49_v10  ;;  %7595 = vmatmul.msk.f32.gmra.mxu1 %vm921_vm0, %v89_v12  ;;  %v8893_v12 = vpop.f32.mrf.mxu0 }
  0xcc   :  { %7649 = vmatmul.msk.f32.gmra.mxu3 %vm921_vm0, %v143_v16  ;;  %668 = vperm.xlu2 %7803, %v230_v17   ;;  %v8895_v16 = vpop.f32.mrf.mxu3 }
  0xcd   :  { %663 = vperm.xlu1 %7802, %v229_v24   ;;  %658 = vperm.xlu0 %7801, %v228_v27   ;;  %15998 = vst [vmem:[#allocation31_spill] sm:$0xff] %v8895_v16  ;;  %v51_v27 = vld [vmem:[%s15813_s1 + $0xd0] sm:$0xff] }
  0xce   :  { %v504_v33 = vpop.permute.xlu2 %503 }
  0xcf   :  { %v8861_v39 = vadd.f32 %v8698_v58, %v504_v33  ;;  %v8863_v46 = vpop.permute.xlu1 %453  ;;  %v233_v58 = vld [vmem:[%s15814_s2 + $0x280] sm:$0xff]  ;;  %v91_v33 = vld [vmem:[%s15813_s1 + $0x210] sm:$0xff] }
  0xd0   :  { %15995 = vst [vmem:[#allocation28_spill] sm:$0xff] %v8863_v46  ;;  %v8890_v10 = vpop.f32.mrf.mxu1 }
  0xd1   :  { %7624 = vmatmul.msk.f32.gmra.mxu2 %vm921_vm0, %v118_v34  ;;  %v145_v34 = vld [vmem:[%s15813_s1 + $0x3c0] sm:$0xff] }
  0xd3   :  { %7556 = vmatmul.msk.f32.gmra.mxu0 %vm921_vm0, %v50_v48  ;;  %7596 = vmatmul.msk.f32.gmra.mxu1 %vm921_vm0, %v90_v53  ;;  %v236_v48 = vld [vmem:[%s15814_s2 + $0x298] sm:$0xff]  ;;  %v235_v53 = vld [vmem:[%s15814_s2 + $0x290] sm:$0xff]  ;;  %v8924_v16 = vpop.f32.mrf.mxu0 }
  0xd4   :  { %7650 = vmatmul.msk.f32.gmra.mxu3 %vm921_vm0, %v144_v60  ;;  %683 = vperm.xlu2 %7803, %v233_v58   ;;  %v234_v60 = vld [vmem:[%s15814_s2 + $0x288] sm:$0xff]  ;;  %v8922_v58 = vpop.permute.xlu0 %448 }
  0xd5   :  { %678 = vperm.xlu1 %7802, %v232_v61   ;;  %673 = vperm.xlu0 %7801, %v231_v62   ;;  %16000 = vst [vmem:[#allocation33_spill] sm:$0xff] %v8922_v58  ;;  %v148_v58 = vld [vmem:[%s15813_s1 + $0x3d8] sm:$0xff] }
  0xd6   :  { %v8897_v17 = vpop.permute.xlu2 %518 }
  0xd7   :  { %v8899_v24 = vpop.permute.xlu1 %468 }
  0xd8   :  { %15999 = vst [vmem:[#allocation32_spill] sm:$0xff] %v8899_v24  ;;  %v1473_v61 = vpop.f32.mrf.mxu1  ;;  %v8928_v24 = vpop.f32.mrf.mxu3 }
  0xd9   :  { %16001 = vst [vmem:[#allocation34_spill] sm:$0xff] %v8928_v24  ;;  %v53_v24 = vld [vmem:[%s15813_s1 + $0xe0] sm:$0xff] }
  0xdb   :  { %7557 = vmatmul.msk.f32.gmra.mxu0 %vm921_vm0, %v51_v27  ;;  %7597 = vmatmul.msk.f32.gmra.mxu1 %vm921_vm0, %v91_v33  ;;  %v52_v27 = vld [vmem:[%s15813_s1 + $0xd8] sm:$0xff]  ;;  %v8961_v46 = vpop.f32.mrf.mxu0 }
  0xdc   :  { %7651 = vmatmul.msk.f32.gmra.mxu3 %vm921_vm0, %v145_v34  ;;  %698 = vperm.xlu2 %7803, %v236_v48   ;;  %v92_v33 = vld [vmem:[%s15813_s1 + $0x218] sm:$0xff]  ;;  %v146_v48 = vld [vmem:[%s15813_s1 + $0x3c8] sm:$0xff] }
  0xdd   :  { %693 = vperm.xlu1 %7802, %v235_v53   ;;  %688 = vperm.xlu0 %7801, %v234_v60   ;;  %v248_v53 = vld [vmem:[%s15814_s2 + $0x2f8] sm:$0xff]  ;;  %v238_v60 = vld [vmem:[%s15814_s2 + $0x2a8] sm:$0xff] }
  0xde   :  { %v534_v62 = vpop.permute.xlu2 %533 }
  0xdf   :  { %v8926_v37 = vadd.f32 %v1473_v61, %v534_v62  ;;  %v8936_v34 = vpop.permute.xlu1 %483  ;;  %v237_v61 = vld [vmem:[%s15814_s2 + $0x2a0] sm:$0xff]  ;;  %v8953_v62 = vpop.permute.xlu0 %463 }
  0xe0   :  { %16002 = vst [vmem:[#allocation35_spill] sm:$0xff] %v8953_v62 }
  0xe3   :  { %7558 = vmatmul.msk.f32.gmra.mxu0 %vm921_vm0, %v52_v27  ;;  %7598 = vmatmul.msk.f32.gmra.mxu1 %vm921_vm0, %v92_v33  ;;  %v147_v27 = vld [vmem:[%s15813_s1 + $0x3d0] sm:$0xff]  ;;  %v280_v33 = vld [vmem:[%s15814_s2 + $0x3f8] sm:$0xff] }
  0xe4   :  { %7652 = vmatmul.msk.f32.gmra.mxu3 %vm921_vm0, %v146_v48  ;;  %758 = vperm.xlu2 %7803, %v248_v53   ;;  %v8969_v48 = vpop.f32.mrf.mxu3  ;;  %v246_v53 = vld [vmem:[%s15814_s2 + $0x2e8] sm:$0xff] }
  0xe5   :  { %708 = vperm.xlu1 %7802, %v238_v60   ;;  %703 = vperm.xlu0 %7801, %v237_v61   ;;  %16003 = vst [vmem:[#allocation36_spill] sm:$0xff] %v8969_v48  ;;  %v247_v60 = vld [vmem:[%s15814_s2 + $0x2f0] sm:$0xff]  ;;  %v1476_v61 = vpop.f32.mrf.mxu1  ;;  %v54_v48 = vld [vmem:[%s15813_s1 + $0xe8] sm:$0xff] }
  0xe6   :  { %v549_v43 = vpop.permute.xlu2 %548 }
  0xe7   :  { %v8977_v62 = vpop.permute.xlu1 %498 }
  0xeb   :  { %7559 = vmatmul.msk.f32.gmra.mxu0 %vm921_vm0, %v53_v24  ;;  %7599 = vmatmul.msk.f32.gmra.mxu1 %vm921_vm0, %v93_v19  ;;  %v8991_v24 = vpop.permute.xlu0 %478  ;;  %v279_v19 = vld [vmem:[%s15814_s2 + $0x3f0] sm:$0xff] }
  0xec   :  { %7653 = vmatmul.msk.f32.gmra.mxu3 %vm921_vm0, %v147_v27  ;;  %918 = vperm.xlu2 %7803, %v280_v33   ;;  %16004 = vst [vmem:[#allocation37_spill] sm:$0xff] %v8991_v24  ;;  %v245_v27 = vld [vmem:[%s15814_s2 + $0x2e0] sm:$0xff]  ;;  %v8999_v33 = vpop.f32.mrf.mxu0 }
  0xed   :  { %748 = vperm.xlu1 %7802, %v246_v53   ;;  %753 = vperm.xlu0 %7801, %v247_v60   ;;  %v9002_v53 = vpop.f32.mrf.mxu3  ;;  %v1479_v60 = vpop.f32.mrf.mxu1 }
  0xee   :  { %16005 = vst [vmem:[#allocation38_spill] sm:$0xff] %v9002_v53  ;;  %v56_v53 = vld [vmem:[%s15813_s1 + $0xf8] sm:$0xff] }
  0xef   :  { %v9005_v8 = vpop.permute.xlu1 %513 }
  0xf3   :  { %7560 = vmatmul.msk.f32.gmra.mxu0 %vm921_vm0, %v54_v48  ;;  %v9007_v24 = vpop.permute.xlu0 %493 }
  0xf4   :  { %7654 = vmatmul.msk.f32.gmra.mxu3 %vm921_vm0, %v148_v58  ;;  %738 = vperm.xlu2 %7803, %v244_v1   ;;  %v55_v58 = vld [vmem:[%s15813_s1 + $0xf0] sm:$0xff]  ;;  %v149_v1 = vld [vmem:[%s15813_s1 + $0x3e0] sm:$0xff]  ;;  %v9020_v48 = vpop.f32.mrf.mxu0 }
  0xf5   :  { %913 = vperm.xlu1 %7802, %v279_v19   ;;  %743 = vperm.xlu0 %7801, %v245_v27   ;;  %v1482_v5 = vpop.f32.mrf.mxu1  ;;  %v9022_v19 = vpop.f32.mrf.mxu3 }
  0xf6   :  { %v9009_v15 = vadd.f32 %v1482_v5, %v549_v43  ;;  %16008 = vst [vmem:[#allocation41_spill] sm:$0xff] %v9022_v19  ;;  %v278_v43 = vld [vmem:[%s15814_s2 + $0x3e8] sm:$0xff]  ;;  %v264_v5 = vld [vmem:[%s15814_s2 + $0x378] sm:$0xff] }
  0xf7   :  { %v529_v50 = vpop.permute.xlu1 %528 }
  0xf8   :  { %16006 = vst [vmem:[#allocation39_spill] sm:$0xff] %v9009_v15  ;;  %v9012_v59 = vadd.f32 %v8890_v10, %v529_v50  ;;  %v243_v50 = vld [vmem:[%s15814_s2 + $0x2d0] sm:$0xff] }
  0xfa   :  { %16007 = vst [vmem:[#allocation40_spill] sm:$0xff] %v9012_v59 }
  0xfb   :  { %7561 = vmatmul.msk.f32.gmra.mxu0 %vm921_vm0, %v55_v58  ;;  %v9035_v10 = vpop.permute.xlu0 %508 }
  0xfc   :  { %7655 = vmatmul.msk.f32.gmra.mxu3 %vm921_vm0, %v149_v1  ;;  %733 = vperm.xlu2 %7803, %v243_v50   ;;  %v150_v50 = vld [vmem:[%s15813_s1 + $0x3e8] sm:$0xff] }
  0xfd   :  { %908 = vperm.xlu1 %7802, %v278_v43   ;;  %838 = vperm.xlu0 %7801, %v264_v5   ;;  %v9047_v43 = vpop.f32.mrf.mxu0  ;;  %v9049_v35 = vpop.f32.mrf.mxu3 }
  0xfe   :  { %16011 = vst [vmem:[#allocation44_spill] sm:$0xff] %v9049_v35  ;;  %v1485_v40 = vpop.f32.mrf.mxu1 }
  0xff   :  { %v544_v58 = vpop.permute.xlu1 %543 }
 0x100   :  { %v9039_v1 = vadd.f32 %v1479_v60, %v544_v58  ;;  %v242_v60 = vld [vmem:[%s15814_s2 + $0x2c8] sm:$0xff]  ;;  %v277_v58 = vld [vmem:[%s15814_s2 + $0x3e0] sm:$0xff] }
 0x102   :  { %16010 = vst [vmem:[#allocation43_spill] sm:$0xff] %v9039_v1 }
 0x103   :  { %v9037_v27 = vpop.permute.xlu0 %523  ;;  %7562 = vmatmul.msk.f32.gmra.mxu0 %vm921_vm0, %v56_v53  ;;  %v151_v53 = vld [vmem:[%s15813_s1 + $0x3f0] sm:$0xff] }
 0x104   :  { %16009 = vst [vmem:[#allocation42_spill] sm:$0xff] %v9037_v27  ;;  %7656 = vmatmul.msk.f32.gmra.mxu3 %vm921_vm0, %v150_v50  ;;  %728 = vperm.xlu2 %7803, %v242_v60   ;;  %v276_v60 = vld [vmem:[%s15814_s2 + $0x3d8] sm:$0xff] }
 0x105   :  { %903 = vperm.xlu1 %7802, %v277_v58   ;;  %833 = vperm.xlu0 %7801, %v263_v22   ;;  %v9072_v50 = vpop.f32.mrf.mxu3  ;;  %v241_v22 = vld [vmem:[%s15814_s2 + $0x2c0] sm:$0xff]  ;;  %v9084_v58 = vadd.f32 %v8797_v49, %v8498_v47  ;;  %v9101_v47 = vadd.f32 %v8893_v12, %v8493_v45  ;;  %v9120_v45 = vadd.f32 %v8924_v16, %v8527_v56 }
 0x106   :  { %16013 = vst [vmem:[#allocation46_spill] sm:$0xff] %v9072_v50  ;;  %v9128_v12 = vadd.f32 %v8961_v46, %v8410_v20 }
 0x107   :  { %16014 = vst [vmem:[#allocation47_spill] sm:$0xff] %v9084_v58  ;;  %v9094_v50 = vmul.f32 0.70710677, %v9084_v58 }
 0x108   :  { %16016 = vst [vmem:[#allocation49_spill] sm:$0xff] %v9101_v47 }
 0x109   :  { %16019 = vst [vmem:[#allocation52_spill] sm:$0xff] %v9120_v45 }
 0x10a   :  { %16021 = vst [vmem:[#allocation54_spill] sm:$0xff] %v9128_v12 }
 0x10b   :  { %v539_v19 = vpop.permute.xlu0 %538 }
 0x10c   :  { %v9053_v5 = vadd.f32 %v1476_v61, %v539_v19  ;;  %v57_v61 = vld [vmem:[%s15813_s1 + $0x100] sm:$0xff]  ;;  %v9070_v19 = vpop.f32.mrf.mxu0  ;;  %7657 = vmatmul.msk.f32.gmra.mxu3 %vm921_vm0, %v151_v53  ;;  %723 = vperm.xlu2 %7803, %v241_v22   ;;  %v9091_v53 = vadd.f32 %v8850_v31, %v8529_v57  ;;  %v1963_v22 = vmul.f32 %v9094_v50, %v9094_v50  ;;  %v9110_v31 = vmul.f32 0.70710677, %v9101_v47 }
 0x10d   :  { %7563 = vmatmul.msk.f32.gmra.mxu0 %vm921_vm0, %v57_v61  ;;  %898 = vperm.xlu1 %7802, %v276_v60   ;;  %v262_v61 = vld [vmem:[%s15814_s2 + $0x368] sm:$0xff]  ;;  %v9114_v60 = vadd.f32 %v8799_v51, %v8897_v17  ;;  %v9135_v17 = vmul.f32 0.70710677, %v9120_v45  ;;  %v9158_v45 = vadd.f32 %v9020_v48, %v8560_v3 }
 0x10e   :  { %16012 = vst [vmem:[#allocation45_spill] sm:$0xff] %v9053_v5  ;;  %828 = vperm.xlu0 %7801, %v262_v61   ;;  %v9097_v23 = vmul.f32 0.70710677, %v9091_v53  ;;  %v9116_v61 = vmin.f32 %v1963_v22, 16.0  ;;  %v9141_v22 = vmul.f32 0.70710677, %v9128_v12 }
 0x10f   :  { %16015 = vst [vmem:[#allocation48_spill] sm:$0xff] %v9091_v53  ;;  %v9131_v58 = vmul.f32 0.70710677, %v9114_v60  ;;  %v2083_v46 = vmul.f32 %v9135_v17, %v9135_v17 }
 0x110   :  { %v2003_v57 = vmul.f32 %v9097_v23, %v9097_v23  ;;  %16018 = vst [vmem:[#allocation51_spill] sm:$0xff] %v9116_v61  ;;  %v1965_v51 = vmul.f32 2.1237322e-06, %v9116_v61  ;;  %v2123_v32 = vmul.f32 %v9141_v22, %v9141_v22 }
 0x111   :  { %16024 = vst [vmem:[#allocation57_spill] sm:$0xff] %v9158_v45  ;;  %v9161_v18 = vmin.f32 %v2083_v46, 16.0 }
 0x112   :  { %v1966_v20 = vadd.f32 0.00028619796, %v1965_v51  ;;  %v9164_v55 = vmin.f32 %v2123_v32, 16.0 }
 0x113   :  { %v554_v35 = vpop.permute.xlu0 %553  ;;  %16025 = vst [vmem:[#allocation58_spill] sm:$0xff] %v9161_v18 }
 0x114   :  { %v9103_v49 = vadd.f32 %v1485_v40, %v554_v35  ;;  %v9122_v35 = vmin.f32 %v2003_v57, 16.0  ;;  %v2043_v40 = vmul.f32 %v9110_v31, %v9110_v31  ;;  %v3843_v57 = vmul.f32 %v9131_v58, %v9131_v58  ;;  %16026 = vst [vmem:[#allocation59_spill] sm:$0xff] %v9164_v55 }
 0x115   :  { %v1967_v51 = vmul.f32 %v1966_v20, %v9116_v61  ;;  %v9175_v20 = vpop.f32.mrf.mxu1  ;;  %v2125_v32 = vmul.f32 2.1237322e-06, %v9164_v55 }
 0x116   :  { %16017 = vst [vmem:[#allocation50_spill] sm:$0xff] %v9103_v49  ;;  %v2005_v56 = vmul.f32 2.1237322e-06, %v9122_v35  ;;  %v9138_v16 = vmin.f32 %v2043_v40, 16.0  ;;  %v9152_v40 = vadd.f32 %v8999_v33, %v8437_v28  ;;  %v9154_v47 = vmin.f32 %v3843_v57, 16.0 }
 0x117   :  { %16020 = vst [vmem:[#allocation53_spill] sm:$0xff] %v9122_v35  ;;  %v9171_v33 = vmul.f32 0.70710677, %v9158_v45  ;;  %v1968_v48 = vadd.f32 0.0036580483, %v1967_v51 }
 0x118   :  { %16022 = vst [vmem:[#allocation55_spill] sm:$0xff] %v9138_v16  ;;  %v2006_v6 = vadd.f32 0.00028619796, %v2005_v56  ;;  %v2045_v53 = vmul.f32 2.1237322e-06, %v9138_v16 }
 0x119   :  { %16023 = vst [vmem:[#allocation56_spill] sm:$0xff] %v9152_v40  ;;  %v9167_v11 = vmul.f32 0.70710677, %v9152_v40  ;;  %v3845_v28 = vmul.f32 2.1237322e-06, %v9154_v47  ;;  %v2203_v45 = vmul.f32 %v9171_v33, %v9171_v33  ;;  %v1969_v63 = vmul.f32 %v1968_v48, %v9116_v61 }
 0x11a   :  { %v2007_v56 = vmul.f32 %v2006_v6, %v9122_v35  ;;  %v2046_v12 = vadd.f32 0.00028619796, %v2045_v53  ;;  %v3856_v3 = vmul.f32 3.8918573e-05, %v9154_v47  ;;  %v2085_v57 = vmul.f32 2.1237322e-06, %v9161_v18 }
 0x11b   :  { %16027 = vst [vmem:[#allocation60_spill] sm:$0xff] %v9175_v20  ;;  %v2163_v40 = vmul.f32 %v9167_v11, %v9167_v11  ;;  %v3846_v52 = vadd.f32 0.00028619796, %v3845_v28  ;;  %v2126_v49 = vadd.f32 0.00028619796, %v2125_v32  ;;  %v9189_v41 = vmin.f32 %v2203_v45, 16.0 }
 0x11c   :  { %v2008_v46 = vadd.f32 0.0036580483, %v2007_v56  ;;  %v2047_v6 = vmul.f32 %v2046_v12, %v9138_v16  ;;  %v3857_v53 = vadd.f32 0.001143296, %v3856_v3  ;;  %v2086_v51 = vadd.f32 0.00028619796, %v2085_v57 }
 0x11d   :  { %v9186_v12 = vmin.f32 %v2163_v40, 16.0  ;;  %v3847_v3 = vmul.f32 %v3846_v52, %v9154_v47  ;;  %16029 = vst [vmem:[#allocation62_spill] sm:$0xff] %v9189_v41  ;;  %v1970_v5 = vadd.f32 0.05243302, %v1969_v63  ;;  %v2127_v57 = vmul.f32 %v2126_v49, %v9164_v55  ;;  %v9195_v32 = vpop.f32.mrf.mxu1 }
 0x11e   :  { %v2009_v0 = vmul.f32 %v2008_v46, %v9122_v35  ;;  %v2048_v38 = vadd.f32 0.0036580483, %v2047_v6  ;;  %v3858_v56 = vmul.f32 %v3857_v53, %v9154_v47  ;;  %v2087_v28 = vmul.f32 %v2086_v51, %v9161_v18  ;;  %16030 = vst [vmem:[#allocation63_spill] sm:$0xff] %v9195_v32  ;;  %v1350_v53 = vpop.f32.mrf.mxu0 }
 0x11f   :  { %16028 = vst [vmem:[#allocation61_spill] sm:$0xff] %v9186_v12  ;;  %v2165_v46 = vmul.f32 2.1237322e-06, %v9186_v12  ;;  %v3848_v6 = vadd.f32 0.0036580483, %v3847_v3  ;;  %v9201_v45 = vadd.f32 %v9047_v43, %v8558_v2 }
 0x120   :  { %v3859_v20 = vadd.f32 0.014752088, %v3858_v56  ;;  %v2010_v1 = vadd.f32 0.05243302, %v2009_v0  ;;  %v2049_v48 = vmul.f32 %v2048_v38, %v9138_v16  ;;  %v2205_v52 = vmul.f32 2.1237322e-06, %v9189_v41 }
 0x121   :  { %16031 = vst [vmem:[#allocation64_spill] sm:$0xff] %v9201_v45  ;;  %v2088_v63 = vadd.f32 0.0036580483, %v2087_v28  ;;  %v1971_v0 = vmul.f32 %v1970_v5, %v9116_v61  ;;  %v2128_v51 = vadd.f32 0.0036580483, %v2127_v57  ;;  %v3849_v3 = vmul.f32 %v3848_v6, %v9154_v47 }
 0x122   :  { %v3860_v40 = vmul.f32 %v3859_v20, %v9154_v47  ;;  %v2011_v38 = vmul.f32 %v2010_v1, %v9122_v35  ;;  %v2050_v49 = vadd.f32 0.05243302, %v2049_v48  ;;  %v2166_v56 = vadd.f32 0.00028619796, %v2165_v46 }
 0x123   :  { %v2206_v54 = vadd.f32 0.00028619796, %v2205_v52  ;;  %v9207_v20 = vmul.f32 0.70710677, %v9201_v45  ;;  %v2089_v21 = vmul.f32 %v2088_v63, %v9161_v18  ;;  %v9211_v2 = vmul.f32 0.70710677, %v8823_v7 }
 0x124   :  { %v3861_v32 = vadd.f32 0.112945676, %v3860_v40  ;;  %v1972_v5 = vadd.f32 0.18741608, %v1971_v0  ;;  %v2012_v28 = vadd.f32 0.18741608, %v2011_v38  ;;  %v2051_v1 = vmul.f32 %v2050_v49, %v9138_v16 }
 0x125   :  { %v2129_v48 = vmul.f32 %v2128_v51, %v9164_v55  ;;  %v2167_v57 = vmul.f32 %v2166_v56, %v9186_v12  ;;  %v3850_v46 = vadd.f32 0.05243302, %v3849_v3  ;;  %v2207_v40 = vmul.f32 %v2206_v54, %v9189_v41  ;;  %v1494_v51 = vpop.f32.mrf.mxu1 }
 0x126   :  { %v3862_v43 = vmul.f32 %v3861_v32, %v9154_v47  ;;  %v2243_v52 = vmul.f32 %v9207_v20, %v9207_v20  ;;  %v9222_v63 = vadd.f32 %v9070_v19, %v8464_v36  ;;  %v569_v32 = vpop.permute.xlu0 %568  ;;  %v2090_v0 = vadd.f32 0.05243302, %v2089_v21  ;;  %v1353_v45 = vpop.f32.mrf.mxu0 }
 0x127   :  { %v3603_v38 = vmul.f32 %v9211_v2, %v9211_v2  ;;  %v1973_v56 = vmul.f32 %v1972_v5, %v9116_v61  ;;  %v2013_v3 = vmul.f32 %v2012_v28, %v9122_v35  ;;  %v2052_v54 = vadd.f32 0.18741608, %v2051_v1 }
 0x128   :  { %v3863_v6 = vadd.f32 0.4994258, %v3862_v43  ;;  %16032 = vst [vmem:[#allocation65_spill] sm:$0xff] %v9222_v63  ;;  %v2130_v43 = vadd.f32 0.05243302, %v2129_v48  ;;  %v3851_v59 = vmul.f32 %v3850_v46, %v9154_v47  ;;  %v9232_v19 = vadd.f32 %v1494_v51, %v569_v32  ;;  %v152_v46 = vld [vmem:[%s15813_s1 + $0x3f8] sm:$0xff] }
 0x129   :  { %v2168_v27 = vadd.f32 0.0036580483, %v2167_v57  ;;  %v2208_v21 = vadd.f32 0.0036580483, %v2207_v40  ;;  %v9234_v15 = vmin.f32 %v2243_v52, 16.0  ;;  %v9241_v5 = vadd.f32 %v8764_v29, %v9005_v8  ;;  %v58_v57 = vld [vmem:[%s15813_s1 + $0x108] sm:$0xff]  ;;  %v9260_v52 = vpop.f32.mrf.mxu3  ;;  %7658 = vmatmul.msk.f32.gmra.mxu3 %vm921_vm0, %v152_v46 }
 0x12a   :  { %v3864_v49 = vmul.f32 %v3863_v6, %v9154_v47  ;;  %16033 = vst [vmem:[#allocation66_spill] sm:$0xff] %v9232_v19  ;;  %v9237_v6 = vmul.f32 0.70710677, %v9222_v63  ;;  %v2091_v28 = vmul.f32 %v2090_v0, %v9161_v18  ;;  %v9244_v1 = vmin.f32 %v3603_v38, 16.0  ;;  %7564 = vmatmul.msk.f32.gmra.mxu0 %vm921_vm0, %v58_v57 }
 0x12b   :  { %16034 = vst [vmem:[#allocation67_spill] sm:$0xff] %v9234_v15  ;;  %v9247_v48 = vmul.f32 0.70710677, %v8861_v39  ;;  %v1974_v40 = vadd.f32 1.1283791, %v1973_v56  ;;  %v2053_v29 = vmul.f32 %v2052_v54, %v9138_v16  ;;  %v9258_v8 = vadd.f32 %v1350_v53, %v8593_v14  ;;  %v240_v14 = vld [vmem:[%s15814_s2 + $0x2b8] sm:$0xff] }
 0x12c   :  { %v9230_v36 = vadd.f32 1.0, %v3864_v49  ;;  %16035 = vst [vmem:[#allocation68_spill] sm:$0xff] %v9237_v6  ;;  %v9263_v32 = vadd.f32 %v1353_v45, %v8591_v13  ;;  %v9267_v0 = vadd.f32 1.1283791, %v2013_v3  ;;  %v2131_v38 = vmul.f32 %v2130_v43, %v9164_v55  ;;  %v275_v13 = vld [vmem:[%s15814_s2 + $0x3d0] sm:$0xff]  ;;  %718 = vperm.xlu2 %7803, %v240_v14  }
 0x12d   :  { %16036 = vst [vmem:[#allocation69_spill] sm:$0xff] %v9241_v5  ;;  %v2169_v49 = vmul.f32 %v2168_v27, %v9186_v12  ;;  %v3852_v51 = vadd.f32 0.18741608, %v3851_v59  ;;  %v2209_v45 = vmul.f32 %v2208_v21, %v9189_v41  ;;  %v2245_v53 = vmul.f32 2.1237322e-06, %v9234_v15  ;;  %893 = vperm.xlu1 %7802, %v275_v13   ;;  %v261_v59 = vld [vmem:[%s15814_s2 + $0x360] sm:$0xff] }
 0x12e   :  { %16037 = vst [vmem:[#allocation70_spill] sm:$0xff] %v9247_v48  ;;  %7804 = vrcp.f32 %v9230_v36  ;;  %v9280_v56 = vmul.f32 0.70710677, %v9241_v5  ;;  %v2092_v27 = vadd.f32 0.18741608, %v2091_v28  ;;  %v2283_v54 = vmul.f32 %v9237_v6, %v9237_v6  ;;  %823 = vperm.xlu0 %7801, %v261_v59  }
 0x12f   :  { %16038 = vst [vmem:[#allocation71_spill] sm:$0xff] %v9258_v8  ;;  %v3605_v3 = vmul.f32 2.1237322e-06, %v9244_v1  ;;  %v3723_v43 = vmul.f32 %v9247_v48, %v9247_v48  ;;  %v9291_v21 = vmul.f32 %v1974_v40, %v9094_v50  ;;  %v9293_v57 = vadd.f32 1.1283791, %v2053_v29  ;;  %v1356_v50 = vpop.f32.mrf.mxu0 }
 0x130   :  { %16039 = vst [vmem:[#allocation72_spill] sm:$0xff] %v9260_v52  ;;  %v9296_v46 = vmul.f32 0.70710677, %v9258_v8  ;;  %v9299_v14 = vmul.f32 0.70710677, %v9263_v32  ;;  %v3853_v61 = vmul.f32 %v3852_v51, %v9154_v47  ;;  %v3803_v40 = vmul.f32 %v9280_v56, %v9280_v56  ;;  %v59_v47 = vld [vmem:[%s15813_s1 + $0x110] sm:$0xff] }
 0x131   :  { %16040 = vst [vmem:[#allocation73_spill] sm:$0xff] %v9263_v32  ;;  %v2132_v13 = vadd.f32 0.18741608, %v2131_v38  ;;  %v2170_v52 = vadd.f32 0.05243302, %v2169_v49  ;;  %v9309_v8 = vmin.f32 %v2283_v54, 16.0  ;;  %v9328_v54 = vadd.f32 %v1356_v50, %v8491_v44 }
 0x132   :  { %16041 = vst [vmem:[#allocation74_spill] sm:$0xff] %v9280_v56  ;;  %v9303_v35 = vmul.f32 0.70710677, %v8926_v37  ;;  %v2210_v59 = vadd.f32 0.05243302, %v2209_v45  ;;  %v9311_v38 = vmin.f32 %v3723_v43, 16.0  ;;  %v2323_v49 = vmul.f32 %v9296_v46, %v9296_v46  ;;  %7565 = vmatmul.msk.f32.gmra.mxu0 %vm921_vm0, %v59_v47 }
 0x133   :  { %16042 = vst [vmem:[#allocation75_spill] sm:$0xff] %v9291_v21  ;;  %v2246_v16 = vadd.f32 0.00028619796, %v2245_v53  ;;  %v2093_v21 = vmul.f32 %v2092_v27, %v9161_v18  ;;  %v3606_v63 = vadd.f32 0.00028619796, %v3605_v3  ;;  %v2363_v51 = vmul.f32 %v9299_v14, %v9299_v14  ;;  %v239_v18 = vld [vmem:[%s15814_s2 + $0x2b0] sm:$0xff] }
 0x134   :  { %16043 = vst [vmem:[#allocation76_spill] sm:$0xff] %v9296_v46  ;;  %v7805_v28 = vpop.eup %7804  ;;  %v9322_v45 = vadd.f32 %v8562_v4, %v8936_v34  ;;  %v3854_v27 = vadd.f32 1.1283791, %v3853_v61  ;;  %v3963_v3 = vmul.f32 %v9303_v35, %v9303_v35  ;;  %v3877_v43 = vand.u32 2147483648, %v9230_v36  ;;  %v274_v4 = vld [vmem:[%s15814_s2 + $0x3c8] sm:$0xff]  ;;  %v260_v34 = vld [vmem:[%s15814_s2 + $0x358] sm:$0xff]  ;;  %713 = vperm.xlu2 %7803, %v239_v18  }
 0x135   :  { %16044 = vst [vmem:[#allocation77_spill] sm:$0xff] %v9299_v14  ;;  %v3867_v29 = vmul.f32 %v7805_v28, %v9230_v36  ;;  %v9340_v61 = vmin.f32 %v3803_v40, 16.0  ;;  %vm3872_vm1 = vweird.f32 %v7805_v28  ;;  %v3875_v44 = vand.u32 2147483647, %v9230_v36  ;;  %888 = vperm.xlu1 %7802, %v274_v4  }
 0x136   :  { %16045 = vst [vmem:[#allocation78_spill] sm:$0xff] %v9303_v35  ;;  %v2247_v50 = vmul.f32 %v2246_v16, %v9234_v15  ;;  %v3607_v47 = vmul.f32 %v3606_v63, %v9244_v1  ;;  %v2285_v32 = vmul.f32 2.1237322e-06, %v9309_v8  ;;  %v3725_v19 = vmul.f32 2.1237322e-06, %v9311_v38  ;;  %818 = vperm.xlu0 %7801, %v260_v34  }
 0x137   :  { %16046 = vst [vmem:[#allocation79_spill] sm:$0xff] %v9309_v8  ;;  %v3868_v53 = vsub.f32 1.0, %v3867_v29  ;;  %v9347_v56 = vmin.f32 %v2323_v49, 16.0  ;;  %v9349_v35 = vmin.f32 %v2363_v51, 16.0  ;;  %vm3871_vm2 = vweird.f32 %v9230_v36 }
 0x138   :  { %16047 = vst [vmem:[#allocation80_spill] sm:$0xff] %v9328_v54  ;;  %v9355_v18 = vmul.f32 0.70710677, %v9322_v45  ;;  %v9358_v16 = vmul.f32 0.70710677, %v9328_v54  ;;  %vm3873_vm3 = vmor %vm3871_vm2, %vm3872_vm1  ;;  %v3878_v63 = vor.u32 1.1754944e-38, %v3877_v43  ;;  %v3855_v4 = vmul.f32 %v3854_v27, %v9131_v58 }
 0x139   :  { %v3869_v29 = vmul.f32 %v7805_v28, %v3868_v53  ;;  %16048 = vst [vmem:[#allocation81_spill] sm:$0xff] %v9347_v56  ;;  %v9352_v53 = vmin.f32 %v3963_v3, 16.0  ;;  %vm3876_vm4 = vcmp.eq.f32.partialorder %v3875_v44, 8.507059e+37  ;;  %v3816_v51 = vmul.f32 3.8918573e-05, %v9340_v61 }
 0x13a   :  { %v2248_v34 = vadd.f32 0.0036580483, %v2247_v50  ;;  %v2286_v36 = vadd.f32 0.00028619796, %v2285_v32  ;;  %v2094_v5 = vadd.f32 1.1283791, %v2093_v21  ;;  %v2171_v48 = vmul.f32 %v2170_v52, %v9186_v12 }
 0x13b   :  { %v3870_v40 = vadd.f32 %v7805_v28, %v3869_v29  ;;  %v3608_v29 = vadd.f32 0.0036580483, %v3607_v47  ;;  %v2325_v14 = vmul.f32 2.1237322e-06, %v9347_v56  ;;  %v2365_v46 = vmul.f32 2.1237322e-06, %v9349_v35 }
 0x13c   :  { %v3726_v6 = vadd.f32 0.00028619796, %v3725_v19  ;;  %v3563_v58 = vmul.f32 %v9355_v18, %v9355_v18  ;;  %v2133_v27 = vmul.f32 %v2132_v13, %v9164_v55  ;;  %v3976_v32 = vmul.f32 3.8918573e-05, %v9352_v53  ;;  %v60_v52 = vld [vmem:[%s15813_s1 + $0x118] sm:$0xff] }
 0x13d   :  { %v3874_v49 = vsel %vm3873_vm3, %v7805_v28, %v3870_v40  ;;  %v2403_v28 = vmul.f32 %v9358_v16, %v9358_v16  ;;  %v3817_v21 = vadd.f32 0.001143296, %v3816_v51  ;;  %v2211_v44 = vmul.f32 %v2210_v59, %v9189_v41  ;;  %7566 = vmatmul.msk.f32.gmra.mxu0 %vm921_vm0, %v60_v52 }
 0x13e   :  { %v3879_v3 = vsel %vm3876_vm4, %v3878_v63, %v3874_v49  ;;  %v2249_v50 = vmul.f32 %v2248_v34, %v9234_v15  ;;  %v3609_v47 = vmul.f32 %v3608_v29, %v9244_v1  ;;  %v2287_v19 = vmul.f32 %v2286_v36, %v9309_v8  ;;  %v258_v34 = vld [vmem:[%s15814_s2 + $0x348] sm:$0xff] }
 0x13f   :  { %v3880_v54 = vmul.f32 %v3879_v3, %v3855_v4  ;;  %v2326_v40 = vadd.f32 0.00028619796, %v2325_v14  ;;  %v1754_v63 = vmul.f32 0.5, %v9114_v60  ;;  %v2366_v13 = vadd.f32 0.00028619796, %v2365_v46  ;;  %v273_v60 = vld [vmem:[%s15814_s2 + $0x3c0] sm:$0xff]  ;;  %808 = vperm.xlu2 %7803, %v258_v34  }
 0x140   :  { %v9383_v59 = vmul.f32 %v9267_v0, %v9097_v23  ;;  %v9385_v49 = vmin.f32 %v3563_v58, 16.0  ;;  %v9387_v51 = vmin.f32 %v2403_v28, 16.0  ;;  %v3727_v46 = vmul.f32 %v3726_v6, %v9311_v38  ;;  %883 = vperm.xlu1 %7802, %v273_v60   ;;  %v259_v23 = vld [vmem:[%s15814_s2 + $0x350] sm:$0xff] }
 0x141   :  { %v7706_v43 = vclamps-f32 %v3880_v54, 1.0  ;;  %v2172_v54 = vadd.f32 0.18741608, %v2171_v48  ;;  %v3977_v14 = vadd.f32 0.001143296, %v3976_v32  ;;  %v3818_v48 = vmul.f32 %v3817_v21, %v9340_v61  ;;  %813 = vperm.xlu0 %7801, %v259_v23  }
 0x142   :  { %16049 = vst [vmem:[#allocation82_spill] sm:$0xff] %v9383_v59  ;;  %v9402_v0 = vmul.f32 %v9293_v57, %v9110_v31  ;;  %v2134_v36 = vadd.f32 1.1283791, %v2133_v27  ;;  %v2212_v3 = vadd.f32 0.18741608, %v2211_v44  ;;  %v2327_v32 = vmul.f32 %v2326_v40, %v9347_v56 }
 0x143   :  { %v7130_v4 = vadd.f32 1.0, %v7706_v43  ;;  %v2288_v58 = vadd.f32 0.0036580483, %v2287_v19  ;;  %v2250_v28 = vadd.f32 0.05243302, %v2249_v50  ;;  %v2367_v43 = vmul.f32 %v2366_v13, %v9349_v35 }
 0x144   :  { %16050 = vst [vmem:[#allocation83_spill] sm:$0xff] %v9402_v0  ;;  %v3610_v6 = vadd.f32 0.05243302, %v3609_v47  ;;  %v9407_v52 = vmul.f32 %v2094_v5, %v9135_v17  ;;  %v3965_v21 = vmul.f32 2.1237322e-06, %v9352_v53  ;;  %v2173_v57 = vmul.f32 %v2172_v54, %v9186_v12  ;;  %v16063_v0 = vld [vmem:[#allocation76_spill] sm:$0xff] }
 0x145   :  { %v7258_v29 = vmul.f32 %v7130_v4, %v1754_v63  ;;  %v3565_v63 = vmul.f32 2.1237322e-06, %v9385_v49  ;;  %v2405_v31 = vmul.f32 2.1237322e-06, %v9387_v51  ;;  %v3728_v27 = vadd.f32 0.0036580483, %v3727_v46 }
 0x146   :  { %16051 = vst [vmem:[#allocation84_spill] sm:$0xff] %v9407_v52  ;;  %v3978_v44 = vmul.f32 %v3977_v14, %v9352_v53  ;;  %v3819_v50 = vadd.f32 0.014752088, %v3818_v48  ;;  %v2213_v47 = vmul.f32 %v2212_v3, %v9189_v41  ;;  %v9416_v19 = vmul.f32 0.5, %v8823_v7 }
 0x147   :  { %7393 = vmatpush.msrb.mxu3 %v7258_v29  ;;  %v2289_v17 = vmul.f32 %v2288_v58, %v9309_v8  ;;  %v9421_v5 = vadd.f32 %v8667_v42, %v8977_v62  ;;  %v2251_v40 = vmul.f32 %v2250_v28, %v9234_v15  ;;  %v2328_v13 = vadd.f32 0.0036580483, %v2327_v32 }
 0x148   :  { %v2368_v4 = vadd.f32 0.0036580483, %v2367_v43  ;;  %v3805_v54 = vmul.f32 2.1237322e-06, %v9340_v61  ;;  %v3611_v34 = vmul.f32 %v3610_v6, %v9244_v1  ;;  %v3966_v60 = vadd.f32 0.00028619796, %v3965_v21 }
 0x149   :  { %v3566_v46 = vadd.f32 0.00028619796, %v3565_v63  ;;  %v2406_v14 = vadd.f32 0.00028619796, %v2405_v31  ;;  %v2174_v29 = vadd.f32 1.1283791, %v2173_v57  ;;  %v3729_v7 = vmul.f32 %v3728_v27, %v9311_v38 }
 0x14a   :  { %v3979_v23 = vadd.f32 0.014752088, %v3978_v44  ;;  %v3820_v48 = vmul.f32 %v3819_v50, %v9340_v61  ;;  %v9429_v42 = vmul.f32 %v2134_v36, %v9141_v22  ;;  %v2214_v62 = vadd.f32 1.1283791, %v2213_v47  ;;  %v1359_v22 = vpop.f32.mrf.mxu0 }
 0x14b   :  { %v2290_v3 = vadd.f32 0.05243302, %v2289_v17  ;;  %v9432_v58 = vmul.f32 0.70710677, %v9421_v5  ;;  %v2252_v28 = vadd.f32 0.18741608, %v2251_v40  ;;  %v2329_v6 = vmul.f32 %v2328_v13, %v9347_v56 }
 0x14c   :  { %16052 = vst [vmem:[#allocation85_spill] sm:$0xff] %v9429_v42  ;;  %v2369_v32 = vmul.f32 %v2368_v4, %v9349_v35  ;;  %v3806_v43 = vadd.f32 0.00028619796, %v3805_v54  ;;  %v3612_v21 = vadd.f32 0.18741608, %v3611_v34  ;;  %v3967_v63 = vmul.f32 %v3966_v60, %v9352_v53 }
 0x14d   :  { %v3567_v31 = vmul.f32 %v3566_v46, %v9385_v49  ;;  %v2407_v57 = vmul.f32 %v2406_v14, %v9387_v51  ;;  %v9440_v36 = vmul.f32 %v2174_v29, %v9167_v11  ;;  %v3730_v27 = vadd.f32 0.05243302, %v3729_v7 }
 0x14e   :  { %v3980_v44 = vmul.f32 %v3979_v23, %v9352_v53  ;;  %v3821_v50 = vadd.f32 0.112945676, %v3820_v48  ;;  %v9444_v47 = vmul.f32 %v2214_v62, %v9171_v33  ;;  %v2291_v17 = vmul.f32 %v2290_v3, %v9309_v8 }
 0x14f   :  { %16053 = vst [vmem:[#allocation86_spill] sm:$0xff] %v9440_v36  ;;  %v9448_v40 = vmul.f32 0.5, %v8861_v39  ;;  %v3683_v13 = vmul.f32 %v9432_v58, %v9432_v58  ;;  %v2253_v4 = vmul.f32 %v2252_v28, %v9234_v15  ;;  %v2330_v54 = vadd.f32 0.05243302, %v2329_v6 }
 0x150   :  { %16054 = vst [vmem:[#allocation87_spill] sm:$0xff] %v9444_v47  ;;  %v2370_v11 = vadd.f32 0.05243302, %v2369_v32  ;;  %v3807_v34 = vmul.f32 %v3806_v43, %v9340_v61  ;;  %v3613_v60 = vmul.f32 %v3612_v21, %v9244_v1  ;;  %v3968_v46 = vadd.f32 0.0036580483, %v3967_v63 }
 0x151   :  { %v3568_v14 = vadd.f32 0.0036580483, %v3567_v31  ;;  %v2408_v33 = vadd.f32 0.0036580483, %v2407_v57  ;;  %v3731_v29 = vmul.f32 %v3730_v27, %v9311_v38  ;;  %v3981_v7 = vadd.f32 0.112945676, %v3980_v44 }
 0x152   :  { %v9458_v39 = vadd.f32 %v8634_v30, %v9007_v24  ;;  %v3822_v23 = vmul.f32 %v3821_v50, %v9340_v61  ;;  %v2292_v48 = vadd.f32 0.18741608, %v2291_v17  ;;  %v9461_v62 = vmin.f32 %v3683_v13, 16.0  ;;  %v1362_v17 = vpop.f32.mrf.mxu0 }
 0x153   :  { %v9464_v3 = vadd.f32 %v1359_v22, %v8626_v26  ;;  %v9468_v28 = vadd.f32 %v8731_v9, %v9035_v10  ;;  %v2254_v6 = vadd.f32 1.1283791, %v2253_v4  ;;  %v2331_v32 = vmul.f32 %v2330_v54, %v9347_v56 }
 0x154   :  { %v2371_v43 = vmul.f32 %v2370_v11, %v9349_v35  ;;  %v3808_v21 = vadd.f32 0.0036580483, %v3807_v34  ;;  %v3614_v30 = vadd.f32 1.1283791, %v3613_v60  ;;  %v3969_v24 = vmul.f32 %v3968_v46, %v9352_v53 }
 0x155   :  { %16055 = vst [vmem:[#allocation88_spill] sm:$0xff] %v9464_v3  ;;  %v3569_v63 = vmul.f32 %v3568_v14, %v9385_v49  ;;  %v2409_v31 = vmul.f32 %v2408_v33, %v9387_v51  ;;  %v3732_v57 = vadd.f32 0.18741608, %v3731_v29  ;;  %v3982_v26 = vmul.f32 %v3981_v7, %v9352_v53 }
 0x156   :  { %v9477_v22 = vmul.f32 0.70710677, %v9458_v39  ;;  %v3823_v9 = vadd.f32 0.4994258, %v3822_v23  ;;  %v2293_v10 = vmul.f32 %v2292_v48, %v9309_v8  ;;  %v3685_v27 = vmul.f32 2.1237322e-06, %v9461_v62 }
 0x157   :  { %v9482_v44 = vmul.f32 0.70710677, %v9464_v3  ;;  %v9485_v50 = vmul.f32 0.70710677, %v9468_v28  ;;  %v2332_v13 = vadd.f32 0.18741608, %v2331_v32  ;;  %v3809_v11 = vmul.f32 %v3808_v21, %v9340_v61 }
 0x158   :  { %v2372_v4 = vadd.f32 0.18741608, %v2371_v43  ;;  %v9488_v54 = vmul.f32 0.5, %v8926_v37  ;;  %v9492_v34 = vmul.f32 %v2254_v6, %v9207_v20  ;;  %v3970_v60 = vadd.f32 0.05243302, %v3969_v24  ;;  %v16069_v3 = vld [vmem:[#allocation74_spill] sm:$0xff] }
 0x159   :  { %v3570_v46 = vadd.f32 0.05243302, %v3569_v63  ;;  %v2410_v14 = vadd.f32 0.05243302, %v2409_v31  ;;  %v3983_v33 = vadd.f32 0.4994258, %v3982_v26  ;;  %v3643_v29 = vmul.f32 %v9477_v22, %v9477_v22 }
 0x15a   :  { %16056 = vst [vmem:[#allocation89_spill] sm:$0xff] %v9488_v54  ;;  %v9497_v7 = vadd.f32 %v1362_v17, %v8624_v25  ;;  %v3824_v23 = vmul.f32 %v3823_v9, %v9340_v61  ;;  %v3733_v37 = vmul.f32 %v3732_v57, %v9311_v38  ;;  %v3686_v48 = vadd.f32 0.00028619796, %v3685_v27 }
 0x15b   :  { %16057 = vst [vmem:[#allocation90_spill] sm:$0xff] %v9492_v34  ;;  %v2443_v32 = vmul.f32 %v9482_v44, %v9482_v44  ;;  %v3763_v20 = vmul.f32 %v9485_v50, %v9485_v50  ;;  %v2294_v6 = vadd.f32 1.1283791, %v2293_v10  ;;  %v2333_v43 = vmul.f32 %v2332_v13, %v9347_v56 }
 0x15c   :  { %16058 = vst [vmem:[#allocation91_spill] sm:$0xff] %v9497_v7  ;;  %v2373_v21 = vmul.f32 %v2372_v4, %v9349_v35  ;;  %v3810_v24 = vadd.f32 0.05243302, %v3809_v11  ;;  %v3971_v25 = vmul.f32 %v3970_v60, %v9352_v53  ;;  %v9509_v63 = vmul.f32 0.5, %v9322_v45 }
 0x15d   :  { %v3571_v31 = vmul.f32 %v3570_v46, %v9385_v49  ;;  %v2411_v57 = vmul.f32 %v2410_v14, %v9387_v51  ;;  %v3984_v26 = vmul.f32 %v3983_v33, %v9352_v53  ;;  %v9514_v9 = vmin.f32 %v3643_v29, 16.0  ;;  %v16059_v14 = vld [vmem:[#allocation39_spill] sm:$0xff] }
 0x15e   :  { %v9517_v10 = vmul.f32 0.70710677, %v9497_v7  ;;  %v9519_v27 = vadd.f32 1.0, %v3824_v23  ;;  %v3734_v17 = vadd.f32 1.1283791, %v3733_v37  ;;  %v3687_v13 = vmul.f32 %v3686_v48, %v9461_v62 }
 0x15f   :  { %v9522_v4 = vmin.f32 %v2443_v32, 16.0  ;;  %v9524_v45 = vmin.f32 %v3763_v20, 16.0  ;;  %v2334_v11 = vadd.f32 1.1283791, %v2333_v43  ;;  %v2374_v60 = vadd.f32 1.1283791, %v2373_v21 }
 0x160   :  { %v3811_v46 = vmul.f32 %v3810_v24, %v9340_v61  ;;  %v9528_v33 = vmul.f32 0.70710677, %v16059_v14  ;;  %v9531_v29 = vmul.f32 %v3614_v30, %v9211_v2  ;;  %v3972_v54 = vadd.f32 0.18741608, %v3971_v25  ;;  %v16060_v20 = vld [vmem:[#allocation68_spill] sm:$0xff]  ;;  %v16062_v30 = vld [vmem:[#allocation70_spill] sm:$0xff] }
 0x161   :  { %v3572_v23 = vadd.f32 0.18741608, %v3571_v31  ;;  %v2412_v59 = vadd.f32 0.18741608, %v2411_v57  ;;  %v9533_v37 = vadd.f32 1.0, %v3984_v26  ;;  %v2483_v32 = vmul.f32 %v9517_v10, %v9517_v10 }
 0x162   :  { %v3645_v48 = vmul.f32 2.1237322e-06, %v9514_v9  ;;  %7806 = vrcp.f32 %v9519_v27  ;;  %v9540_v43 = vmul.f32 %v2294_v6, %v16060_v20  ;;  %v3688_v21 = vadd.f32 0.0036580483, %v3687_v13  ;;  %v16065_v6 = vld [vmem:[#allocation77_spill] sm:$0xff] }
 0x163   :  { %v2445_v24 = vmul.f32 2.1237322e-06, %v9522_v4  ;;  %v3765_v2 = vmul.f32 2.1237322e-06, %v9524_v45  ;;  %v9545_v25 = vmul.f32 %v3734_v17, %v16062_v30  ;;  %v9548_v31 = vmul.f32 0.5, %v9421_v5 }
 0x164   :  { %16061 = vst [vmem:[#allocation39_spill] sm:$0xff] %v9540_v43  ;;  %v3812_v57 = vadd.f32 0.18741608, %v3811_v46  ;;  %v4083_v26 = vmul.f32 %v9528_v33, %v9528_v33  ;;  %v9553_v52 = vmul.f32 %v2334_v11, %v16063_v0  ;;  %v9556_v20 = vmul.f32 %v2374_v60, %v16065_v6 }
 0x165   :  { %v3973_v13 = vmul.f32 %v3972_v54, %v9352_v53  ;;  %v9560_v42 = vmul.f32 0.5, %v9458_v39  ;;  %v3573_v17 = vmul.f32 %v3572_v23, %v9385_v49  ;;  %v2413_v5 = vmul.f32 %v2412_v59, %v9387_v51  ;;  %v16067_v53 = vld [vmem:[#allocation69_spill] sm:$0xff] }
 0x166   :  { %16064 = vst [vmem:[#allocation68_spill] sm:$0xff] %v9553_v52  ;;  %v3646_v30 = vadd.f32 0.00028619796, %v3645_v48  ;;  %v9564_v46 = vmin.f32 %v2483_v32, 16.0  ;;  %7808 = vrcp.f32 %v9533_v37  ;;  %v3689_v0 = vmul.f32 %v3688_v21, %v9461_v62 }
 0x167   :  { %16066 = vst [vmem:[#allocation70_spill] sm:$0xff] %v9556_v20  ;;  %v2446_v11 = vadd.f32 0.00028619796, %v2445_v24  ;;  %v3766_v36 = vadd.f32 0.00028619796, %v3765_v2  ;;  %v3997_v6 = vand.u32 2147483648, %v9533_v37  ;;  %v3813_v39 = vmul.f32 %v3812_v57, %v9340_v61 }
 0x168   :  { %v7807_v60 = vpop.eup %7806  ;;  %v9570_v54 = vmul.f32 0.5, %v16067_v53  ;;  %v9573_v23 = vmin.f32 %v4083_v26, 16.0  ;;  %v3974_v59 = vadd.f32 1.1283791, %v3973_v13  ;;  %v3776_v47 = vmul.f32 3.8918573e-05, %v9524_v45 }
 0x169   :  { %v3827_v32 = vmul.f32 %v7807_v60, %v9519_v27  ;;  %v3574_v21 = vadd.f32 1.1283791, %v3573_v17  ;;  %v2414_v24 = vadd.f32 1.1283791, %v2413_v5  ;;  %v3647_v2 = vmul.f32 %v3646_v30, %v9514_v9 }
 0x16a   :  { %v2485_v34 = vmul.f32 2.1237322e-06, %v9564_v46  ;;  %v3690_v55 = vadd.f32 0.05243302, %v3689_v0  ;;  %v2447_v53 = vmul.f32 %v2446_v11, %v9522_v4  ;;  %v3767_v61 = vmul.f32 %v3766_v36, %v9524_v45  ;;  %v16068_v0 = vld [vmem:[#allocation78_spill] sm:$0xff] }
 0x16b   :  { %v3828_v57 = vsub.f32 1.0, %v3827_v32  ;;  %v9582_v26 = vor.u32 1.1754944e-38, %v3997_v6  ;;  %v3814_v13 = vadd.f32 1.1283791, %v3813_v39  ;;  %v4085_v48 = vmul.f32 2.1237322e-06, %v9573_v23 }
 0x16c   :  { %v3837_v12 = vand.u32 2147483648, %v9519_v27  ;;  %v9586_v41 = vpop.eup %7808  ;;  %vm3832_vm5 = vweird.f32 %v7807_v60  ;;  %v3835_v5 = vand.u32 2147483647, %v9519_v27  ;;  %v3777_v30 = vadd.f32 0.001143296, %v3776_v47 }
 0x16d   :  { %v3829_v17 = vmul.f32 %v7807_v60, %v3828_v57  ;;  %v9590_v43 = vmul.f32 %v3974_v59, %v16068_v0  ;;  %v3648_v11 = vadd.f32 0.0036580483, %v3647_v2  ;;  %v2486_v36 = vadd.f32 0.00028619796, %v2485_v34 }
 0x16e   :  { %v4096_v6 = vmul.f32 3.8918573e-05, %v9573_v23  ;;  %v2448_v32 = vadd.f32 0.0036580483, %v2447_v53  ;;  %v3768_v39 = vadd.f32 0.0036580483, %v3767_v61  ;;  %vm3831_vm6 = vweird.f32 %v9519_v27 }
 0x16f   :  { %v3830_v52 = vadd.f32 %v7807_v60, %v3829_v17  ;;  %v3987_v20 = vmul.f32 %v9586_v41, %v9533_v37  ;;  %v4086_v57 = vadd.f32 0.00028619796, %v4085_v48  ;;  %vm3833_vm7 = vmor %vm3831_vm6, %vm3832_vm5  ;;  %v3838_v15 = vor.u32 1.1754944e-38, %v3837_v12  ;;  %v16070_v61 = vld [vmem:[#allocation40_spill] sm:$0xff] }
 0x170   :  { %v3736_v47 = vmul.f32 3.8918573e-05, %v9311_v38  ;;  %v3815_v59 = vmul.f32 %v3814_v13, %v16069_v3  ;;  %vm3836_vm8 = vcmp.eq.f32.partialorder %v3835_v5, 8.507059e+37  ;;  %v3778_v34 = vmul.f32 %v3777_v30, %v9524_v45 }
 0x171   :  { %v3834_v0 = vsel %vm3833_vm7, %v7807_v60, %v3830_v52  ;;  %v2487_v2 = vmul.f32 %v2486_v36, %v9564_v46  ;;  %v4097_v53 = vadd.f32 0.001143296, %v4096_v6  ;;  %v9601_v17 = vmul.f32 0.70710677, %v16070_v61 }
 0x172   :  { %v3839_v27 = vsel %vm3836_vm8, %v3838_v15, %v3834_v0  ;;  %v3691_v7 = vmul.f32 %v3690_v55, %v9461_v62  ;;  %v3649_v48 = vmul.f32 %v3648_v11, %v9514_v9  ;;  %v3779_v8 = vadd.f32 0.014752088, %v3778_v34 }
 0x173   :  { %v3840_v12 = vmul.f32 %v3839_v27, %v3815_v59  ;;  %v9606_v56 = vmul.f32 %v3574_v21, %v9355_v18  ;;  %v9609_v52 = vmul.f32 %v2414_v24, %v9358_v16  ;;  %v2449_v3 = vmul.f32 %v2448_v32, %v9522_v4  ;;  %v16072_v32 = vld [vmem:[#allocation42_spill] sm:$0xff] }
 0x174   :  { %v3737_v60 = vadd.f32 0.001143296, %v3736_v47  ;;  %v3988_v13 = vsub.f32 1.0, %v3987_v20  ;;  %v3769_v5 = vmul.f32 %v3768_v39, %v9524_v45  ;;  %v4087_v15 = vmul.f32 %v4086_v57, %v9573_v23  ;;  %v16073_v39 = vld [vmem:[#allocation26_spill] sm:$0xff] }
 0x175   :  { %16071 = vst [vmem:[#allocation76_spill] sm:$0xff] %v9609_v52  ;;  %v7705_v30 = vclamps-f32 %v3840_v12, 1.0  ;;  %v2488_v55 = vadd.f32 0.0036580483, %v2487_v2  ;;  %v4098_v11 = vmul.f32 %v4097_v53, %v9573_v23  ;;  %v3923_v36 = vmul.f32 %v9601_v17, %v9601_v17 }
 0x176   :  { %v3780_v18 = vmul.f32 %v3779_v8, %v9524_v45  ;;  %vm3991_vm9 = vweird.f32 %v9533_v37  ;;  %v3692_v16 = vadd.f32 0.18741608, %v3691_v7  ;;  %v3650_v21 = vadd.f32 0.05243302, %v3649_v48 }
 0x177   :  { %v7129_v24 = vadd.f32 1.0, %v7705_v30  ;;  %v3738_v20 = vmul.f32 %v3737_v60, %v9311_v38  ;;  %v2450_v6 = vadd.f32 0.05243302, %v2449_v3  ;;  %v9622_v57 = vadd.f32 %v16073_v39, %v16072_v32 }
 0x178   :  { %v3781_v47 = vadd.f32 0.112945676, %v3780_v18  ;;  %v3696_v59 = vmul.f32 3.8918573e-05, %v9461_v62  ;;  %v3989_v0 = vmul.f32 %v9586_v41, %v3988_v13  ;;  %v9627_v34 = vmul.f32 0.5, %v9468_v28 }
 0x179   :  { %v3770_v8 = vadd.f32 0.05243302, %v3769_v5  ;;  %v4088_v2 = vadd.f32 0.0036580483, %v4087_v15  ;;  %v2489_v7 = vmul.f32 %v2488_v55, %v9564_v46  ;;  %v4099_v53 = vadd.f32 0.014752088, %v4098_v11 }
 0x17a   :  { %v9630_v27 = vmin.f32 %v3923_v36, 16.0  ;;  %v7257_v48 = vmul.f32 %v7129_v24, %v9570_v54  ;;  %vm3992_vm10 = vweird.f32 %v9586_v41  ;;  %v3782_v12 = vmul.f32 %v3781_v47, %v9524_v45 }
 0x17b   :  { %v3739_v3 = vadd.f32 0.014752088, %v3738_v20  ;;  %v3697_v60 = vadd.f32 0.001143296, %v3696_v59  ;;  %v16074_v13 = vand.u32 2147483647, %v9533_v37  ;;  %v3693_v5 = vmul.f32 %v3692_v16, %v9461_v62  ;;  %vm9661_vm12 = vmor %vm3991_vm9, %vm3992_vm10 }
 0x17c   :  { %v3651_v15 = vmul.f32 %v3650_v21, %v9514_v9  ;;  %v2451_v30 = vmul.f32 %v2450_v6, %v9522_v4  ;;  %v9645_v54 = vmul.f32 0.70710677, %v9622_v57  ;;  %7394 = vmatpush.msrb.mxu3 %v7257_v48  ;;  %v3990_v55 = vadd.f32 %v9586_v41, %v3989_v0 }
 0x17d   :  { %vm9637_vm11 = vcmp.eq.f32.partialorder %v16074_v13, 8.507059e+37  ;;  %v3771_v11 = vmul.f32 %v3770_v8, %v9524_v45  ;;  %v4089_v36 = vmul.f32 %v4088_v2, %v9573_v23  ;;  %v3783_v18 = vadd.f32 0.4994258, %v3782_v12 }
 0x17e   :  { %v2490_v24 = vadd.f32 0.05243302, %v2489_v7  ;;  %v4100_v20 = vmul.f32 %v4099_v53, %v9573_v23  ;;  %v3925_v16 = vmul.f32 2.1237322e-06, %v9630_v27  ;;  %v3740_v21 = vmul.f32 %v3739_v3, %v9311_v38 }
 0x17f   :  { %v3936_v6 = vmul.f32 3.8918573e-05, %v9630_v27  ;;  %v3784_v32 = vmul.f32 %v3783_v18, %v9524_v45  ;;  %v3698_v39 = vmul.f32 %v3697_v60, %v9461_v62  ;;  %v3656_v47 = vmul.f32 3.8918573e-05, %v9514_v9 }
 0x180   :  { %v3694_v0 = vadd.f32 1.1283791, %v3693_v5  ;;  %v3652_v8 = vadd.f32 0.18741608, %v3651_v15  ;;  %v2452_v2 = vadd.f32 0.18741608, %v2451_v30  ;;  %v3883_v7 = vmul.f32 %v9645_v54, %v9645_v54 }
 0x181   :  { %v3994_v53 = vsel %vm9661_vm12, %v9586_v41, %v3990_v55  ;;  %v3772_v48 = vadd.f32 0.18741608, %v3771_v11  ;;  %v4090_v12 = vadd.f32 0.05243302, %v4089_v36  ;;  %v9670_v3 = vadd.f32 1.0, %v3784_v32 }
 0x182   :  { %v2491_v37 = vmul.f32 %v2490_v24, %v9564_v46  ;;  %v4101_v60 = vadd.f32 0.112945676, %v4100_v20  ;;  %v3926_v13 = vadd.f32 0.00028619796, %v3925_v16  ;;  %v3741_v18 = vadd.f32 0.112945676, %v3740_v21 }
 0x183   :  { %v3937_v52 = vadd.f32 0.001143296, %v3936_v6  ;;  %7810 = vrcp.f32 %v9670_v3  ;;  %v3699_v5 = vadd.f32 0.014752088, %v3698_v39  ;;  %v3657_v15 = vadd.f32 0.001143296, %v3656_v47 }
 0x184   :  { %v9675_v30 = vmul.f32 %v3694_v0, %v9432_v58  ;;  %v3653_v59 = vmul.f32 %v3652_v8, %v9514_v9  ;;  %v9679_v41 = vmul.f32 0.5, %v16059_v14  ;;  %v9681_v55 = vmin.f32 %v3883_v7, 16.0  ;;  %v1365_v14 = vpop.f32.mrf.mxu0 }
 0x185   :  { %v3999_v11 = vsel %vm9637_vm11, %v9582_v26, %v3994_v53  ;;  %v2453_v36 = vmul.f32 %v2452_v2, %v9522_v4  ;;  %v3773_v24 = vmul.f32 %v3772_v48, %v9524_v45  ;;  %v9689_v20 = vmul.f32 0.5, %v16070_v61  ;;  %v16082_v53 = vld [vmem:[#allocation5_spill] sm:$0xff] }
 0x186   :  { %16079 = vst [vmem:[#allocation77_spill] sm:$0xff] %v9679_v41  ;;  %v2492_v58 = vadd.f32 0.18741608, %v2491_v37  ;;  %v4091_v16 = vmul.f32 %v4090_v12, %v9573_v23  ;;  %v3927_v21 = vmul.f32 %v3926_v13, %v9630_v27  ;;  %v3742_v6 = vmul.f32 %v3741_v18, %v9311_v38 }
 0x187   :  { %16080 = vst [vmem:[#allocation69_spill] sm:$0xff] %v9689_v20  ;;  %v4102_v32 = vmul.f32 %v4101_v60, %v9573_v23  ;;  %v3938_v28 = vmul.f32 %v3937_v52, %v9630_v27  ;;  %v3700_v26 = vmul.f32 %v3699_v5, %v9461_v62  ;;  %v3658_v39 = vmul.f32 %v3657_v15, %v9514_v9 }
 0x188   :  { %v9699_v45 = vmul.f32 %v3999_v11, %v9590_v43  ;;  %v3654_v61 = vadd.f32 1.1283791, %v3653_v59  ;;  %v3885_v47 = vmul.f32 2.1237322e-06, %v9681_v55  ;;  %v3743_v0 = vadd.f32 0.4994258, %v3742_v6 }
 0x189   :  { %v7811_v8 = vpop.eup %7810  ;;  %v2454_v2 = vadd.f32 1.1283791, %v2453_v36  ;;  %v3774_v7 = vadd.f32 1.1283791, %v3773_v24  ;;  %v9703_v48 = vadd.f32 %v1365_v14, %v16082_v53  ;;  %v3701_v12 = vadd.f32 0.112945676, %v3700_v26 }
 0x18a   :  { %16081 = vst [vmem:[#allocation78_spill] sm:$0xff] %v9699_v45  ;;  %v4092_v37 = vadd.f32 0.18741608, %v4091_v16  ;;  %v3896_v52 = vmul.f32 3.8918573e-05, %v9681_v55  ;;  %v3787_v60 = vmul.f32 %v7811_v8, %v9670_v3  ;;  %v2493_v43 = vmul.f32 %v2492_v58, %v9564_v46 }
 0x18b   :  { %v3659_v13 = vadd.f32 0.014752088, %v3658_v39  ;;  %v4103_v18 = vadd.f32 0.4994258, %v4102_v32  ;;  %v3928_v5 = vadd.f32 0.0036580483, %v3927_v21  ;;  %v3744_v36 = vmul.f32 %v3743_v0, %v9311_v38 }
 0x18c   :  { %v3939_v15 = vadd.f32 0.014752088, %v3938_v28  ;;  %v3886_v59 = vadd.f32 0.00028619796, %v3885_v47  ;;  %v3788_v11 = vsub.f32 1.0, %v3787_v60  ;;  %v3702_v24 = vmul.f32 %v3701_v12, %v9461_v62 }
 0x18d   :  { %v3775_v14 = vmul.f32 %v3774_v7, %v9485_v50  ;;  %vm3792_vm13 = vweird.f32 %v7811_v8  ;;  %v3795_v16 = vand.u32 2147483647, %v9670_v3  ;;  %v3797_v6 = vand.u32 2147483648, %v9670_v3  ;;  %v61_v7 = vld [vmem:[%s15813_s1 + $0x120] sm:$0xff] }
 0x18e   :  { %v3789_v26 = vmul.f32 %v7811_v8, %v3788_v11  ;;  %v9713_v39 = vadd.f32 1.0, %v3744_v36  ;;  %v3703_v58 = vadd.f32 0.4994258, %v3702_v24  ;;  %v3660_v21 = vmul.f32 %v3659_v13, %v9514_v9  ;;  %7567 = vmatmul.msk.f32.gmra.mxu0 %vm921_vm0, %v61_v7  ;;  %v271_v13 = vld [vmem:[%s15814_s2 + $0x3b0] sm:$0xff] }
 0x18f   :  { %v2494_v32 = vadd.f32 1.1283791, %v2493_v43  ;;  %v4093_v28 = vmul.f32 %v4092_v37, %v9573_v23  ;;  %v4104_v38 = vmul.f32 %v4103_v18, %v9573_v23  ;;  %v3929_v47 = vmul.f32 %v3928_v5, %v9630_v27  ;;  %v272_v43 = vld [vmem:[%s15814_s2 + $0x3b8] sm:$0xff]  ;;  %873 = vperm.xlu2 %7803, %v271_v13  }
 0x190   :  { %v3940_v50 = vmul.f32 %v3939_v15, %v9630_v27  ;;  %v3790_v0 = vadd.f32 %v7811_v8, %v3789_v26  ;;  %vm3791_vm14 = vweird.f32 %v9670_v3  ;;  %7812 = vrcp.f32 %v9713_v39  ;;  %878 = vperm.xlu0 %7801, %v272_v43  }
 0x191   :  { %v3887_v53 = vmul.f32 %v3886_v59, %v9681_v55  ;;  %v3897_v12 = vadd.f32 0.001143296, %v3896_v52  ;;  %v9727_v37 = vmul.f32 0.70710677, %v9703_v48  ;;  %vm3793_vm15 = vmor %vm3791_vm14, %vm3792_vm13  ;;  %v3798_v23 = vor.u32 1.1754944e-38, %v3797_v6  ;;  %v257_v52 = vld [vmem:[%s15814_s2 + $0x340] sm:$0xff] }
 0x192   :  { %v3794_v60 = vsel %vm3793_vm15, %v7811_v8, %v3790_v0  ;;  %vm3796_vm1 = vcmp.eq.f32.partialorder %v3795_v16, 8.507059e+37  ;;  %v3704_v3 = vmul.f32 %v3703_v58, %v9461_v62  ;;  %v3661_v18 = vadd.f32 0.112945676, %v3660_v21  ;;  %803 = vperm.xlu1 %7802, %v257_v52  }
 0x193   :  { %v4094_v5 = vadd.f32 1.1283791, %v4093_v28  ;;  %v9741_v15 = vadd.f32 1.0, %v4104_v38  ;;  %v3930_v8 = vadd.f32 0.05243302, %v3929_v47  ;;  %v3799_v59 = vsel %vm3796_vm1, %v3798_v23, %v3794_v60  ;;  %v16084_v28 = vld [vmem:[#allocation43_spill] sm:$0xff] }
 0x194   :  { %v9744_v62 = vmul.f32 %v3654_v61, %v9477_v22  ;;  %v9747_v11 = vmul.f32 %v2454_v2, %v9482_v44  ;;  %v9750_v36 = vmul.f32 0.5, %v9622_v57  ;;  %v3800_v24 = vmul.f32 %v3799_v59, %v3775_v14 }
 0x195   :  { %v9753_v16 = vmul.f32 %v2494_v32, %v9517_v10  ;;  %v3941_v6 = vadd.f32 0.112945676, %v3940_v50  ;;  %v3888_v26 = vadd.f32 0.0036580483, %v3887_v53  ;;  %v3898_v58 = vmul.f32 %v3897_v12, %v9681_v55 }
 0x196   :  { %16083 = vst [vmem:[#allocation74_spill] sm:$0xff] %v9750_v36  ;;  %v7813_v21 = vpop.eup %7812  ;;  %v2523_v22 = vmul.f32 %v9727_v37, %v9727_v37  ;;  %v7704_v61 = vclamps-f32 %v3800_v24, 1.0  ;;  %v9758_v44 = vadd.f32 1.0, %v3704_v3  ;;  %v3662_v57 = vmul.f32 %v3661_v18, %v9514_v9 }
 0x197   :  { %v9762_v2 = vmul.f32 %v4094_v5, %v9528_v33  ;;  %7814 = vrcp.f32 %v9741_v15  ;;  %v3931_v10 = vmul.f32 %v3930_v8, %v9630_v27  ;;  %v3747_v14 = vmul.f32 %v7813_v21, %v9713_v39 }
 0x198   :  { %v9769_v38 = vmul.f32 0.5, %v16084_v28  ;;  %v7128_v47 = vadd.f32 1.0, %v7704_v61  ;;  %7816 = vrcp.f32 %v9758_v44  ;;  %v4117_v50 = vand.u32 2147483648, %v9741_v15 }
 0x199   :  { %v3942_v0 = vmul.f32 %v3941_v6, %v9630_v27  ;;  %v3889_v33 = vmul.f32 %v3888_v26, %v9681_v55  ;;  %v3748_v7 = vsub.f32 1.0, %v3747_v14  ;;  %v3899_v53 = vadd.f32 0.014752088, %v3898_v58 }
 0x19a   :  { %16085 = vst [vmem:[#allocation40_spill] sm:$0xff] %v9769_v38  ;;  %v9775_v12 = vmin.f32 %v2523_v22, 16.0  ;;  %v7256_v23 = vmul.f32 %v7128_v47, %v9627_v34  ;;  %v3663_v60 = vadd.f32 0.4994258, %v3662_v57  ;;  %v3932_v3 = vadd.f32 0.18741608, %v3931_v10 }
 0x19b   :  { %v3749_v13 = vmul.f32 %v7813_v21, %v3748_v7  ;;  %v3757_v52 = vand.u32 2147483648, %v9713_v39  ;;  %v3616_v43 = vmul.f32 3.8918573e-05, %v9244_v1  ;;  %v9781_v18 = vmul.f32 0.70710677, %v16084_v28 }
 0x19c   :  { %7395 = vmatpush.msrb.mxu3 %v7256_v23  ;;  %vm3752_vm2 = vweird.f32 %v7813_v21  ;;  %v3755_v5 = vand.u32 2147483647, %v9713_v39  ;;  %v3664_v8 = vmul.f32 %v3663_v60, %v9514_v9  ;;  %v9787_v24 = vor.u32 1.1754944e-38, %v4117_v50 }
 0x19d   :  { %v9785_v59 = vpop.eup %7814  ;;  %v3943_v34 = vadd.f32 0.4994258, %v3942_v0  ;;  %v3890_v6 = vadd.f32 0.05243302, %v3889_v33  ;;  %v3750_v26 = vadd.f32 %v7813_v21, %v3749_v13  ;;  %v3900_v22 = vmul.f32 %v3899_v53, %v9681_v55 }
 0x19e   :  { %v7817_v58 = vpop.eup %7816  ;;  %v2525_v61 = vmul.f32 2.1237322e-06, %v9775_v12  ;;  %vm3751_vm3 = vweird.f32 %v9713_v39  ;;  %v9792_v57 = vadd.f32 1.0, %v3664_v8  ;;  %v9795_v10 = vmul.f32 %v3932_v3, %v9630_v27  ;;  %v16086_v39 = vld [vmem:[#allocation45_spill] sm:$0xff] }
 0x19f   :  { %vm3753_vm4 = vmor %vm3751_vm3, %vm3752_vm2  ;;  %v3758_v9 = vor.u32 1.1754944e-38, %v3757_v52  ;;  %v3617_v14 = vadd.f32 0.001143296, %v3616_v43  ;;  %v3576_v28 = vmul.f32 3.8918573e-05, %v9385_v49  ;;  %v4043_v47 = vmul.f32 %v9781_v18, %v9781_v18 }
 0x1a0   :  { %v3754_v50 = vsel %vm3753_vm4, %v7813_v21, %v3750_v26  ;;  %vm3756_vm5 = vcmp.eq.f32.partialorder %v3755_v5, 8.507059e+37  ;;  %v3707_v0 = vmul.f32 %v7817_v58, %v9758_v44  ;;  %v3944_v33 = vmul.f32 %v3943_v34, %v9630_v27 }
 0x1a1   :  { %v9803_v7 = vmul.f32 0.70710677, %v16086_v39  ;;  %v3759_v53 = vsel %vm3756_vm5, %v3758_v9, %v3754_v50  ;;  %7818 = vrcp.f32 %v9792_v57  ;;  %v3891_v23 = vmul.f32 %v3890_v6, %v9681_v55 }
 0x1a2   :  { %v3901_v60 = vadd.f32 0.112945676, %v3900_v22  ;;  %v3760_v3 = vmul.f32 %v3759_v53, %v9545_v25  ;;  %v3708_v13 = vsub.f32 1.0, %v3707_v0  ;;  %v2526_v52 = vadd.f32 0.00028619796, %v2525_v61 }
 0x1a3   :  { %v3717_v21 = vand.u32 2147483648, %v9758_v44  ;;  %v3618_v43 = vmul.f32 %v3617_v14, %v9244_v1  ;;  %v3577_v5 = vadd.f32 0.001143296, %v3576_v28  ;;  %vm3712_vm6 = vweird.f32 %v7817_v58 }
 0x1a4   :  { %v7703_v8 = vclamps-f32 %v3760_v3, 1.0  ;;  %v3709_v27 = vmul.f32 %v7817_v58, %v3708_v13  ;;  %v3715_v34 = vand.u32 2147483647, %v9758_v44  ;;  %v9811_v26 = vmin.f32 %v4043_v47, 16.0 }
 0x1a5   :  { %v4003_v6 = vmul.f32 %v9803_v7, %v9803_v7  ;;  %v3619_v22 = vadd.f32 0.014752088, %v3618_v43  ;;  %v3578_v25 = vmul.f32 %v3577_v5, %v9385_v49  ;;  %v4107_v61 = vmul.f32 %v9785_v59, %v9741_v15 }
 0x1a6   :  { %v7127_v9 = vadd.f32 1.0, %v7703_v8  ;;  %v3710_v50 = vadd.f32 %v7817_v58, %v3709_v27  ;;  %vm3711_vm7 = vweird.f32 %v9758_v44  ;;  %v9819_v28 = vadd.f32 1.0, %v3944_v33 }
 0x1a7   :  { %v7819_v14 = vpop.eup %7818  ;;  %vm3713_vm8 = vmor %vm3711_vm7, %vm3712_vm6  ;;  %v3718_v0 = vor.u32 1.1754944e-38, %v3717_v21  ;;  %v3620_v47 = vmul.f32 %v3619_v22, %v9244_v1  ;;  %v3579_v53 = vadd.f32 0.014752088, %v3578_v25  ;;  %vm3716_vm9 = vcmp.eq.f32.partialorder %v3715_v34, 8.507059e+37 }
 0x1a8   :  { %v7255_v3 = vmul.f32 %v7127_v9, %v9448_v40  ;;  %v3714_v13 = vsel %vm3713_vm8, %v7817_v58, %v3710_v50  ;;  %v3667_v43 = vmul.f32 %v7819_v14, %v9792_v57  ;;  %v3902_v5 = vmul.f32 %v3901_v60, %v9681_v55  ;;  %v559_v60 = vpop.permute.xlu1 %558 }
 0x1a9   :  { %v4056_v8 = vmul.f32 3.8918573e-05, %v9811_v26  ;;  %v9826_v27 = vmin.f32 %v4003_v6, 16.0  ;;  %v3719_v44 = vsel %vm3716_vm9, %v3718_v0, %v3714_v13  ;;  %v4045_v33 = vmul.f32 2.1237322e-06, %v9811_v26 }
 0x1aa   :  { %7396 = vmatpush.msrb.mxu3 %v7255_v3  ;;  %v3720_v21 = vmul.f32 %v3719_v44, %v9675_v30  ;;  %v3668_v22 = vsub.f32 1.0, %v3667_v43  ;;  %v3621_v25 = vadd.f32 0.112945676, %v3620_v47  ;;  %v4108_v32 = vsub.f32 1.0, %v4107_v61  ;;  %v16087_v44 = vld [vmem:[#allocation60_spill] sm:$0xff] }
 0x1ab   :  { %v3675_v40 = vand.u32 2147483647, %v9792_v57  ;;  %v3677_v58 = vand.u32 2147483648, %v9792_v57  ;;  %v3580_v34 = vmul.f32 %v3579_v53, %v9385_v49  ;;  %vm3672_vm10 = vweird.f32 %v7819_v14 }
 0x1ac   :  { %v7702_v9 = vclamps-f32 %v3720_v21, 1.0  ;;  %v3669_v50 = vmul.f32 %v7819_v14, %v3668_v22  ;;  %v3622_v6 = vmul.f32 %v3621_v25, %v9244_v1  ;;  %7820 = vrcp.f32 %v9819_v28 }
 0x1ad   :  { %v4057_v0 = vadd.f32 0.001143296, %v4056_v8  ;;  %v4016_v30 = vmul.f32 3.8918573e-05, %v9826_v27  ;;  %vm3671_vm11 = vweird.f32 %v9792_v57  ;;  %v3581_v13 = vadd.f32 0.112945676, %v3580_v34  ;;  %v1368_v8 = vpop.f32.mrf.mxu0 }
 0x1ae   :  { %v7126_v61 = vadd.f32 1.0, %v7702_v9  ;;  %v3670_v47 = vadd.f32 %v7819_v14, %v3669_v50  ;;  %v3623_v3 = vadd.f32 0.4994258, %v3622_v6  ;;  %v3892_v43 = vadd.f32 0.18741608, %v3891_v23  ;;  %vm3673_vm12 = vmor %vm3671_vm11, %vm3672_vm10 }
 0x1af   :  { %v2527_v53 = vmul.f32 %v2526_v52, %v9775_v12  ;;  %v9839_v21 = vadd.f32 %v16087_v44, %v559_v60  ;;  %v3678_v22 = vor.u32 1.1754944e-38, %v3677_v58  ;;  %vm4111_vm13 = vweird.f32 %v9741_v15 }
 0x1b0   :  { %v4046_v25 = vadd.f32 0.00028619796, %v4045_v33  ;;  %v7254_v36 = vmul.f32 %v7126_v61, %v9548_v31  ;;  %v3674_v20 = vsel %vm3673_vm12, %v7819_v14, %v3670_v47  ;;  %vm3676_vm14 = vcmp.eq.f32.partialorder %v3675_v40, 8.507059e+37  ;;  %v16088_v14 = vld [vmem:[#allocation11_spill] sm:$0xff] }
 0x1b1   :  { %v4109_v57 = vmul.f32 %v9785_v59, %v4108_v32  ;;  %v3903_v9 = vadd.f32 0.4994258, %v3902_v5  ;;  %v3679_v34 = vsel %vm3676_vm14, %v3678_v22, %v3674_v20  ;;  %v3624_v23 = vmul.f32 %v3623_v3, %v9244_v1 }
 0x1b2   :  { %v4058_v52 = vmul.f32 %v4057_v0, %v9811_v26  ;;  %v4017_v60 = vadd.f32 0.001143296, %v4016_v30  ;;  %7397 = vmatpush.msrb.mxu3 %v7254_v36  ;;  %v3680_v58 = vmul.f32 %v3679_v34, %v9744_v62  ;;  %v3582_v50 = vmul.f32 %v3581_v13, %v9385_v49  ;;  %v9848_v33 = vpop.eup %7820 }
 0x1b3   :  { %v3934_v31 = vadd.f32 1.1283791, %v9795_v10  ;;  %v9852_v40 = vadd.f32 %v1368_v8, %v16088_v14  ;;  %v9855_v32 = vmul.f32 0.70710677, %v9839_v21  ;;  %v9857_v20 = vadd.f32 1.0, %v3624_v23 }
 0x1b4   :  { %vm4112_vm15 = vweird.f32 %v9785_v59  ;;  %v16089_v1 = vand.u32 2147483647, %v9741_v15  ;;  %v3893_v36 = vmul.f32 %v3892_v43, %v9681_v55  ;;  %v4047_v10 = vmul.f32 %v4046_v25, %v9811_v26 }
 0x1b5   :  { %v7701_v5 = vclamps-f32 %v3680_v58, 1.0  ;;  %v4110_v6 = vadd.f32 %v9785_v59, %v4109_v57  ;;  %v3904_v0 = vmul.f32 %v3903_v9, %v9681_v55  ;;  %v2528_v30 = vadd.f32 0.0036580483, %v2527_v53  ;;  %vm9886_vm2 = vmor %vm4111_vm13, %vm4112_vm15  ;;  %v564_v58 = vpop.permute.xlu2 %563 }
 0x1b6   :  { %vm9862_vm1 = vcmp.eq.f32.partialorder %v16089_v1, 8.507059e+37  ;;  %7822 = vrcp.f32 %v9857_v20  ;;  %v4059_v61 = vadd.f32 0.014752088, %v4058_v52  ;;  %v4018_v47 = vmul.f32 %v4017_v60, %v9826_v27 }
 0x1b7   :  { %v7125_v3 = vadd.f32 1.0, %v7701_v5  ;;  %v3583_v13 = vadd.f32 0.4994258, %v3582_v50  ;;  %v3947_v44 = vmul.f32 %v9848_v33, %v9819_v28  ;;  %v3957_v43 = vand.u32 2147483648, %v9819_v28 }
 0x1b8   :  { %v9876_v22 = vmul.f32 0.70710677, %v9852_v40  ;;  %v4163_v25 = vmul.f32 %v9855_v32, %v9855_v32  ;;  %v3894_v55 = vadd.f32 1.1283791, %v3893_v36  ;;  %v4048_v53 = vadd.f32 0.0036580483, %v4047_v10 }
 0x1b9   :  { %v4005_v8 = vmul.f32 2.1237322e-06, %v9826_v27  ;;  %v7253_v57 = vmul.f32 %v7125_v3, %v9560_v42  ;;  %v9891_v34 = vmul.f32 %v3934_v31, %v9601_v17  ;;  %v9893_v23 = vadd.f32 1.0, %v3904_v0 }
 0x1ba   :  { %v2529_v52 = vmul.f32 %v2528_v30, %v9775_v12  ;;  %v9897_v60 = vmul.f32 0.5, %v16086_v39  ;;  %v4114_v42 = vsel %vm9886_vm2, %v9785_v59, %v4110_v6  ;;  %v4060_v15 = vmul.f32 %v4059_v61, %v9811_v26 }
 0x1bb   :  { %v4019_v50 = vadd.f32 0.014752088, %v4018_v47  ;;  %7398 = vmatpush.msrb.mxu3 %v7253_v57  ;;  %v3584_v14 = vmul.f32 %v3583_v13, %v9385_v49  ;;  %v3948_v31 = vsub.f32 1.0, %v3947_v44  ;;  %v3955_v1 = vand.u32 2147483647, %v9819_v28 }
 0x1bc   :  { %16094 = vst [vmem:[#allocation42_spill] sm:$0xff] %v9897_v60  ;;  %v7823_v17 = vpop.eup %7822  ;;  %v2563_v36 = vmul.f32 %v9876_v22, %v9876_v22  ;;  %v9907_v39 = vmin.f32 %v4163_v25, 16.0  ;;  %v9909_v10 = vor.u32 1.1754944e-38, %v3957_v43  ;;  %v9912_v5 = vmul.f32 %v3894_v55, %v9645_v54  ;;  %v16095_v25 = vld [vmem:[#allocation50_spill] sm:$0xff]  ;;  %v1371_v60 = vpop.f32.mrf.mxu0 }
 0x1bd   :  { %v4049_v59 = vmul.f32 %v4048_v53, %v9811_v26  ;;  %v4006_v6 = vadd.f32 0.00028619796, %v4005_v8  ;;  %v4119_v49 = vsel %vm9862_vm1, %v9787_v24, %v4114_v42  ;;  %vm3952_vm3 = vweird.f32 %v9848_v33  ;;  %v16096_v8 = vld [vmem:[#allocation63_spill] sm:$0xff] }
 0x1be   :  { %v2530_v0 = vadd.f32 0.05243302, %v2529_v52  ;;  %v3627_v30 = vmul.f32 %v7823_v17, %v9857_v20  ;;  %vm3951_vm4 = vweird.f32 %v9819_v28  ;;  %7824 = vrcp.f32 %v9893_v23 }
 0x1bf   :  { %v4061_v61 = vadd.f32 0.112945676, %v4060_v15  ;;  %v4020_v54 = vmul.f32 %v4019_v50, %v9826_v27  ;;  %v9923_v47 = vadd.f32 1.0, %v3584_v14  ;;  %v3949_v3 = vmul.f32 %v9848_v33, %v3948_v31  ;;  %vm9965_vm10 = vmor %vm3951_vm4, %vm3952_vm3 }
 0x1c0   :  { %v9926_v13 = vmin.f32 %v2563_v36, 16.0  ;;  %v4176_v24 = vmul.f32 3.8918573e-05, %v9907_v39  ;;  %v3628_v62 = vsub.f32 1.0, %v3627_v30  ;;  %v4050_v44 = vadd.f32 0.05243302, %v4049_v59 }
 0x1c1   :  { %v4007_v43 = vmul.f32 %v4006_v6, %v9826_v27  ;;  %v9931_v55 = vmul.f32 0.70710677, %v16095_v25  ;;  %v3637_v53 = vand.u32 2147483648, %v9857_v20  ;;  %v9935_v57 = vadd.f32 %v16096_v8, %v564_v58  ;;  %v9949_v6 = vpop.permute.xlu2 %578 }
 0x1c2   :  { %v3629_v9 = vmul.f32 %v7823_v17, %v3628_v62  ;;  %vm3632_vm5 = vweird.f32 %v7823_v17  ;;  %v3635_v52 = vand.u32 2147483647, %v9857_v20  ;;  %v2531_v42 = vmul.f32 %v2530_v0, %v9775_v12 }
 0x1c3   :  { %v4062_v15 = vmul.f32 %v4061_v61, %v9811_v26  ;;  %v4021_v50 = vadd.f32 0.112945676, %v4020_v54  ;;  %7826 = vrcp.f32 %v9923_v47  ;;  %vm9941_vm6 = vcmp.eq.f32.partialorder %v3955_v1, 8.507059e+37 }
 0x1c4   :  { %v2565_v31 = vmul.f32 2.1237322e-06, %v9926_v13  ;;  %v4177_v36 = vadd.f32 0.001143296, %v4176_v24  ;;  %v3630_v58 = vadd.f32 %v7823_v17, %v3629_v9  ;;  %vm3631_vm7 = vweird.f32 %v9857_v20  ;;  %v9947_v59 = vpop.eup %7824  ;;  %v1374_v41 = vpop.f32.mrf.mxu0 }
 0x1c5   :  { %v3950_v0 = vadd.f32 %v9848_v33, %v3949_v3  ;;  %v4051_v30 = vmul.f32 %v4050_v44, %v9811_v26  ;;  %v4123_v1 = vmul.f32 %v9931_v55, %v9931_v55  ;;  %vm3633_vm8 = vmor %vm3631_vm7, %vm3632_vm5  ;;  %v3638_v61 = vor.u32 1.1754944e-38, %v3637_v53 }
 0x1c6   :  { %v4008_v54 = vadd.f32 0.0036580483, %v4007_v43  ;;  %v9957_v24 = vmul.f32 0.70710677, %v9935_v57  ;;  %v3634_v62 = vsel %vm3633_vm8, %v7823_v17, %v3630_v58  ;;  %vm3636_vm9 = vcmp.eq.f32.partialorder %v3635_v52, 8.507059e+37 }
 0x1c7   :  { %v3917_v20 = vand.u32 2147483648, %v9893_v23  ;;  %v4063_v8 = vadd.f32 0.4994258, %v4062_v15  ;;  %v4022_v9 = vmul.f32 %v4021_v50, %v9826_v27  ;;  %v3639_v3 = vsel %vm3636_vm9, %v3638_v61, %v3634_v62 }
 0x1c8   :  { %v2532_v43 = vadd.f32 0.18741608, %v2531_v42  ;;  %v2566_v53 = vadd.f32 0.00028619796, %v2565_v31  ;;  %v4178_v45 = vmul.f32 %v4177_v36, %v9907_v39  ;;  %v3640_v17 = vmul.f32 %v3639_v3, %v9531_v29 }
 0x1c9   :  { %v9971_v52 = vpop.eup %7826  ;;  %v9974_v15 = vmul.f32 %v4119_v49, %v9762_v2  ;;  %v3954_v50 = vsel %vm9965_vm10, %v9848_v33, %v3950_v0  ;;  %v3907_v28 = vmul.f32 %v9947_v59, %v9893_v23  ;;  %v9981_v58 = vmin.f32 %v4123_v1, 16.0 }
 0x1ca   :  { %v4052_v42 = vadd.f32 0.18741608, %v4051_v30  ;;  %v4009_v31 = vmul.f32 %v4008_v54, %v9826_v27  ;;  %v4203_v29 = vmul.f32 %v9957_v24, %v9957_v24  ;;  %v7700_v36 = vclamps-f32 %v3640_v17, 1.0 }
 0x1cb   :  { %16101 = vst [vmem:[#allocation26_spill] sm:$0xff] %v9974_v15  ;;  %v3915_v61 = vand.u32 2147483647, %v9893_v23  ;;  %v9987_v2 = vor.u32 1.1754944e-38, %v3917_v20  ;;  %v4064_v49 = vmul.f32 %v4063_v8, %v9811_v26  ;;  %v4023_v62 = vadd.f32 0.4994258, %v4022_v9 }
 0x1cc   :  { %v2533_v33 = vmul.f32 %v2532_v43, %v9775_v12  ;;  %v2567_v0 = vmul.f32 %v2566_v53, %v9926_v13  ;;  %v4179_v1 = vadd.f32 0.014752088, %v4178_v45  ;;  %v3587_v30 = vmul.f32 %v9971_v52, %v9923_v47  ;;  %v10003_v45 = vpop.permute.xlu2 %593 }
 0x1cd   :  { %v3959_v54 = vsel %vm9941_vm6, %v9909_v10, %v3954_v50  ;;  %v4136_v3 = vmul.f32 3.8918573e-05, %v9981_v58  ;;  %v7124_v44 = vadd.f32 1.0, %v7700_v36  ;;  %v2576_v20 = vmul.f32 3.8918573e-05, %v9926_v13 }
 0x1ce   :  { %v3908_v17 = vsub.f32 1.0, %v3907_v28  ;;  %v4053_v8 = vmul.f32 %v4052_v42, %v9811_v26  ;;  %v4010_v9 = vadd.f32 0.05243302, %v4009_v31  ;;  %v10000_v43 = vmin.f32 %v4203_v29, 16.0 }
 0x1cf   :  { %vm3912_vm11 = vweird.f32 %v9947_v59  ;;  %v10005_v53 = vadd.f32 1.0, %v4064_v49  ;;  %v4024_v14 = vmul.f32 %v4023_v62, %v9826_v27  ;;  %v7252_v10 = vmul.f32 %v7124_v44, %v9416_v19 }
 0x1d0   :  { %v2568_v50 = vadd.f32 0.0036580483, %v2567_v0  ;;  %v4165_v36 = vmul.f32 2.1237322e-06, %v9907_v39  ;;  %v4180_v28 = vmul.f32 %v4179_v1, %v9907_v39  ;;  %v3588_v26 = vsub.f32 1.0, %v3587_v30  ;;  %v16103_v1 = vld [vmem:[#allocation10_spill] sm:$0xff] }
 0x1d1   :  { %v10012_v42 = vmul.f32 %v3959_v54, %v9891_v34  ;;  %vm3911_vm12 = vweird.f32 %v9893_v23  ;;  %v2534_v31 = vadd.f32 1.1283791, %v2533_v33  ;;  %v4137_v29 = vadd.f32 0.001143296, %v4136_v3  ;;  %7399 = vmatpush.msrb.mxu3 %v7252_v10 }
 0x1d2   :  { %v2577_v49 = vadd.f32 0.001143296, %v2576_v20  ;;  %v3909_v62 = vmul.f32 %v9947_v59, %v3908_v17  ;;  %v4054_v38 = vadd.f32 1.1283791, %v4053_v8  ;;  %v4011_v19 = vmul.f32 %v4010_v9, %v9826_v27  ;;  %vm10059_vm2 = vmor %vm3911_vm12, %vm3912_vm11 }
 0x1d3   :  { %16102 = vst [vmem:[#allocation5_spill] sm:$0xff] %v10012_v42  ;;  %v4216_v0 = vmul.f32 3.8918573e-05, %v10000_v43  ;;  %7828 = vrcp.f32 %v10005_v53  ;;  %v10020_v30 = vadd.f32 %v1371_v60, %v16103_v1  ;;  %v3589_v34 = vmul.f32 %v9971_v52, %v3588_v26 }
 0x1d4   :  { %v2578_v54 = vmul.f32 %v2577_v49, %v9926_v13  ;;  %v10024_v33 = vadd.f32 1.0, %v4024_v14  ;;  %v2569_v3 = vmul.f32 %v2568_v50, %v9926_v13  ;;  %v4166_v44 = vadd.f32 0.00028619796, %v4165_v36 }
 0x1d5   :  { %v4181_v20 = vadd.f32 0.112945676, %v4180_v28  ;;  %vm10027_vm13 = vcmp.eq.f32.partialorder %v3915_v61, 8.507059e+37  ;;  %v4138_v8 = vmul.f32 %v4137_v29, %v9981_v58  ;;  %v3590_v9 = vadd.f32 %v9971_v52, %v3589_v34 }
 0x1d6   :  { %vm3592_vm14 = vweird.f32 %v9971_v52  ;;  %v3597_v60 = vand.u32 2147483648, %v9923_v47  ;;  %v10036_v10 = vmul.f32 %v2534_v31, %v9727_v37  ;;  %v4217_v14 = vadd.f32 0.001143296, %v4216_v0  ;;  %v10051_v0 = vpop.permute.xlu2 %608 }
 0x1d7   :  { %v3595_v50 = vand.u32 2147483647, %v9923_v47  ;;  %v2579_v36 = vadd.f32 0.014752088, %v2578_v54  ;;  %v3910_v61 = vadd.f32 %v9947_v59, %v3909_v62  ;;  %v10041_v28 = vmul.f32 0.5, %v9839_v21  ;;  %16107 = vst [vmem:[#allocation45_spill] sm:$0xff] %v10051_v0 }
 0x1d8   :  { %v10044_v26 = vmul.f32 0.70710677, %v10020_v30  ;;  %vm3591_vm15 = vweird.f32 %v9923_v47  ;;  %v4012_v29 = vadd.f32 0.18741608, %v4011_v19  ;;  %7830 = vrcp.f32 %v10024_v33 }
 0x1d9   :  { %16106 = vst [vmem:[#allocation43_spill] sm:$0xff] %v10041_v28  ;;  %v2570_v49 = vadd.f32 0.05243302, %v2569_v3  ;;  %v4167_v37 = vmul.f32 %v4166_v44, %v9907_v39  ;;  %vm3593_vm1 = vmor %vm3591_vm15, %vm3592_vm14  ;;  %v10049_v31 = vpop.eup %7828  ;;  %v4139_v62 = vadd.f32 0.014752088, %v4138_v8  ;;  %v3598_v1 = vor.u32 1.1754944e-38, %v3597_v60 }
 0x1da   :  { %v3594_v21 = vsel %vm3593_vm1, %v9971_v52, %v3590_v9  ;;  %v2580_v34 = vmul.f32 %v2579_v36, %v9926_v13  ;;  %v4182_v19 = vmul.f32 %v4181_v20, %v9907_v39  ;;  %v4125_v54 = vmul.f32 2.1237322e-06, %v9981_v58 }
 0x1db   :  { %v4218_v3 = vmul.f32 %v4217_v14, %v10000_v43  ;;  %vm3596_vm3 = vcmp.eq.f32.partialorder %v3595_v50, 8.507059e+37  ;;  %v3914_v52 = vsel %vm10059_vm2, %v9947_v59, %v3910_v61  ;;  %v2603_v44 = vmul.f32 %v10044_v26, %v10044_v26  ;;  %v62_v50 = vld [vmem:[%s15813_s1 + $0x128] sm:$0xff]  ;;  %v255_v59 = vld [vmem:[%s15814_s2 + $0x330] sm:$0xff] }
 0x1dc   :  { %v3599_v8 = vsel %vm3596_vm3, %v3598_v1, %v3594_v21  ;;  %v2581_v23 = vadd.f32 0.112945676, %v2580_v34  ;;  %v10072_v9 = vmul.f32 %v4054_v38, %v9781_v18  ;;  %v4067_v20 = vmul.f32 %v10049_v31, %v10005_v53  ;;  %7568 = vmatmul.msk.f32.gmra.mxu0 %vm921_vm0, %v62_v50  ;;  %793 = vperm.xlu2 %7803, %v255_v59   ;;  %v270_v18 = vld [vmem:[%s15814_s2 + $0x3a8] sm:$0xff] }
 0x1dd   :  { %v4013_v60 = vmul.f32 %v4012_v29, %v9826_v27  ;;  %v2571_v14 = vmul.f32 %v2570_v49, %v9926_v13  ;;  %v4168_v36 = vadd.f32 0.0036580483, %v4167_v37  ;;  %v4140_v61 = vmul.f32 %v4139_v62, %v9981_v58  ;;  %v256_v27 = vld [vmem:[%s15814_s2 + $0x338] sm:$0xff]  ;;  %868 = vperm.xlu1 %7802, %v270_v18  }
 0x1de   :  { %v3600_v38 = vmul.f32 %v3599_v8, %v9606_v56  ;;  %v2582_v29 = vmul.f32 %v2581_v23, %v9926_v13  ;;  %v10094_v49 = vpop.eup %7830  ;;  %v3919_v37 = vsel %vm10027_vm13, %v9987_v2, %v3914_v52  ;;  %v4183_v56 = vadd.f32 0.4994258, %v4182_v19  ;;  %798 = vperm.xlu0 %7801, %v256_v27  }
 0x1df   :  { %v4126_v62 = vadd.f32 0.00028619796, %v4125_v54  ;;  %v4219_v21 = vadd.f32 0.014752088, %v4218_v3  ;;  %v10100_v34 = vmin.f32 %v2603_v44, 16.0  ;;  %v4068_v50 = vsub.f32 1.0, %v4067_v20 }
 0x1e0   :  { %v7699_v47 = vclamps-f32 %v3600_v38, 1.0  ;;  %v2583_v8 = vadd.f32 0.4994258, %v2582_v29  ;;  %v4077_v23 = vand.u32 2147483648, %v10005_v53  ;;  %v4014_v59 = vadd.f32 1.1283791, %v4013_v60 }
 0x1e1   :  { %16110 = vst [vmem:[#allocation60_spill] sm:$0xff] %v10100_v34  ;;  %v2572_v42 = vadd.f32 0.18741608, %v2571_v14  ;;  %v4027_v2 = vmul.f32 %v10094_v49, %v10024_v33  ;;  %v4141_v17 = vadd.f32 0.112945676, %v4140_v61  ;;  %vm4071_vm4 = vweird.f32 %v10005_v53  ;;  %v10112_v14 = vpop.permute.xlu2 %623  ;;  %v16112_v38 = vld [vmem:[#allocation6_spill] sm:$0xff] }
 0x1e2   :  { %v7123_v19 = vadd.f32 1.0, %v7699_v47  ;;  %v2584_v54 = vmul.f32 %v2583_v8, %v9926_v13  ;;  %v4169_v3 = vmul.f32 %v4168_v36, %v9907_v39  ;;  %v4184_v52 = vmul.f32 %v4183_v56, %v9907_v39  ;;  %16111 = vst [vmem:[#allocation11_spill] sm:$0xff] %v10112_v14 }
 0x1e3   :  { %v4127_v44 = vmul.f32 %v4126_v62, %v9981_v58  ;;  %v4220_v20 = vmul.f32 %v4219_v21, %v10000_v43  ;;  %v2605_v60 = vmul.f32 2.1237322e-06, %v10100_v34  ;;  %v10115_v18 = vadd.f32 %v1374_v41, %v16112_v38  ;;  %v10129_v21 = vpop.f32.mrf.mxu2 }
 0x1e4   :  { %v7251_v61 = vmul.f32 %v7123_v19, %v9509_v63  ;;  %v10118_v27 = vadd.f32 1.0, %v2584_v54  ;;  %v10121_v29 = vmul.f32 %v3919_v37, %v9912_v5  ;;  %v4069_v36 = vmul.f32 %v10049_v31, %v4068_v50 }
 0x1e5   :  { %v10124_v56 = vor.u32 1.1754944e-38, %v4077_v23  ;;  %v10127_v62 = vmul.f32 0.5, %v16095_v25  ;;  %v4028_v47 = vsub.f32 1.0, %v4027_v2  ;;  %v4142_v41 = vmul.f32 %v4141_v17, %v9981_v58 }
 0x1e6   :  { %16113 = vst [vmem:[#allocation50_spill] sm:$0xff] %v10121_v29  ;;  %v10133_v8 = vmul.f32 0.5, %v10020_v30  ;;  %7400 = vmatpush.msrb.mxu3 %v7251_v61  ;;  %7832 = vrcp.f32 %v10118_v27  ;;  %v2573_v63 = vmul.f32 %v2572_v42, %v9926_v13  ;;  %v4170_v5 = vadd.f32 0.05243302, %v4169_v3 }
 0x1e7   :  { %16114 = vst [vmem:[#allocation63_spill] sm:$0xff] %v10127_v62  ;;  %v10137_v37 = vadd.f32 1.0, %v4184_v52  ;;  %v4221_v50 = vadd.f32 0.112945676, %v4220_v20  ;;  %v10140_v25 = vmul.f32 %v4014_v59, %v9803_v7  ;;  %v4128_v23 = vadd.f32 0.0036580483, %v4127_v44 }
 0x1e8   :  { %16115 = vst [vmem:[#allocation10_spill] sm:$0xff] %v10133_v8  ;;  %v2606_v19 = vadd.f32 0.00028619796, %v2605_v60  ;;  %v10143_v2 = vmul.f32 0.70710677, %v10115_v18  ;;  %v10146_v30 = vadd.f32 %v10049_v31, %v4069_v36  ;;  %vm4072_vm5 = vweird.f32 %v10049_v31  ;;  %v16116_v59 = vld [vmem:[#allocation66_spill] sm:$0xff] }
 0x1e9   :  { %vm4031_vm6 = vweird.f32 %v10024_v33  ;;  %v4037_v13 = vand.u32 2147483648, %v10024_v33  ;;  %v4029_v42 = vmul.f32 %v10094_v49, %v4028_v47  ;;  %v4143_v17 = vadd.f32 0.4994258, %v4142_v41  ;;  %vm10161_vm7 = vmor %vm4071_vm4, %vm4072_vm5  ;;  %v639_v8 = vpop.permute.xlu2 %638 }
 0x1ea   :  { %v4205_v7 = vmul.f32 2.1237322e-06, %v10000_v43  ;;  %v10154_v54 = vmul.f32 0.70710677, %v16116_v59  ;;  %v2574_v3 = vadd.f32 1.1283791, %v2573_v63  ;;  %v4171_v52 = vmul.f32 %v4170_v5, %v9907_v39 }
 0x1eb   :  { %7834 = vrcp.f32 %v10137_v37  ;;  %v4222_v44 = vmul.f32 %v4221_v50, %v10000_v43  ;;  %v4035_v38 = vand.u32 2147483647, %v10024_v33  ;;  %v4129_v61 = vmul.f32 %v4128_v23, %v9981_v58  ;;  %v1536_v62 = vpop.f32.mrf.mxu2 }
 0x1ec   :  { %v7833_v20 = vpop.eup %7832  ;;  %v2607_v36 = vmul.f32 %v2606_v19, %v10100_v34  ;;  %v2643_v47 = vmul.f32 %v10143_v2, %v10143_v2  ;;  %v4074_v41 = vsel %vm10161_vm7, %v10049_v31, %v10146_v30  ;;  %vm4032_vm8 = vweird.f32 %v10094_v49 }
 0x1ed   :  { %v4038_v63 = vor.u32 1.1754944e-38, %v4037_v13  ;;  %v2587_v5 = vmul.f32 %v7833_v20, %v10118_v27  ;;  %v4030_v50 = vadd.f32 %v10094_v49, %v4029_v42  ;;  %v4144_v1 = vmul.f32 %v4143_v17, %v9981_v58  ;;  %vm10196_vm10 = vmor %vm4031_vm6, %vm4032_vm8 }
 0x1ee   :  { %v4206_v23 = vadd.f32 0.00028619796, %v4205_v7  ;;  %v4243_v19 = vmul.f32 %v10154_v54, %v10154_v54  ;;  %v16119_v29 = vand.u32 2147483647, %v10005_v53  ;;  %v2575_v31 = vmul.f32 %v2574_v3, %v9876_v22 }
 0x1ef   :  { %v4172_v30 = vadd.f32 0.18741608, %v4171_v52  ;;  %v4223_v13 = vadd.f32 0.4994258, %v4222_v44  ;;  %v2588_v60 = vsub.f32 1.0, %v2587_v5  ;;  %v10187_v17 = vmin.f32 %v2643_v47, 16.0 }
 0x1f0   :  { %vm10182_vm9 = vcmp.eq.f32.partialorder %v16119_v29, 8.507059e+37  ;;  %v4130_v42 = vadd.f32 0.05243302, %v4129_v61  ;;  %v2608_v28 = vadd.f32 0.0036580483, %v2607_v36  ;;  %v2597_v7 = vand.u32 2147483648, %v10118_v27 }
 0x1f1   :  { %16122 = vst [vmem:[#allocation6_spill] sm:$0xff] %v10187_v17  ;;  %v10190_v14 = vpop.eup %7834  ;;  %v10200_v22 = vadd.f32 %v1536_v62, %v639_v8  ;;  %v2589_v29 = vmul.f32 %v7833_v20, %v2588_v60  ;;  %vm2592_vm11 = vweird.f32 %v7833_v20  ;;  %v2595_v3 = vand.u32 2147483647, %v10118_v27 }
 0x1f2   :  { %v4034_v52 = vsel %vm10196_vm10, %v10094_v49, %v4030_v50  ;;  %v10206_v44 = vadd.f32 1.0, %v4144_v1  ;;  %v4207_v61 = vmul.f32 %v4206_v23, %v10000_v43  ;;  %v10209_v36 = vmin.f32 %v4243_v19, 16.0 }
 0x1f3   :  { %v4224_v33 = vmul.f32 %v4223_v13, %v10000_v43  ;;  %v2590_v47 = vadd.f32 %v7833_v20, %v2589_v29  ;;  %vm2591_vm12 = vweird.f32 %v10118_v27  ;;  %v2536_v62 = vmul.f32 3.8918573e-05, %v9775_v12 }
 0x1f4   :  { %v4187_v8 = vmul.f32 %v10190_v14, %v10137_v37  ;;  %v4131_v5 = vmul.f32 %v4130_v42, %v9981_v58  ;;  %v2609_v49 = vmul.f32 %v2608_v28, %v10100_v34  ;;  %vm2593_vm13 = vmor %vm2591_vm12, %vm2592_vm11  ;;  %v2598_v1 = vor.u32 1.1754944e-38, %v2597_v7 }
 0x1f5   :  { %v2645_v50 = vmul.f32 2.1237322e-06, %v10187_v17  ;;  %v10220_v23 = vmul.f32 0.70710677, %v10200_v22  ;;  %v2594_v19 = vsel %vm2593_vm13, %v7833_v20, %v2590_v47  ;;  %vm2596_vm14 = vcmp.eq.f32.partialorder %v2595_v3, 8.507059e+37 }
 0x1f6   :  { %7836 = vrcp.f32 %v10206_v44  ;;  %v4208_v27 = vadd.f32 0.0036580483, %v4207_v61  ;;  %v4245_v13 = vmul.f32 2.1237322e-06, %v10209_v36  ;;  %v2599_v60 = vsel %vm2596_vm14, %v2598_v1, %v2594_v19 }
 0x1f7   :  { %vm4036_vm15 = vcmp.eq.f32.partialorder %v4035_v38, 8.507059e+37  ;;  %v10224_v53 = vadd.f32 1.0, %v4224_v33  ;;  %v2600_v42 = vmul.f32 %v2599_v60, %v2575_v31  ;;  %v2537_v28 = vadd.f32 0.001143296, %v2536_v62 }
 0x1f8   :  { %v4079_v7 = vsel %vm10182_vm9, %v10124_v56, %v4074_v41  ;;  %v4039_v29 = vsel %vm4036_vm15, %v4038_v63, %v4034_v52  ;;  %v4173_v0 = vmul.f32 %v4172_v30, %v9907_v39  ;;  %v4256_v20 = vmul.f32 3.8918573e-05, %v10209_v36 }
 0x1f9   :  { %v2610_v3 = vadd.f32 0.05243302, %v2609_v49  ;;  %v2646_v47 = vadd.f32 0.00028619796, %v2645_v50  ;;  %v4803_v61 = vmul.f32 %v10220_v23, %v10220_v23  ;;  %v7674_v1 = vclamps-f32 %v2600_v42, 1.0  ;;  %v16128_v42 = vld [vmem:[#allocation14_spill] sm:$0xff] }
 0x1fa   :  { %v4188_v38 = vsub.f32 1.0, %v4187_v8  ;;  %v4132_v33 = vadd.f32 0.18741608, %v4131_v5  ;;  %v4209_v31 = vmul.f32 %v4208_v27, %v10000_v43  ;;  %v4246_v62 = vadd.f32 0.00028619796, %v4245_v13  ;;  %v1377_v5 = vpop.f32.mrf.mxu0 }
 0x1fb   :  { %7838 = vrcp.f32 %v10224_v53  ;;  %v1722_v15 = vmul.f32 0.5, %v9852_v40  ;;  %v7098_v56 = vadd.f32 1.0, %v7674_v1  ;;  %v2538_v39 = vmul.f32 %v2537_v28, %v9775_v12 }
 0x1fc   :  { %v10237_v41 = vpop.eup %7836  ;;  %v10240_v63 = vmul.f32 %v4079_v7, %v10072_v9  ;;  %v4174_v30 = vadd.f32 1.1283791, %v4173_v0  ;;  %v10243_v52 = vmul.f32 0.5, %v9935_v57  ;;  %v4257_v8 = vadd.f32 0.001143296, %v4256_v20 }
 0x1fd   :  { %v2611_v49 = vmul.f32 %v2610_v3, %v10100_v34  ;;  %v2647_v50 = vmul.f32 %v2646_v47, %v10187_v17  ;;  %v10247_v19 = vmin.f32 %v4803_v61, 16.0  ;;  %v7226_v40 = vmul.f32 %v7098_v56, %v1722_v15 }
 0x1fe   :  { %16125 = vst [vmem:[#allocation66_spill] sm:$0xff] %v10240_v63  ;;  %v10250_v27 = vmul.f32 %v4039_v29, %v10140_v25  ;;  %v4189_v13 = vmul.f32 %v10190_v14, %v4188_v38  ;;  %v4133_v9 = vmul.f32 %v4132_v33, %v9981_v58  ;;  %v4247_v0 = vmul.f32 %v4246_v62, %v10209_v36 }
 0x1ff   :  { %16126 = vst [vmem:[#allocation92_spill] sm:$0xff] %v10243_v52  ;;  %v4147_v57 = vmul.f32 %v10237_v41, %v10206_v44  ;;  %v4210_v60 = vadd.f32 0.05243302, %v4209_v31  ;;  %v10258_v28 = vadd.f32 %v1377_v5, %v16128_v42  ;;  %7353 = vmatpush.msrb.mxu1 %v7226_v40  ;;  %v2539_v7 = vadd.f32 0.014752088, %v2538_v39  ;;  %v10270_v31 = vpop.f32.mrf.mxu2 }
 0x200   :  { %16127 = vst [vmem:[#allocation93_spill] sm:$0xff] %v10250_v27  ;;  %v4175_v20 = vmul.f32 %v4174_v30, %v9855_v32  ;;  %v4195_v25 = vand.u32 2147483647, %v10137_v37  ;;  %v4197_v29 = vand.u32 2147483648, %v10137_v37  ;;  %v4258_v3 = vmul.f32 %v4257_v8, %v10209_v36 }
 0x201   :  { %v10264_v58 = vpop.eup %7838  ;;  %vm4191_vm1 = vweird.f32 %v10137_v37  ;;  %v2612_v47 = vadd.f32 0.18741608, %v2611_v49  ;;  %v2648_v61 = vadd.f32 0.0036580483, %v2647_v50  ;;  %v4805_v1 = vmul.f32 2.1237322e-06, %v10247_v19  ;;  %v1497_v50 = vpop.f32.mrf.mxu1 }
 0x202   :  { %v4190_v38 = vadd.f32 %v10190_v14, %v4189_v13  ;;  %vm4192_vm2 = vweird.f32 %v10190_v14  ;;  %v4134_v33 = vadd.f32 1.1283791, %v4133_v9  ;;  %v4248_v32 = vadd.f32 0.0036580483, %v4247_v0 }
 0x203   :  { %v4148_v62 = vsub.f32 1.0, %v4147_v57  ;;  %v4211_v15 = vmul.f32 %v4210_v60, %v10000_v43  ;;  %v10274_v56 = vmul.f32 0.70710677, %v10258_v28  ;;  %v2540_v39 = vmul.f32 %v2539_v7, %v9775_v12  ;;  %vm10285_vm4 = vmor %vm4191_vm1, %vm4192_vm2 }
 0x204   :  { %vm10277_vm3 = vcmp.eq.f32.partialorder %v4195_v25, 8.507059e+37  ;;  %v4198_v8 = vor.u32 1.1754944e-38, %v4197_v29  ;;  %v4227_v5 = vmul.f32 %v10264_v58, %v10224_v53  ;;  %v4259_v49 = vadd.f32 0.014752088, %v4258_v3 }
 0x205   :  { %v2613_v40 = vmul.f32 %v2612_v47, %v10100_v34  ;;  %v2649_v13 = vmul.f32 %v2648_v61, %v10187_v17  ;;  %v4806_v9 = vadd.f32 0.00028619796, %v4805_v1  ;;  %v4816_v0 = vmul.f32 3.8918573e-05, %v10247_v19 }
 0x206   :  { %v4194_v57 = vsel %vm10285_vm4, %v10190_v14, %v4190_v38  ;;  %v10296_v60 = vmul.f32 %v4134_v33, %v9931_v55  ;;  %v4155_v37 = vand.u32 2147483647, %v10206_v44  ;;  %v4249_v42 = vmul.f32 %v4248_v32, %v10209_v36 }
 0x207   :  { %v4149_v7 = vmul.f32 %v10237_v41, %v4148_v62  ;;  %v4212_v25 = vadd.f32 0.18741608, %v4211_v15  ;;  %v2683_v29 = vmul.f32 %v10274_v56, %v10274_v56  ;;  %v2541_v3 = vadd.f32 0.112945676, %v2540_v39 }
 0x208   :  { %vm4151_vm5 = vweird.f32 %v10206_v44  ;;  %v4157_v47 = vand.u32 2147483648, %v10206_v44  ;;  %v4228_v61 = vsub.f32 1.0, %v4227_v5  ;;  %v4260_v14 = vmul.f32 %v4259_v49, %v10209_v36 }
 0x209   :  { %v2614_v55 = vadd.f32 1.1283791, %v2613_v40  ;;  %v2650_v1 = vadd.f32 0.05243302, %v2649_v13  ;;  %v4807_v38 = vmul.f32 %v4806_v9, %v10247_v19  ;;  %v4817_v33 = vadd.f32 0.001143296, %v4816_v0  ;;  %v10321_v0 = vpop.f32.mrf.mxu2 }
 0x20a   :  { %v4199_v32 = vsel %vm10277_vm3, %v4198_v8, %v4194_v57  ;;  %vm4152_vm6 = vweird.f32 %v10237_v41  ;;  %vm10310_vm7 = vcmp.eq.f32.partialorder %v4155_v37, 8.507059e+37  ;;  %v4250_v15 = vadd.f32 0.05243302, %v4249_v42  ;;  %v574_v37 = vpop.permute.xlu1 %573 }
 0x20b   :  { %v4150_v39 = vadd.f32 %v10237_v41, %v4149_v7  ;;  %v4213_v5 = vmul.f32 %v4212_v25, %v10000_v43  ;;  %v10316_v49 = vmin.f32 %v2683_v29, 16.0  ;;  %v2542_v40 = vmul.f32 %v2541_v3, %v9775_v12  ;;  %vm10334_vm8 = vmor %vm4151_vm5, %vm4152_vm6  ;;  %v654_v29 = vpop.permute.xlu2 %653 }
 0x20c   :  { %v4158_v13 = vor.u32 1.1754944e-38, %v4157_v47  ;;  %v4229_v30 = vmul.f32 %v10264_v58, %v4228_v61  ;;  %v4261_v8 = vadd.f32 0.112945676, %v4260_v14  ;;  %v2496_v9 = vmul.f32 3.8918573e-05, %v9564_v46 }
 0x20d   :  { %16135 = vst [vmem:[#allocation14_spill] sm:$0xff] %v10316_v49  ;;  %v10324_v57 = vmul.f32 %v2614_v55, %v10044_v26  ;;  %v2651_v42 = vmul.f32 %v2650_v1, %v10187_v17  ;;  %v4808_v43 = vadd.f32 0.0036580483, %v4807_v38  ;;  %v4818_v7 = vmul.f32 %v4817_v33, %v10247_v19 }
 0x20e   :  { %v10328_v25 = vmul.f32 %v4199_v32, %v4175_v20  ;;  %v10339_v3 = vmul.f32 0.5, %v10115_v18  ;;  %v4251_v26 = vmul.f32 %v4250_v15, %v10209_v36  ;;  %v1498_v47 = vadd.f32 %v1497_v50, %v574_v37 }
 0x20f   :  { %16136 = vst [vmem:[#allocation94_spill] sm:$0xff] %v10324_v57  ;;  %v4154_v61 = vsel %vm10334_vm8, %v10237_v41, %v4150_v39  ;;  %v4214_v20 = vadd.f32 1.1283791, %v4213_v5  ;;  %v2685_v14 = vmul.f32 2.1237322e-06, %v10316_v49  ;;  %v4230_v44 = vadd.f32 %v10264_v58, %v4229_v30 }
 0x210   :  { %16137 = vst [vmem:[#allocation95_spill] sm:$0xff] %v10328_v25  ;;  %v2543_v55 = vadd.f32 0.4994258, %v2542_v40  ;;  %vm4232_vm9 = vweird.f32 %v10264_v58  ;;  %v4262_v1 = vmul.f32 %v4261_v8, %v10209_v36  ;;  %v2497_v38 = vadd.f32 0.001143296, %v2496_v9 }
 0x211   :  { %16140 = vst [vmem:[#allocation96_spill] sm:$0xff] %v10339_v3  ;;  %v2652_v18 = vadd.f32 0.18741608, %v2651_v42  ;;  %v10350_v33 = vmul.f32 0.5, %v16116_v59  ;;  %v4809_v32 = vmul.f32 %v4808_v43, %v10247_v19  ;;  %v4819_v15 = vadd.f32 0.014752088, %v4818_v7 }
 0x212   :  { %v4159_v41 = vsel %vm10310_vm7, %v4158_v13, %v4154_v61  ;;  %vm4231_vm10 = vweird.f32 %v10224_v53  ;;  %v4252_v39 = vadd.f32 0.18741608, %v4251_v26  ;;  %v10356_v5 = vmul.f32 0.70710677, %v1498_v47 }
 0x213   :  { %16141 = vst [vmem:[#allocation97_spill] sm:$0xff] %v10350_v33  ;;  %vm10358_vm11 = vmor %vm4231_vm10, %vm4232_vm9  ;;  %v4235_v40 = vand.u32 2147483647, %v10224_v53  ;;  %v4237_v59 = vand.u32 2147483648, %v10224_v53  ;;  %v2686_v30 = vadd.f32 0.00028619796, %v2685_v14  ;;  %v2544_v8 = vmul.f32 %v2543_v55, %v9775_v12  ;;  %v1545_v14 = vpop.f32.mrf.mxu2 }
 0x214   :  { %v4234_v62 = vsel %vm10358_vm11, %v10264_v58, %v4230_v44  ;;  %v4263_v13 = vadd.f32 0.4994258, %v4262_v1  ;;  %v2498_v9 = vmul.f32 %v2497_v38, %v9564_v46  ;;  %v2456_v37 = vmul.f32 3.8918573e-05, %v9522_v4 }
 0x215   :  { %v2653_v42 = vmul.f32 %v2652_v18, %v10187_v17  ;;  %v4810_v43 = vadd.f32 0.05243302, %v4809_v32  ;;  %v4820_v7 = vmul.f32 %v4819_v15, %v10247_v19  ;;  %v10372_v26 = vadd.f32 1.0, %v2544_v8 }
 0x216   :  { %v4253_v53 = vmul.f32 %v4252_v39, %v10209_v36  ;;  %v4283_v12 = vmul.f32 %v10356_v5, %v10356_v5  ;;  %v2499_v61 = vadd.f32 0.014752088, %v2498_v9  ;;  %v2457_v58 = vadd.f32 0.001143296, %v2456_v37 }
 0x217   :  { %v10378_v55 = vmul.f32 %v4159_v41, %v10296_v60  ;;  %v4215_v44 = vmul.f32 %v4214_v20, %v9957_v24  ;;  %v4238_v1 = vor.u32 1.1754944e-38, %v4237_v59  ;;  %v2687_v38 = vmul.f32 %v2686_v30, %v10316_v49 }
 0x218   :  { %vm4236_vm12 = vcmp.eq.f32.partialorder %v4235_v40, 8.507059e+37  ;;  %v4264_v18 = vmul.f32 %v4263_v13, %v10209_v36  ;;  %v1546_v32 = vadd.f32 %v1545_v14, %v654_v29  ;;  %7840 = vrcp.f32 %v10372_v26 }
 0x219   :  { %16144 = vst [vmem:[#allocation98_spill] sm:$0xff] %v10378_v55  ;;  %v4239_v15 = vsel %vm4236_vm12, %v4238_v1, %v4234_v62  ;;  %v2654_v39 = vadd.f32 1.1283791, %v2653_v42  ;;  %v4811_v50 = vmul.f32 %v4810_v43, %v10247_v19  ;;  %v4821_v8 = vadd.f32 0.112945676, %v4820_v7 }
 0x21a   :  { %v4254_v9 = vadd.f32 1.1283791, %v4253_v53  ;;  %v10385_v37 = vmin.f32 %v4283_v12, 16.0  ;;  %v2500_v60 = vmul.f32 %v2499_v61, %v9564_v46  ;;  %v2458_v24 = vmul.f32 %v2457_v58, %v9522_v4 }
 0x21b   :  { %v10390_v20 = vmul.f32 0.5, %v10200_v22  ;;  %v10393_v36 = vmul.f32 0.5, %v10258_v28  ;;  %v2688_v41 = vadd.f32 0.0036580483, %v2687_v38  ;;  %v10395_v40 = vmul.f32 0.5, %v1498_v47  ;;  %v63_v38 = vld [vmem:[%s15813_s1 + $0x130] sm:$0xff] }
 0x21c   :  { %v10397_v59 = vmul.f32 %v4239_v15, %v4215_v44  ;;  %v10399_v30 = vadd.f32 1.0, %v4264_v18  ;;  %v10401_v62 = vmul.f32 0.5, %v1546_v32  ;;  %v2501_v13 = vadd.f32 0.112945676, %v2500_v60  ;;  %7569 = vmatmul.msk.f32.gmra.mxu0 %vm921_vm0, %v63_v38 }
 0x21d   :  { %16145 = vst [vmem:[#allocation99_spill] sm:$0xff] %v10390_v20  ;;  %v10404_v42 = vmul.f32 %v2654_v39, %v10143_v2  ;;  %v4812_v43 = vadd.f32 0.18741608, %v4811_v50  ;;  %v2459_v7 = vadd.f32 0.014752088, %v2458_v24  ;;  %v10408_v28 = vmul.f32 %v4254_v9, %v10154_v54 }
 0x21e   :  { %16146 = vst [vmem:[#allocation100_spill] sm:$0xff] %v10393_v36  ;;  %v2416_v22 = vmul.f32 3.8918573e-05, %v9387_v51  ;;  %v7841_v29 = vpop.eup %7840  ;;  %v4822_v47 = vmul.f32 %v4821_v8, %v10247_v19  ;;  %v4285_v53 = vmul.f32 2.1237322e-06, %v10385_v37  ;;  %v2689_v61 = vmul.f32 %v2688_v41, %v10316_v49 }
 0x21f   :  { %16147 = vst [vmem:[#allocation101_spill] sm:$0xff] %v10395_v40  ;;  %v2376_v12 = vmul.f32 3.8918573e-05, %v9349_v35  ;;  %v4296_v58 = vmul.f32 3.8918573e-05, %v10385_v37  ;;  %v2547_v2 = vmul.f32 %v7841_v29, %v10372_v26  ;;  %v2502_v14 = vmul.f32 %v2501_v13, %v9564_v46 }
 0x220   :  { %16148 = vst [vmem:[#allocation102_spill] sm:$0xff] %v10397_v59  ;;  %v4277_v1 = vand.u32 2147483648, %v10399_v30  ;;  %v10419_v54 = vmul.f32 0.70710677, %v1546_v32  ;;  %v2460_v18 = vmul.f32 %v2459_v7, %v9522_v4  ;;  %v2557_v39 = vand.u32 2147483648, %v10372_v26 }
 0x221   :  { %16149 = vst [vmem:[#allocation103_spill] sm:$0xff] %v10401_v62  ;;  %v2548_v15 = vsub.f32 1.0, %v2547_v2  ;;  %v2503_v50 = vadd.f32 0.4994258, %v2502_v14  ;;  %v2417_v8 = vadd.f32 0.001143296, %v2416_v22  ;;  %7842 = vrcp.f32 %v10399_v30 }
 0x222   :  { %16150 = vst [vmem:[#allocation104_spill] sm:$0xff] %v10404_v42  ;;  %v2555_v9 = vand.u32 2147483647, %v10372_v26  ;;  %v2461_v60 = vadd.f32 0.112945676, %v2460_v18  ;;  %vm2552_vm13 = vweird.f32 %v7841_v29  ;;  %vm2551_vm14 = vweird.f32 %v10372_v26  ;;  %v16154_v62 = vld [vmem:[#allocation91_spill] sm:$0xff] }
 0x223   :  { %v2377_v32 = vadd.f32 0.001143296, %v2376_v12  ;;  %v2549_v24 = vmul.f32 %v7841_v29, %v2548_v15  ;;  %v2504_v41 = vmul.f32 %v2503_v50, %v9564_v46  ;;  %v2418_v13 = vmul.f32 %v2417_v8, %v9387_v51  ;;  %v268_v12 = vld [vmem:[%s15814_s2 + $0x398] sm:$0xff]  ;;  %v254_v46 = vld [vmem:[%s15814_s2 + $0x328] sm:$0xff]  ;;  %vm2553_vm15 = vmor %vm2551_vm14, %vm2552_vm13 }
 0x224   :  { %v4823_v7 = vadd.f32 0.4994258, %v4822_v47  ;;  %v2690_v2 = vadd.f32 0.05243302, %v2689_v61  ;;  %v2462_v44 = vmul.f32 %v2461_v60, %v9522_v4  ;;  %v2558_v22 = vor.u32 1.1754944e-38, %v2557_v39  ;;  %v269_v47 = vld [vmem:[%s15814_s2 + $0x3a0] sm:$0xff]  ;;  %858 = vperm.xlu2 %7803, %v268_v12   ;;  %788 = vperm.xlu1 %7802, %v254_v46  }
 0x225   :  { %v2378_v14 = vmul.f32 %v2377_v32, %v9349_v35  ;;  %v2550_v38 = vadd.f32 %v7841_v29, %v2549_v24  ;;  %v10434_v20 = vadd.f32 1.0, %v2504_v41  ;;  %v4813_v61 = vmul.f32 %v4812_v43, %v10247_v19  ;;  %863 = vperm.xlu0 %7801, %v269_v47  }
 0x226   :  { %v2463_v26 = vadd.f32 0.4994258, %v2462_v44  ;;  %v2419_v18 = vadd.f32 0.014752088, %v2418_v13  ;;  %v4923_v39 = vmul.f32 %v10419_v54, %v10419_v54  ;;  %vm2556_vm1 = vcmp.eq.f32.partialorder %v2555_v9, 8.507059e+37 }
 0x227   :  { %v2379_v15 = vadd.f32 0.014752088, %v2378_v14  ;;  %v2554_v50 = vsel %vm2553_vm15, %v7841_v29, %v2550_v38  ;;  %7844 = vrcp.f32 %v10434_v20  ;;  %v10450_v8 = vpop.eup %7842  ;;  %v4286_v60 = vadd.f32 0.00028619796, %v4285_v53  ;;  %v16151_v14 = vld [vmem:[#allocation81_spill] sm:$0xff] }
 0x228   :  { %v4297_v32 = vadd.f32 0.001143296, %v4296_v58  ;;  %v2559_v43 = vsel %vm2556_vm1, %v2558_v22, %v2554_v50  ;;  %v2464_v24 = vmul.f32 %v2463_v26, %v9522_v4  ;;  %v2420_v41 = vmul.f32 %v2419_v18, %v9387_v51  ;;  %v1380_v58 = vpop.f32.mrf.mxu0  ;;  %v1500_v22 = vpop.f32.mrf.mxu1 }
 0x229   :  { %v2560_v44 = vmul.f32 %v2559_v43, %v10036_v10  ;;  %v2380_v13 = vmul.f32 %v2379_v15, %v9349_v35  ;;  %v2336_v12 = vmul.f32 3.8918573e-05, %v16151_v14  ;;  %v10457_v29 = vor.u32 1.1754944e-38, %v4277_v1  ;;  %v16152_v43 = vld [vmem:[#allocation13_spill] sm:$0xff] }
 0x22a   :  { %v4814_v9 = vadd.f32 1.1283791, %v4813_v61  ;;  %v4824_v38 = vmul.f32 %v4823_v7, %v10247_v19  ;;  %v10460_v46 = vadd.f32 1.0, %v2464_v24  ;;  %v10462_v53 = vmin.f32 %v4923_v39, 16.0 }
 0x22b   :  { %v7673_v4 = vclamps-f32 %v2560_v44, 1.0  ;;  %v2421_v47 = vadd.f32 0.112945676, %v2420_v41  ;;  %v2381_v10 = vadd.f32 0.112945676, %v2380_v13  ;;  %v4287_v26 = vmul.f32 %v4286_v60, %v10385_v37 }
 0x22c   :  { %v4298_v18 = vmul.f32 %v4297_v32, %v10385_v37  ;;  %v1721_v15 = vmul.f32 0.5, %v9703_v48  ;;  %7846 = vrcp.f32 %v10460_v46  ;;  %v2337_v39 = vadd.f32 0.001143296, %v2336_v12 }
 0x22d   :  { %v7845_v1 = vpop.eup %7844  ;;  %v7097_v61 = vadd.f32 1.0, %v7673_v4  ;;  %v2422_v19 = vmul.f32 %v2421_v47, %v9387_v51  ;;  %v2382_v7 = vmul.f32 %v2381_v10, %v9349_v35  ;;  %v10471_v50 = vmul.f32 %v2690_v2, %v10316_v49 }
 0x22e   :  { %v10474_v24 = vadd.f32 %v1380_v58, %v16152_v43  ;;  %v10477_v60 = vadd.f32 %v1500_v22, %v9949_v6  ;;  %v2507_v48 = vmul.f32 %v7845_v1, %v10434_v20  ;;  %v10481_v32 = vmul.f32 %v4814_v9, %v10220_v23 }
 0x22f   :  { %v4936_v44 = vmul.f32 3.8918573e-05, %v10462_v53  ;;  %v7225_v41 = vmul.f32 %v7097_v61, %v1721_v15  ;;  %v2423_v13 = vadd.f32 0.4994258, %v2422_v19  ;;  %v10484_v4 = vadd.f32 1.0, %v4824_v38 }
 0x230   :  { %v10486_v12 = vadd.f32 0.0036580483, %v4287_v26  ;;  %v2508_v2 = vsub.f32 1.0, %v2507_v48  ;;  %v2383_v47 = vadd.f32 0.4994258, %v2382_v7  ;;  %v2517_v6 = vand.u32 2147483648, %v10434_v20  ;;  %v10497_v7 = vpop.f32.mrf.mxu2 }
 0x231   :  { %v4299_v58 = vadd.f32 0.014752088, %v4298_v18  ;;  %7354 = vmatpush.msrb.mxu1 %v7225_v41  ;;  %v2424_v22 = vmul.f32 %v2423_v13, %v9387_v51  ;;  %v2338_v10 = vmul.f32 %v2337_v39, %v16151_v14  ;;  %vm2512_vm2 = vweird.f32 %v7845_v1  ;;  %v16153_v39 = vld [vmem:[#allocation79_spill] sm:$0xff] }
 0x232   :  { %v7847_v23 = vpop.eup %7846  ;;  %v2509_v9 = vmul.f32 %v7845_v1, %v2508_v2  ;;  %v2515_v15 = vand.u32 2147483647, %v10434_v20  ;;  %v2384_v38 = vmul.f32 %v2383_v47, %v9349_v35  ;;  %v4925_v26 = vmul.f32 2.1237322e-06, %v10462_v53 }
 0x233   :  { %v4937_v61 = vadd.f32 0.001143296, %v4936_v44  ;;  %v2467_v19 = vmul.f32 %v7847_v23, %v10460_v46  ;;  %v10495_v18 = vadd.f32 1.0, %v2424_v22  ;;  %vm2511_vm3 = vweird.f32 %v10434_v20 }
 0x234   :  { %v2510_v43 = vadd.f32 %v7845_v1, %v2509_v9  ;;  %v10500_v51 = vadd.f32 1.0, %v2384_v38  ;;  %v2296_v48 = vmul.f32 3.8918573e-05, %v16153_v39  ;;  %vm2513_vm4 = vmor %vm2511_vm3, %vm2512_vm2  ;;  %v2518_v41 = vor.u32 1.1754944e-38, %v2517_v6 }
 0x235   :  { %v2468_v13 = vsub.f32 1.0, %v2467_v19  ;;  %7848 = vrcp.f32 %v10495_v18  ;;  %v2339_v35 = vadd.f32 0.014752088, %v2338_v10  ;;  %vm2516_vm5 = vcmp.eq.f32.partialorder %v2515_v15, 8.507059e+37 }
 0x236   :  { %v2514_v44 = vsel %vm2513_vm4, %v7845_v1, %v2510_v43  ;;  %v2477_v2 = vand.u32 2147483648, %v10460_v46  ;;  %7850 = vrcp.f32 %v10500_v51  ;;  %vm2472_vm6 = vweird.f32 %v7847_v23 }
 0x237   :  { %v2519_v47 = vsel %vm2516_vm5, %v2518_v41, %v2514_v44  ;;  %v2469_v22 = vmul.f32 %v7847_v23, %v2468_v13  ;;  %v2475_v20 = vand.u32 2147483647, %v10460_v46  ;;  %v10509_v9 = vmul.f32 %v10450_v8, %v10399_v30 }
 0x238   :  { %7852 = vrcp.f32 %v10484_v4  ;;  %v2520_v6 = vmul.f32 %v2519_v47, %v9753_v16  ;;  %v2297_v10 = vadd.f32 0.001143296, %v2296_v48  ;;  %v10514_v1 = vmul.f32 %v4299_v58, %v10385_v37 }
 0x239   :  { %v2470_v15 = vadd.f32 %v7847_v23, %v2469_v22  ;;  %vm2471_vm7 = vweird.f32 %v10460_v46  ;;  %v2340_v38 = vmul.f32 %v2339_v35, %v16151_v14  ;;  %v10518_v19 = vadd.f32 0.00028619796, %v4925_v26 }
 0x23a   :  { %v4938_v43 = vmul.f32 %v4937_v61, %v10462_v53  ;;  %v7672_v41 = vclamps-f32 %v2520_v6, 1.0  ;;  %vm2473_vm8 = vmor %vm2471_vm7, %vm2472_vm6  ;;  %v2478_v13 = vor.u32 1.1754944e-38, %v2477_v2  ;;  %v1720_v3 = vmul.f32 0.5, %v16154_v62  ;;  %v16155_v61 = vld [vmem:[#allocation88_spill] sm:$0xff] }
 0x23b   :  { %v7849_v44 = vpop.eup %7848  ;;  %v2474_v16 = vsel %vm2473_vm8, %v7847_v23, %v2470_v15  ;;  %vm2476_vm9 = vcmp.eq.f32.partialorder %v2475_v20, 8.507059e+37  ;;  %v2341_v48 = vadd.f32 0.112945676, %v2340_v38  ;;  %v2298_v35 = vmul.f32 %v2297_v10, %v16153_v39  ;;  %v10532_v23 = vpop.f32.mrf.mxu2 }
 0x23c   :  { %v7851_v58 = vpop.eup %7850  ;;  %v7096_v47 = vadd.f32 1.0, %v7672_v41  ;;  %v2479_v22 = vsel %vm2476_vm9, %v2478_v13, %v2474_v16  ;;  %v2427_v46 = vmul.f32 %v7849_v44, %v10495_v18  ;;  %v10525_v26 = vmul.f32 0.70710677, %v10474_v24 }
 0x23d   :  { %v1719_v6 = vmul.f32 0.5, %v16155_v61  ;;  %v2480_v2 = vmul.f32 %v2479_v22, %v9747_v11  ;;  %v2387_v57 = vmul.f32 %v7851_v58, %v10500_v51  ;;  %vm2431_vm10 = vweird.f32 %v10495_v18 }
 0x23e   :  { %v10530_v62 = vpop.eup %7852  ;;  %v7224_v20 = vmul.f32 %v7096_v47, %v1720_v3  ;;  %v2428_v15 = vsub.f32 1.0, %v2427_v46  ;;  %v2342_v38 = vmul.f32 %v2341_v48, %v16151_v14  ;;  %v2435_v41 = vand.u32 2147483647, %v10495_v18 }
 0x23f   :  { %v7671_v10 = vclamps-f32 %v2480_v2, 1.0  ;;  %v2437_v13 = vand.u32 2147483648, %v10495_v18  ;;  %v2388_v16 = vsub.f32 1.0, %v2387_v57  ;;  %vm2432_vm11 = vweird.f32 %v7849_v44  ;;  %v16156_v18 = vld [vmem:[#allocation76_spill] sm:$0xff] }
 0x240   :  { %7355 = vmatpush.msrb.mxu1 %v7224_v20  ;;  %v2429_v11 = vmul.f32 %v7849_v44, %v2428_v15  ;;  %v2343_v22 = vadd.f32 0.4994258, %v2342_v38  ;;  %v2299_v61 = vadd.f32 0.014752088, %v2298_v35  ;;  %v2395_v3 = vand.u32 2147483647, %v10500_v51  ;;  %vm2433_vm13 = vmor %vm2431_vm10, %vm2432_vm11 }
 0x241   :  { %v7095_v42 = vadd.f32 1.0, %v7671_v10  ;;  %v2389_v36 = vmul.f32 %v7851_v58, %v2388_v16  ;;  %v2397_v47 = vand.u32 2147483648, %v10500_v51  ;;  %vm2392_vm12 = vweird.f32 %v7851_v58 }
 0x242   :  { %v2430_v46 = vadd.f32 %v7849_v44, %v2429_v11  ;;  %v2344_v48 = vmul.f32 %v2343_v22, %v16151_v14  ;;  %v2300_v2 = vmul.f32 %v2299_v61, %v16153_v39  ;;  %v4939_v34 = vadd.f32 0.014752088, %v4938_v43 }
 0x243   :  { %v7223_v17 = vmul.f32 %v7095_v42, %v1719_v6  ;;  %v2438_v57 = vor.u32 1.1754944e-38, %v2437_v13  ;;  %v2390_v20 = vadd.f32 %v7851_v58, %v2389_v36  ;;  %vm2436_vm14 = vcmp.eq.f32.partialorder %v2435_v41, 8.507059e+37  ;;  %v669_v6 = vpop.permute.xlu2 %668  ;;  %v16157_v41 = vld [vmem:[#allocation67_spill] sm:$0xff]  ;;  %v1554_v16 = vpop.f32.mrf.mxu2 }
 0x244   :  { %v2434_v35 = vsel %vm2433_vm13, %v7849_v44, %v2430_v46  ;;  %vm2391_vm15 = vweird.f32 %v10500_v51  ;;  %v10545_v15 = vadd.f32 1.0, %v2344_v48  ;;  %v10548_v38 = vmul.f32 0.70710677, %v10477_v60 }
 0x245   :  { %7356 = vmatpush.msrb.mxu1 %v7223_v17  ;;  %v2439_v14 = vsel %vm2436_vm14, %v2438_v57, %v2434_v35  ;;  %vm2393_vm1 = vmor %vm2391_vm15, %vm2392_vm12  ;;  %v2398_v43 = vor.u32 1.1754944e-38, %v2397_v47  ;;  %v2301_v42 = vadd.f32 0.112945676, %v2300_v2  ;;  %vm2396_vm2 = vcmp.eq.f32.partialorder %v2395_v3, 8.507059e+37  ;;  %v16158_v47 = vld [vmem:[#allocation70_spill] sm:$0xff]  ;;  %v16159_v2 = vld [vmem:[#allocation80_spill] sm:$0xff] }
 0x246   :  { %v2440_v10 = vmul.f32 %v2439_v14, %v16156_v18  ;;  %v2394_v13 = vsel %vm2393_vm1, %v7851_v58, %v2390_v20  ;;  %7854 = vrcp.f32 %v10545_v15  ;;  %v4289_v36 = vmul.f32 %v10486_v12, %v10385_v37 }
 0x247   :  { %v4301_v51 = vadd.f32 0.112945676, %v10514_v1  ;;  %v2399_v44 = vsel %vm2396_vm2, %v2398_v43, %v2394_v13  ;;  %v2256_v17 = vmul.f32 3.8918573e-05, %v16157_v41  ;;  %v4268_v11 = vsub.f32 1.0, %v10509_v9 }
 0x248   :  { %v4927_v22 = vmul.f32 %v10518_v19, %v10462_v53  ;;  %v7670_v61 = vclamps-f32 %v2440_v10, 1.0  ;;  %v2400_v58 = vmul.f32 %v2399_v44, %v16158_v47  ;;  %v4940_v3 = vmul.f32 %v4939_v34, %v10462_v53 }
 0x249   :  { %v2723_v46 = vmul.f32 %v10525_v26, %v10525_v26  ;;  %v10564_v12 = vadd.f32 %v1554_v16, %v669_v6  ;;  %v2302_v1 = vmul.f32 %v2301_v42, %v16153_v39  ;;  %v4323_v48 = vmul.f32 %v10548_v38, %v10548_v38  ;;  %v16160_v6 = vld [vmem:[#allocation73_spill] sm:$0xff] }
 0x24a   :  { %v1718_v9 = vmul.f32 0.5, %v16159_v2  ;;  %v7094_v57 = vadd.f32 1.0, %v7670_v61  ;;  %v7669_v20 = vclamps-f32 %v2400_v58, 1.0  ;;  %v2692_v19 = vadd.f32 0.18741608, %v10471_v50 }
 0x24b   :  { %v4290_v35 = vadd.f32 0.05243302, %v4289_v36  ;;  %v4302_v14 = vmul.f32 %v4301_v51, %v10385_v37  ;;  %v2257_v34 = vadd.f32 0.001143296, %v2256_v17  ;;  %v4928_v18 = vadd.f32 0.0036580483, %v4927_v22 }
 0x24c   :  { %v7855_v43 = vpop.eup %7854  ;;  %v7222_v10 = vmul.f32 %v7094_v57, %v1718_v9  ;;  %v1717_v13 = vmul.f32 0.5, %v16160_v6  ;;  %v7093_v44 = vadd.f32 1.0, %v7669_v20  ;;  %v4269_v42 = vmul.f32 %v10450_v8, %v4268_v11 }
 0x24d   :  { %vm4272_vm3 = vweird.f32 %v10450_v8  ;;  %v10576_v16 = vmul.f32 0.70710677, %v10564_v12  ;;  %v2303_v61 = vadd.f32 0.4994258, %v2302_v1  ;;  %vm4271_vm4 = vweird.f32 %v10399_v30 }
 0x24e   :  { %v4941_v50 = vadd.f32 0.112945676, %v4940_v3  ;;  %v10579_v36 = vmin.f32 %v2723_v46, 16.0  ;;  %v10581_v51 = vmin.f32 %v4323_v48, 16.0  ;;  %7357 = vmatpush.msrb.mxu1 %v7222_v10  ;;  %v7221_v17 = vmul.f32 %v7093_v44, %v1717_v13  ;;  %vm10617_vm9 = vmor %vm4271_vm4, %vm4272_vm3 }
 0x24f   :  { %v4835_v22 = vand.u32 2147483647, %v10484_v4  ;;  %v2347_v11 = vmul.f32 %v7855_v43, %v10545_v15  ;;  %v2258_v58 = vmul.f32 %v2257_v34, %v16157_v41  ;;  %v4827_v1 = vmul.f32 %v10530_v62, %v10484_v4 }
 0x250   :  { %16161 = vst [vmem:[#allocation81_spill] sm:$0xff] %v10579_v36  ;;  %v4291_v2 = vmul.f32 %v4290_v35, %v10385_v37  ;;  %v4303_v3 = vadd.f32 0.4994258, %v4302_v14  ;;  %v4929_v46 = vmul.f32 %v4928_v18, %v10462_v53  ;;  %7358 = vmatpush.msrb.mxu1 %v7221_v17  ;;  %v4270_v48 = vadd.f32 %v10450_v8, %v4269_v42 }
 0x251   :  { %v5043_v9 = vmul.f32 %v10576_v16, %v10576_v16  ;;  %v2348_v57 = vsub.f32 1.0, %v2347_v11  ;;  %v2304_v20 = vmul.f32 %v2303_v61, %v16153_v39  ;;  %v16162_v10 = vand.u32 2147483647, %v10399_v30 }
 0x252   :  { %v4942_v35 = vmul.f32 %v4941_v50, %v10462_v53  ;;  %v2725_v14 = vmul.f32 2.1237322e-06, %v10579_v36  ;;  %v4336_v18 = vmul.f32 3.8918573e-05, %v10581_v51  ;;  %v2357_v6 = vand.u32 2147483648, %v10545_v15 }
 0x253   :  { %vm10597_vm5 = vcmp.eq.f32.partialorder %v16162_v10, 8.507059e+37  ;;  %v2349_v13 = vmul.f32 %v7855_v43, %v2348_v57  ;;  %vm2352_vm6 = vweird.f32 %v7855_v43  ;;  %v2355_v44 = vand.u32 2147483647, %v10545_v15 }
 0x254   :  { %v2259_v42 = vadd.f32 0.014752088, %v2258_v58  ;;  %v4828_v39 = vsub.f32 1.0, %v4827_v1  ;;  %v4292_v61 = vadd.f32 0.18741608, %v4291_v2  ;;  %v4304_v17 = vmul.f32 %v4303_v3, %v10385_v37 }
 0x255   :  { %v4930_v11 = vadd.f32 0.05243302, %v4929_v46  ;;  %v10607_v10 = vmin.f32 %v5043_v9, 16.0  ;;  %v2350_v47 = vadd.f32 %v7855_v43, %v2349_v13  ;;  %vm2351_vm7 = vweird.f32 %v10545_v15 }
 0x256   :  { %v10610_v50 = vadd.f32 1.0, %v2304_v20  ;;  %v2693_v27 = vmul.f32 %v2692_v19, %v10316_v49  ;;  %v4943_v63 = vadd.f32 0.4994258, %v4942_v35  ;;  %v2726_v57 = vadd.f32 0.00028619796, %v2725_v14  ;;  %vm2353_vm8 = vmor %vm2351_vm7, %vm2352_vm6  ;;  %v16167_v35 = vld [vmem:[#allocation68_spill] sm:$0xff] }
 0x257   :  { %v2358_v55 = vor.u32 1.1754944e-38, %v2357_v6  ;;  %v4337_v1 = vadd.f32 0.001143296, %v4336_v18  ;;  %v2354_v2 = vsel %vm2353_vm8, %v7855_v43, %v2350_v47  ;;  %vm2356_vm10 = vcmp.eq.f32.partialorder %v2355_v44, 8.507059e+37  ;;  %v10632_v43 = vpop.f32.mrf.mxu2 }
 0x258   :  { %v2260_v15 = vmul.f32 %v2259_v42, %v16157_v41  ;;  %v4274_v19 = vsel %vm10617_vm9, %v10450_v8, %v4270_v48  ;;  %v4829_v3 = vmul.f32 %v10530_v62, %v4828_v39  ;;  %v10626_v46 = vadd.f32 1.0, %v4304_v17 }
 0x259   :  { %v2359_v9 = vsel %vm2356_vm10, %v2358_v55, %v2354_v2  ;;  %v4931_v30 = vmul.f32 %v4930_v11, %v10462_v53  ;;  %v5056_v20 = vmul.f32 3.8918573e-05, %v10607_v10  ;;  %7856 = vrcp.f32 %v10610_v50 }
 0x25a   :  { %v2360_v14 = vmul.f32 %v2359_v9, %v16167_v35  ;;  %vm4832_vm11 = vweird.f32 %v10530_v62  ;;  %vm10635_vm12 = vcmp.eq.f32.partialorder %v4835_v22, 8.507059e+37  ;;  %v2694_v8 = vadd.f32 1.1283791, %v2693_v27 }
 0x25b   :  { %v4944_v48 = vmul.f32 %v4943_v63, %v10462_v53  ;;  %v4279_v55 = vsel %vm10597_vm5, %v10457_v29, %v4274_v19  ;;  %v2727_v18 = vmul.f32 %v2726_v57, %v10579_v36  ;;  %v4338_v6 = vmul.f32 %v4337_v1, %v10581_v51 }
 0x25c   :  { %v2261_v13 = vadd.f32 0.112945676, %v2260_v15  ;;  %v4830_v44 = vadd.f32 %v10530_v62, %v4829_v3  ;;  %v4293_v42 = vmul.f32 %v4292_v61, %v10385_v37  ;;  %7858 = vrcp.f32 %v10626_v46  ;;  %v584_v3 = vpop.permute.xlu0 %583 }
 0x25d   :  { %v7668_v22 = vclamps-f32 %v2360_v14, 1.0  ;;  %vm4831_vm13 = vweird.f32 %v10484_v4  ;;  %v4932_v27 = vadd.f32 0.18741608, %v4931_v30  ;;  %v4325_v63 = vmul.f32 2.1237322e-06, %v10581_v51 }
 0x25e   :  { %v5057_v39 = vadd.f32 0.001143296, %v5056_v20  ;;  %v16170_v29 = vand.u32 2147483648, %v10484_v4  ;;  %v10653_v17 = vmul.f32 %v2694_v8, %v10274_v56  ;;  %v10655_v11 = vadd.f32 1.0, %v4944_v48  ;;  %vm10667_vm14 = vmor %vm4831_vm13, %vm4832_vm11  ;;  %v1503_v56 = vpop.f32.mrf.mxu1 }
 0x25f   :  { %v10658_v57 = vmul.f32 0.5, %v10474_v24  ;;  %v10660_v37 = vpop.eup %7856  ;;  %v10663_v61 = vmul.f32 %v4279_v55, %v10408_v28  ;;  %v2728_v4 = vadd.f32 0.0036580483, %v2727_v18  ;;  %v4339_v1 = vadd.f32 0.014752088, %v4338_v6 }
 0x260   :  { %v4838_v34 = vor.u32 1.1754944e-38, %v16170_v29  ;;  %16171 = vst [vmem:[#allocation13_spill] sm:$0xff] %v10653_v17  ;;  %v2262_v2 = vmul.f32 %v2261_v13, %v16157_v41  ;;  %v4834_v24 = vsel %vm10667_vm14, %v10530_v62, %v4830_v44  ;;  %v4294_v15 = vadd.f32 1.1283791, %v4293_v42  ;;  %v16177_v62 = vld [vmem:[#allocation71_spill] sm:$0xff]  ;;  %v10693_v13 = vpop.f32.mrf.mxu2 }
 0x261   :  { %16172 = vst [vmem:[#allocation79_spill] sm:$0xff] %v10658_v57  ;;  %v10676_v19 = vmul.f32 0.5, %v10477_v60  ;;  %v7092_v28 = vadd.f32 1.0, %v7668_v22  ;;  %v4317_v9 = vand.u32 2147483648, %v10626_v46  ;;  %v4933_v30 = vmul.f32 %v4932_v27, %v10462_v53 }
 0x262   :  { %16173 = vst [vmem:[#allocation91_spill] sm:$0xff] %v10663_v61  ;;  %v4326_v20 = vadd.f32 0.00028619796, %v4325_v63  ;;  %v5058_v35 = vmul.f32 %v5057_v39, %v10607_v10  ;;  %v10681_v14 = vpop.eup %7858  ;;  %7860 = vrcp.f32 %v10655_v11  ;;  %v10684_v8 = vadd.f32 %v1503_v56, %v584_v3 }
 0x263   :  { %16176 = vst [vmem:[#allocation88_spill] sm:$0xff] %v10676_v19  ;;  %v1716_v48 = vmul.f32 0.5, %v16177_v62  ;;  %v2307_v60 = vmul.f32 %v10660_v37, %v10610_v50  ;;  %v4839_v55 = vsel %vm10635_vm12, %v4838_v34, %v4834_v24  ;;  %v2729_v18 = vmul.f32 %v2728_v4, %v10579_v36  ;;  %v1383_v24 = vpop.f32.mrf.mxu0 }
 0x264   :  { %v4340_v53 = vmul.f32 %v4339_v1, %v10581_v51  ;;  %v2263_v6 = vadd.f32 0.4994258, %v2262_v2  ;;  %v10696_v44 = vmul.f32 %v4294_v15, %v10356_v5  ;;  %v4315_v42 = vand.u32 2147483647, %v10626_v46  ;;  %v10711_v1 = vpop.permute.xlu1 %588 }
 0x265   :  { %v5045_v22 = vmul.f32 2.1237322e-06, %v10607_v10  ;;  %v7220_v27 = vmul.f32 %v7092_v28, %v1716_v48  ;;  %v4307_v63 = vmul.f32 %v10681_v14, %v10626_v46  ;;  %v10702_v47 = vor.u32 1.1754944e-38, %v4317_v9 }
 0x266   :  { %v4327_v39 = vmul.f32 %v4326_v20, %v10581_v51  ;;  %v5059_v29 = vadd.f32 0.014752088, %v5058_v35  ;;  %v10706_v34 = vmul.f32 %v4839_v55, %v10481_v32  ;;  %v4934_v58 = vadd.f32 1.1283791, %v4933_v30 }
 0x267   :  { %v10709_v5 = vmul.f32 0.70710677, %v10684_v8  ;;  %7359 = vmatpush.msrb.mxu1 %v7220_v27  ;;  %v2308_v4 = vsub.f32 1.0, %v2307_v60  ;;  %v2730_v56 = vadd.f32 0.05243302, %v2729_v18  ;;  %v2317_v15 = vand.u32 2147483648, %v10610_v50 }
 0x268   :  { %16178 = vst [vmem:[#allocation76_spill] sm:$0xff] %v10706_v34  ;;  %v4341_v2 = vadd.f32 0.112945676, %v4340_v53  ;;  %v2264_v28 = vmul.f32 %v2263_v6, %v16157_v41  ;;  %v10715_v3 = vpop.eup %7860  ;;  %vm4312_vm15 = vweird.f32 %v10681_v14  ;;  %v5046_v32 = vadd.f32 0.00028619796, %v5045_v22  ;;  %v16179_v41 = vld [vmem:[#allocation7_spill] sm:$0xff]  ;;  %v1563_v35 = vpop.f32.mrf.mxu2 }
 0x269   :  { %v2309_v9 = vmul.f32 %v10660_v37, %v2308_v4  ;;  %vm2312_vm1 = vweird.f32 %v10660_v37  ;;  %v2315_v30 = vand.u32 2147483647, %v10610_v50  ;;  %v4308_v20 = vsub.f32 1.0, %v4307_v63 }
 0x26a   :  { %v4328_v62 = vadd.f32 0.0036580483, %v4327_v39  ;;  %v5060_v48 = vmul.f32 %v5059_v29, %v10607_v10  ;;  %vm4311_vm2 = vweird.f32 %v10626_v46  ;;  %v10725_v60 = vadd.f32 %v1383_v24, %v16179_v41  ;;  %v684_v29 = vpop.permute.xlu2 %683 }
 0x26b   :  { %v4363_v55 = vmul.f32 %v10709_v5, %v10709_v5  ;;  %v2310_v18 = vadd.f32 %v10660_v37, %v2309_v9  ;;  %vm2311_vm3 = vweird.f32 %v10610_v50  ;;  %v4947_v53 = vmul.f32 %v10715_v3, %v10655_v11  ;;  %vm10775_vm7 = vmor %vm4311_vm2, %vm4312_vm15 }
 0x26c   :  { %v4342_v6 = vmul.f32 %v4341_v2, %v10581_v51  ;;  %vm2313_vm4 = vmor %vm2311_vm3, %vm2312_vm1  ;;  %v2318_v22 = vor.u32 1.1754944e-38, %v2317_v15  ;;  %v10734_v27 = vadd.f32 1.0, %v2264_v28  ;;  %v2731_v63 = vmul.f32 %v2730_v56, %v10579_v36  ;;  %v16180_v56 = vld [vmem:[#allocation39_spill] sm:$0xff] }
 0x26d   :  { %v5047_v39 = vmul.f32 %v5046_v32, %v10607_v10  ;;  %v2314_v4 = vsel %vm2313_vm4, %v10660_v37, %v2310_v18  ;;  %vm2316_vm5 = vcmp.eq.f32.partialorder %v2315_v30, 8.507059e+37  ;;  %v4309_v24 = vmul.f32 %v10681_v14, %v4308_v20  ;;  %v16184_v18 = vld [vmem:[#allocation62_spill] sm:$0xff] }
 0x26e   :  { %v4329_v50 = vmul.f32 %v4328_v62, %v10581_v51  ;;  %v5061_v9 = vadd.f32 0.112945676, %v5060_v48  ;;  %v2319_v41 = vsel %vm2316_vm5, %v2318_v22, %v2314_v4  ;;  %v4957_v2 = vand.u32 2147483648, %v10655_v11  ;;  %v10760_v4 = vpop.permute.xlu1 %603 }
 0x26f   :  { %v10743_v15 = vmul.f32 0.70710677, %v10725_v60  ;;  %v10745_v28 = vmin.f32 %v4363_v55, 16.0  ;;  %v2320_v32 = vmul.f32 %v2319_v41, %v16180_v56  ;;  %v4948_v34 = vsub.f32 1.0, %v4947_v53  ;;  %v253_v56 = vld [vmem:[%s15814_s2 + $0x320] sm:$0xff] }
 0x270   :  { %v4343_v17 = vadd.f32 0.4994258, %v4342_v6  ;;  %v10748_v37 = vadd.f32 %v1563_v35, %v684_v29  ;;  %7862 = vrcp.f32 %v10734_v27  ;;  %vm10751_vm6 = vcmp.eq.f32.partialorder %v4315_v42, 8.507059e+37  ;;  %783 = vperm.xlu0 %7801, %v253_v56  }
 0x271   :  { %v10756_v20 = vmul.f32 %v4934_v58, %v10419_v54  ;;  %v5048_v62 = vadd.f32 0.0036580483, %v5047_v39  ;;  %v7667_v48 = vclamps-f32 %v2320_v32, 1.0  ;;  %v2216_v55 = vmul.f32 3.8918573e-05, %v16184_v18 }
 0x272   :  { %16181 = vst [vmem:[#allocation67_spill] sm:$0xff] %v10748_v37  ;;  %v4310_v22 = vadd.f32 %v10681_v14, %v4309_v24  ;;  %v2732_v53 = vadd.f32 0.18741608, %v2731_v63  ;;  %v4330_v35 = vadd.f32 0.05243302, %v4329_v50  ;;  %v5062_v6 = vmul.f32 %v5061_v9, %v10607_v10  ;;  %v64_v50 = vld [vmem:[%s15813_s1 + $0x138] sm:$0xff] }
 0x273   :  { %v10763_v29 = vor.u32 1.1754944e-38, %v4957_v2  ;;  %v10766_v42 = vmul.f32 0.5, %v10564_v12  ;;  %v2763_v54 = vmul.f32 %v10743_v15, %v10743_v15  ;;  %v4376_v58 = vmul.f32 3.8918573e-05, %v10745_v28  ;;  %v16189_v9 = vld [vmem:[#allocation65_spill] sm:$0xff]  ;;  %7570 = vmatmul.msk.f32.gmra.mxu0 %vm921_vm0, %v64_v50  ;;  %s7520_s1 = sshll.u32 %s8087_s8, 4  ;;  %s7521_s1 = int_to_ptr.vmem [resolvable:$true] %s7520_s1 }
 0x274   :  { %v4949_v63 = vmul.f32 %v10715_v3, %v4948_v34  ;;  %v4344_v24 = vmul.f32 %v4343_v17, %v10581_v51  ;;  %v10782_v12 = vmul.f32 0.70710677, %v10748_v37  ;;  %v1715_v41 = vmul.f32 0.5, %v16189_v9  ;;  %v252_v17 = vld [vmem:[%s15814_s2 + $0x318] sm:$0xff]  ;;  %v267_v34 = vld [vmem:[%s15814_s2 + $0x390] sm:$0xff] }
 0x275   :  { %16185 = vst [vmem:[#allocation70_spill] sm:$0xff] %v10766_v42  ;;  %vm4951_vm8 = vweird.f32 %v10655_v11  ;;  %v5049_v46 = vmul.f32 %v5048_v62, %v10607_v10  ;;  %v7091_v2 = vadd.f32 1.0, %v7667_v48  ;;  %v2217_v32 = vadd.f32 0.001143296, %v2216_v55  ;;  %778 = vperm.xlu2 %7803, %v252_v17   ;;  %853 = vperm.xlu1 %7802, %v267_v34  }
 0x276   :  { %16188 = vst [vmem:[#allocation80_spill] sm:$0xff] %v10782_v12  ;;  %v7863_v9 = vpop.eup %7862  ;;  %v4314_v62 = vsel %vm10775_vm7, %v10681_v14, %v4310_v22  ;;  %v2733_v48 = vmul.f32 %v2732_v53, %v10579_v36  ;;  %v4331_v50 = vmul.f32 %v4330_v35, %v10581_v51  ;;  %v5063_v37 = vadd.f32 0.4994258, %v5062_v6  ;;  %v16191_v14 = vld [vmem:[#allocation61_spill] sm:$0xff] }
 0x277   :  { %v10805_v42 = vmin.f32 %v2763_v54, 16.0  ;;  %v4377_v57 = vadd.f32 0.001143296, %v4376_v58  ;;  %v7219_v49 = vmul.f32 %v7091_v2, %v1715_v41  ;;  %v2267_v25 = vmul.f32 %v7863_v9, %v10734_v27 }
 0x278   :  { %v4950_v55 = vadd.f32 %v10715_v3, %v4949_v63  ;;  %vm4952_vm0 = vweird.f32 %v10715_v3  ;;  %v10810_v39 = vadd.f32 1.0, %v4344_v24  ;;  %v2176_v22 = vmul.f32 3.8918573e-05, %v16191_v14 }
 0x279   :  { %16190 = vst [vmem:[#allocation73_spill] sm:$0xff] %v10805_v42  ;;  %v5050_v53 = vadd.f32 0.05243302, %v5049_v46  ;;  %v5163_v35 = vmul.f32 %v10782_v12, %v10782_v12  ;;  %7360 = vmatpush.msrb.mxu1 %v7219_v49  ;;  %v2268_v6 = vsub.f32 1.0, %v2267_v25  ;;  %v2218_v54 = vmul.f32 %v2217_v32, %v16184_v18  ;;  %vm10833_vm10 = vmor %vm4951_vm8, %vm4952_vm0 }
 0x27a   :  { %v4319_v58 = vsel %vm10751_vm6, %v10702_v47, %v4314_v62  ;;  %v2734_v41 = vadd.f32 1.1283791, %v2733_v48  ;;  %v4332_v63 = vadd.f32 0.18741608, %v4331_v50  ;;  %v5064_v2 = vmul.f32 %v5063_v37, %v10607_v10  ;;  %v10837_v37 = vpop.permute.xlu1 %618  ;;  %v16198_v47 = vld [vmem:[#allocation59_spill] sm:$0xff] }
 0x27b   :  { %v16192_v24 = vand.u32 2147483647, %v10655_v11  ;;  %v2765_v46 = vmul.f32 2.1237322e-06, %v10805_v42  ;;  %v4378_v49 = vmul.f32 %v4377_v57, %v10745_v28  ;;  %v2269_v25 = vmul.f32 %v7863_v9, %v2268_v6  ;;  %16197 = vst [vmem:[#allocation68_spill] sm:$0xff] %v10837_v37 }
 0x27c   :  { %v2277_v34 = vand.u32 2147483648, %v10734_v27  ;;  %vm2272_vm11 = vweird.f32 %v7863_v9  ;;  %v2275_v30 = vand.u32 2147483647, %v10734_v27  ;;  %v2219_v56 = vadd.f32 0.014752088, %v2218_v54 }
 0x27d   :  { %vm10822_vm9 = vcmp.eq.f32.partialorder %v16192_v24, 8.507059e+37  ;;  %v2177_v32 = vadd.f32 0.001143296, %v2176_v22  ;;  %v4954_v57 = vsel %vm10833_vm10, %v10715_v3, %v4950_v55  ;;  %7864 = vrcp.f32 %v10810_v39 }
 0x27e   :  { %v5051_v62 = vmul.f32 %v5050_v53, %v10607_v10  ;;  %v10845_v11 = vmin.f32 %v5163_v35, 16.0  ;;  %v10847_v48 = vadd.f32 1.0, %v5064_v2  ;;  %v2270_v50 = vadd.f32 %v7863_v9, %v2269_v25 }
 0x27f   :  { %vm2271_vm12 = vweird.f32 %v10734_v27  ;;  %v2220_v6 = vmul.f32 %v2219_v56, %v16184_v18  ;;  %v4379_v24 = vadd.f32 0.014752088, %v4378_v49  ;;  %v2278_v22 = vor.u32 1.1754944e-38, %v2277_v34  ;;  %v16200_v34 = vld [vmem:[#allocation90_spill] sm:$0xff] }
 0x280   :  { %vm2273_vm13 = vmor %vm2271_vm12, %vm2272_vm11  ;;  %v2178_v54 = vmul.f32 %v2177_v32, %v16191_v14  ;;  %v2136_v3 = vmul.f32 3.8918573e-05, %v16198_v47  ;;  %v2766_v55 = vadd.f32 0.00028619796, %v2765_v46  ;;  %vm2276_vm14 = vcmp.eq.f32.partialorder %v2275_v30, 8.507059e+37 }
 0x281   :  { %v2274_v12 = vsel %vm2273_vm13, %v7863_v9, %v2270_v50  ;;  %v2221_v53 = vadd.f32 0.112945676, %v2220_v6  ;;  %v5176_v35 = vmul.f32 3.8918573e-05, %v10845_v11  ;;  %v10855_v27 = vmul.f32 %v4319_v58, %v10696_v44 }
 0x282   :  { %v2279_v2 = vsel %vm2276_vm14, %v2278_v22, %v2274_v12  ;;  %v2179_v36 = vadd.f32 0.014752088, %v2178_v54  ;;  %v2137_v25 = vadd.f32 0.001143296, %v2136_v3  ;;  %v4333_v49 = vmul.f32 %v4332_v63, %v10581_v51  ;;  %v634_v54 = vpop.permute.xlu1 %633  ;;  %v16202_v3 = vld [vmem:[#allocation64_spill] sm:$0xff] }
 0x283   :  { %16199 = vst [vmem:[#allocation71_spill] sm:$0xff] %v10855_v27  ;;  %7866 = vrcp.f32 %v10847_v48  ;;  %v2280_v56 = vmul.f32 %v2279_v2, %v16200_v34  ;;  %v10860_v32 = vpop.eup %7864  ;;  %v4380_v9 = vmul.f32 %v4379_v24, %v10745_v28  ;;  %v2222_v46 = vmul.f32 %v2221_v53, %v16184_v18  ;;  %v10875_v34 = vpop.permute.xlu0 %598 }
 0x284   :  { %v2180_v30 = vmul.f32 %v2179_v36, %v16191_v14  ;;  %v2138_v12 = vmul.f32 %v2137_v25, %v16198_v47  ;;  %v4959_v44 = vsel %vm10822_vm9, %v10763_v29, %v4954_v57  ;;  %v10870_v51 = vmul.f32 %v2734_v41, %v10525_v26 }
 0x285   :  { %v4365_v58 = vmul.f32 2.1237322e-06, %v10745_v28  ;;  %v7666_v63 = vclamps-f32 %v2280_v56, 1.0  ;;  %v5052_v50 = vadd.f32 0.18741608, %v5051_v62  ;;  %v2767_v6 = vmul.f32 %v2766_v55, %v10805_v42 }
 0x286   :  { %16201 = vst [vmem:[#allocation7_spill] sm:$0xff] %v10870_v51  ;;  %v5177_v24 = vadd.f32 0.001143296, %v5176_v35  ;;  %v2223_v22 = vadd.f32 0.4994258, %v2222_v46  ;;  %v1714_v36 = vmul.f32 0.5, %v16202_v3  ;;  %v4347_v26 = vmul.f32 %v10860_v32, %v10810_v39 }
 0x287   :  { %v7090_v53 = vadd.f32 1.0, %v7666_v63  ;;  %v2181_v2 = vadd.f32 0.112945676, %v2180_v30  ;;  %v2139_v25 = vadd.f32 0.014752088, %v2138_v12  ;;  %v10886_v12 = vadd.f32 %v10129_v21, %v634_v54  ;;  %v10892_v63 = vpop.f32.mrf.mxu1 }
 0x288   :  { %v4334_v29 = vadd.f32 1.1283791, %v4333_v49  ;;  %v4381_v41 = vadd.f32 0.112945676, %v4380_v9  ;;  %v2224_v17 = vmul.f32 %v2223_v22, %v16184_v18  ;;  %v4366_v62 = vadd.f32 0.00028619796, %v4365_v58 }
 0x289   :  { %v10880_v57 = vpop.eup %7866  ;;  %v7218_v55 = vmul.f32 %v7090_v53, %v1714_v36  ;;  %v2182_v35 = vmul.f32 %v2181_v2, %v16191_v14  ;;  %v2140_v56 = vmul.f32 %v2139_v25, %v16198_v47  ;;  %v2768_v46 = vadd.f32 0.0036580483, %v2767_v6 }
 0x28a   :  { %v5178_v30 = vmul.f32 %v5177_v24, %v10845_v11  ;;  %v10888_v49 = vadd.f32 1.0, %v2224_v17  ;;  %v4357_v9 = vand.u32 2147483648, %v10810_v39  ;;  %v5053_v18 = vmul.f32 %v5052_v50, %v10607_v10 }
 0x28b   :  { %7361 = vmatpush.msrb.mxu1 %v7218_v55  ;;  %v2183_v58 = vadd.f32 0.4994258, %v2182_v35  ;;  %v2141_v22 = vadd.f32 0.112945676, %v2140_v56  ;;  %v4348_v3 = vsub.f32 1.0, %v4347_v26  ;;  %v5067_v6 = vmul.f32 %v10880_v57, %v10847_v48  ;;  %v10920_v56 = vpop.permute.xlu0 %613 }
 0x28c   :  { %v4382_v24 = vmul.f32 %v4381_v41, %v10745_v28  ;;  %7868 = vrcp.f32 %v10888_v49  ;;  %v10899_v21 = vmul.f32 %v4959_v44, %v10756_v20  ;;  %v10902_v54 = vmul.f32 %v4334_v29, %v10548_v38 }
 0x28d   :  { %v4367_v10 = vmul.f32 %v4366_v62, %v10745_v28  ;;  %v2184_v50 = vmul.f32 %v2183_v58, %v16191_v14  ;;  %v2769_v36 = vmul.f32 %v2768_v46, %v10805_v42  ;;  %v5179_v53 = vadd.f32 0.014752088, %v5178_v30 }
 0x28e   :  { %16203 = vst [vmem:[#allocation39_spill] sm:$0xff] %v10899_v21  ;;  %v10908_v2 = vmul.f32 0.70710677, %v10886_v12  ;;  %v2142_v25 = vmul.f32 %v2141_v22, %v16198_v47  ;;  %vm4351_vm15 = vweird.f32 %v10810_v39  ;;  %v4355_v20 = vand.u32 2147483647, %v10810_v39 }
 0x28f   :  { %v5054_v44 = vadd.f32 1.1283791, %v5053_v18  ;;  %v10913_v26 = vadd.f32 1.0, %v2184_v50  ;;  %v4349_v38 = vmul.f32 %v10860_v32, %v4348_v3  ;;  %v4358_v29 = vor.u32 1.1754944e-38, %v4357_v9 }
 0x290   :  { %v5068_v41 = vsub.f32 1.0, %v5067_v6  ;;  %v4383_v14 = vadd.f32 0.4994258, %v4382_v24  ;;  %v10917_v17 = vmul.f32 0.5, %v10725_v60  ;;  %v4368_v62 = vadd.f32 0.0036580483, %v4367_v10 }
 0x291   :  { %7870 = vrcp.f32 %v10913_v26  ;;  %v2143_v55 = vadd.f32 0.4994258, %v2142_v25  ;;  %v2770_v46 = vadd.f32 0.05243302, %v2769_v36  ;;  %v10923_v30 = vmul.f32 0.5, %v10684_v8  ;;  %v10944_v36 = vpop.f32.mrf.mxu1 }
 0x292   :  { %16204 = vst [vmem:[#allocation62_spill] sm:$0xff] %v10917_v17  ;;  %v7869_v35 = vpop.eup %7868  ;;  %v5180_v18 = vmul.f32 %v5179_v53, %v10845_v11  ;;  %v4763_v9 = vmul.f32 %v10908_v2, %v10908_v2  ;;  %vm4352_vm1 = vweird.f32 %v10860_v32  ;;  %v10930_v60 = vmul.f32 %v5054_v44, %v10576_v16 }
 0x293   :  { %16205 = vst [vmem:[#allocation65_spill] sm:$0xff] %v10923_v30  ;;  %v5075_v58 = vand.u32 2147483647, %v10847_v48  ;;  %v2227_v22 = vmul.f32 %v7869_v35, %v10888_v49  ;;  %v4350_v3 = vadd.f32 %v10860_v32, %v4349_v38  ;;  %vm10935_vm2 = vcmp.eq.f32.partialorder %v4355_v20, 8.507059e+37  ;;  %vm10957_vm3 = vmor %vm4351_vm15, %vm4352_vm1 }
 0x294   :  { %v5069_v8 = vmul.f32 %v10880_v57, %v5068_v41  ;;  %v5077_v24 = vand.u32 2147483648, %v10847_v48  ;;  %v4384_v10 = vmul.f32 %v4383_v14, %v10745_v28  ;;  %v4369_v50 = vmul.f32 %v4368_v62, %v10745_v28 }
 0x295   :  { %v5165_v16 = vmul.f32 2.1237322e-06, %v10845_v11  ;;  %v2228_v53 = vsub.f32 1.0, %v2227_v22  ;;  %v2144_v25 = vmul.f32 %v2143_v55, %v16198_v47  ;;  %v2771_v20 = vmul.f32 %v2770_v46, %v10805_v42 }
 0x296   :  { %v5181_v44 = vadd.f32 0.112945676, %v5180_v18  ;;  %v10948_v38 = vmin.f32 %v4763_v9, 16.0  ;;  %v2237_v41 = vand.u32 2147483648, %v10888_v49  ;;  %vm2232_vm4 = vweird.f32 %v7869_v35 }
 0x297   :  { %v10951_v21 = vpop.eup %7870  ;;  %v2229_v62 = vmul.f32 %v7869_v35, %v2228_v53  ;;  %v2235_v47 = vand.u32 2147483647, %v10888_v49  ;;  %v10962_v55 = vadd.f32 1.0, %v2144_v25  ;;  %v4354_v46 = vsel %vm10957_vm3, %v10860_v32, %v4350_v3 }
 0x298   :  { %v10968_v18 = vadd.f32 %v10880_v57, %v5069_v8  ;;  %vm5072_vm5 = vweird.f32 %v10880_v57  ;;  %v10971_v39 = vadd.f32 1.0, %v4384_v10  ;;  %v4370_v9 = vadd.f32 0.05243302, %v4369_v50  ;;  %v629_v10 = vpop.permute.xlu0 %628 }
 0x299   :  { %v5166_v22 = vadd.f32 0.00028619796, %v5165_v16  ;;  %v2230_v51 = vadd.f32 %v7869_v35, %v2229_v62  ;;  %vm2231_vm6 = vweird.f32 %v10888_v49  ;;  %v5182_v53 = vmul.f32 %v5181_v44, %v10845_v11 }
 0x29a   :  { %vm2233_vm7 = vmor %vm2231_vm6, %vm2232_vm4  ;;  %v2238_v25 = vor.u32 1.1754944e-38, %v2237_v41  ;;  %v2187_v14 = vmul.f32 %v10951_v21, %v10913_v26  ;;  %7872 = vrcp.f32 %v10962_v55  ;;  %v2772_v32 = vadd.f32 0.18741608, %v2771_v20 }
 0x29b   :  { %v4776_v3 = vmul.f32 3.8918573e-05, %v10948_v38  ;;  %v2234_v8 = vsel %vm2233_vm7, %v7869_v35, %v2230_v51  ;;  %vm2236_vm8 = vcmp.eq.f32.partialorder %v2235_v47, 8.507059e+37  ;;  %vm5071_vm0 = vweird.f32 %v10847_v48  ;;  %v16212_v35 = vld [vmem:[#allocation87_spill] sm:$0xff] }
 0x29c   :  { %7874 = vrcp.f32 %v10971_v39  ;;  %v2239_v49 = vsel %vm2236_vm8, %v2238_v25, %v2234_v8  ;;  %v2188_v50 = vsub.f32 1.0, %v2187_v14  ;;  %v4359_v16 = vsel %vm10935_vm2, %v4358_v29, %v4354_v46  ;;  %vm10985_vm9 = vmor %vm5071_vm0, %vm5072_vm5  ;;  %v16215_v25 = vld [vmem:[#allocation29_spill] sm:$0xff]  ;;  %v1512_v8 = vpop.f32.mrf.mxu1 }
 0x29d   :  { %v5078_v20 = vor.u32 1.1754944e-38, %v5077_v24  ;;  %v4371_v51 = vmul.f32 %v4370_v9, %v10745_v28  ;;  %v2240_v41 = vmul.f32 %v2239_v49, %v16212_v35  ;;  %v5074_v48 = vsel %vm10985_vm9, %v10880_v57, %v10968_v18 }
 0x29e   :  { %v5167_v62 = vmul.f32 %v5166_v22, %v10845_v11  ;;  %v5183_v6 = vadd.f32 0.4994258, %v5182_v53  ;;  %v2189_v29 = vmul.f32 %v10951_v21, %v2188_v50  ;;  %vm10997_vm10 = vcmp.eq.f32.partialorder %v5075_v58, 8.507059e+37 }
 0x29f   :  { %v2773_v24 = vmul.f32 %v2772_v32, %v10805_v42  ;;  %v4765_v46 = vmul.f32 2.1237322e-06, %v10948_v38  ;;  %v4777_v9 = vadd.f32 0.001143296, %v4776_v3  ;;  %v11004_v14 = vadd.f32 %v16215_v25, %v629_v10  ;;  %v16216_v3 = vld [vmem:[#allocation58_spill] sm:$0xff]  ;;  %v16217_v25 = vld [vmem:[#allocation57_spill] sm:$0xff] }
 0x2a0   :  { %v11006_v49 = vpop.eup %7872  ;;  %v7665_v57 = vclamps-f32 %v2240_v41, 1.0  ;;  %v2190_v18 = vadd.f32 %v10951_v21, %v2189_v29  ;;  %vm2192_vm11 = vweird.f32 %v10951_v21  ;;  %v2197_v58 = vand.u32 2147483648, %v10913_v26 }
 0x2a1   :  { %v4372_v22 = vadd.f32 0.18741608, %v4371_v51  ;;  %v2195_v53 = vand.u32 2147483647, %v10913_v26  ;;  %v2147_v32 = vmul.f32 %v11006_v49, %v10962_v55  ;;  %v2096_v50 = vmul.f32 3.8918573e-05, %v16216_v3 }
 0x2a2   :  { %v11015_v10 = vpop.eup %7874  ;;  %v5168_v44 = vadd.f32 0.0036580483, %v5167_v62  ;;  %v5184_v35 = vmul.f32 %v5183_v6, %v10845_v11  ;;  %v11019_v41 = vadd.f32 %v1512_v8, %v10875_v34  ;;  %vm2191_vm12 = vweird.f32 %v10913_v26 }
 0x2a3   :  { %v4766_v29 = vadd.f32 0.00028619796, %v4765_v46  ;;  %v11023_v51 = vmul.f32 0.70710677, %v11004_v14  ;;  %v1713_v17 = vmul.f32 0.5, %v16217_v25  ;;  %v7089_v42 = vadd.f32 1.0, %v7665_v57  ;;  %vm2193_vm13 = vmor %vm2191_vm12, %vm2192_vm11 }
 0x2a4   :  { %v4778_v52 = vmul.f32 %v4777_v9, %v10948_v38  ;;  %v2194_v62 = vsel %vm2193_vm13, %v10951_v21, %v2190_v18  ;;  %v2198_v6 = vor.u32 1.1754944e-38, %v2197_v58  ;;  %v2148_v33 = vsub.f32 1.0, %v2147_v32  ;;  %v16219_v18 = vld [vmem:[#allocation86_spill] sm:$0xff] }
 0x2a5   :  { %v4387_v34 = vmul.f32 %v11015_v10, %v10971_v39  ;;  %v7217_v26 = vmul.f32 %v7089_v42, %v1713_v17  ;;  %vm2196_vm14 = vcmp.eq.f32.partialorder %v2195_v53, 8.507059e+37  ;;  %v2097_v46 = vadd.f32 0.001143296, %v2096_v50 }
 0x2a6   :  { %v5169_v8 = vmul.f32 %v5168_v44, %v10845_v11  ;;  %v11033_v59 = vadd.f32 1.0, %v5184_v35  ;;  %v11036_v57 = vmul.f32 0.70710677, %v11019_v41  ;;  %v2199_v25 = vsel %vm2196_vm14, %v2198_v6, %v2194_v62  ;;  %v16221_v62 = vld [vmem:[#allocation55_spill] sm:$0xff] }
 0x2a7   :  { %v4767_v9 = vmul.f32 %v4766_v29, %v10948_v38  ;;  %v4723_v21 = vmul.f32 %v11023_v51, %v11023_v51  ;;  %7362 = vmatpush.msrb.mxu1 %v7217_v26  ;;  %v2200_v58 = vmul.f32 %v2199_v25, %v16219_v18  ;;  %v2149_v42 = vmul.f32 %v11006_v49, %v2148_v33 }
 0x2a8   :  { %16218 = vst [vmem:[#allocation61_spill] sm:$0xff] %v11033_v59  ;;  %v11044_v17 = vmul.f32 %v4359_v16, %v10902_v54  ;;  %v5079_v53 = vsel %vm10997_vm10, %v5078_v20, %v5074_v48  ;;  %v2774_v32 = vadd.f32 1.1283791, %v2773_v24  ;;  %v4779_v50 = vadd.f32 0.014752088, %v4778_v52  ;;  %v16222_v48 = vld [vmem:[#allocation56_spill] sm:$0xff] }
 0x2a9   :  { %v4373_v44 = vmul.f32 %v4372_v22, %v10745_v28  ;;  %v7664_v35 = vclamps-f32 %v2200_v58, 1.0  ;;  %v2098_v29 = vmul.f32 %v2097_v46, %v16216_v3  ;;  %v2056_v6 = vmul.f32 3.8918573e-05, %v16221_v62  ;;  %v265_v58 = vld [vmem:[%s15814_s2 + $0x380] sm:$0xff] }
 0x2aa   :  { %16220 = vst [vmem:[#allocation59_spill] sm:$0xff] %v11044_v17  ;;  %v4388_v26 = vsub.f32 1.0, %v4387_v34  ;;  %v5170_v40 = vadd.f32 0.05243302, %v5169_v8  ;;  %7876 = vrcp.f32 %v11033_v59  ;;  %v4483_v33 = vmul.f32 %v11036_v57, %v11036_v57  ;;  %843 = vperm.xlu2 %7803, %v265_v58  }
 0x2ab   :  { %v4768_v54 = vadd.f32 0.0036580483, %v4767_v9  ;;  %v11054_v16 = vmin.f32 %v4723_v21, 16.0  ;;  %v7088_v20 = vadd.f32 1.0, %v7664_v35  ;;  %v2150_v52 = vadd.f32 %v11006_v49, %v2149_v42 }
 0x2ac   :  { %v4780_v28 = vmul.f32 %v4779_v50, %v10948_v38  ;;  %v1712_v47 = vmul.f32 0.5, %v16222_v48  ;;  %vm2152_vm15 = vweird.f32 %v11006_v49  ;;  %v2157_v24 = vand.u32 2147483648, %v10962_v55 }
 0x2ad   :  { %vm2151_vm1 = vweird.f32 %v10962_v55  ;;  %v2155_v22 = vand.u32 2147483647, %v10962_v55  ;;  %v2099_v34 = vadd.f32 0.014752088, %v2098_v29  ;;  %v2057_v46 = vadd.f32 0.001143296, %v2056_v6 }
 0x2ae   :  { %v11064_v8 = vmul.f32 %v5079_v53, %v10930_v60  ;;  %v11067_v25 = vmul.f32 %v2774_v32, %v10743_v15  ;;  %v11069_v9 = vmin.f32 %v4483_v33, 16.0  ;;  %v7216_v21 = vmul.f32 %v7088_v20, %v1712_v47  ;;  %vm11071_vm2 = vmor %vm2151_vm1, %vm2152_vm15  ;;  %v251_v53 = vld [vmem:[%s15814_s2 + $0x310] sm:$0xff]  ;;  %v266_v32 = vld [vmem:[%s15814_s2 + $0x388] sm:$0xff] }
 0x2af   :  { %v11078_v55 = vadd.f32 1.1283791, %v4373_v44  ;;  %v4769_v42 = vmul.f32 %v4768_v54, %v10948_v38  ;;  %v4736_v60 = vmul.f32 3.8918573e-05, %v11054_v16  ;;  %v2154_v15 = vsel %vm11071_vm2, %v11006_v49, %v2150_v52  ;;  %773 = vperm.xlu1 %7802, %v251_v53   ;;  %848 = vperm.xlu0 %7801, %v266_v32  }
 0x2b0   :  { %16223 = vst [vmem:[#allocation90_spill] sm:$0xff] %v11064_v8  ;;  %v11091_v50 = vpop.eup %7876  ;;  %v4389_v44 = vmul.f32 %v11015_v10, %v4388_v26  ;;  %vm4391_vm3 = vweird.f32 %v10971_v39  ;;  %v4395_v35 = vand.u32 2147483647, %v10971_v39  ;;  %v5171_v29 = vmul.f32 %v5170_v40, %v10845_v11  ;;  %7363 = vmatpush.msrb.mxu1 %v7216_v21  ;;  %v16228_v40 = vld [vmem:[#allocation85_spill] sm:$0xff] }
 0x2b1   :  { %16224 = vst [vmem:[#allocation64_spill] sm:$0xff] %v11067_v25  ;;  %v2158_v49 = vor.u32 1.1754944e-38, %v2157_v24  ;;  %v4781_v6 = vadd.f32 0.112945676, %v4780_v28  ;;  %vm2156_vm4 = vcmp.eq.f32.partialorder %v2155_v22, 8.507059e+37  ;;  %v2100_v33 = vmul.f32 %v2099_v34, %v16216_v3  ;;  %v16229_v34 = vld [vmem:[#allocation53_spill] sm:$0xff] }
 0x2b2   :  { %16227 = vst [vmem:[#allocation87_spill] sm:$0xff] %v11091_v50  ;;  %v2058_v54 = vmul.f32 %v2057_v46, %v16221_v62  ;;  %v4397_v20 = vand.u32 2147483648, %v10971_v39  ;;  %v4725_v26 = vmul.f32 2.1237322e-06, %v11054_v16  ;;  %v4496_v52 = vmul.f32 3.8918573e-05, %v11069_v9 }
 0x2b3   :  { %v2159_v48 = vsel %vm2156_vm4, %v2158_v49, %v2154_v15  ;;  %v4770_v47 = vadd.f32 0.05243302, %v4769_v42  ;;  %v4737_v18 = vadd.f32 0.001143296, %v4736_v60  ;;  %v2101_v24 = vadd.f32 0.112945676, %v2100_v33 }
 0x2b4   :  { %v2160_v21 = vmul.f32 %v2159_v48, %v16228_v40  ;;  %v4390_v28 = vadd.f32 %v11015_v10, %v4389_v44  ;;  %vm4392_vm5 = vweird.f32 %v11015_v10  ;;  %v2059_v22 = vadd.f32 0.014752088, %v2058_v54  ;;  %v16230_v54 = vld [vmem:[#allocation54_spill] sm:$0xff] }
 0x2b5   :  { %v2016_v58 = vmul.f32 3.8918573e-05, %v16229_v34  ;;  %v5172_v46 = vadd.f32 0.18741608, %v5171_v29  ;;  %v4782_v53 = vmul.f32 %v4781_v6, %v10948_v38  ;;  %v2102_v8 = vmul.f32 %v2101_v24, %v16216_v3  ;;  %vm11122_vm7 = vmor %vm4391_vm3, %vm4392_vm5 }
 0x2b6   :  { %v7663_v32 = vclamps-f32 %v2160_v21, 1.0  ;;  %v5187_v42 = vmul.f32 %v11091_v50, %v11033_v59  ;;  %v4726_v60 = vadd.f32 0.00028619796, %v4725_v26  ;;  %v4497_v15 = vadd.f32 0.001143296, %v4496_v52 }
 0x2b7   :  { %v2060_v49 = vmul.f32 %v2059_v22, %v16221_v62  ;;  %v4771_v44 = vmul.f32 %v4770_v47, %v10948_v38  ;;  %v4738_v33 = vmul.f32 %v4737_v18, %v11054_v16  ;;  %v1711_v48 = vmul.f32 0.5, %v16230_v54  ;;  %v1386_v47 = vpop.f32.mrf.mxu0 }
 0x2b8   :  { %v7087_v40 = vadd.f32 1.0, %v7663_v32  ;;  %vm11114_vm6 = vcmp.eq.f32.partialorder %v4395_v35, 8.507059e+37  ;;  %v4398_v6 = vor.u32 1.1754944e-38, %v4397_v20  ;;  %v2103_v21 = vadd.f32 0.4994258, %v2102_v8  ;;  %v11130_v32 = vpop.f32.mrf.mxu2 }
 0x2b9   :  { %v2017_v24 = vadd.f32 0.001143296, %v2016_v58  ;;  %v4783_v52 = vadd.f32 0.4994258, %v4782_v53  ;;  %v11128_v18 = vadd.f32 %v10892_v63, %v10711_v1  ;;  %v2061_v22 = vadd.f32 0.112945676, %v2060_v49 }
 0x2ba   :  { %v7215_v35 = vmul.f32 %v7087_v40, %v1711_v48  ;;  %v4394_v8 = vsel %vm11122_vm7, %v11015_v10, %v4390_v28  ;;  %v4727_v39 = vmul.f32 %v4726_v60, %v11054_v16  ;;  %v4498_v20 = vmul.f32 %v4497_v15, %v11069_v9  ;;  %v16235_v63 = vld [vmem:[#allocation17_spill] sm:$0xff] }
 0x2bb   :  { %v2104_v58 = vmul.f32 %v2103_v21, %v16216_v3  ;;  %v5173_v53 = vmul.f32 %v5172_v46, %v10845_v11  ;;  %v5188_v54 = vsub.f32 1.0, %v5187_v42  ;;  %v4772_v25 = vadd.f32 0.18741608, %v4771_v44 }
 0x2bc   :  { %v4739_v1 = vadd.f32 0.014752088, %v4738_v33  ;;  %7364 = vmatpush.msrb.mxu1 %v7215_v35  ;;  %v11140_v49 = vadd.f32 %v1386_v47, %v16235_v63  ;;  %v2062_v40 = vmul.f32 %v2061_v22, %v16221_v62  ;;  %v2018_v10 = vmul.f32 %v2017_v24, %v16229_v34  ;;  %v699_v63 = vpop.permute.xlu2 %698 }
 0x2bd   :  { %v11142_v48 = vadd.f32 1.0, %v2104_v58  ;;  %v4375_v28 = vmul.f32 %v11078_v55, %v10709_v5  ;;  %v4399_v3 = vsel %vm11114_vm6, %v4398_v6, %v4394_v8  ;;  %v4784_v11 = vmul.f32 %v4783_v52, %v10948_v38 }
 0x2be   :  { %v11152_v46 = vmul.f32 0.70710677, %v11128_v18  ;;  %v11155_v42 = vmul.f32 0.5, %v10886_v12  ;;  %v4728_v60 = vadd.f32 0.0036580483, %v4727_v39  ;;  %v5189_v33 = vmul.f32 %v11091_v50, %v5188_v54 }
 0x2bf   :  { %v4499_v15 = vadd.f32 0.014752088, %v4498_v20  ;;  %7878 = vrcp.f32 %v11142_v48  ;;  %v11158_v44 = vadd.f32 1.1283791, %v5173_v53  ;;  %v4773_v5 = vmul.f32 %v4772_v25, %v10948_v38 }
 0x2c0   :  { %16236 = vst [vmem:[#allocation29_spill] sm:$0xff] %v11155_v42  ;;  %v4740_v55 = vmul.f32 %v4739_v1, %v11054_v16  ;;  %v11163_v29 = vmul.f32 %v4399_v3, %v4375_v28  ;;  %v11166_v6 = vmul.f32 0.70710677, %v11140_v49  ;;  %v2063_v21 = vadd.f32 0.4994258, %v2062_v40  ;;  %v11184_v20 = vpop.f32.mrf.mxu2  ;;  %v16241_v1 = vld [vmem:[#allocation51_spill] sm:$0xff] }
 0x2c1   :  { %16237 = vst [vmem:[#allocation58_spill] sm:$0xff] %v11158_v44  ;;  %v2019_v12 = vadd.f32 0.014752088, %v2018_v10  ;;  %vm5191_vm8 = vweird.f32 %v11033_v59  ;;  %v11169_v24 = vadd.f32 1.0, %v4784_v11  ;;  %v11172_v26 = vmul.f32 0.5, %v11004_v14 }
 0x2c2   :  { %16238 = vst [vmem:[#allocation57_spill] sm:$0xff] %v11163_v29  ;;  %v4403_v52 = vmul.f32 %v11152_v46, %v11152_v46  ;;  %v4729_v38 = vmul.f32 %v4728_v60, %v11054_v16  ;;  %v4500_v25 = vmul.f32 %v4499_v15, %v11069_v9  ;;  %v2064_v47 = vmul.f32 %v2063_v21, %v16221_v62 }
 0x2c3   :  { %16239 = vst [vmem:[#allocation86_spill] sm:$0xff] %v11172_v26  ;;  %v2020_v35 = vmul.f32 %v2019_v12, %v16229_v34  ;;  %v11181_v22 = vadd.f32 %v11091_v50, %v5189_v33  ;;  %vm5192_vm0 = vweird.f32 %v11091_v50  ;;  %v4774_v8 = vadd.f32 1.1283791, %v4773_v5 }
 0x2c4   :  { %v4741_v39 = vadd.f32 0.112945676, %v4740_v55  ;;  %v2803_v58 = vmul.f32 %v11166_v6, %v11166_v6  ;;  %v11188_v53 = vadd.f32 1.0, %v2064_v47  ;;  %v1976_v62 = vmul.f32 3.8918573e-05, %v16241_v1  ;;  %vm11198_vm9 = vmor %vm5191_vm8, %vm5192_vm0 }
 0x2c5   :  { %16240 = vst [vmem:[#allocation55_spill] sm:$0xff] %v11181_v22  ;;  %v7879_v14 = vpop.eup %7878  ;;  %v2021_v54 = vadd.f32 0.112945676, %v2020_v35  ;;  %7880 = vrcp.f32 %v11169_v24  ;;  %v11193_v40 = vmin.f32 %v4403_v52, 16.0  ;;  %v16242_v28 = vmov 0 }
 0x2c6   :  { %v2107_v10 = vmul.f32 %v7879_v14, %v11142_v48  ;;  %v16243_v28 = vsel %vm11198_vm9, 4294967295, %v16242_v28  ;;  %v4730_v11 = vadd.f32 0.05243302, %v4729_v38  ;;  %v4501_v60 = vadd.f32 0.112945676, %v4500_v25 }
 0x2c7   :  { %16244 = vst [vmem:[#allocation56_spill] sm:$0xff] %v16243_v28  ;;  %7882 = vrcp.f32 %v11188_v53  ;;  %v11209_v33 = vmul.f32 %v4774_v8, %v10908_v2  ;;  %v4742_v5 = vmul.f32 %v4741_v39, %v11054_v16  ;;  %v11212_v21 = vmin.f32 %v2803_v58, 16.0 }
 0x2c8   :  { %v2108_v55 = vsub.f32 1.0, %v2107_v10  ;;  %v2117_v12 = vand.u32 2147483648, %v11142_v48  ;;  %v2022_v52 = vmul.f32 %v2021_v54, %v16229_v34  ;;  %v1977_v38 = vadd.f32 0.001143296, %v1976_v62 }
 0x2c9   :  { %16245 = vst [vmem:[#allocation85_spill] sm:$0xff] %v11212_v21  ;;  %v4416_v25 = vmul.f32 3.8918573e-05, %v11193_v40  ;;  %vm2112_vm10 = vweird.f32 %v7879_v14  ;;  %v2115_v35 = vand.u32 2147483647, %v11142_v48  ;;  %v4731_v2 = vmul.f32 %v4730_v11, %v11054_v16 }
 0x2ca   :  { %v2109_v47 = vmul.f32 %v7879_v14, %v2108_v55  ;;  %v4502_v8 = vmul.f32 %v4501_v60, %v11069_v9  ;;  %v2023_v39 = vadd.f32 0.4994258, %v2022_v52  ;;  %v4797_v10 = vand.u32 2147483648, %v11169_v24 }
 0x2cb   :  { %v11221_v58 = vpop.eup %7880  ;;  %v4743_v3 = vadd.f32 0.4994258, %v4742_v5  ;;  %vm2111_vm11 = vweird.f32 %v11142_v48  ;;  %v2805_v55 = vmul.f32 2.1237322e-06, %v11212_v21  ;;  %v2118_v15 = vor.u32 1.1754944e-38, %v2117_v12  ;;  %v1572_v5 = vpop.f32.mrf.mxu2 }
 0x2cc   :  { %v2110_v54 = vadd.f32 %v7879_v14, %v2109_v47  ;;  %vm2113_vm12 = vmor %vm2111_vm11, %vm2112_vm10  ;;  %v2024_v11 = vmul.f32 %v2023_v39, %v16229_v34  ;;  %v1978_v60 = vmul.f32 %v1977_v38, %v16241_v1  ;;  %v4417_v52 = vadd.f32 0.001143296, %v4416_v25  ;;  %v16247_v38 = vld [vmem:[#allocation84_spill] sm:$0xff] }
 0x2cd   :  { %v11225_v62 = vpop.eup %7882  ;;  %v4485_v44 = vmul.f32 2.1237322e-06, %v11069_v9  ;;  %vm2116_vm13 = vcmp.eq.f32.partialorder %v2115_v35, 8.507059e+37  ;;  %v4732_v47 = vadd.f32 0.18741608, %v4731_v2  ;;  %v4787_v59 = vmul.f32 %v11221_v58, %v11169_v24 }
 0x2ce   :  { %v2114_v22 = vsel %vm2113_vm12, %v7879_v14, %v2110_v54  ;;  %v4503_v50 = vadd.f32 0.4994258, %v4502_v8  ;;  %v2067_v28 = vmul.f32 %v11225_v62, %v11188_v53  ;;  %v4744_v12 = vmul.f32 %v4743_v3, %v11054_v16 }
 0x2cf   :  { %v2119_v48 = vsel %vm2116_vm13, %v2118_v15, %v2114_v22  ;;  %v11236_v34 = vadd.f32 %v1572_v5, %v699_v63  ;;  %v4405_v39 = vmul.f32 2.1237322e-06, %v11193_v40  ;;  %v11240_v35 = vadd.f32 1.0, %v2024_v11 }
 0x2d0   :  { %v2120_v25 = vmul.f32 %v2119_v48, %v16247_v38  ;;  %v2068_v14 = vsub.f32 1.0, %v2067_v28  ;;  %v1979_v2 = vadd.f32 0.014752088, %v1978_v60  ;;  %v2806_v8 = vadd.f32 0.00028619796, %v2805_v55  ;;  %v16248_v28 = vld [vmem:[#allocation52_spill] sm:$0xff] }
 0x2d1   :  { %16246 = vst [vmem:[#allocation53_spill] sm:$0xff] %v11236_v34  ;;  %v4418_v22 = vmul.f32 %v4417_v52, %v11193_v40  ;;  %v4486_v15 = vadd.f32 0.00028619796, %v4485_v44  ;;  %v4504_v26 = vmul.f32 %v4503_v50, %v11069_v9  ;;  %vm2072_vm14 = vweird.f32 %v11225_v62 }
 0x2d2   :  { %v7662_v54 = vclamps-f32 %v2120_v25, 1.0  ;;  %v2069_v42 = vmul.f32 %v11225_v62, %v2068_v14  ;;  %7884 = vrcp.f32 %v11240_v35  ;;  %v11248_v63 = vmul.f32 0.70710677, %v11236_v34 }
 0x2d3   :  { %v1710_v3 = vmul.f32 0.5, %v16248_v28  ;;  %v2077_v55 = vand.u32 2147483648, %v11188_v53  ;;  %vm2071_vm15 = vweird.f32 %v11188_v53  ;;  %v2075_v50 = vand.u32 2147483647, %v11188_v53 }
 0x2d4   :  { %v7086_v11 = vadd.f32 1.0, %v7662_v54  ;;  %v2070_v60 = vadd.f32 %v11225_v62, %v2069_v42  ;;  %v1980_v44 = vmul.f32 %v1979_v2, %v16241_v1  ;;  %v4788_v52 = vsub.f32 1.0, %v4787_v59  ;;  %vm11260_vm1 = vmor %vm2071_vm15, %vm2072_vm14 }
 0x2d5   :  { %v4733_v5 = vmul.f32 %v4732_v47, %v11054_v16  ;;  %v11258_v48 = vmul.f32 0.5, %v11140_v49  ;;  %v4419_v14 = vadd.f32 0.014752088, %v4418_v22  ;;  %v4487_v42 = vmul.f32 %v4486_v15, %v11069_v9  ;;  %v649_v47 = vpop.permute.xlu1 %648 }
 0x2d6   :  { %v7214_v38 = vmul.f32 %v7086_v11, %v1710_v3  ;;  %v11265_v54 = vadd.f32 1.0, %v4504_v26  ;;  %v2074_v53 = vsel %vm11260_vm1, %v11225_v62, %v2070_v60  ;;  %v11270_v59 = vor.u32 1.1754944e-38, %v4797_v10  ;;  %v16252_v60 = vld [vmem:[#allocation83_spill] sm:$0xff] }
 0x2d7   :  { %16249 = vst [vmem:[#allocation54_spill] sm:$0xff] %v11258_v48  ;;  %v11272_v16 = vadd.f32 1.0, %v4744_v12  ;;  %v2807_v49 = vmul.f32 %v2806_v8, %v11212_v21  ;;  %v2078_v2 = vor.u32 1.1754944e-38, %v2077_v55  ;;  %v4406_v3 = vadd.f32 0.00028619796, %v4405_v39 }
 0x2d8   :  { %7365 = vmatpush.msrb.mxu1 %v7214_v38  ;;  %v7885_v28 = vpop.eup %7884  ;;  %v5283_v22 = vmul.f32 %v11248_v63, %v11248_v63  ;;  %vm2076_vm2 = vcmp.eq.f32.partialorder %v2075_v50, 8.507059e+37  ;;  %v1981_v26 = vadd.f32 0.112945676, %v1980_v44  ;;  %v4789_v15 = vmul.f32 %v11221_v58, %v4788_v52 }
 0x2d9   :  { %vm4792_vm3 = vweird.f32 %v11221_v58  ;;  %v4734_v10 = vadd.f32 1.1283791, %v4733_v5  ;;  %v2079_v62 = vsel %vm2076_vm2, %v2078_v2, %v2074_v53  ;;  %v2027_v12 = vmul.f32 %v7885_v28, %v11240_v35  ;;  %v16253_v2 = vld [vmem:[#allocation49_spill] sm:$0xff] }
 0x2da   :  { %v4420_v8 = vmul.f32 %v4419_v14, %v11193_v40  ;;  %v11282_v11 = vadd.f32 %v10321_v0, %v649_v47  ;;  %v4488_v55 = vadd.f32 0.0036580483, %v4487_v42  ;;  %7886 = vrcp.f32 %v11265_v54 }
 0x2db   :  { %vm4791_vm4 = vweird.f32 %v11169_v24  ;;  %7888 = vrcp.f32 %v11272_v16  ;;  %v2808_v39 = vadd.f32 0.0036580483, %v2807_v49  ;;  %v2080_v50 = vmul.f32 %v2079_v62, %v16252_v60 }
 0x2dc   :  { %v2028_v44 = vsub.f32 1.0, %v2027_v12  ;;  %v4407_v52 = vmul.f32 %v4406_v3, %v11193_v40  ;;  %v11289_v5 = vmin.f32 %v5283_v22, 16.0  ;;  %v2037_v38 = vand.u32 2147483648, %v11240_v35  ;;  %vm11328_vm10 = vmor %vm4791_vm4, %vm4792_vm3 }
 0x2dd   :  { %v1982_v0 = vmul.f32 %v1981_v26, %v16241_v1  ;;  %v7661_v25 = vclamps-f32 %v2080_v50, 1.0  ;;  %vm2032_vm5 = vweird.f32 %v7885_v28  ;;  %v2035_v42 = vand.u32 2147483647, %v11240_v35  ;;  %v644_v26 = vpop.permute.xlu0 %643 }
 0x2de   :  { %v2029_v14 = vmul.f32 %v7885_v28, %v2028_v44  ;;  %v4421_v53 = vadd.f32 0.112945676, %v4420_v8  ;;  %v11295_v47 = vmul.f32 0.70710677, %v11282_v11  ;;  %v4489_v49 = vmul.f32 %v4488_v55, %v11069_v9 }
 0x2df   :  { %v1709_v62 = vmul.f32 0.5, %v16253_v2  ;;  %v16254_v3 = vand.u32 2147483647, %v11169_v24  ;;  %v7085_v12 = vadd.f32 1.0, %v7661_v25  ;;  %vm2031_vm7 = vweird.f32 %v11240_v35 }
 0x2e0   :  { %v2030_v60 = vadd.f32 %v7885_v28, %v2029_v14  ;;  %v1983_v50 = vadd.f32 0.4994258, %v1982_v0  ;;  %v11306_v8 = vpop.eup %7886  ;;  %v4790_v44 = vadd.f32 %v11221_v58, %v4789_v15  ;;  %v2809_v55 = vmul.f32 %v2808_v39, %v11212_v21  ;;  %vm2033_vm8 = vmor %vm2031_vm7, %vm2032_vm5  ;;  %v16257_v14 = vld [vmem:[#allocation82_spill] sm:$0xff] }
 0x2e1   :  { %vm11301_vm6 = vcmp.eq.f32.partialorder %v16254_v3, 8.507059e+37  ;;  %v4408_v34 = vadd.f32 0.0036580483, %v4407_v52  ;;  %v2038_v2 = vor.u32 1.1754944e-38, %v2037_v38  ;;  %v11311_v3 = vpop.eup %7888  ;;  %v5296_v48 = vmul.f32 3.8918573e-05, %v11289_v5 }
 0x2e2   :  { %v7213_v61 = vmul.f32 %v7085_v12, %v1709_v62  ;;  %v2034_v25 = vsel %vm2033_vm8, %v7885_v28, %v2030_v60  ;;  %vm2036_vm0 = vcmp.eq.f32.partialorder %v2035_v42, 8.507059e+37  ;;  %v4422_v35 = vmul.f32 %v4421_v53, %v11193_v40 }
 0x2e3   :  { %v4883_v0 = vmul.f32 %v11295_v47, %v11295_v47  ;;  %v11318_v15 = vadd.f32 %v10270_v31, %v644_v26  ;;  %v2039_v39 = vsel %vm2036_vm0, %v2038_v2, %v2034_v25  ;;  %v4490_v52 = vadd.f32 0.05243302, %v4489_v49  ;;  %v759_v26 = vpop.permute.xlu2 %758 }
 0x2e4   :  { %v4507_v38 = vmul.f32 %v11306_v8, %v11265_v54  ;;  %7366 = vmatpush.msrb.mxu1 %v7213_v61  ;;  %v2040_v19 = vmul.f32 %v2039_v39, %v16257_v14  ;;  %v1984_v62 = vmul.f32 %v1983_v50, %v16241_v1  ;;  %v4747_v31 = vmul.f32 %v11311_v3, %v11272_v16 }
 0x2e5   :  { %v2810_v53 = vadd.f32 0.05243302, %v2809_v55  ;;  %v11336_v61 = vmul.f32 0.5, %v11128_v18  ;;  %v4794_v1 = vsel %vm11328_vm10, %v11221_v58, %v4790_v44  ;;  %v4409_v49 = vmul.f32 %v4408_v34, %v11193_v40 }
 0x2e6   :  { %v5297_v24 = vadd.f32 0.001143296, %v5296_v48  ;;  %v7660_v12 = vclamps-f32 %v2040_v19, 1.0  ;;  %v11343_v60 = vmul.f32 %v4734_v10, %v11023_v51  ;;  %v4423_v50 = vadd.f32 0.4994258, %v4422_v35  ;;  %v16261_v48 = vld [vmem:[#allocation27_spill] sm:$0xff] }
 0x2e7   :  { %16260 = vst [vmem:[#allocation17_spill] sm:$0xff] %v11336_v61  ;;  %v11345_v2 = vmin.f32 %v4883_v0, 16.0  ;;  %v11348_v55 = vmul.f32 0.70710677, %v11318_v15  ;;  %v4757_v18 = vand.u32 2147483648, %v11272_v16  ;;  %v4491_v25 = vmul.f32 %v4490_v52, %v11069_v9  ;;  %v16262_v0 = vld [vmem:[#allocation48_spill] sm:$0xff] }
 0x2e8   :  { %v4508_v39 = vsub.f32 1.0, %v4507_v38  ;;  %v11352_v58 = vadd.f32 1.0, %v1984_v62  ;;  %v4799_v19 = vsel %vm11301_vm6, %v11270_v59, %v4794_v1  ;;  %v4748_v34 = vsub.f32 1.0, %v4747_v31 }
 0x2e9   :  { %v2811_v51 = vmul.f32 %v2810_v53, %v11212_v21  ;;  %v11359_v10 = vadd.f32 %v16261_v48, %v759_v26  ;;  %v4410_v44 = vadd.f32 0.05243302, %v4409_v49  ;;  %v5298_v35 = vmul.f32 %v5297_v24, %v11289_v5 }
 0x2ea   :  { %v1708_v14 = vmul.f32 0.5, %v16262_v0  ;;  %v7084_v28 = vadd.f32 1.0, %v7660_v12  ;;  %vm4751_vm11 = vweird.f32 %v11272_v16  ;;  %v4424_v52 = vmul.f32 %v4423_v50, %v11193_v40 }
 0x2eb   :  { %v4896_v38 = vmul.f32 3.8918573e-05, %v11345_v2  ;;  %v4843_v59 = vmul.f32 %v11348_v55, %v11348_v55  ;;  %v11370_v22 = vadd.f32 %v10944_v36, %v10003_v45  ;;  %v4492_v62 = vadd.f32 0.18741608, %v4491_v25 }
 0x2ec   :  { %v4509_v31 = vmul.f32 %v11306_v8, %v4508_v39  ;;  %v7212_v53 = vmul.f32 %v7084_v28, %v1708_v14  ;;  %7890 = vrcp.f32 %v11352_v58  ;;  %v4749_v1 = vmul.f32 %v11311_v3, %v4748_v34 }
 0x2ed   :  { %v11375_v49 = vor.u32 1.1754944e-38, %v4757_v18  ;;  %v2812_v24 = vadd.f32 0.18741608, %v2811_v51  ;;  %v11378_v26 = vmul.f32 0.70710677, %v11359_v10  ;;  %v11381_v12 = vmul.f32 %v4799_v19, %v11209_v33 }
 0x2ee   :  { %vm4752_vm12 = vweird.f32 %v11311_v3  ;;  %v4411_v45 = vmul.f32 %v4410_v44, %v11193_v40  ;;  %v5299_v36 = vadd.f32 0.014752088, %v5298_v35  ;;  %7367 = vmatpush.msrb.mxu1 %v7212_v53  ;;  %v11385_v50 = vadd.f32 1.0, %v4424_v52 }
 0x2ef   :  { %16263 = vst [vmem:[#allocation51_spill] sm:$0xff] %v11381_v12  ;;  %v5285_v25 = vmul.f32 2.1237322e-06, %v11289_v5  ;;  %v11388_v39 = vmin.f32 %v4843_v59, 16.0  ;;  %v11391_v18 = vmul.f32 0.70710677, %v11370_v22  ;;  %v4493_v51 = vmul.f32 %v4492_v62, %v11069_v9  ;;  %vm11422_vm1 = vmor %vm4751_vm11, %vm4752_vm12 }
 0x2f0   :  { %v4897_v34 = vadd.f32 0.001143296, %v4896_v38  ;;  %v4510_v33 = vadd.f32 %v11306_v8, %v4509_v31  ;;  %vm4512_vm13 = vweird.f32 %v11306_v8  ;;  %v11397_v19 = vadd.f32 %v11311_v3, %v4749_v1  ;;  %v1389_v38 = vpop.f32.mrf.mxu0 }
 0x2f1   :  { %v2813_v48 = vmul.f32 %v2812_v24, %v11212_v21  ;;  %v5763_v44 = vmul.f32 %v11378_v26, %v11378_v26  ;;  %v4517_v35 = vand.u32 2147483648, %v11265_v54  ;;  %v4412_v14 = vadd.f32 0.18741608, %v4411_v45 }
 0x2f2   :  { %v11403_v0 = vpop.eup %7890  ;;  %v5300_v28 = vmul.f32 %v5299_v36, %v11289_v5  ;;  %vm4511_vm14 = vweird.f32 %v11265_v54  ;;  %v4515_v9 = vand.u32 2147483647, %v11265_v54  ;;  %7892 = vrcp.f32 %v11385_v50 }
 0x2f3   :  { %v4856_v52 = vmul.f32 3.8918573e-05, %v11388_v39  ;;  %v4443_v59 = vmul.f32 %v11391_v18, %v11391_v18  ;;  %vm11412_vm15 = vmor %vm4511_vm14, %vm4512_vm13  ;;  %v1987_v31 = vmul.f32 %v11403_v0, %v11352_v58  ;;  %v5286_v53 = vadd.f32 0.00028619796, %v5285_v25  ;;  %v16268_v25 = vld [vmem:[#allocation16_spill] sm:$0xff] }
 0x2f4   :  { %v4898_v1 = vmul.f32 %v4897_v34, %v11345_v2  ;;  %v4494_v24 = vadd.f32 1.1283791, %v4493_v51  ;;  %v4514_v45 = vsel %vm11412_vm15, %v11306_v8, %v4510_v33  ;;  %v4754_v36 = vsel %vm11422_vm1, %v11311_v3, %v11397_v19 }
 0x2f5   :  { %v11434_v42 = vmin.f32 %v5763_v44, 16.0  ;;  %v4518_v12 = vor.u32 1.1754944e-38, %v4517_v35  ;;  %v1988_v21 = vsub.f32 1.0, %v1987_v31  ;;  %v11436_v30 = vadd.f32 1.1283791, %v2813_v48 }
 0x2f6   :  { %v5301_v27 = vadd.f32 0.112945676, %v5300_v28  ;;  %v11439_v17 = vadd.f32 %v1389_v38, %v16268_v25  ;;  %vm4516_vm2 = vcmp.eq.f32.partialorder %v4515_v9, 8.507059e+37  ;;  %v16269_v34 = vand.u32 2147483647, %v11272_v16  ;;  %v7347_v16 = vld [vmem:[%s15816_s4] sm:$0xff]  ;;  %v664_v25 = vpop.permute.xlu1 %663 }
 0x2f7   :  { %v4413_v51 = vmul.f32 %v4412_v14, %v11193_v40  ;;  %v4857_v3 = vadd.f32 0.001143296, %v4856_v52  ;;  %v11448_v33 = vmin.f32 %v4443_v59, 16.0  ;;  %v4519_v19 = vsel %vm4516_vm2, %v4518_v12, %v4514_v45  ;;  %7350 = vperm.xlu2 %7803, %v7347_v16   ;;  %v249_v14 = vld [vmem:[%s15814_s2 + $0x300] sm:$0xff] }
 0x2f8   :  { %vm11443_vm3 = vcmp.eq.f32.partialorder %v16269_v34, 8.507059e+37  ;;  %v5287_v48 = vmul.f32 %v5286_v53, %v11289_v5  ;;  %v4885_v44 = vmul.f32 2.1237322e-06, %v11345_v2  ;;  %v4899_v35 = vadd.f32 0.014752088, %v4898_v1  ;;  %v11456_v9 = vpop.eup %7892  ;;  %763 = vperm.xlu1 %7802, %v249_v14  }
 0x2f9   :  { %v4495_v28 = vmul.f32 %v4494_v24, %v11036_v57  ;;  %v5776_v38 = vmul.f32 3.8918573e-05, %v11434_v42  ;;  %v1989_v40 = vmul.f32 %v11403_v0, %v1988_v21  ;;  %vm1992_vm4 = vweird.f32 %v11403_v0  ;;  %v250_v57 = vld [vmem:[%s15814_s2 + $0x308] sm:$0xff] }
 0x2fa   :  { %v1997_v12 = vand.u32 2147483648, %v11352_v58  ;;  %v5302_v52 = vmul.f32 %v5301_v27, %v11289_v5  ;;  %v11470_v59 = vmul.f32 0.70710677, %v11439_v17  ;;  %v1995_v21 = vand.u32 2147483647, %v11352_v58  ;;  %768 = vperm.xlu0 %7801, %v250_v57  }
 0x2fb   :  { %v4520_v62 = vmul.f32 %v4519_v19, %v4495_v28  ;;  %v4858_v31 = vmul.f32 %v4857_v3, %v11388_v39  ;;  %v4456_v54 = vmul.f32 3.8918573e-05, %v11448_v33  ;;  %v1990_v53 = vadd.f32 %v11403_v0, %v1989_v40 }
 0x2fc   :  { %vm1991_vm5 = vweird.f32 %v11352_v58  ;;  %v4427_v1 = vmul.f32 %v11456_v9, %v11385_v50  ;;  %v5288_v27 = vadd.f32 0.0036580483, %v5287_v48  ;;  %v4886_v24 = vadd.f32 0.00028619796, %v4885_v44 }
 0x2fd   :  { %v4845_v45 = vmul.f32 2.1237322e-06, %v11388_v39  ;;  %vm1993_vm6 = vmor %vm1991_vm5, %vm1992_vm4  ;;  %v4900_v34 = vmul.f32 %v4899_v35, %v11345_v2  ;;  %v5777_v3 = vadd.f32 0.001143296, %v5776_v38  ;;  %v1998_v28 = vor.u32 1.1754944e-38, %v1997_v12 }
 0x2fe   :  { %v1994_v19 = vsel %vm1993_vm6, %v11403_v0, %v1990_v53  ;;  %v5303_v16 = vadd.f32 0.4994258, %v5302_v52  ;;  %v2843_v58 = vmul.f32 %v11470_v59, %v11470_v59  ;;  %v7722_v40 = vclamps-f32 %v4520_v62, 1.0  ;;  %v16272_v0 = vld [vmem:[#allocation75_spill] sm:$0xff] }
 0x2ff   :  { %vm1996_vm7 = vcmp.eq.f32.partialorder %v1995_v21, 8.507059e+37  ;;  %v4859_v48 = vadd.f32 0.014752088, %v4858_v31  ;;  %v4457_v44 = vadd.f32 0.001143296, %v4456_v54  ;;  %v11487_v14 = vadd.f32 %v10532_v23, %v664_v25 }
 0x300   :  { %v1999_v57 = vsel %vm1996_vm7, %v1998_v28, %v1994_v19  ;;  %v4759_v35 = vsel %vm11443_vm3, %v11375_v49, %v4754_v36  ;;  %v4414_v38 = vadd.f32 1.1283791, %v4413_v51  ;;  %v4846_v29 = vadd.f32 0.00028619796, %v4845_v45  ;;  %v11498_v19 = vpop.f32.mrf.mxu2 }
 0x301   :  { %v2000_v12 = vmul.f32 %v1999_v57, %v16272_v0  ;;  %v5289_v52 = vmul.f32 %v5288_v27, %v11289_v5  ;;  %v4887_v53 = vmul.f32 %v4886_v24, %v11345_v2  ;;  %v4901_v62 = vadd.f32 0.112945676, %v4900_v34 }
 0x302   :  { %v5778_v21 = vmul.f32 %v5777_v3, %v11434_v42  ;;  %v4428_v31 = vsub.f32 1.0, %v4427_v1  ;;  %v11496_v54 = vmin.f32 %v2843_v58, 16.0  ;;  %v7146_v23 = vadd.f32 1.0, %v7722_v40  ;;  %v16274_v1 = vld [vmem:[#allocation47_spill] sm:$0xff] }
 0x303   :  { %v7659_v25 = vclamps-f32 %v2000_v12, 1.0  ;;  %v5304_v49 = vmul.f32 %v5303_v16, %v11289_v5  ;;  %v4860_v36 = vmul.f32 %v4859_v48, %v11388_v39  ;;  %v4458_v8 = vmul.f32 %v4457_v44, %v11448_v33 }
 0x304   :  { %16273 = vst [vmem:[#allocation84_spill] sm:$0xff] %v11496_v54  ;;  %v11504_v51 = vmul.f32 0.70710677, %v11487_v14  ;;  %v4847_v27 = vmul.f32 %v4846_v29, %v11388_v39  ;;  %v1770_v24 = vmul.f32 0.5, %v11019_v41  ;;  %v1707_v45 = vmul.f32 0.5, %v16274_v1  ;;  %v7339_v29 = vld [vmem:[%s15815_s3] sm:$0xff] }
 0x305   :  { %v7083_v34 = vadd.f32 1.0, %v7659_v25  ;;  %v11510_v3 = vmul.f32 %v4759_v35, %v11343_v60  ;;  %v4888_v28 = vadd.f32 0.0036580483, %v4887_v53  ;;  %v4902_v16 = vmul.f32 %v4901_v62, %v11345_v2  ;;  %v679_v35 = vpop.permute.xlu1 %678 }
 0x306   :  { %v5779_v58 = vadd.f32 0.014752088, %v5778_v21  ;;  %v5290_v40 = vadd.f32 0.05243302, %v5289_v52  ;;  %v2845_v48 = vmul.f32 2.1237322e-06, %v11496_v54  ;;  %v7274_v44 = vmul.f32 %v7146_v23, %v1770_v24 }
 0x307   :  { %16275 = vst [vmem:[#allocation52_spill] sm:$0xff] %v11510_v3  ;;  %v7211_v57 = vmul.f32 %v7083_v34, %v1707_v45  ;;  %v11517_v41 = vadd.f32 1.0, %v5304_v49  ;;  %v4861_v0 = vadd.f32 0.112945676, %v4860_v36  ;;  %v4459_v12 = vadd.f32 0.014752088, %v4458_v8 }
 0x308   :  { %v5003_v60 = vmul.f32 %v11504_v51, %v11504_v51  ;;  %v11523_v53 = vmul.f32 %v11436_v30, %v11166_v6  ;;  %v11526_v52 = vmul.f32 %v4414_v38, %v11152_v46  ;;  %v4429_v62 = vmul.f32 %v11456_v9, %v4428_v31  ;;  %v659_v6 = vpop.permute.xlu0 %658 }
 0x309   :  { %v4848_v21 = vadd.f32 0.0036580483, %v4847_v27  ;;  %7368 = vmatpush.msrb.mxu1 %v7211_v57  ;;  %v4435_v23 = vand.u32 2147483647, %v11385_v50  ;;  %v4889_v25 = vmul.f32 %v4888_v28, %v11345_v2  ;;  %v4903_v49 = vadd.f32 0.4994258, %v4902_v16  ;;  %v11546_v28 = vpop.f32.mrf.mxu2 }
 0x30a   :  { %16276 = vst [vmem:[#allocation83_spill] sm:$0xff] %v11523_v53  ;;  %v5780_v36 = vmul.f32 %v5779_v58, %v11434_v42  ;;  %7369 = vmatmul.f32.vlgmr.msrb.gmra.mxu1 %v7339_v29  ;;  %v5291_v8 = vmul.f32 %v5290_v40, %v11289_v5  ;;  %v2846_v24 = vadd.f32 0.00028619796, %v2845_v48  ;;  %v4445_v30 = vmul.f32 2.1237322e-06, %v11448_v33 }
 0x30b   :  { %v11535_v46 = vadd.f32 %v10693_v13, %v679_v35  ;;  %7413 = vmatpush.msra.mxu1 %v7274_v44  ;;  %7894 = vrcp.f32 %v11517_v41  ;;  %v4862_v38 = vmul.f32 %v4861_v0, %v11388_v39  ;;  %v4460_v31 = vmul.f32 %v4459_v12, %v11448_v33 }
 0x30c   :  { %v11540_v27 = vmin.f32 %v5003_v60, 16.0  ;;  %v4430_v1 = vadd.f32 %v11456_v9, %v4429_v62  ;;  %vm4432_vm8 = vweird.f32 %v11456_v9  ;;  %v4437_v45 = vand.u32 2147483648, %v11385_v50 }
 0x30d   :  { %v4849_v34 = vmul.f32 %v4848_v21, %v11388_v39  ;;  %vm11548_vm0 = vcmp.eq.f32.partialorder %v4435_v23, 8.507059e+37  ;;  %v4890_v16 = vadd.f32 0.05243302, %v4889_v25  ;;  %v4904_v58 = vmul.f32 %v4903_v49, %v11345_v2 }
 0x30e   :  { %v5781_v40 = vadd.f32 0.112945676, %v5780_v36  ;;  %v11554_v48 = vadd.f32 %v10497_v7, %v659_v6  ;;  %v5292_v44 = vadd.f32 0.18741608, %v5291_v8  ;;  %v2847_v57 = vmul.f32 %v2846_v24, %v11496_v54 }
 0x30f   :  { %v4446_v29 = vadd.f32 0.00028619796, %v4445_v30  ;;  %v11558_v0 = vmul.f32 0.70710677, %v11535_v46  ;;  %vm4431_vm10 = vweird.f32 %v11385_v50  ;;  %v4863_v12 = vadd.f32 0.4994258, %v4862_v38 }
 0x310   :  { %v4461_v60 = vadd.f32 0.112945676, %v4460_v31  ;;  %v5016_v35 = vmul.f32 3.8918573e-05, %v11540_v27  ;;  %v4438_v62 = vor.u32 1.1754944e-38, %v4437_v45  ;;  %v11563_v21 = vmul.f32 0.5, %v11282_v11  ;;  %vm11572_vm11 = vmor %vm4431_vm10, %vm4432_vm8 }
 0x311   :  { %v11566_v7 = vmul.f32 0.5, %v11318_v15  ;;  %v4850_v23 = vadd.f32 0.05243302, %v4849_v34  ;;  %v11568_v25 = vpop.eup %7894  ;;  %v4891_v50 = vmul.f32 %v4890_v16, %v11345_v2  ;;  %v11577_v36 = vadd.f32 1.0, %v4904_v58 }
 0x312   :  { %16279 = vst [vmem:[#allocation49_spill] sm:$0xff] %v11563_v21  ;;  %v5782_v8 = vmul.f32 %v5781_v40, %v11434_v42  ;;  %v11581_v11 = vmul.f32 0.70710677, %v11554_v48  ;;  %v4434_v15 = vsel %vm11572_vm11, %v11456_v9, %v4430_v1  ;;  %v5293_v24 = vmul.f32 %v5292_v44, %v11289_v5 }
 0x313   :  { %16280 = vst [vmem:[#allocation82_spill] sm:$0xff] %v11566_v7  ;;  %v2848_v30 = vadd.f32 0.0036580483, %v2847_v57  ;;  %v5123_v6 = vmul.f32 %v11558_v0, %v11558_v0  ;;  %v4864_v38 = vmul.f32 %v4863_v12, %v11388_v39  ;;  %v4447_v31 = vmul.f32 %v4446_v29, %v11448_v33 }
 0x314   :  { %v4462_v45 = vmul.f32 %v4461_v60, %v11448_v33  ;;  %v5017_v34 = vadd.f32 0.001143296, %v5016_v35  ;;  %v5307_v16 = vmul.f32 %v11568_v25, %v11517_v41  ;;  %v4851_v58 = vmul.f32 %v4850_v23, %v11388_v39  ;;  %v11607_v35 = vpop.f32.mrf.mxu2 }
 0x315   :  { %v11596_v9 = vmul.f32 0.5, %v11439_v17  ;;  %v5765_v5 = vmul.f32 2.1237322e-06, %v11434_v42  ;;  %v4892_v1 = vadd.f32 0.18741608, %v4891_v50  ;;  %7896 = vrcp.f32 %v11577_v36  ;;  %16284 = vst [vmem:[#allocation48_spill] sm:$0xff] %v11607_v35 }
 0x316   :  { %v5783_v40 = vadd.f32 0.4994258, %v5782_v8  ;;  %v4963_v44 = vmul.f32 %v11581_v11, %v11581_v11  ;;  %v4439_v57 = vsel %vm11548_vm0, %v4438_v62, %v4434_v15  ;;  %v5294_v29 = vadd.f32 1.1283791, %v5293_v24 }
 0x317   :  { %16283 = vst [vmem:[#allocation27_spill] sm:$0xff] %v11596_v9  ;;  %v2849_v12 = vmul.f32 %v2848_v30, %v11496_v54  ;;  %v11605_v60 = vmin.f32 %v5123_v6, 16.0  ;;  %v11609_v17 = vadd.f32 1.0, %v4864_v38  ;;  %v4448_v23 = vadd.f32 0.0036580483, %v4447_v31 }
 0x318   :  { %v4463_v49 = vadd.f32 0.4994258, %v4462_v45  ;;  %v5018_v50 = vmul.f32 %v5017_v34, %v11540_v27  ;;  %v5308_v8 = vsub.f32 1.0, %v5307_v16  ;;  %v4852_v7 = vadd.f32 0.18741608, %v4851_v58 }
 0x319   :  { %v11613_v3 = vmul.f32 0.5, %v11370_v22  ;;  %v5766_v13 = vadd.f32 0.00028619796, %v5765_v5  ;;  %v5315_v62 = vand.u32 2147483647, %v11517_v41  ;;  %v4893_v15 = vmul.f32 %v4892_v1, %v11345_v2 }
 0x31a   :  { %v5784_v24 = vmul.f32 %v5783_v40, %v11434_v42  ;;  %v11618_v30 = vmin.f32 %v4963_v44, 16.0  ;;  %v11621_v6 = vmul.f32 %v4439_v57, %v11526_v52  ;;  %v5317_v38 = vand.u32 2147483648, %v11517_v41 }
 0x31b   :  { %16285 = vst [vmem:[#allocation16_spill] sm:$0xff] %v11613_v3  ;;  %v2850_v31 = vadd.f32 0.05243302, %v2849_v12  ;;  %v5136_v45 = vmul.f32 3.8918573e-05, %v11605_v60  ;;  %v11625_v34 = vpop.eup %7896  ;;  %7898 = vrcp.f32 %v11609_v17  ;;  %v4449_v22 = vmul.f32 %v4448_v23, %v11448_v33 }
 0x31c   :  { %16286 = vst [vmem:[#allocation75_spill] sm:$0xff] %v11621_v6  ;;  %v4464_v2 = vmul.f32 %v4463_v49, %v11448_v33  ;;  %v5019_v16 = vadd.f32 0.014752088, %v5018_v50  ;;  %v11631_v58 = vmul.f32 %v5294_v29, %v11248_v63  ;;  %v5309_v52 = vmul.f32 %v11568_v25, %v5308_v8  ;;  %v674_v49 = vpop.permute.xlu0 %673 }
 0x31d   :  { %v4853_v5 = vmul.f32 %v4852_v7, %v11388_v39  ;;  %v5767_v1 = vmul.f32 %v5766_v13, %v11434_v42  ;;  %vm5311_vm12 = vweird.f32 %v11517_v41  ;;  %v4894_v40 = vadd.f32 1.1283791, %v4893_v15 }
 0x31e   :  { %16287 = vst [vmem:[#allocation47_spill] sm:$0xff] %v11631_v58  ;;  %v11637_v44 = vadd.f32 1.0, %v5784_v24  ;;  %v4976_v57 = vmul.f32 3.8918573e-05, %v11618_v30  ;;  %vm11640_vm13 = vcmp.eq.f32.partialorder %v5315_v62, 8.507059e+37  ;;  %v5318_v23 = vor.u32 1.1754944e-38, %v5317_v38  ;;  %v11654_v38 = vpop.f32.mrf.mxu2 }
 0x31f   :  { %v4907_v63 = vmul.f32 %v11625_v34, %v11577_v36  ;;  %v5137_v29 = vadd.f32 0.001143296, %v5136_v45  ;;  %v2851_v39 = vmul.f32 %v2850_v31, %v11496_v54  ;;  %v4450_v7 = vadd.f32 0.05243302, %v4449_v22  ;;  %16290 = vst [vmem:[#allocation105_spill] sm:$0xff] %v11654_v38 }
 0x320   :  { %v11647_v50 = vadd.f32 1.0, %v4464_v2  ;;  %v5020_v8 = vmul.f32 %v5019_v16, %v11540_v27  ;;  %v5310_v13 = vadd.f32 %v11568_v25, %v5309_v52  ;;  %vm5312_vm14 = vweird.f32 %v11568_v25 }
 0x321   :  { %v4854_v62 = vadd.f32 1.1283791, %v4853_v5  ;;  %v5768_v15 = vadd.f32 0.0036580483, %v5767_v1  ;;  %v11652_v24 = vpop.eup %7898  ;;  %v11657_v45 = vmul.f32 %v4894_v40, %v11295_v47  ;;  %7900 = vrcp.f32 %v11637_v44  ;;  %vm11668_vm15 = vmor %vm5311_vm12, %vm5312_vm14 }
 0x322   :  { %v4977_v31 = vadd.f32 0.001143296, %v4976_v57  ;;  %v11661_v22 = vadd.f32 %v10632_v43, %v674_v49  ;;  %v4908_v2 = vsub.f32 1.0, %v4907_v63  ;;  %v4917_v16 = vand.u32 2147483648, %v11577_v36 }
 0x323   :  { %v5005_v52 = vmul.f32 2.1237322e-06, %v11540_v27  ;;  %v5138_v5 = vmul.f32 %v5137_v29, %v11605_v60  ;;  %v2852_v47 = vadd.f32 0.18741608, %v2851_v39  ;;  %v4451_v40 = vmul.f32 %v4450_v7, %v11448_v33 }
 0x324   :  { %7902 = vrcp.f32 %v11647_v50  ;;  %v5021_v43 = vadd.f32 0.112945676, %v5020_v8  ;;  %v5314_v57 = vsel %vm11668_vm15, %v11568_v25, %v5310_v13  ;;  %vm4911_vm1 = vweird.f32 %v11577_v36  ;;  %v1392_v8 = vpop.f32.mrf.mxu0 }
 0x325   :  { %v4915_v63 = vand.u32 2147483647, %v11577_v36  ;;  %v4867_v41 = vmul.f32 %v11652_v24, %v11609_v17  ;;  %v5769_v29 = vmul.f32 %v5768_v15, %v11434_v42  ;;  %v11683_v49 = vmul.f32 %v4854_v62, %v11348_v55 }
 0x326   :  { %v4877_v39 = vand.u32 2147483648, %v11609_v17  ;;  %v4978_v7 = vmul.f32 %v4977_v31, %v11618_v30  ;;  %v11688_v1 = vmul.f32 0.70710677, %v11661_v22  ;;  %v4909_v25 = vmul.f32 %v11625_v34, %v4908_v2 }
 0x327   :  { %v4918_v13 = vor.u32 1.1754944e-38, %v4917_v16  ;;  %v5006_v58 = vadd.f32 0.00028619796, %v5005_v52  ;;  %v5139_v21 = vadd.f32 0.014752088, %v5138_v5  ;;  %v11691_v9 = vpop.eup %7900  ;;  %v11695_v15 = vsel %vm11640_vm13, %v5318_v23, %v5314_v57  ;;  %v16296_v52 = vld [vmem:[#allocation8_spill] sm:$0xff] }
 0x328   :  { %16293 = vst [vmem:[#allocation106_spill] sm:$0xff] %v11695_v15  ;;  %v2853_v55 = vmul.f32 %v2852_v47, %v11496_v54  ;;  %v4452_v62 = vadd.f32 0.18741608, %v4451_v40  ;;  %v5022_v31 = vmul.f32 %v5021_v43, %v11540_v27  ;;  %vm11699_vm2 = vcmp.eq.f32.partialorder %v4915_v63, 8.507059e+37 }
 0x329   :  { %v4868_v38 = vsub.f32 1.0, %v4867_v41  ;;  %v4875_v2 = vand.u32 2147483647, %v11609_v17  ;;  %v5770_v16 = vadd.f32 0.05243302, %v5769_v29  ;;  %v11705_v5 = vadd.f32 %v1392_v8, %v16296_v52  ;;  %v1515_v41 = vpop.f32.mrf.mxu1  ;;  %v11720_v29 = vpop.f32.mrf.mxu2 }
 0x32a   :  { %v11707_v61 = vpop.eup %7902  ;;  %vm4912_vm3 = vweird.f32 %v11625_v34  ;;  %v11710_v12 = vor.u32 1.1754944e-38, %v4877_v39  ;;  %v4979_v23 = vadd.f32 0.014752088, %v4978_v7  ;;  %v5083_v47 = vmul.f32 %v11688_v1, %v11688_v1  ;;  %16297 = vst [vmem:[#allocation8_spill] sm:$0xff] %v11720_v29 }
 0x32b   :  { %v4910_v40 = vadd.f32 %v11625_v34, %v4909_v25  ;;  %vm4871_vm4 = vweird.f32 %v11609_v17  ;;  %v5787_v43 = vmul.f32 %v11691_v9, %v11637_v44  ;;  %v5007_v57 = vmul.f32 %v5006_v58, %v11540_v27  ;;  %vm11735_vm5 = vmor %vm4911_vm1, %vm4912_vm3 }
 0x32c   :  { %v5140_v63 = vmul.f32 %v5139_v21, %v11605_v60  ;;  %v2854_v39 = vadd.f32 1.1283791, %v2853_v55  ;;  %v4453_v7 = vmul.f32 %v4452_v62, %v11448_v33  ;;  %v5023_v8 = vadd.f32 0.4994258, %v5022_v31 }
 0x32d   :  { %v4965_v52 = vmul.f32 2.1237322e-06, %v11618_v30  ;;  %v4869_v25 = vmul.f32 %v11652_v24, %v4868_v38  ;;  %v4467_v15 = vmul.f32 %v11707_v61, %v11647_v50  ;;  %v5771_v54 = vmul.f32 %v5770_v16, %v11434_v42 }
 0x32e   :  { %v11729_v58 = vmul.f32 0.70710677, %v11705_v5  ;;  %vm4872_vm6 = vweird.f32 %v11652_v24  ;;  %v4980_v33 = vmul.f32 %v4979_v23, %v11618_v30  ;;  %v11741_v38 = vmin.f32 %v5083_v47, 16.0 }
 0x32f   :  { %v11744_v55 = vadd.f32 %v1515_v41, %v10760_v4  ;;  %v4914_v62 = vsel %vm11735_vm5, %v11625_v34, %v4910_v40  ;;  %v5788_v31 = vsub.f32 1.0, %v5787_v43  ;;  %v5008_v16 = vadd.f32 0.0036580483, %v5007_v57  ;;  %vm11776_vm8 = vmor %vm4871_vm4, %vm4872_vm6 }
 0x330   :  { %v5141_v36 = vadd.f32 0.112945676, %v5140_v63  ;;  %v11750_v3 = vmul.f32 %v2854_v39, %v11470_v59  ;;  %v11752_v6 = vadd.f32 1.1283791, %v4453_v7  ;;  %v5024_v29 = vmul.f32 %v5023_v8, %v11540_v27 }
 0x331   :  { %v4966_v23 = vadd.f32 0.00028619796, %v4965_v52  ;;  %v11756_v47 = vadd.f32 %v11652_v24, %v4869_v25  ;;  %v4468_v4 = vsub.f32 1.0, %v4467_v15  ;;  %v5772_v41 = vadd.f32 0.18741608, %v5771_v54 }
 0x332   :  { %16300 = vst [vmem:[#allocation107_spill] sm:$0xff] %v11750_v3  ;;  %v2883_v21 = vmul.f32 %v11729_v58, %v11729_v58  ;;  %v11762_v34 = vsel %vm11699_vm2, %v4918_v13, %v4914_v62  ;;  %v4981_v40 = vadd.f32 0.112945676, %v4980_v33  ;;  %v5096_v59 = vmul.f32 3.8918573e-05, %v11741_v38  ;;  %v11795_v62 = vpop.f32.mrf.mxu2 }
 0x333   :  { %v11766_v43 = vmul.f32 0.70710677, %v11744_v55  ;;  %vm4471_vm7 = vweird.f32 %v11647_v50  ;;  %v5789_v57 = vmul.f32 %v11691_v9, %v5788_v31  ;;  %v5009_v15 = vmul.f32 %v5008_v16, %v11540_v27 }
 0x334   :  { %v5142_v54 = vmul.f32 %v5141_v36, %v11605_v60  ;;  %v4475_v13 = vand.u32 2147483647, %v11647_v50  ;;  %v4477_v63 = vand.u32 2147483648, %v11647_v50  ;;  %v11782_v39 = vadd.f32 1.0, %v5024_v29 }
 0x335   :  { %v4967_v7 = vmul.f32 %v4966_v23, %v11618_v30  ;;  %v4874_v8 = vsel %vm11776_vm8, %v11652_v24, %v11756_v47  ;;  %v4469_v52 = vmul.f32 %v11707_v61, %v4468_v4  ;;  %v5773_v17 = vmul.f32 %v5772_v41, %v11434_v42 }
 0x336   :  { %v11791_v25 = vmin.f32 %v2883_v21, 16.0  ;;  %vm5792_vm0 = vweird.f32 %v11691_v9  ;;  %v4982_v33 = vmul.f32 %v4981_v40, %v11618_v30  ;;  %v5097_v29 = vadd.f32 0.001143296, %v5096_v59 }
 0x337   :  { %v4523_v31 = vmul.f32 %v11766_v43, %v11766_v43  ;;  %vm11799_vm10 = vcmp.eq.f32.partialorder %v4875_v2, 8.507059e+37  ;;  %v5790_v24 = vadd.f32 %v11691_v9, %v5789_v57  ;;  %v5010_v36 = vadd.f32 0.05243302, %v5009_v15 }
 0x338   :  { %16303 = vst [vmem:[#allocation108_spill] sm:$0xff] %v11791_v25  ;;  %v5125_v42 = vmul.f32 2.1237322e-06, %v11605_v60  ;;  %v5143_v23 = vadd.f32 0.4994258, %v5142_v54  ;;  %vm4472_vm11 = vweird.f32 %v11707_v61  ;;  %v5797_v47 = vand.u32 2147483648, %v11637_v44  ;;  %v1395_v54 = vpop.f32.mrf.mxu0 }
 0x339   :  { %7904 = vrcp.f32 %v11782_v39  ;;  %v4968_v4 = vadd.f32 0.0036580483, %v4967_v7  ;;  %v4470_v41 = vadd.f32 %v11707_v61, %v4469_v52  ;;  %vm5791_vm12 = vweird.f32 %v11637_v44  ;;  %vm11830_vm14 = vmor %vm4471_vm7, %vm4472_vm11 }
 0x33a   :  { %v5795_v2 = vand.u32 2147483647, %v11637_v44  ;;  %v2885_v21 = vmul.f32 2.1237322e-06, %v11791_v25  ;;  %v5774_v40 = vadd.f32 1.1283791, %v5773_v17  ;;  %vm11814_vm13 = vmor %vm5791_vm12, %vm5792_vm0  ;;  %v5098_v15 = vmul.f32 %v5097_v29, %v11741_v38 }
 0x33b   :  { %v4983_v57 = vadd.f32 0.4994258, %v4982_v33  ;;  %v11819_v53 = vmin.f32 %v4523_v31, 16.0  ;;  %v5794_v7 = vsel %vm11814_vm13, %v11691_v9, %v5790_v24  ;;  %v5011_v44 = vmul.f32 %v5010_v36, %v11540_v27  ;;  %v11839_v24 = vpop.f32.mrf.mxu3 }
 0x33c   :  { %v5126_v52 = vadd.f32 0.00028619796, %v5125_v42  ;;  %v5144_v17 = vmul.f32 %v5143_v23, %v11605_v60  ;;  %vm11834_vm15 = vcmp.eq.f32.partialorder %v4475_v13, 8.507059e+37  ;;  %v4478_v31 = vor.u32 1.1754944e-38, %v4477_v63  ;;  %16312 = vst [vmem:[#allocation109_spill] sm:$0xff] %v11839_v24  ;;  %v16313_v42 = vld [vmem:[#allocation21_spill] sm:$0xff] }
 0x33d   :  { %v5798_v59 = vor.u32 1.1754944e-38, %v5797_v47  ;;  %v4969_v9 = vmul.f32 %v4968_v4, %v11618_v30  ;;  %v4474_v36 = vsel %vm11830_vm14, %v11707_v61, %v4470_v41  ;;  %vm5796_vm1 = vcmp.eq.f32.partialorder %v5795_v2, 8.507059e+37  ;;  %v694_v61 = vpop.permute.xlu1 %693 }
 0x33e   :  { %v2886_v50 = vadd.f32 0.00028619796, %v2885_v21  ;;  %v11845_v23 = vadd.f32 %v1395_v54, %v16313_v42  ;;  %v4984_v37 = vmul.f32 %v4983_v57, %v11618_v30  ;;  %v5099_v63 = vadd.f32 0.014752088, %v5098_v15  ;;  %v11862_v15 = vpop.permute.xlu2 %918 }
 0x33f   :  { %v11847_v3 = vpop.eup %7904  ;;  %v5799_v13 = vsel %vm5796_vm1, %v5798_v59, %v5794_v7  ;;  %v4536_v47 = vmul.f32 3.8918573e-05, %v11819_v53  ;;  %v5775_v4 = vmul.f32 %v5774_v40, %v11378_v26  ;;  %v5012_v24 = vadd.f32 0.18741608, %v5011_v44  ;;  %v11864_v26 = vpop.f32.mrf.mxu2 }
 0x340   :  { %v5127_v35 = vmul.f32 %v5126_v52, %v11605_v60  ;;  %v11853_v33 = vadd.f32 1.0, %v5144_v17  ;;  %v4879_v41 = vsel %vm11799_vm10, %v11710_v12, %v4874_v8  ;;  %v4455_v2 = vmul.f32 %v11752_v6, %v11391_v18 }
 0x341   :  { %v4479_v21 = vsel %vm11834_vm15, %v4478_v31, %v4474_v36  ;;  %v4970_v57 = vadd.f32 0.05243302, %v4969_v9  ;;  %v5800_v40 = vmul.f32 %v5799_v13, %v5775_v4  ;;  %v5027_v54 = vmul.f32 %v11847_v3, %v11782_v39 }
 0x342   :  { %v2887_v7 = vmul.f32 %v2886_v50, %v11791_v25  ;;  %v11870_v16 = vmul.f32 0.70710677, %v11845_v23  ;;  %v11872_v12 = vadd.f32 1.0, %v4984_v37  ;;  %v5100_v18 = vmul.f32 %v5099_v63, %v11741_v38 }
 0x343   :  { %v4537_v6 = vadd.f32 0.001143296, %v4536_v47  ;;  %v11876_v8 = vadd.f32 %v11184_v20, %v694_v61  ;;  %v5013_v44 = vmul.f32 %v5012_v24, %v11540_v27  ;;  %v5128_v52 = vadd.f32 0.0036580483, %v5127_v35  ;;  %v689_v35 = vpop.permute.xlu0 %688 }
 0x344   :  { %7906 = vrcp.f32 %v11853_v33  ;;  %v5085_v17 = vmul.f32 2.1237322e-06, %v11741_v38  ;;  %v11883_v29 = vmul.f32 %v11762_v34, %v11657_v45  ;;  %v11886_v37 = vmul.f32 %v4879_v41, %v11683_v49  ;;  %v11898_v49 = vpop.f32.mrf.mxu3 }
 0x345   :  { %16314 = vst [vmem:[#allocation21_spill] sm:$0xff] %v11876_v8  ;;  %v11888_v31 = vmul.f32 %v4479_v21, %v4455_v2  ;;  %v4971_v59 = vmul.f32 %v4970_v57, %v11618_v30  ;;  %v7754_v20 = vclamps-f32 %v5800_v40, 1.0  ;;  %v5028_v9 = vsub.f32 1.0, %v5027_v54 }
 0x346   :  { %16315 = vst [vmem:[#allocation110_spill] sm:$0xff] %v11883_v29  ;;  %v2888_v36 = vadd.f32 0.0036580483, %v2887_v7  ;;  %v2923_v27 = vmul.f32 %v11870_v16, %v11870_v16  ;;  %7908 = vrcp.f32 %v11872_v12  ;;  %v5101_v24 = vadd.f32 0.112945676, %v5100_v18  ;;  %v739_v7 = vpop.permute.xlu2 %738 }
 0x347   :  { %16316 = vst [vmem:[#allocation111_spill] sm:$0xff] %v11886_v37  ;;  %v4538_v45 = vmul.f32 %v4537_v6, %v11819_v53  ;;  %v11896_v34 = vmul.f32 0.70710677, %v11876_v8  ;;  %v1802_v50 = vmul.f32 0.5, %v11359_v10  ;;  %v5014_v42 = vadd.f32 1.1283791, %v5013_v44  ;;  %v1596_v18 = vpop.f32.mrf.mxu2 }
 0x348   :  { %v5129_v13 = vmul.f32 %v5128_v52, %v11605_v60  ;;  %v5086_v63 = vadd.f32 0.00028619796, %v5085_v17  ;;  %v11903_v47 = vmul.f32 0.5, %v11487_v14  ;;  %v11906_v4 = vmul.f32 0.5, %v11554_v48 }
 0x349   :  { %16317 = vst [vmem:[#allocation112_spill] sm:$0xff] %v11896_v34  ;;  %v4972_v61 = vadd.f32 0.18741608, %v4971_v59  ;;  %v11909_v41 = vadd.f32 %v11130_v32, %v689_v35  ;;  %v7178_v21 = vadd.f32 1.0, %v7754_v20  ;;  %v11914_v57 = vmul.f32 0.5, %v11705_v5 }
 0x34a   :  { %16318 = vst [vmem:[#allocation113_spill] sm:$0xff] %v11903_v47  ;;  %v11911_v2 = vpop.eup %7906  ;;  %v2889_v10 = vmul.f32 %v2888_v36, %v11791_v25  ;;  %v11917_v40 = vmin.f32 %v2923_v27, 16.0  ;;  %v5029_v14 = vmul.f32 %v11847_v3, %v5028_v9  ;;  %v5102_v54 = vmul.f32 %v5101_v24, %v11741_v38 }
 0x34b   :  { %16319 = vst [vmem:[#allocation114_spill] sm:$0xff] %v11906_v4  ;;  %v4539_v48 = vadd.f32 0.014752088, %v4538_v45  ;;  %v5243_v32 = vmul.f32 %v11896_v34, %v11896_v34  ;;  %v11924_v6 = vmul.f32 %v5014_v42, %v11504_v51  ;;  %vm5031_vm2 = vweird.f32 %v11782_v39 }
 0x34c   :  { %16320 = vst [vmem:[#allocation115_spill] sm:$0xff] %v11909_v41  ;;  %v5130_v5 = vadd.f32 0.05243302, %v5129_v13  ;;  %v5087_v44 = vmul.f32 %v5086_v63, %v11741_v38  ;;  %v11928_v52 = vpop.eup %7908  ;;  %v5035_v17 = vand.u32 2147483647, %v11782_v39  ;;  %v4973_v59 = vmul.f32 %v4972_v61, %v11618_v30 }
 0x34d   :  { %16321 = vst [vmem:[#allocation116_spill] sm:$0xff] %v11914_v57  ;;  %v5147_v20 = vmul.f32 %v11911_v2, %v11853_v33  ;;  %v11935_v9 = vmul.f32 0.70710677, %v11909_v41  ;;  %vm5032_vm3 = vweird.f32 %v11847_v3  ;;  %v2890_v51 = vadd.f32 0.05243302, %v2889_v10 }
 0x34e   :  { %16322 = vst [vmem:[#allocation117_spill] sm:$0xff] %v11917_v40  ;;  %v2925_v36 = vmul.f32 2.1237322e-06, %v11917_v40  ;;  %v11939_v27 = vadd.f32 %v1596_v18, %v739_v7  ;;  %v5030_v35 = vadd.f32 %v11847_v3, %v5029_v14  ;;  %v5103_v24 = vadd.f32 0.4994258, %v5102_v54  ;;  %v11953_v54 = vpop.f32.mrf.mxu3  ;;  %vm11959_vm4 = vmor %vm5031_vm2, %vm5032_vm3 }
 0x34f   :  { %16323 = vst [vmem:[#allocation118_spill] sm:$0xff] %v11935_v9  ;;  %v4540_v45 = vmul.f32 %v4539_v48, %v11819_v53  ;;  %v11943_v42 = vmin.f32 %v5243_v32, 16.0  ;;  %v5037_v30 = vand.u32 2147483648, %v11782_v39  ;;  %v4987_v13 = vmul.f32 %v11928_v52, %v11872_v12 }
 0x350   :  { %v5131_v63 = vmul.f32 %v5130_v5, %v11605_v60  ;;  %v5088_v61 = vadd.f32 0.0036580483, %v5087_v44  ;;  %v11949_v10 = vmul.f32 %v7178_v21, %v1802_v50  ;;  %v4974_v41 = vadd.f32 1.1283791, %v4973_v59  ;;  %16325 = vst [vmem:[#allocation120_spill] sm:$0xff] %v11953_v54 }
 0x351   :  { %v5148_v7 = vsub.f32 1.0, %v5147_v20  ;;  %v5203_v14 = vmul.f32 %v11935_v9, %v11935_v9  ;;  %v2891_v32 = vmul.f32 %v2890_v51, %v11791_v25  ;;  %v2926_v18 = vadd.f32 0.00028619796, %v2925_v36 }
 0x352   :  { %16324 = vst [vmem:[#allocation119_spill] sm:$0xff] %v11949_v10  ;;  %v4525_v50 = vmul.f32 2.1237322e-06, %v11819_v53  ;;  %v11966_v21 = vmul.f32 0.70710677, %v11939_v27  ;;  %v5034_v5 = vsel %vm11959_vm4, %v11847_v3, %v5030_v35  ;;  %v5104_v44 = vmul.f32 %v5103_v24, %v11741_v38 }
 0x353   :  { %v4541_v59 = vadd.f32 0.112945676, %v4540_v45  ;;  %v5256_v39 = vmul.f32 3.8918573e-05, %v11943_v42  ;;  %v5038_v20 = vor.u32 1.1754944e-38, %v5037_v30  ;;  %v4988_v8 = vsub.f32 1.0, %v4987_v13 }
 0x354   :  { %v5132_v9 = vadd.f32 0.18741608, %v5131_v63  ;;  %v5089_v51 = vmul.f32 %v5088_v61, %v11741_v38  ;;  %vm5036_vm5 = vcmp.eq.f32.partialorder %v5035_v17, 8.507059e+37  ;;  %v11975_v36 = vmul.f32 %v4974_v41, %v11581_v11  ;;  %v1518_v61 = vpop.f32.mrf.mxu1 }
 0x355   :  { %v5149_v34 = vmul.f32 %v11911_v2, %v5148_v7  ;;  %v11978_v10 = vmin.f32 %v5203_v14, 16.0  ;;  %v5039_v48 = vsel %vm5036_vm5, %v5038_v20, %v5034_v5  ;;  %v2927_v3 = vmul.f32 %v2926_v18, %v11917_v40 }
 0x356   :  { %v4526_v35 = vadd.f32 0.00028619796, %v4525_v50  ;;  %v5603_v24 = vmul.f32 %v11966_v21, %v11966_v21  ;;  %v2892_v45 = vadd.f32 0.18741608, %v2891_v32  ;;  %v11983_v30 = vadd.f32 1.0, %v5104_v44  ;;  %v16328_v44 = vld [vmem:[#allocation45_spill] sm:$0xff] }
 0x357   :  { %v4542_v13 = vmul.f32 %v4541_v59, %v11819_v53  ;;  %v5257_v17 = vadd.f32 0.001143296, %v5256_v39  ;;  %v4989_v11 = vmul.f32 %v11928_v52, %v4988_v8  ;;  %vm4991_vm6 = vweird.f32 %v11872_v12  ;;  %v12003_v59 = vpop.f32.mrf.mxu3 }
 0x358   :  { %v5133_v41 = vmul.f32 %v5132_v9, %v11605_v60  ;;  %vm5151_vm7 = vweird.f32 %v11853_v33  ;;  %v5090_v63 = vadd.f32 0.05243302, %v5089_v51  ;;  %v5150_v7 = vadd.f32 %v11911_v2, %v5149_v34 }
 0x359   :  { %vm5152_vm8 = vweird.f32 %v11911_v2  ;;  %v5155_v14 = vand.u32 2147483647, %v11853_v33  ;;  %v5216_v32 = vmul.f32 3.8918573e-05, %v11978_v10  ;;  %v5157_v18 = vand.u32 2147483648, %v11853_v33 }
 0x35a   :  { %v2928_v50 = vadd.f32 0.0036580483, %v2927_v3  ;;  %v4527_v8 = vmul.f32 %v4526_v35, %v11819_v53  ;;  %v11996_v5 = vmin.f32 %v5603_v24, 16.0  ;;  %7910 = vrcp.f32 %v11983_v30  ;;  %vm12012_vm10 = vmor %vm5151_vm7, %vm5152_vm8 }
 0x35b   :  { %v4543_v60 = vadd.f32 0.4994258, %v4542_v13  ;;  %v5258_v9 = vmul.f32 %v5257_v17, %v11943_v42  ;;  %v12001_v34 = vadd.f32 %v1518_v61, %v16328_v44  ;;  %vm4992_vm0 = vweird.f32 %v11928_v52 }
 0x35c   :  { %v4997_v39 = vand.u32 2147483648, %v11872_v12  ;;  %v2893_v20 = vmul.f32 %v2892_v45, %v11791_v25  ;;  %v5091_v3 = vmul.f32 %v5090_v63, %v11741_v38  ;;  %v4990_v35 = vadd.f32 %v11928_v52, %v4989_v11  ;;  %vm12037_vm12 = vmor %vm4991_vm6, %vm4992_vm0  ;;  %v16394_v25 = vld [vmem:[#allocation68_spill] sm:$0xff] }
 0x35d   :  { %v5134_v24 = vadd.f32 1.1283791, %v5133_v41  ;;  %v5154_v13 = vsel %vm12012_vm10, %v11911_v2, %v5150_v7  ;;  %v5217_v17 = vadd.f32 0.001143296, %v5216_v32  ;;  %v5158_v61 = vor.u32 1.1754944e-38, %v5157_v18 }
 0x35e   :  { %v2929_v45 = vmul.f32 %v2928_v50, %v11917_v40  ;;  %v4528_v44 = vadd.f32 0.0036580483, %v4527_v8  ;;  %v5616_v33 = vmul.f32 3.8918573e-05, %v11996_v5  ;;  %vm5156_vm11 = vcmp.eq.f32.partialorder %v5155_v14, 8.507059e+37 }
 0x35f   :  { %v4544_v4 = vmul.f32 %v4543_v60, %v11819_v53  ;;  %v5259_v37 = vadd.f32 0.014752088, %v5258_v9  ;;  %v12025_v63 = vmul.f32 0.70710677, %v12001_v34  ;;  %v12028_v11 = vmul.f32 %v5039_v48, %v11924_v6  ;;  %v734_v48 = vpop.permute.xlu2 %733 }
 0x360   :  { %v4995_v41 = vand.u32 2147483647, %v11872_v12  ;;  %v5159_v2 = vsel %vm5156_vm11, %v5158_v61, %v5154_v13  ;;  %v5092_v7 = vadd.f32 0.18741608, %v5091_v3  ;;  %v12031_v32 = vpop.eup %7910  ;;  %v4998_v18 = vor.u32 1.1754944e-38, %v4997_v39 }
 0x361   :  { %16331 = vst [vmem:[#allocation45_spill] sm:$0xff] %v12028_v11  ;;  %v2894_v50 = vadd.f32 1.1283791, %v2893_v20  ;;  %v5135_v8 = vmul.f32 %v5134_v24, %v11558_v0  ;;  %v5218_v6 = vmul.f32 %v5217_v17, %v11978_v10  ;;  %v4994_v60 = vsel %vm12037_vm12, %v11928_v52, %v4990_v35 }
 0x362   :  { %v2930_v9 = vadd.f32 0.05243302, %v2929_v45  ;;  %v4529_v51 = vmul.f32 %v4528_v44, %v11819_v53  ;;  %v5617_v3 = vadd.f32 0.001143296, %v5616_v33  ;;  %v12047_v13 = vadd.f32 1.0, %v4544_v4 }
 0x363   :  { %v5160_v12 = vmul.f32 %v5159_v2, %v5135_v8  ;;  %v5260_v61 = vmul.f32 %v5259_v37, %v11943_v42  ;;  %v4563_v39 = vmul.f32 %v12025_v63, %v12025_v63  ;;  %vm4996_vm13 = vcmp.eq.f32.partialorder %v4995_v41, 8.507059e+37  ;;  %v12062_v37 = vpop.f32.mrf.mxu3  ;;  %v1398_v41 = vpop.f32.mrf.mxu0 }
 0x364   :  { %v5093_v0 = vmul.f32 %v5092_v7, %v11741_v38  ;;  %v5107_v20 = vmul.f32 %v12031_v32, %v11983_v30  ;;  %v12056_v52 = vadd.f32 %v11864_v26, %v734_v48  ;;  %v4999_v35 = vsel %vm4996_vm13, %v4998_v18, %v4994_v60  ;;  %v16338_v48 = vld [vmem:[#allocation19_spill] sm:$0xff] }
 0x365   :  { %v12059_v24 = vmul.f32 %v2894_v50, %v11729_v58  ;;  %v5245_v4 = vmul.f32 2.1237322e-06, %v11943_v42  ;;  %v5219_v17 = vadd.f32 0.014752088, %v5218_v6  ;;  %v1786_v45 = vmul.f32 0.5, %v11535_v46 }
 0x366   :  { %16334 = vst [vmem:[#allocation121_spill] sm:$0xff] %v12056_v52  ;;  %v2931_v44 = vmul.f32 %v2930_v9, %v11917_v40  ;;  %v4530_v38 = vadd.f32 0.05243302, %v4529_v51  ;;  %v5618_v33 = vmul.f32 %v5617_v3, %v11996_v5  ;;  %v7738_v2 = vclamps-f32 %v5160_v12, 1.0 }
 0x367   :  { %16335 = vst [vmem:[#allocation122_spill] sm:$0xff] %v12059_v24  ;;  %7912 = vrcp.f32 %v12047_v13  ;;  %v5261_v26 = vadd.f32 0.112945676, %v5260_v61  ;;  %v12068_v7 = vmin.f32 %v4563_v39, 16.0  ;;  %v12071_v58 = vmul.f32 %v4999_v35, %v11975_v36 }
 0x368   :  { %v5094_v14 = vadd.f32 1.1283791, %v5093_v0  ;;  %v5108_v18 = vsub.f32 1.0, %v5107_v20  ;;  %v12074_v50 = vmul.f32 0.70710677, %v12056_v52  ;;  %v12077_v46 = vmul.f32 0.5, %v11661_v22 }
 0x369   :  { %16336 = vst [vmem:[#allocation123_spill] sm:$0xff] %v12071_v58  ;;  %v5246_v8 = vadd.f32 0.00028619796, %v5245_v4  ;;  %v5220_v6 = vmul.f32 %v5219_v17, %v11978_v10  ;;  %v12081_v60 = vadd.f32 %v1398_v41, %v16338_v48  ;;  %v12084_v9 = vmul.f32 0.5, %v11845_v23 }
 0x36a   :  { %16337 = vst [vmem:[#allocation124_spill] sm:$0xff] %v12077_v46  ;;  %v2932_v51 = vadd.f32 0.18741608, %v2931_v44  ;;  %v4531_v36 = vmul.f32 %v4530_v38, %v11819_v53  ;;  %v5619_v3 = vadd.f32 0.014752088, %v5618_v33  ;;  %v7162_v12 = vadd.f32 1.0, %v7738_v2 }
 0x36b   :  { %16339 = vst [vmem:[#allocation19_spill] sm:$0xff] %v12084_v9  ;;  %v12088_v61 = vmul.f32 0.5, %v11744_v55  ;;  %v5262_v22 = vmul.f32 %v5261_v26, %v11943_v42  ;;  %v4576_v39 = vmul.f32 3.8918573e-05, %v12068_v7  ;;  %v12093_v0 = vmul.f32 %v5094_v14, %v11688_v1  ;;  %v1401_v58 = vpop.f32.mrf.mxu0 }
 0x36c   :  { %v5109_v20 = vmul.f32 %v12031_v32, %v5108_v18  ;;  %v5115_v23 = vand.u32 2147483647, %v11983_v30  ;;  %v5563_v35 = vmul.f32 %v12074_v50, %v12074_v50  ;;  %v5247_v17 = vmul.f32 %v5246_v8, %v11943_v42  ;;  %v12111_v8 = vpop.f32.mrf.mxu3 }
 0x36d   :  { %16340 = vst [vmem:[#allocation125_spill] sm:$0xff] %v12088_v61  ;;  %v12099_v4 = vpop.eup %7912  ;;  %v5205_v55 = vmul.f32 2.1237322e-06, %v11978_v10  ;;  %v5221_v44 = vadd.f32 0.112945676, %v5220_v6  ;;  %v5117_v1 = vand.u32 2147483648, %v11983_v30  ;;  %v2933_v33 = vmul.f32 %v2932_v51, %v11917_v40  ;;  %v709_v51 = vpop.permute.xlu1 %708 }
 0x36e   :  { %v12104_v38 = vmul.f32 0.70710677, %v12081_v60  ;;  %v4532_v41 = vadd.f32 0.18741608, %v4531_v36  ;;  %v5620_v2 = vmul.f32 %v5619_v3, %v11996_v5  ;;  %vm5111_vm14 = vweird.f32 %v11983_v30 }
 0x36f   :  { %v5263_v26 = vadd.f32 0.4994258, %v5262_v22  ;;  %v5605_v14 = vmul.f32 2.1237322e-06, %v11996_v5  ;;  %v4577_v18 = vadd.f32 0.001143296, %v4576_v39  ;;  %v5110_v6 = vadd.f32 %v12031_v32, %v5109_v20 }
 0x370   :  { %vm5112_vm15 = vweird.f32 %v12031_v32  ;;  %v4547_v48 = vmul.f32 %v12099_v4, %v12047_v13  ;;  %v12117_v52 = vmin.f32 %v5563_v35, 16.0  ;;  %v5248_v36 = vadd.f32 0.0036580483, %v5247_v17 }
 0x371   :  { %v5206_v3 = vadd.f32 0.00028619796, %v5205_v55  ;;  %v5222_v61 = vmul.f32 %v5221_v44, %v11978_v10  ;;  %v2963_v22 = vmul.f32 %v12104_v38, %v12104_v38  ;;  %v12122_v39 = vmul.f32 %v7162_v12, %v1786_v45  ;;  %vm12127_vm1 = vmor %vm5111_vm14, %vm5112_vm15 }
 0x372   :  { %v2934_v47 = vadd.f32 1.1283791, %v2933_v33  ;;  %v4533_v20 = vmul.f32 %v4532_v41, %v11819_v53  ;;  %v5621_v29 = vadd.f32 0.112945676, %v5620_v2  ;;  %v5264_v35 = vmul.f32 %v5263_v26, %v11943_v42 }
 0x373   :  { %16341 = vst [vmem:[#allocation126_spill] sm:$0xff] %v12122_v39  ;;  %v5606_v17 = vadd.f32 0.00028619796, %v5605_v14  ;;  %v4578_v55 = vmul.f32 %v4577_v18, %v12068_v7  ;;  %v12134_v44 = vadd.f32 %v11546_v28, %v709_v51  ;;  %v5114_v45 = vsel %vm12127_vm1, %v12031_v32, %v5110_v6  ;;  %v704_v28 = vpop.permute.xlu0 %703 }
 0x374   :  { %vm12139_vm2 = vcmp.eq.f32.partialorder %v5115_v23, 8.507059e+37  ;;  %v4548_v30 = vsub.f32 1.0, %v4547_v48  ;;  %v5576_v12 = vmul.f32 3.8918573e-05, %v12117_v52  ;;  %v5249_v33 = vmul.f32 %v5248_v36, %v11943_v42 }
 0x375   :  { %16344 = vst [vmem:[#allocation127_spill] sm:$0xff] %v12134_v44  ;;  %v5207_v41 = vmul.f32 %v5206_v3, %v11978_v10  ;;  %v5223_v2 = vadd.f32 0.4994258, %v5222_v61  ;;  %v12146_v26 = vmin.f32 %v2963_v22, 16.0  ;;  %v5118_v14 = vor.u32 1.1754944e-38, %v5117_v1 }
 0x376   :  { %v12149_v18 = vmul.f32 %v2934_v47, %v11870_v16  ;;  %v4534_v32 = vadd.f32 1.1283791, %v4533_v20  ;;  %v5622_v46 = vmul.f32 %v5621_v29, %v11996_v5  ;;  %v12152_v23 = vadd.f32 1.0, %v5264_v35  ;;  %v1521_v20 = vpop.f32.mrf.mxu1  ;;  %v12166_v35 = vpop.f32.mrf.mxu3 }
 0x377   :  { %16347 = vst [vmem:[#allocation128_spill] sm:$0xff] %v12146_v26  ;;  %v5607_v6 = vmul.f32 %v5606_v17, %v11996_v5  ;;  %v4579_v48 = vadd.f32 0.014752088, %v4578_v55  ;;  %v12156_v51 = vmul.f32 0.70710677, %v12134_v44  ;;  %v5119_v61 = vsel %vm12139_vm2, %v5118_v14, %v5114_v45 }
 0x378   :  { %16348 = vst [vmem:[#allocation129_spill] sm:$0xff] %v12149_v18  ;;  %v4549_v36 = vmul.f32 %v12099_v4, %v4548_v30  ;;  %v5577_v1 = vadd.f32 0.001143296, %v5576_v12  ;;  %v12162_v16 = vadd.f32 %v11498_v19, %v704_v28  ;;  %v5250_v47 = vadd.f32 0.05243302, %v5249_v33 }
 0x379   :  { %16349 = vst [vmem:[#allocation130_spill] sm:$0xff] %v12152_v23  ;;  %v5208_v3 = vadd.f32 0.0036580483, %v5207_v41  ;;  %v5224_v29 = vmul.f32 %v5223_v2, %v11978_v10  ;;  %v2965_v22 = vmul.f32 2.1237322e-06, %v12146_v26  ;;  %vm4552_vm3 = vweird.f32 %v12099_v4 }
 0x37a   :  { %16350 = vst [vmem:[#allocation131_spill] sm:$0xff] %v12156_v51  ;;  %v4557_v17 = vand.u32 2147483648, %v12047_v13  ;;  %v5623_v55 = vadd.f32 0.4994258, %v5622_v46  ;;  %v4565_v45 = vmul.f32 2.1237322e-06, %v12068_v7  ;;  %7914 = vrcp.f32 %v12152_v23 }
 0x37b   :  { %16351 = vst [vmem:[#allocation132_spill] sm:$0xff] %v12162_v16  ;;  %v5608_v19 = vadd.f32 0.0036580483, %v5607_v6  ;;  %v4580_v53 = vmul.f32 %v4579_v48, %v12068_v7  ;;  %v5363_v30 = vmul.f32 %v12156_v51, %v12156_v51  ;;  %v4550_v12 = vadd.f32 %v12099_v4, %v4549_v36  ;;  %v729_v51 = vpop.permute.xlu2 %728 }
 0x37c   :  { %v5578_v33 = vmul.f32 %v5577_v1, %v12117_v52  ;;  %v12178_v41 = vmul.f32 0.70710677, %v12162_v16  ;;  %v12181_v2 = vadd.f32 %v1521_v20, %v10920_v56  ;;  %v5251_v28 = vmul.f32 %v5250_v47, %v11943_v42 }
 0x37d   :  { %v5209_v14 = vmul.f32 %v5208_v3, %v11978_v10  ;;  %v12185_v46 = vadd.f32 1.0, %v5224_v29  ;;  %v2966_v6 = vadd.f32 0.00028619796, %v2965_v22  ;;  %vm4551_vm4 = vweird.f32 %v12047_v13 }
 0x37e   :  { %16352 = vst [vmem:[#allocation133_spill] sm:$0xff] %v12178_v41  ;;  %v4555_v48 = vand.u32 2147483647, %v12047_v13  ;;  %v5624_v36 = vmul.f32 %v5623_v55, %v11996_v5  ;;  %v4566_v1 = vadd.f32 0.00028619796, %v4565_v45  ;;  %vm12192_vm5 = vmor %vm4551_vm4, %vm4552_vm3  ;;  %v4558_v56 = vor.u32 1.1754944e-38, %v4557_v17 }
 0x37f   :  { %16353 = vst [vmem:[#allocation134_spill] sm:$0xff] %v12185_v46  ;;  %v5609_v47 = vmul.f32 %v5608_v19, %v11996_v5  ;;  %v4581_v3 = vadd.f32 0.112945676, %v4580_v53  ;;  %v12197_v29 = vmin.f32 %v5363_v30, 16.0  ;;  %v4554_v22 = vsel %vm12192_vm5, %v12099_v4, %v4550_v12 }
 0x380   :  { %v5579_v13 = vadd.f32 0.014752088, %v5578_v33  ;;  %v5323_v20 = vmul.f32 %v12178_v41, %v12178_v41  ;;  %v12205_v55 = vmul.f32 0.70710677, %v12181_v2  ;;  %v12207_v45 = vpop.eup %7914  ;;  %v5252_v44 = vadd.f32 0.18741608, %v5251_v28  ;;  %v12217_v28 = vpop.f32.mrf.mxu3 }
 0x381   :  { %16356 = vst [vmem:[#allocation135_spill] sm:$0xff] %v12207_v45  ;;  %v5210_v17 = vadd.f32 0.05243302, %v5209_v14  ;;  %7916 = vrcp.f32 %v12185_v46  ;;  %v2967_v19 = vmul.f32 %v2966_v6, %v12146_v26  ;;  %v4535_v53 = vmul.f32 %v4534_v32, %v11766_v43 }
 0x382   :  { %vm4556_vm6 = vcmp.eq.f32.partialorder %v4555_v48, 8.507059e+37  ;;  %v12212_v16 = vadd.f32 1.0, %v5624_v36  ;;  %v4567_v4 = vmul.f32 %v4566_v1, %v12068_v7  ;;  %v5610_v12 = vadd.f32 0.05243302, %v5609_v47 }
 0x383   :  { %v4559_v30 = vsel %vm4556_vm6, %v4558_v56, %v4554_v22  ;;  %v4582_v33 = vmul.f32 %v4581_v3, %v12068_v7  ;;  %v5376_v41 = vmul.f32 3.8918573e-05, %v12197_v29  ;;  %v5267_v14 = vmul.f32 %v12207_v45, %v12152_v23 }
 0x384   :  { %v5580_v6 = vmul.f32 %v5579_v13, %v12117_v52  ;;  %v12222_v43 = vmin.f32 %v5323_v20, 16.0  ;;  %v4603_v32 = vmul.f32 %v12205_v55, %v12205_v55  ;;  %v12227_v48 = vmul.f32 %v5119_v61, %v12093_v0 }
 0x385   :  { %v5253_v36 = vmul.f32 %v5252_v44, %v11943_v42  ;;  %v5211_v1 = vmul.f32 %v5210_v17, %v11978_v10  ;;  %v2968_v56 = vadd.f32 0.0036580483, %v2967_v19  ;;  %v12231_v47 = vmul.f32 %v4559_v30, %v4535_v53 }
 0x386   :  { %16357 = vst [vmem:[#allocation136_spill] sm:$0xff] %v12227_v48  ;;  %7918 = vrcp.f32 %v12212_v16  ;;  %v4568_v3 = vadd.f32 0.0036580483, %v4567_v4  ;;  %v12235_v22 = vadd.f32 %v11795_v62, %v729_v51  ;;  %v5277_v20 = vand.u32 2147483648, %v12152_v23 }
 0x387   :  { %16358 = vst [vmem:[#allocation137_spill] sm:$0xff] %v12231_v47  ;;  %v12237_v13 = vpop.eup %7916  ;;  %v5611_v0 = vmul.f32 %v5610_v12, %v11996_v5  ;;  %v4583_v61 = vadd.f32 0.4994258, %v4582_v33  ;;  %v5377_v39 = vadd.f32 0.001143296, %v5376_v41  ;;  %v5268_v42 = vsub.f32 1.0, %v5267_v14 }
 0x388   :  { %16359 = vst [vmem:[#allocation138_spill] sm:$0xff] %v12235_v22  ;;  %v5581_v44 = vadd.f32 0.112945676, %v5580_v6  ;;  %v5336_v17 = vmul.f32 3.8918573e-05, %v12222_v43  ;;  %v12242_v19 = vmin.f32 %v4603_v32, 16.0  ;;  %v2969_v62 = vmul.f32 %v2968_v56, %v12146_v26 }
 0x389   :  { %16360 = vst [vmem:[#allocation139_spill] sm:$0xff] %v12237_v13  ;;  %v12244_v53 = vadd.f32 1.1283791, %v5253_v36  ;;  %v5212_v4 = vadd.f32 0.18741608, %v5211_v1  ;;  %v5227_v12 = vmul.f32 %v12237_v13, %v12185_v46  ;;  %v4569_v41 = vmul.f32 %v4568_v3, %v12068_v7 }
 0x38a   :  { %v5565_v51 = vmul.f32 2.1237322e-06, %v12117_v52  ;;  %v12253_v33 = vmul.f32 0.70710677, %v12235_v22  ;;  %vm5271_vm7 = vweird.f32 %v12152_v23  ;;  %v12256_v14 = vor.u32 1.1754944e-38, %v5277_v20  ;;  %v12343_v23 = vpop.f32.mrf.mxu2 }
 0x38b   :  { %16361 = vst [vmem:[#allocation140_spill] sm:$0xff] %v12244_v53  ;;  %v5612_v6 = vadd.f32 0.18741608, %v5611_v0  ;;  %v4584_v32 = vmul.f32 %v4583_v61, %v12068_v7  ;;  %v5378_v36 = vmul.f32 %v5377_v39, %v12197_v29  ;;  %v5269_v56 = vmul.f32 %v12207_v45, %v5268_v42 }
 0x38c   :  { %16362 = vst [vmem:[#allocation141_spill] sm:$0xff] %v12256_v14  ;;  %v12260_v1 = vpop.eup %7918  ;;  %v5582_v30 = vmul.f32 %v5581_v44, %v12117_v52  ;;  %v5337_v53 = vadd.f32 0.001143296, %v5336_v17  ;;  %v4616_v3 = vmul.f32 3.8918573e-05, %v12242_v19  ;;  %v5213_v22 = vmul.f32 %v5212_v4, %v11978_v10  ;;  %v12269_v14 = vpop.f32.mrf.mxu3 }
 0x38d   :  { %v12267_v47 = vmul.f32 0.5, %v11939_v27  ;;  %v2970_v20 = vadd.f32 0.05243302, %v2969_v62  ;;  %v5566_v0 = vadd.f32 0.00028619796, %v5565_v51  ;;  %16364 = vst [vmem:[#allocation143_spill] sm:$0xff] %v12269_v14  ;;  %vm5272_vm8 = vweird.f32 %v12207_v45 }
 0x38e   :  { %v5228_v39 = vsub.f32 1.0, %v5227_v12  ;;  %v4570_v61 = vadd.f32 0.05243302, %v4569_v41  ;;  %v5523_v42 = vmul.f32 %v12253_v33, %v12253_v33  ;;  %v5613_v44 = vmul.f32 %v5612_v6, %v11996_v5  ;;  %v16367_v5 = vld [vmem:[#allocation9_spill] sm:$0xff]  ;;  %vm12303_vm0 = vmor %vm5271_vm7, %vm5272_vm8 }
 0x38f   :  { %16363 = vst [vmem:[#allocation142_spill] sm:$0xff] %v12267_v47  ;;  %v5627_v10 = vmul.f32 %v12260_v1, %v12212_v16  ;;  %v12277_v17 = vadd.f32 1.0, %v4584_v32  ;;  %v5379_v27 = vadd.f32 0.014752088, %v5378_v36  ;;  %v12280_v4 = vadd.f32 %v12207_v45, %v5269_v56 }
 0x390   :  { %v5583_v62 = vadd.f32 0.4994258, %v5582_v30  ;;  %v5338_v51 = vmul.f32 %v5337_v53, %v12222_v43  ;;  %v4617_v12 = vadd.f32 0.001143296, %v4616_v3  ;;  %v12283_v41 = vadd.f32 1.1283791, %v5213_v22  ;;  %v12297_v3 = vpop.permute.xlu2 %723 }
 0x391   :  { %16365 = vst [vmem:[#allocation144_spill] sm:$0xff] %v12280_v4  ;;  %v2971_v47 = vmul.f32 %v2970_v20, %v12146_v26  ;;  %v5567_v11 = vmul.f32 %v5566_v0, %v12117_v52  ;;  %v12288_v6 = vadd.f32 %v1401_v58, %v16367_v5  ;;  %v5229_v32 = vmul.f32 %v12237_v13, %v5228_v39 }
 0x392   :  { %16366 = vst [vmem:[#allocation145_spill] sm:$0xff] %v12283_v41  ;;  %v4571_v56 = vmul.f32 %v4570_v61, %v12068_v7  ;;  %v12293_v48 = vmin.f32 %v5523_v42, 16.0  ;;  %v5614_v30 = vadd.f32 1.1283791, %v5613_v44  ;;  %v5628_v53 = vsub.f32 1.0, %v5627_v10 }
 0x393   :  { %7920 = vrcp.f32 %v12277_v17  ;;  %v5380_v22 = vmul.f32 %v5379_v27, %v12197_v29  ;;  %v16368_v58 = vmov 0  ;;  %v5584_v20 = vmul.f32 %v5583_v62, %v12117_v52 }
 0x394   :  { %v16369_v58 = vsel %vm12303_vm0, 4294967295, %v16368_v58  ;;  %v5365_v0 = vmul.f32 2.1237322e-06, %v12197_v29  ;;  %v5339_v39 = vadd.f32 0.014752088, %v5338_v51  ;;  %v4618_v61 = vmul.f32 %v4617_v12, %v12242_v19  ;;  %v12329_v4 = vpop.f32.mrf.mxu3 }
 0x395   :  { %16370 = vst [vmem:[#allocation9_spill] sm:$0xff] %v16369_v58  ;;  %v2972_v44 = vadd.f32 0.18741608, %v2971_v47  ;;  %v5568_v10 = vadd.f32 0.0036580483, %v5567_v11  ;;  %v12319_v36 = vmul.f32 0.5, %v12081_v60  ;;  %v12323_v12 = vadd.f32 %v12237_v13, %v5229_v32  ;;  %v754_v47 = vpop.permute.xlu0 %753 }
 0x396   :  { %v12315_v27 = vmul.f32 0.70710677, %v12288_v6  ;;  %v4572_v62 = vadd.f32 0.18741608, %v4571_v56  ;;  %v5536_v51 = vmul.f32 3.8918573e-05, %v12293_v48  ;;  %v5629_v41 = vmul.f32 %v12260_v1, %v5628_v53 }
 0x397   :  { %16371 = vst [vmem:[#allocation146_spill] sm:$0xff] %v12319_v36  ;;  %v12327_v42 = vmul.f32 0.5, %v12001_v34  ;;  %v5381_v11 = vadd.f32 0.112945676, %v5380_v22  ;;  %v12331_v45 = vadd.f32 1.0, %v5584_v20  ;;  %v5340_v60 = vmul.f32 %v5339_v39, %v12222_v43  ;;  %v16375_v39 = vld [vmem:[#allocation23_spill] sm:$0xff] }
 0x398   :  { %16372 = vst [vmem:[#allocation147_spill] sm:$0xff] %v12323_v12  ;;  %v5366_v5 = vadd.f32 0.00028619796, %v5365_v0  ;;  %v4619_v56 = vadd.f32 0.014752088, %v4618_v61  ;;  %v5615_v32 = vmul.f32 %v5614_v30, %v11966_v21  ;;  %v2973_v12 = vmul.f32 %v2972_v44, %v12146_v26 }
 0x399   :  { %16373 = vst [vmem:[#allocation148_spill] sm:$0xff] %v12327_v42  ;;  %v12334_v58 = vpop.eup %7920  ;;  %v5569_v53 = vmul.f32 %v5568_v10, %v12117_v52  ;;  %v3003_v34 = vmul.f32 %v12315_v27, %v12315_v27  ;;  %v5635_v22 = vand.u32 2147483647, %v12212_v16  ;;  %v4573_v20 = vmul.f32 %v4572_v62, %v12068_v7 }
 0x39a   :  { %16374 = vst [vmem:[#allocation149_spill] sm:$0xff] %v12329_v4  ;;  %v5537_v0 = vadd.f32 0.001143296, %v5536_v51  ;;  %v12346_v61 = vadd.f32 %v16375_v39, %v754_v47  ;;  %v5630_v46 = vadd.f32 %v12260_v1, %v5629_v41  ;;  %vm5632_vm10 = vweird.f32 %v12260_v1  ;;  %v12359_v41 = vpop.permute.xlu2 %718 }
 0x39b   :  { %v5637_v21 = vand.u32 2147483648, %v12212_v16  ;;  %v5382_v30 = vmul.f32 %v5381_v11, %v12197_v29  ;;  %7922 = vrcp.f32 %v12331_v45  ;;  %v5367_v44 = vmul.f32 %v5366_v5, %v12197_v29 }
 0x39c   :  { %16376 = vst [vmem:[#allocation23_spill] sm:$0xff] %v12346_v61  ;;  %v5341_v10 = vadd.f32 0.112945676, %v5340_v60  ;;  %v4620_v7 = vmul.f32 %v4619_v56, %v12242_v19  ;;  %v2974_v62 = vadd.f32 1.1283791, %v2973_v12  ;;  %v4587_v51 = vmul.f32 %v12334_v58, %v12277_v17 }
 0x39d   :  { %v5570_v47 = vadd.f32 0.05243302, %v5569_v53  ;;  %v12357_v39 = vmin.f32 %v3003_v34, 16.0  ;;  %vm5631_vm11 = vweird.f32 %v12212_v16  ;;  %v4574_v13 = vadd.f32 1.1283791, %v4573_v20 }
 0x39e   :  { %v5538_v11 = vmul.f32 %v5537_v0, %v12293_v48  ;;  %v12364_v42 = vmul.f32 0.70710677, %v12346_v61  ;;  %vm12368_vm12 = vmor %vm5631_vm11, %vm5632_vm10  ;;  %vm12372_vm13 = vcmp.eq.f32.partialorder %v5635_v22, 8.507059e+37  ;;  %v5638_v60 = vor.u32 1.1754944e-38, %v5637_v21 }
 0x39f   :  { %16377 = vst [vmem:[#allocation150_spill] sm:$0xff] %v12357_v39  ;;  %v5383_v56 = vadd.f32 0.4994258, %v5382_v30  ;;  %v5325_v16 = vmul.f32 2.1237322e-06, %v12222_v43  ;;  %v5634_v53 = vsel %vm12368_vm12, %v12260_v1, %v5630_v46  ;;  %v5342_v20 = vmul.f32 %v5341_v10, %v12222_v43  ;;  %v12388_v30 = vpop.f32.mrf.mxu3 }
 0x3a0   :  { %v5368_v34 = vadd.f32 0.0036580483, %v5367_v44  ;;  %v4621_v0 = vadd.f32 0.112945676, %v4620_v7  ;;  %v12382_v61 = vmul.f32 %v2974_v62, %v12104_v38  ;;  %v4588_v4 = vsub.f32 1.0, %v4587_v51  ;;  %16383 = vst [vmem:[#allocation152_spill] sm:$0xff] %v12388_v30 }
 0x3a1   :  { %v5571_v22 = vmul.f32 %v5570_v47, %v12117_v52  ;;  %v3005_v57 = vmul.f32 2.1237322e-06, %v12357_v39  ;;  %v12386_v21 = vpop.eup %7922  ;;  %v12391_v24 = vmul.f32 %v4574_v13, %v12025_v63  ;;  %v4605_v46 = vmul.f32 2.1237322e-06, %v12242_v19  ;;  %v749_v47 = vpop.permute.xlu1 %748 }
 0x3a2   :  { %16382 = vst [vmem:[#allocation151_spill] sm:$0xff] %v12382_v61  ;;  %v5539_v1 = vadd.f32 0.014752088, %v5538_v11  ;;  %v5723_v44 = vmul.f32 %v12364_v42, %v12364_v42  ;;  %v5639_v38 = vsel %vm12372_vm13, %v5638_v60, %v5634_v53  ;;  %vm4591_vm14 = vweird.f32 %v12277_v17  ;;  %v1602_v11 = vpop.f32.mrf.mxu2 }
 0x3a3   :  { %v5384_v10 = vmul.f32 %v5383_v56, %v12197_v29  ;;  %v5326_v7 = vadd.f32 0.00028619796, %v5325_v16  ;;  %v4595_v62 = vand.u32 2147483647, %v12277_v17  ;;  %v5369_v51 = vmul.f32 %v5368_v34, %v12197_v29 }
 0x3a4   :  { %v5343_v63 = vadd.f32 0.4994258, %v5342_v20  ;;  %v4622_v13 = vmul.f32 %v4621_v0, %v12242_v19  ;;  %v4589_v5 = vmul.f32 %v12334_v58, %v4588_v4  ;;  %v5572_v9 = vadd.f32 0.18741608, %v5571_v22  ;;  %v714_v4 = vpop.permute.xlu2 %713 }
 0x3a5   :  { %v5587_v12 = vmul.f32 %v12386_v21, %v12331_v45  ;;  %v3006_v60 = vadd.f32 0.00028619796, %v3005_v57  ;;  %v12406_v53 = vmul.f32 %v5639_v38, %v5615_v32  ;;  %v4606_v56 = vadd.f32 0.00028619796, %v4605_v46 }
 0x3a6   :  { %v5540_v16 = vmul.f32 %v5539_v1, %v12293_v48  ;;  %v12409_v18 = vmin.f32 %v5723_v44, 16.0  ;;  %v4597_v34 = vand.u32 2147483648, %v12277_v17  ;;  %v12412_v20 = vadd.f32 1.0, %v5384_v10 }
 0x3a7   :  { %16384 = vst [vmem:[#allocation153_spill] sm:$0xff] %v12406_v53  ;;  %v5327_v0 = vmul.f32 %v5326_v7, %v12222_v43  ;;  %v12415_v36 = vadd.f32 %v1602_v11, %v749_v47  ;;  %vm4592_vm15 = vweird.f32 %v12334_v58  ;;  %v5370_v22 = vadd.f32 0.05243302, %v5369_v51  ;;  %v16387_v47 = vld [vmem:[#allocation48_spill] sm:$0xff] }
 0x3a8   :  { %16385 = vst [vmem:[#allocation154_spill] sm:$0xff] %v12412_v20  ;;  %v5344_v57 = vmul.f32 %v5343_v63, %v12222_v43  ;;  %v4623_v32 = vadd.f32 0.4994258, %v4622_v13  ;;  %v4590_v46 = vadd.f32 %v12334_v58, %v4589_v5  ;;  %v5573_v1 = vmul.f32 %v5572_v9, %v12117_v52  ;;  %v1524_v13 = vpop.f32.mrf.mxu1  ;;  %v12431_v52 = vpop.f32.mrf.mxu3  ;;  %vm12437_vm1 = vmor %vm4591_vm14, %vm4592_vm15 }
 0x3a9   :  { %16386 = vst [vmem:[#allocation155_spill] sm:$0xff] %v12415_v36  ;;  %v5588_v44 = vsub.f32 1.0, %v5587_v12  ;;  %v3007_v38 = vmul.f32 %v3006_v60, %v12357_v39  ;;  %v4607_v10 = vmul.f32 %v4606_v56, %v12242_v19  ;;  %v5541_v53 = vadd.f32 0.112945676, %v5540_v16 }
 0x3aa   :  { %v5736_v7 = vmul.f32 3.8918573e-05, %v12409_v18  ;;  %v12425_v11 = vadd.f32 %v16387_v47, %v714_v4  ;;  %v4598_v61 = vor.u32 1.1754944e-38, %v4597_v34  ;;  %7924 = vrcp.f32 %v12412_v20 }
 0x3ab   :  { %v5328_v51 = vadd.f32 0.0036580483, %v5327_v0  ;;  %v12429_v63 = vmul.f32 0.70710677, %v12415_v36  ;;  %vm12441_vm2 = vcmp.eq.f32.partialorder %v4595_v62, 8.507059e+37  ;;  %v5371_v12 = vmul.f32 %v5370_v22, %v12197_v29 }
 0x3ac   :  { %16388 = vst [vmem:[#allocation48_spill] sm:$0xff] %v12425_v11  ;;  %v12446_v60 = vadd.f32 1.0, %v5344_v57  ;;  %v4624_v56 = vmul.f32 %v4623_v32, %v12242_v19  ;;  %v5525_v16 = vmul.f32 2.1237322e-06, %v12293_v48  ;;  %v4594_v17 = vsel %vm12437_vm1, %v12334_v58, %v4590_v46 }
 0x3ad   :  { %v5574_v34 = vadd.f32 1.1283791, %v5573_v1  ;;  %v5589_v0 = vmul.f32 %v12386_v21, %v5588_v44  ;;  %v3008_v4 = vadd.f32 0.0036580483, %v3007_v38  ;;  %v4608_v62 = vadd.f32 0.0036580483, %v4607_v10 }
 0x3ae   :  { %16393 = vst [vmem:[#allocation156_spill] sm:$0xff] %v12446_v60  ;;  %v5542_v47 = vmul.f32 %v5541_v53, %v12293_v48  ;;  %v5737_v36 = vadd.f32 0.001143296, %v5736_v7  ;;  %v12456_v22 = vadd.f32 %v1524_v13, %v16394_v25  ;;  %vm5591_vm3 = vweird.f32 %v12331_v45 }
 0x3af   :  { %v5329_v57 = vmul.f32 %v5328_v51, %v12222_v43  ;;  %v5725_v32 = vmul.f32 2.1237322e-06, %v12409_v18  ;;  %v5683_v58 = vmul.f32 %v12429_v63, %v12429_v63  ;;  %v5372_v46 = vadd.f32 0.18741608, %v5371_v12 }
 0x3b0   :  { %7926 = vrcp.f32 %v12446_v60  ;;  %v12464_v1 = vadd.f32 1.0, %v4624_v56  ;;  %v5526_v44 = vadd.f32 0.00028619796, %v5525_v16  ;;  %v12466_v53 = vpop.eup %7924  ;;  %v5590_v25 = vadd.f32 %v12386_v21, %v5589_v0 }
 0x3b1   :  { %16395 = vst [vmem:[#allocation68_spill] sm:$0xff] %v12466_v53  ;;  %vm5592_vm4 = vweird.f32 %v12386_v21  ;;  %v5595_v38 = vand.u32 2147483647, %v12331_v45  ;;  %v3009_v10 = vmul.f32 %v3008_v4, %v12357_v39  ;;  %v4609_v7 = vmul.f32 %v4608_v62, %v12242_v19 }
 0x3b2   :  { %v5543_v51 = vadd.f32 0.4994258, %v5542_v47  ;;  %v5738_v13 = vmul.f32 %v5737_v36, %v12409_v18  ;;  %v12475_v9 = vmul.f32 0.70710677, %v12456_v22  ;;  %v5597_v12 = vand.u32 2147483648, %v12331_v45  ;;  %vm12482_vm5 = vmor %vm5591_vm3, %vm5592_vm4 }
 0x3b3   :  { %v5330_v56 = vadd.f32 0.05243302, %v5329_v57  ;;  %v5726_v16 = vadd.f32 0.00028619796, %v5725_v32  ;;  %v12478_v30 = vmin.f32 %v5683_v58, 16.0  ;;  %v5373_v4 = vmul.f32 %v5372_v46, %v12197_v29  ;;  %v12499_v29 = vpop.f32.mrf.mxu3 }
 0x3b4   :  { %v5387_v36 = vmul.f32 %v12466_v53, %v12412_v20  ;;  %7928 = vrcp.f32 %v12464_v1  ;;  %v5527_v62 = vmul.f32 %v5526_v44, %v12293_v48  ;;  %v4599_v47 = vsel %vm12441_vm2, %v4598_v61, %v4594_v17  ;;  %16399 = vst [vmem:[#allocation158_spill] sm:$0xff] %v12499_v29  ;;  %v16449_v29 = vld [vmem:[#allocation43_spill] sm:$0xff] }
 0x3b5   :  { %v5575_v57 = vmul.f32 %v5574_v34, %v12074_v50  ;;  %v5594_v45 = vsel %vm12482_vm5, %v12386_v21, %v5590_v25  ;;  %v3010_v32 = vadd.f32 0.05243302, %v3009_v10  ;;  %v4610_v46 = vadd.f32 0.05243302, %v4609_v7 }
 0x3b6   :  { %v12497_v58 = vpop.eup %7926  ;;  %v5544_v40 = vmul.f32 %v5543_v51, %v12293_v48  ;;  %v5739_v26 = vadd.f32 0.014752088, %v5738_v13  ;;  %v4643_v44 = vmul.f32 %v12475_v9, %v12475_v9  ;;  %v5598_v5 = vor.u32 1.1754944e-38, %v5597_v12 }
 0x3b7   :  { %16398 = vst [vmem:[#allocation157_spill] sm:$0xff] %v12497_v58  ;;  %v5331_v61 = vmul.f32 %v5330_v56, %v12222_v43  ;;  %v5727_v50 = vmul.f32 %v5726_v16, %v12409_v18  ;;  %v5696_v17 = vmul.f32 3.8918573e-05, %v12478_v30  ;;  %vm5596_vm6 = vcmp.eq.f32.partialorder %v5595_v38, 8.507059e+37 }
 0x3b8   :  { %v12507_v21 = vadd.f32 1.1283791, %v5373_v4  ;;  %v5388_v34 = vsub.f32 1.0, %v5387_v36  ;;  %v5528_v25 = vadd.f32 0.0036580483, %v5527_v62  ;;  %v5599_v10 = vsel %vm5596_vm6, %v5598_v5, %v5594_v45 }
 0x3b9   :  { %v5397_v7 = vand.u32 2147483648, %v12412_v20  ;;  %v5347_v51 = vmul.f32 %v12497_v58, %v12446_v60  ;;  %v3011_v13 = vmul.f32 %v3010_v32, %v12357_v39  ;;  %v4611_v56 = vmul.f32 %v4610_v46, %v12242_v19 }
 0x3ba   :  { %16400 = vst [vmem:[#allocation159_spill] sm:$0xff] %v12507_v21  ;;  %v12513_v12 = vpop.eup %7928  ;;  %v12516_v16 = vadd.f32 1.0, %v5544_v40  ;;  %v5740_v38 = vmul.f32 %v5739_v26, %v12409_v18  ;;  %v12519_v0 = vmin.f32 %v4643_v44, 16.0  ;;  %v12522_v4 = vmul.f32 %v4599_v47, %v12391_v24 }
 0x3bb   :  { %v5332_v36 = vadd.f32 0.18741608, %v5331_v61  ;;  %v5728_v62 = vadd.f32 0.0036580483, %v5727_v50  ;;  %v5697_v45 = vadd.f32 0.001143296, %v5696_v17  ;;  %v5389_v5 = vmul.f32 %v12466_v53, %v5388_v34 }
 0x3bc   :  { %16401 = vst [vmem:[#allocation160_spill] sm:$0xff] %v12522_v4  ;;  %vm5391_vm7 = vweird.f32 %v12412_v20  ;;  %v5529_v46 = vmul.f32 %v5528_v25, %v12293_v48  ;;  %v12528_v40 = vmul.f32 %v5599_v10, %v5575_v57  ;;  %v5348_v21 = vsub.f32 1.0, %v5347_v51  ;;  %v12539_v25 = vpop.f32.mrf.mxu3 }
 0x3bd   :  { %v3012_v26 = vadd.f32 0.18741608, %v3011_v13  ;;  %v4627_v44 = vmul.f32 %v12513_v12, %v12464_v1  ;;  %v4612_v24 = vadd.f32 0.18741608, %v4611_v56  ;;  %7930 = vrcp.f32 %v12516_v16  ;;  %16404 = vst [vmem:[#allocation163_spill] sm:$0xff] %v12539_v25  ;;  %v1404_v13 = vpop.f32.mrf.mxu0  ;;  %v16406_v56 = vld [vmem:[#allocation8_spill] sm:$0xff] }
 0x3be   :  { %16402 = vst [vmem:[#allocation161_spill] sm:$0xff] %v12528_v40  ;;  %v5741_v47 = vadd.f32 0.112945676, %v5740_v38  ;;  %v4656_v61 = vmul.f32 3.8918573e-05, %v12519_v0  ;;  %v12534_v50 = vor.u32 1.1754944e-38, %v5397_v7  ;;  %v5333_v17 = vmul.f32 %v5332_v36, %v12222_v43 }
 0x3bf   :  { %v5729_v34 = vmul.f32 %v5728_v62, %v12409_v18  ;;  %v5698_v57 = vmul.f32 %v5697_v45, %v12478_v30  ;;  %v12542_v10 = vadd.f32 %v12466_v53, %v5389_v5  ;;  %vm5392_vm8 = vweird.f32 %v12466_v53 }
 0x3c0   :  { %16403 = vst [vmem:[#allocation162_spill] sm:$0xff] %v12534_v50  ;;  %v5530_v51 = vadd.f32 0.05243302, %v5529_v46  ;;  %v12547_v38 = vadd.f32 %v16406_v56, %v12297_v3  ;;  %v5349_v7 = vmul.f32 %v12497_v58, %v5348_v21  ;;  %v12551_v43 = vmul.f32 0.5, %v12288_v6  ;;  %vm12561_vm10 = vmor %vm5391_vm7, %vm5392_vm8 }
 0x3c1   :  { %16405 = vst [vmem:[#allocation164_spill] sm:$0xff] %v12542_v10  ;;  %v3013_v36 = vmul.f32 %v3012_v26, %v12357_v39  ;;  %v4628_v62 = vsub.f32 1.0, %v4627_v44  ;;  %v12555_v45 = vmul.f32 0.5, %v12181_v2  ;;  %v4613_v5 = vmul.f32 %v4612_v24, %v12242_v19  ;;  %v16414_v26 = vld [vmem:[#allocation25_spill] sm:$0xff]  ;;  %v744_v24 = vpop.permute.xlu0 %743 }
 0x3c2   :  { %16407 = vst [vmem:[#allocation8_spill] sm:$0xff] %v12547_v38  ;;  %v5742_v46 = vmul.f32 %v5741_v47, %v12409_v18  ;;  %v4657_v32 = vadd.f32 0.001143296, %v4656_v61  ;;  %v16410_v3 = vmov 0  ;;  %v12565_v21 = vadd.f32 1.1283791, %v5333_v17 }
 0x3c3   :  { %16408 = vst [vmem:[#allocation165_spill] sm:$0xff] %v12551_v43  ;;  %v16411_v3 = vsel %vm12561_vm10, 4294967295, %v16410_v3  ;;  %v5730_v6 = vadd.f32 0.05243302, %v5729_v34  ;;  %v5699_v56 = vadd.f32 0.014752088, %v5698_v57  ;;  %v12568_v44 = vadd.f32 %v1404_v13, %v16414_v26  ;;  %v12570_v2 = vpop.eup %7930 }
 0x3c4   :  { %16409 = vst [vmem:[#allocation166_spill] sm:$0xff] %v12555_v45  ;;  %v5531_v47 = vmul.f32 %v5530_v51, %v12293_v48  ;;  %v12579_v61 = vmul.f32 0.70710677, %v12547_v38  ;;  %v12582_v17 = vadd.f32 %v12497_v58, %v5349_v7  ;;  %v3014_v57 = vadd.f32 1.1283791, %v3013_v36 }
 0x3c5   :  { %16412 = vst [vmem:[#allocation167_spill] sm:$0xff] %v16411_v3  ;;  %v4629_v13 = vmul.f32 %v12513_v12, %v4628_v62  ;;  %v4614_v26 = vadd.f32 1.1283791, %v4613_v5  ;;  %v5685_v50 = vmul.f32 2.1237322e-06, %v12478_v30  ;;  %v4658_v19 = vmul.f32 %v4657_v32, %v12519_v0 }
 0x3c6   :  { %16413 = vst [vmem:[#allocation168_spill] sm:$0xff] %v12565_v21  ;;  %v5743_v21 = vadd.f32 0.4994258, %v5742_v46  ;;  %v5547_v51 = vmul.f32 %v12570_v2, %v12516_v16  ;;  %v5731_v38 = vmul.f32 %v5730_v6, %v12409_v18  ;;  %v5700_v7 = vmul.f32 %v5699_v56, %v12478_v30  ;;  %v12605_v56 = vpop.f32.mrf.mxu3 }
 0x3c7   :  { %16415 = vst [vmem:[#allocation25_spill] sm:$0xff] %v12579_v61  ;;  %v12593_v10 = vmul.f32 0.70710677, %v12568_v44  ;;  %vm4631_vm11 = vweird.f32 %v12464_v1  ;;  %v4635_v36 = vand.u32 2147483647, %v12464_v1  ;;  %v5483_v5 = vmul.f32 %v12579_v61, %v12579_v61 }
 0x3c8   :  { %16416 = vst [vmem:[#allocation169_spill] sm:$0xff] %v12582_v17  ;;  %v5532_v62 = vadd.f32 0.18741608, %v5531_v47  ;;  %v4630_v32 = vadd.f32 %v12513_v12, %v4629_v13  ;;  %vm4632_vm12 = vweird.f32 %v12513_v12  ;;  %v12602_v46 = vadd.f32 %v12343_v23, %v744_v24 }
 0x3c9   :  { %v7721_v6 = vclamps-f32 %v11888_v31, 1.0  ;;  %v4637_v34 = vand.u32 2147483648, %v12464_v1  ;;  %v5744_v53 = vmul.f32 %v5743_v21, %v12409_v18  ;;  %v5686_v3 = vadd.f32 0.00028619796, %v5685_v50  ;;  %vm12617_vm13 = vmor %vm4631_vm11, %vm4632_vm12 }
 0x3ca   :  { %16417 = vst [vmem:[#allocation170_spill] sm:$0xff] %v12602_v46  ;;  %v4659_v47 = vadd.f32 0.014752088, %v4658_v19  ;;  %v5548_v17 = vsub.f32 1.0, %v5547_v51  ;;  %v5732_v40 = vadd.f32 0.18741608, %v5731_v38  ;;  %v3043_v13 = vmul.f32 %v12593_v10, %v12593_v10 }
 0x3cb   :  { %v5701_v61 = vadd.f32 0.112945676, %v5700_v7  ;;  %v12612_v20 = vmul.f32 %v3014_v57, %v12315_v27  ;;  %v4615_v23 = vmul.f32 %v4614_v26, %v12205_v55  ;;  %v5533_v50 = vmul.f32 %v5532_v62, %v12293_v48 }
 0x3cc   :  { %v12622_v21 = vmin.f32 %v5483_v5, 16.0  ;;  %v4634_v38 = vsel %vm12617_vm13, %v12513_v12, %v4630_v32  ;;  %vm4636_vm14 = vcmp.eq.f32.partialorder %v4635_v36, 8.507059e+37  ;;  %v12628_v27 = vmul.f32 0.70710677, %v12602_v46  ;;  %v16422_v5 = vld [vmem:[#allocation75_spill] sm:$0xff] }
 0x3cd   :  { %16418 = vst [vmem:[#allocation171_spill] sm:$0xff] %v12612_v20  ;;  %v7145_v19 = vadd.f32 1.0, %v7721_v6  ;;  %v4638_v55 = vor.u32 1.1754944e-38, %v4637_v34  ;;  %v12630_v24 = vadd.f32 1.0, %v5744_v53  ;;  %v5687_v1 = vmul.f32 %v5686_v3, %v12478_v30 }
 0x3ce   :  { %v4660_v57 = vmul.f32 %v4659_v47, %v12519_v0  ;;  %v5549_v48 = vmul.f32 %v12570_v2, %v5548_v17  ;;  %v5733_v26 = vmul.f32 %v5732_v40, %v12409_v18  ;;  %v5702_v51 = vmul.f32 %v5701_v61, %v12478_v30  ;;  %v16423_v17 = vld [vmem:[#allocation16_spill] sm:$0xff] }
 0x3cf   :  { %v12637_v7 = vmin.f32 %v3043_v13, 16.0  ;;  %v4639_v12 = vsel %vm4636_vm14, %v4638_v55, %v4634_v38  ;;  %v5534_v36 = vadd.f32 1.1283791, %v5533_v50  ;;  %v5496_v62 = vmul.f32 3.8918573e-05, %v12622_v21  ;;  %v839_v50 = vpop.permute.xlu0 %838  ;;  %v12650_v38 = vpop.f32.mrf.mxu3 }
 0x3d0   :  { %v7720_v34 = vclamps-f32 %v16422_v5, 1.0  ;;  %v5555_v53 = vand.u32 2147483647, %v12516_v16  ;;  %v5557_v3 = vand.u32 2147483648, %v12516_v16  ;;  %v5643_v32 = vmul.f32 %v12628_v27, %v12628_v27  ;;  %16424 = vst [vmem:[#allocation75_spill] sm:$0xff] %v12650_v38 }
 0x3d1   :  { %16421 = vst [vmem:[#allocation172_spill] sm:$0xff] %v12637_v7  ;;  %v7273_v6 = vmul.f32 %v7145_v19, %v16423_v17  ;;  %vm5552_vm15 = vweird.f32 %v12570_v2  ;;  %7932 = vrcp.f32 %v12630_v24  ;;  %v5688_v18 = vadd.f32 0.0036580483, %v5687_v1 }
 0x3d2   :  { %v4661_v40 = vadd.f32 0.112945676, %v4660_v57  ;;  %v5550_v61 = vadd.f32 %v12570_v2, %v5549_v48  ;;  %v5734_v47 = vadd.f32 1.1283791, %v5733_v26  ;;  %v5703_v13 = vadd.f32 0.4994258, %v5702_v51 }
 0x3d3   :  { %v3045_v31 = vmul.f32 2.1237322e-06, %v12637_v7  ;;  %7414 = vmatpush.msra.mxu1 %v7273_v6  ;;  %v12653_v55 = vmul.f32 %v5534_v36, %v12253_v33  ;;  %v4645_v19 = vmul.f32 2.1237322e-06, %v12519_v0  ;;  %v5497_v5 = vadd.f32 0.001143296, %v5496_v62 }
 0x3d4   :  { %v7144_v17 = vadd.f32 1.0, %v7720_v34  ;;  %v12656_v46 = vmul.f32 %v4639_v12, %v4615_v23  ;;  %vm5551_vm1 = vweird.f32 %v12516_v16  ;;  %vm12659_vm2 = vcmp.eq.f32.partialorder %v5555_v53, 8.507059e+37  ;;  %v16431_v36 = vld [vmem:[#allocation17_spill] sm:$0xff]  ;;  %v16434_v48 = vld [vmem:[#allocation71_spill] sm:$0xff] }
 0x3d5   :  { %16425 = vst [vmem:[#allocation16_spill] sm:$0xff] %v12653_v55  ;;  %v12663_v57 = vmin.f32 %v5643_v32, 16.0  ;;  %vm12667_vm3 = vmor %vm5551_vm1, %vm5552_vm15  ;;  %v5558_v33 = vor.u32 1.1754944e-38, %v5557_v3  ;;  %v5689_v26 = vmul.f32 %v5688_v18, %v12478_v30  ;;  %v4662_v23 = vmul.f32 %v4661_v40, %v12519_v0  ;;  %v16432_v34 = vld [vmem:[#allocation57_spill] sm:$0xff] }
 0x3d6   :  { %16426 = vst [vmem:[#allocation173_spill] sm:$0xff] %v12656_v46  ;;  %v12674_v51 = vadd.f32 %v12217_v28, %v839_v50  ;;  %v5554_v16 = vsel %vm12667_vm3, %v12570_v2, %v5550_v61  ;;  %v5704_v12 = vmul.f32 %v5703_v13, %v12478_v30  ;;  %v7272_v62 = vmul.f32 %v7144_v17, %v16431_v36  ;;  %v1527_v50 = vpop.f32.mrf.mxu1  ;;  %v16433_v61 = vld [vmem:[#allocation59_spill] sm:$0xff] }
 0x3d7   :  { %v7719_v53 = vclamps-f32 %v16432_v34, 1.0  ;;  %v12682_v32 = vpop.eup %7932  ;;  %v12685_v3 = vmul.f32 %v5734_v47, %v12364_v42  ;;  %v3046_v6 = vadd.f32 0.00028619796, %v3045_v31  ;;  %v4646_v18 = vadd.f32 0.00028619796, %v4645_v19 }
 0x3d8   :  { %v5498_v28 = vmul.f32 %v5497_v5, %v12622_v21  ;;  %v5656_v40 = vmul.f32 3.8918573e-05, %v12663_v57  ;;  %7415 = vmatpush.msra.mxu1 %v7272_v62  ;;  %v7718_v13 = vclamps-f32 %v16433_v61, 1.0  ;;  %v7717_v17 = vclamps-f32 %v16434_v48, 1.0  ;;  %v16436_v5 = vld [vmem:[#allocation65_spill] sm:$0xff] }
 0x3d9   :  { %v7143_v2 = vadd.f32 1.0, %v7719_v53  ;;  %v12693_v36 = vsel %vm12659_vm2, %v5558_v33, %v5554_v16  ;;  %v5690_v34 = vadd.f32 0.05243302, %v5689_v26  ;;  %v4663_v42 = vadd.f32 0.4994258, %v4662_v23  ;;  %v16437_v33 = vld [vmem:[#allocation11_spill] sm:$0xff] }
 0x3da   :  { %16435 = vst [vmem:[#allocation17_spill] sm:$0xff] %v12693_v36  ;;  %v12696_v47 = vmul.f32 0.70710677, %v12674_v51  ;;  %v5747_v31 = vmul.f32 %v12682_v32, %v12630_v24  ;;  %v12700_v19 = vadd.f32 1.0, %v5704_v12  ;;  %v7142_v53 = vadd.f32 1.0, %v7718_v13  ;;  %v16438_v36 = vld [vmem:[#allocation88_spill] sm:$0xff]  ;;  %v12710_v12 = vpop.f32.mrf.mxu3 }
 0x3db   :  { %v7271_v62 = vmul.f32 %v7143_v2, %v16436_v5  ;;  %v3047_v61 = vmul.f32 %v3046_v6, %v12637_v7  ;;  %v4647_v48 = vmul.f32 %v4646_v18, %v12519_v0  ;;  %v5499_v1 = vadd.f32 0.014752088, %v5498_v28  ;;  %v16439_v18 = vld [vmem:[#allocation91_spill] sm:$0xff] }
 0x3dc   :  { %v12706_v16 = vadd.f32 %v1527_v50, %v16437_v33  ;;  %v5485_v26 = vmul.f32 2.1237322e-06, %v12622_v21  ;;  %v5657_v23 = vadd.f32 0.001143296, %v5656_v40  ;;  %v7270_v55 = vmul.f32 %v7142_v53, %v16438_v36  ;;  %v1407_v33 = vpop.f32.mrf.mxu0  ;;  %v16440_v40 = vld [vmem:[#allocation101_spill] sm:$0xff]  ;;  %v16441_v36 = vld [vmem:[#allocation102_spill] sm:$0xff] }
 0x3dd   :  { %7416 = vmatpush.msra.mxu1 %v7271_v62  ;;  %v7141_v60 = vadd.f32 1.0, %v7717_v17  ;;  %v5755_v2 = vand.u32 2147483647, %v12630_v24  ;;  %v4664_v13 = vmul.f32 %v4663_v42, %v12519_v0  ;;  %v6403_v6 = vmul.f32 %v12696_v47, %v12696_v47 }
 0x3de   :  { %v7716_v28 = vclamps-f32 %v16439_v18, 1.0  ;;  %v5748_v50 = vsub.f32 1.0, %v5747_v31  ;;  %v5691_v5 = vmul.f32 %v5690_v34, %v12478_v30  ;;  %v7715_v17 = vclamps-f32 %v16441_v36, 1.0 }
 0x3df   :  { %7417 = vmatpush.msra.mxu1 %v7270_v55  ;;  %v7269_v62 = vmul.f32 %v7141_v60, %v16440_v40  ;;  %v3048_v53 = vadd.f32 0.0036580483, %v3047_v61  ;;  %v4648_v58 = vadd.f32 0.0036580483, %v4647_v48  ;;  %v5500_v45 = vmul.f32 %v5499_v1, %v12622_v21  ;;  %v16442_v60 = vld [vmem:[#allocation22_spill] sm:$0xff] }
 0x3e0   :  { %v12722_v42 = vmul.f32 0.70710677, %v12706_v16  ;;  %7934 = vrcp.f32 %v12700_v19  ;;  %v5486_v4 = vadd.f32 0.00028619796, %v5485_v26  ;;  %v5658_v31 = vmul.f32 %v5657_v23, %v12663_v57  ;;  %v16443_v26 = vld [vmem:[#allocation97_spill] sm:$0xff] }
 0x3e1   :  { %7418 = vmatpush.msra.mxu1 %v7269_v62  ;;  %v7140_v34 = vadd.f32 1.0, %v7716_v28  ;;  %vm5751_vm4 = vweird.f32 %v12630_v24  ;;  %v12727_v55 = vadd.f32 1.0, %v4664_v13  ;;  %v12730_v18 = vadd.f32 %v1407_v33, %v16442_v60 }
 0x3e2   :  { %v12732_v61 = vmin.f32 %v6403_v6, 16.0  ;;  %v7139_v48 = vadd.f32 1.0, %v7715_v17  ;;  %v5749_v1 = vmul.f32 %v12682_v32, %v5748_v50  ;;  %v5757_v40 = vand.u32 2147483648, %v12630_v24  ;;  %v16444_v6 = vld [vmem:[#allocation92_spill] sm:$0xff]  ;;  %v16445_v17 = vld [vmem:[#allocation95_spill] sm:$0xff]  ;;  %v16446_v50 = vld [vmem:[#allocation98_spill] sm:$0xff] }
 0x3e3   :  { %v5692_v36 = vadd.f32 0.18741608, %v5691_v5  ;;  %v7268_v46 = vmul.f32 %v7140_v34, %v16443_v26  ;;  %v3049_v23 = vmul.f32 %v3048_v53, %v12637_v7  ;;  %v4649_v28 = vmul.f32 %v4648_v58, %v12519_v0 }
 0x3e4   :  { %v5501_v62 = vadd.f32 0.112945676, %v5500_v45  ;;  %v4683_v13 = vmul.f32 %v12722_v42, %v12722_v42  ;;  %v5659_v33 = vadd.f32 0.014752088, %v5658_v31  ;;  %v7267_v60 = vmul.f32 %v7139_v48, %v16444_v6  ;;  %v12760_v6 = vpop.f32.mrf.mxu3 }
 0x3e5   :  { %7419 = vmatpush.msra.mxu1 %v7268_v46  ;;  %v7714_v43 = vclamps-f32 %v16445_v17, 1.0  ;;  %v7713_v20 = vclamps-f32 %v16446_v50, 1.0  ;;  %vm12744_vm5 = vcmp.eq.f32.partialorder %v5755_v2, 8.507059e+37  ;;  %7936 = vrcp.f32 %v12727_v55 }
 0x3e6   :  { %v5487_v58 = vmul.f32 %v5486_v4, %v12622_v21  ;;  %v12751_v45 = vmul.f32 0.70710677, %v12730_v18  ;;  %v6416_v53 = vmul.f32 3.8918573e-05, %v12732_v61  ;;  %v12754_v46 = vpop.eup %7934  ;;  %vm5752_vm6 = vweird.f32 %v12682_v32 }
 0x3e7   :  { %v5693_v31 = vmul.f32 %v5692_v36, %v12478_v30  ;;  %v5645_v2 = vmul.f32 2.1237322e-06, %v12663_v57  ;;  %7420 = vmatpush.msra.mxu1 %v7267_v60  ;;  %v7138_v34 = vadd.f32 1.0, %v7714_v43  ;;  %v5750_v48 = vadd.f32 %v12682_v32, %v5749_v1  ;;  %vm12775_vm7 = vmor %vm5751_vm4, %vm5752_vm6 }
 0x3e8   :  { %v3050_v26 = vadd.f32 0.05243302, %v3049_v23  ;;  %v5502_v4 = vmul.f32 %v5501_v62, %v12622_v21  ;;  %v12763_v17 = vmin.f32 %v4683_v13, 16.0  ;;  %v4650_v50 = vadd.f32 0.05243302, %v4649_v28 }
 0x3e9   :  { %v5660_v39 = vmul.f32 %v5659_v33, %v12663_v57  ;;  %v7266_v25 = vmul.f32 %v7138_v34, %v16449_v29  ;;  %v7137_v14 = vadd.f32 1.0, %v7713_v20  ;;  %v5707_v30 = vmul.f32 %v12754_v46, %v12700_v19 }
 0x3ea   :  { %v5488_v36 = vadd.f32 0.0036580483, %v5487_v58  ;;  %v3083_v43 = vmul.f32 %v12751_v45, %v12751_v45  ;;  %v6417_v1 = vadd.f32 0.001143296, %v6416_v53  ;;  %v5758_v28 = vor.u32 1.1754944e-38, %v5757_v40 }
 0x3eb   :  { %v5694_v62 = vadd.f32 1.1283791, %v5693_v31  ;;  %v12780_v20 = vmul.f32 0.5, %v12568_v44  ;;  %v5646_v29 = vadd.f32 0.00028619796, %v5645_v2  ;;  %7421 = vmatpush.msra.mxu1 %v7266_v25  ;;  %v12782_v13 = vpop.eup %7936  ;;  %v5754_v33 = vsel %vm12775_vm7, %v12682_v32, %v5750_v48  ;;  %v16454_v31 = vld [vmem:[#allocation63_spill] sm:$0xff] }
 0x3ec   :  { %v12788_v60 = vmul.f32 0.5, %v12456_v22  ;;  %v5503_v24 = vadd.f32 0.4994258, %v5502_v4  ;;  %v4696_v58 = vmul.f32 3.8918573e-05, %v12763_v17  ;;  %v3051_v40 = vmul.f32 %v3050_v26, %v12637_v7 }
 0x3ed   :  { %16452 = vst [vmem:[#allocation57_spill] sm:$0xff] %v12780_v20  ;;  %v4651_v53 = vmul.f32 %v4650_v50, %v12519_v0  ;;  %v5661_v44 = vadd.f32 0.112945676, %v5660_v39  ;;  %v7265_v2 = vmul.f32 %v7137_v14, %v16454_v31  ;;  %v5708_v25 = vsub.f32 1.0, %v5707_v30  ;;  %v16456_v50 = vld [vmem:[#allocation105_spill] sm:$0xff] }
 0x3ee   :  { %16453 = vst [vmem:[#allocation59_spill] sm:$0xff] %v12788_v60  ;;  %v5489_v34 = vmul.f32 %v5488_v36, %v12622_v21  ;;  %v12795_v20 = vmin.f32 %v3083_v43, 16.0  ;;  %v6418_v32 = vmul.f32 %v6417_v1, %v12732_v61  ;;  %v5759_v22 = vsel %vm12744_vm5, %v5758_v28, %v5754_v33 }
 0x3ef   :  { %v12801_v48 = vmul.f32 %v5694_v62, %v12429_v63  ;;  %v4667_v26 = vmul.f32 %v12782_v13, %v12727_v55  ;;  %v5647_v39 = vmul.f32 %v5646_v29, %v12663_v57  ;;  %7422 = vmatpush.msra.mxu1 %v7265_v2  ;;  %vm5711_vm8 = vweird.f32 %v12700_v19  ;;  %v12816_v62 = vpop.f32.mrf.mxu3  ;;  %v16461_v2 = vld [vmem:[#allocation26_spill] sm:$0xff] }
 0x3f0   :  { %16455 = vst [vmem:[#allocation71_spill] sm:$0xff] %v12795_v20  ;;  %v5504_v14 = vmul.f32 %v5503_v24, %v12622_v21  ;;  %v4697_v4 = vadd.f32 0.001143296, %v4696_v58  ;;  %v12810_v30 = vadd.f32 %v16456_v50, %v12359_v41  ;;  %v5715_v5 = vand.u32 2147483647, %v12700_v19 }
 0x3f1   :  { %v3052_v36 = vadd.f32 0.18741608, %v3051_v40  ;;  %v4652_v63 = vadd.f32 0.18741608, %v4651_v53  ;;  %v5662_v43 = vmul.f32 %v5661_v44, %v12663_v57  ;;  %v5709_v1 = vmul.f32 %v12754_v46, %v5708_v25  ;;  %v12824_v40 = vpop.permute.xlu1 %913 }
 0x3f2   :  { %16457 = vst [vmem:[#allocation65_spill] sm:$0xff] %v12810_v30  ;;  %v5490_v23 = vadd.f32 0.05243302, %v5489_v34  ;;  %v3085_v28 = vmul.f32 2.1237322e-06, %v12795_v20  ;;  %v12819_v33 = vmul.f32 %v5759_v22, %v12685_v3  ;;  %v4668_v24 = vsub.f32 1.0, %v4667_v26 }
 0x3f3   :  { %v6419_v29 = vadd.f32 0.014752088, %v6418_v32  ;;  %v5648_v41 = vadd.f32 0.0036580483, %v5647_v39  ;;  %v4685_v58 = vmul.f32 2.1237322e-06, %v12763_v17  ;;  %v4698_v53 = vmul.f32 %v4697_v4, %v12763_v17 }
 0x3f4   :  { %16458 = vst [vmem:[#allocation11_spill] sm:$0xff] %v12819_v33  ;;  %v12822_v31 = vadd.f32 1.0, %v5504_v14  ;;  %v12828_v44 = vmul.f32 0.70710677, %v12810_v30  ;;  %v7712_v25 = vclamps-f32 %v16461_v2, 1.0  ;;  %v5717_v34 = vand.u32 2147483648, %v12700_v19 }
 0x3f5   :  { %v3053_v3 = vmul.f32 %v3052_v36, %v12637_v7  ;;  %v4653_v32 = vmul.f32 %v4652_v63, %v12519_v0  ;;  %v5663_v22 = vadd.f32 0.4994258, %v5662_v43  ;;  %v5710_v26 = vadd.f32 %v12754_v46, %v5709_v1 }
 0x3f6   :  { %16459 = vst [vmem:[#allocation88_spill] sm:$0xff] %v12822_v31  ;;  %vm5712_vm11 = vweird.f32 %v12754_v46  ;;  %v3086_v39 = vadd.f32 0.00028619796, %v3085_v28  ;;  %v6420_v14 = vmul.f32 %v6419_v29, %v12732_v61  ;;  %v4669_v4 = vmul.f32 %v12782_v13, %v4668_v24 }
 0x3f7   :  { %16460 = vst [vmem:[#allocation91_spill] sm:$0xff] %v12828_v44  ;;  %v5491_v50 = vmul.f32 %v5490_v23, %v12622_v21  ;;  %v5649_v2 = vmul.f32 %v5648_v41, %v12663_v57  ;;  %v4686_v30 = vadd.f32 0.00028619796, %v4685_v58  ;;  %7938 = vrcp.f32 %v12822_v31  ;;  %vm12845_vm12 = vmor %vm5711_vm8, %vm5712_vm11 }
 0x3f8   :  { %v4699_v36 = vadd.f32 0.014752088, %v4698_v53  ;;  %v5443_v0 = vmul.f32 %v12828_v44, %v12828_v44  ;;  %v7136_v63 = vadd.f32 1.0, %v7712_v25  ;;  %vm12849_vm13 = vcmp.eq.f32.partialorder %v5715_v5, 8.507059e+37  ;;  %v16466_v5 = vld [vmem:[#allocation77_spill] sm:$0xff] }
 0x3f9   :  { %v3054_v23 = vadd.f32 1.1283791, %v3053_v3  ;;  %v4654_v28 = vadd.f32 1.1283791, %v4653_v32  ;;  %v5664_v29 = vmul.f32 %v5663_v22, %v12663_v57  ;;  %v5714_v24 = vsel %vm12845_vm12, %v12754_v46, %v5710_v26  ;;  %v12865_v22 = vpop.f32.mrf.mxu3 }
 0x3fa   :  { %v5718_v41 = vor.u32 1.1754944e-38, %v5717_v34  ;;  %v3087_v58 = vmul.f32 %v3086_v39, %v12795_v20  ;;  %v6421_v19 = vadd.f32 0.112945676, %v6420_v14  ;;  %v5492_v53 = vadd.f32 0.18741608, %v5491_v50  ;;  %v834_v39 = vpop.permute.xlu0 %833 }
 0x3fb   :  { %v5650_v25 = vadd.f32 0.05243302, %v5649_v2  ;;  %v4687_v44 = vmul.f32 %v4686_v30, %v12763_v17  ;;  %v7264_v33 = vmul.f32 %v7136_v63, %v16466_v5  ;;  %v4670_v60 = vadd.f32 %v12782_v13, %v4669_v4  ;;  %v12878_v2 = vpop.permute.xlu1 %908 }
 0x3fc   :  { %vm4672_vm14 = vweird.f32 %v12782_v13  ;;  %v4700_v3 = vmul.f32 %v4699_v36, %v12763_v17  ;;  %v12863_v32 = vmin.f32 %v5443_v0, 16.0  ;;  %v12868_v46 = vmul.f32 %v3054_v23, %v12593_v10 }
 0x3fd   :  { %v4655_v34 = vmul.f32 %v4654_v28, %v12475_v9  ;;  %v4677_v26 = vand.u32 2147483648, %v12727_v55  ;;  %v12872_v30 = vadd.f32 1.0, %v5664_v29  ;;  %7423 = vmatpush.msra.mxu1 %v7264_v33  ;;  %v12874_v14 = vpop.eup %7938  ;;  %vm4671_vm15 = vweird.f32 %v12727_v55 }
 0x3fe   :  { %16467 = vst [vmem:[#allocation101_spill] sm:$0xff] %v12863_v32  ;;  %v4675_v4 = vand.u32 2147483647, %v12727_v55  ;;  %v3088_v50 = vadd.f32 0.0036580483, %v3087_v58  ;;  %v6422_v10 = vmul.f32 %v6421_v19, %v12732_v61  ;;  %v5719_v9 = vsel %vm12849_vm13, %v5718_v41, %v5714_v24  ;;  %vm12885_vm1 = vmor %vm4671_vm15, %vm4672_vm14 }
 0x3ff   :  { %16468 = vst [vmem:[#allocation102_spill] sm:$0xff] %v12868_v46  ;;  %v5493_v33 = vmul.f32 %v5492_v53, %v12622_v21  ;;  %v5651_v0 = vmul.f32 %v5650_v25, %v12663_v57  ;;  %v4688_v63 = vadd.f32 0.0036580483, %v4687_v44  ;;  %v4674_v55 = vsel %vm12885_vm1, %v12782_v13, %v4670_v60 }
 0x400   :  { %16469 = vst [vmem:[#allocation22_spill] sm:$0xff] %v12872_v30  ;;  %v4701_v43 = vadd.f32 0.112945676, %v4700_v3  ;;  %v5456_v23 = vmul.f32 3.8918573e-05, %v12863_v32  ;;  %v12896_v1 = vadd.f32 %v12166_v35, %v834_v39  ;;  %v4678_v28 = vor.u32 1.1754944e-38, %v4677_v26 }
 0x401   :  { %16470 = vst [vmem:[#allocation97_spill] sm:$0xff] %v12874_v14  ;;  %v5507_v29 = vmul.f32 %v12874_v14, %v12822_v31  ;;  %7940 = vrcp.f32 %v12872_v30  ;;  %v6405_v21 = vmul.f32 2.1237322e-06, %v12732_v61  ;;  %vm4676_vm2 = vcmp.eq.f32.partialorder %v4675_v4, 8.507059e+37 }
 0x402   :  { %v5517_v44 = vand.u32 2147483648, %v12822_v31  ;;  %v3089_v24 = vmul.f32 %v3088_v50, %v12795_v20  ;;  %v6423_v13 = vadd.f32 0.4994258, %v6422_v10  ;;  %v4679_v60 = vsel %vm4676_vm2, %v4678_v28, %v4674_v55 }
 0x403   :  { %v12904_v41 = vadd.f32 1.1283791, %v5493_v33  ;;  %v5652_v58 = vadd.f32 0.18741608, %v5651_v0  ;;  %v4689_v35 = vmul.f32 %v4688_v63, %v12763_v17  ;;  %v4702_v53 = vmul.f32 %v4701_v43, %v12763_v17  ;;  %v1695_v0 = vpop.f32.mrf.mxu3 }
 0x404   :  { %v5457_v25 = vadd.f32 0.001143296, %v5456_v23  ;;  %v12910_v5 = vmul.f32 0.70710677, %v12896_v1  ;;  %v12913_v3 = vmul.f32 %v5719_v9, %v12801_v48  ;;  %v5508_v26 = vsub.f32 1.0, %v5507_v29  ;;  %v1410_v23 = vpop.f32.mrf.mxu0  ;;  %v904_v29 = vpop.permute.xlu1 %903 }
 0x405   :  { %16473 = vst [vmem:[#allocation92_spill] sm:$0xff] %v12904_v41  ;;  %v5445_v39 = vmul.f32 2.1237322e-06, %v12863_v32  ;;  %v6406_v4 = vadd.f32 0.00028619796, %v6405_v21  ;;  %v12916_v50 = vmul.f32 %v4679_v60, %v4655_v34  ;;  %v12918_v10 = vor.u32 1.1754944e-38, %v5517_v44 }
 0x406   :  { %16474 = vst [vmem:[#allocation95_spill] sm:$0xff] %v12913_v3  ;;  %v3090_v36 = vadd.f32 0.05243302, %v3089_v24  ;;  %v6424_v33 = vmul.f32 %v6423_v13, %v12732_v61  ;;  %vm5512_vm3 = vweird.f32 %v12874_v14  ;;  %v5653_v55 = vmul.f32 %v5652_v58, %v12663_v57 }
 0x407   :  { %16475 = vst [vmem:[#allocation98_spill] sm:$0xff] %v12916_v50  ;;  %v12921_v63 = vpop.eup %7940  ;;  %v12926_v48 = vmul.f32 0.5, %v12730_v18  ;;  %v4690_v9 = vadd.f32 0.05243302, %v4689_v35  ;;  %vm5511_vm4 = vweird.f32 %v12822_v31  ;;  %v4703_v34 = vadd.f32 0.4994258, %v4702_v53 }
 0x408   :  { %16476 = vst [vmem:[#allocation43_spill] sm:$0xff] %v12918_v10  ;;  %v5458_v43 = vmul.f32 %v5457_v25, %v12863_v32  ;;  %v12931_v28 = vmul.f32 0.70710677, %v12425_v11  ;;  %v6363_v21 = vmul.f32 %v12910_v5, %v12910_v5  ;;  %v5509_v44 = vmul.f32 %v12874_v14, %v5508_v26  ;;  %v16480_v35 = vld [vmem:[#allocation66_spill] sm:$0xff]  ;;  %v16481_v11 = vld [vmem:[#allocation12_spill] sm:$0xff]  ;;  %v16482_v26 = vld [vmem:[#allocation93_spill] sm:$0xff] }
 0x409   :  { %16477 = vst [vmem:[#allocation63_spill] sm:$0xff] %v12921_v63  ;;  %v5446_v57 = vadd.f32 0.00028619796, %v5445_v39  ;;  %v6407_v18 = vmul.f32 %v6406_v4, %v12732_v61  ;;  %v12937_v24 = vadd.f32 %v1695_v0, %v904_v29  ;;  %v5667_v13 = vmul.f32 %v12921_v63, %v12872_v30  ;;  %vm12979_vm5 = vmor %vm5511_vm4, %vm5512_vm3 }
 0x40a   :  { %16478 = vst [vmem:[#allocation105_spill] sm:$0xff] %v12926_v48  ;;  %v3091_v60 = vmul.f32 %v3090_v36, %v12795_v20  ;;  %v12942_v58 = vadd.f32 1.0, %v6424_v33  ;;  %v7711_v53 = vclamps-f32 %v16480_v35, 1.0  ;;  %v5654_v25 = vadd.f32 1.1283791, %v5653_v55 }
 0x40b   :  { %16479 = vst [vmem:[#allocation26_spill] sm:$0xff] %v12931_v28  ;;  %v4691_v19 = vmul.f32 %v4690_v9, %v12763_v17  ;;  %v12947_v41 = vadd.f32 %v1410_v23, %v16481_v11  ;;  %v7710_v39 = vclamps-f32 %v16482_v26, 1.0  ;;  %v4704_v4 = vmul.f32 %v4703_v34, %v12763_v17 }
 0x40c   :  { %v5459_v0 = vadd.f32 0.014752088, %v5458_v43  ;;  %v5403_v29 = vmul.f32 %v12931_v28, %v12931_v28  ;;  %v12953_v3 = vmin.f32 %v6363_v21, 16.0  ;;  %v12956_v36 = vadd.f32 %v12874_v14, %v5509_v44 }
 0x40d   :  { %v6408_v33 = vadd.f32 0.0036580483, %v6407_v18  ;;  %v12959_v55 = vmul.f32 0.70710677, %v12937_v24  ;;  %v7135_v9 = vadd.f32 1.0, %v7711_v53  ;;  %v5668_v11 = vsub.f32 1.0, %v5667_v13 }
 0x40e   :  { %16483 = vst [vmem:[#allocation77_spill] sm:$0xff] %v12956_v36  ;;  %v3092_v23 = vadd.f32 0.18741608, %v3091_v60  ;;  %v5447_v35 = vmul.f32 %v5446_v57, %v12863_v32  ;;  %7942 = vrcp.f32 %v12942_v58  ;;  %v12964_v34 = vmul.f32 0.5, %v12706_v16  ;;  %v16489_v53 = vld [vmem:[#allocation40_spill] sm:$0xff] }
 0x40f   :  { %v4692_v43 = vadd.f32 0.18741608, %v4691_v19  ;;  %v12967_v21 = vmul.f32 0.70710677, %v12947_v41  ;;  %v7134_v44 = vadd.f32 1.0, %v7710_v39  ;;  %v12969_v26 = vadd.f32 1.0, %v4704_v4 }
 0x410   :  { %16484 = vst [vmem:[#allocation66_spill] sm:$0xff] %v12964_v34  ;;  %v5460_v18 = vmul.f32 %v5459_v0, %v12863_v32  ;;  %v12972_v28 = vmin.f32 %v5403_v29, 16.0  ;;  %v6376_v13 = vmul.f32 3.8918573e-05, %v12953_v3  ;;  %v16486_v16 = vmov 0 }
 0x411   :  { %v16487_v16 = vsel %vm12979_vm5, 4294967295, %v16486_v16  ;;  %v12984_v19 = vmul.f32 0.5, %v12674_v51  ;;  %v6409_v57 = vmul.f32 %v6408_v33, %v12732_v61  ;;  %v6923_v60 = vmul.f32 %v12959_v55, %v12959_v55  ;;  %v1413_v51 = vpop.f32.mrf.mxu0 }
 0x412   :  { %16485 = vst [vmem:[#allocation12_spill] sm:$0xff] %v12972_v28  ;;  %v7263_v39 = vmul.f32 %v7135_v9, %v16489_v53  ;;  %v12995_v0 = vmul.f32 %v5654_v25, %v12628_v27  ;;  %v5669_v29 = vmul.f32 %v12921_v63, %v5668_v11  ;;  %v5448_v10 = vadd.f32 0.0036580483, %v5447_v35  ;;  %v16491_v9 = vld [vmem:[#allocation42_spill] sm:$0xff] }
 0x413   :  { %16488 = vst [vmem:[#allocation93_spill] sm:$0xff] %v16487_v16  ;;  %v3093_v31 = vmul.f32 %v3092_v23, %v12795_v20  ;;  %v4693_v33 = vmul.f32 %v4692_v43, %v12763_v17  ;;  %v3123_v34 = vmul.f32 %v12967_v21, %v12967_v21  ;;  %v7262_v53 = vmul.f32 %v7134_v44, %v16491_v9  ;;  %v16492_v23 = vld [vmem:[#allocation30_spill] sm:$0xff] }
 0x414   :  { %16490 = vst [vmem:[#allocation40_spill] sm:$0xff] %v12995_v0  ;;  %7424 = vmatpush.msra.mxu1 %v7263_v39  ;;  %v13003_v50 = vpop.eup %7942  ;;  %7944 = vrcp.f32 %v12969_v26  ;;  %v5461_v27 = vadd.f32 0.112945676, %v5460_v18  ;;  %v5416_v25 = vmul.f32 3.8918573e-05, %v12972_v28  ;;  %vm5671_vm6 = vweird.f32 %v12872_v30  ;;  %v16493_v39 = vld [vmem:[#allocation78_spill] sm:$0xff]  ;;  %v809_v30 = vpop.permute.xlu2 %808 }
 0x415   :  { %v6377_v11 = vadd.f32 0.001143296, %v6376_v13  ;;  %v6410_v35 = vadd.f32 0.05243302, %v6409_v57  ;;  %v13009_v4 = vadd.f32 %v1413_v51, %v16492_v23  ;;  %v13011_v17 = vmin.f32 %v6923_v60, 16.0 }
 0x416   :  { %7425 = vmatpush.msra.mxu1 %v7262_v53  ;;  %vm5672_vm7 = vweird.f32 %v12921_v63  ;;  %v5449_v44 = vmul.f32 %v5448_v10, %v12863_v32  ;;  %v7709_v18 = vclamps-f32 %v16493_v39, 1.0  ;;  %v13018_v9 = vadd.f32 %v12921_v63, %v5669_v29 }
 0x417   :  { %v3094_v13 = vadd.f32 1.1283791, %v3093_v31  ;;  %v6427_v57 = vmul.f32 %v13003_v50, %v12942_v58  ;;  %v13022_v51 = vmin.f32 %v3123_v34, 16.0  ;;  %v4694_v60 = vadd.f32 1.1283791, %v4693_v33  ;;  %vm13038_vm8 = vmor %vm5671_vm6, %vm5672_vm7 }
 0x418   :  { %16494 = vst [vmem:[#allocation42_spill] sm:$0xff] %v13018_v9  ;;  %v5462_v53 = vmul.f32 %v5461_v27, %v12863_v32  ;;  %v5417_v23 = vadd.f32 0.001143296, %v5416_v25  ;;  %v6378_v0 = vmul.f32 %v6377_v11, %v12953_v3  ;;  %v6411_v10 = vmul.f32 %v6410_v35, %v12732_v61  ;;  %v16500_v11 = vld [vmem:[#allocation5_spill] sm:$0xff] }
 0x419   :  { %16495 = vst [vmem:[#allocation30_spill] sm:$0xff] %v13022_v51  ;;  %v13029_v39 = vmul.f32 0.70710677, %v13009_v4  ;;  %v6936_v31 = vmul.f32 3.8918573e-05, %v13011_v17  ;;  %v16496_v34 = vmov 0  ;;  %v13051_v36 = vmul.f32 %v3094_v13, %v12751_v45 }
 0x41a   :  { %v13032_v29 = vpop.eup %7944  ;;  %v16497_v34 = vsel %vm13038_vm8, 4294967295, %v16496_v34  ;;  %v5450_v33 = vadd.f32 0.05243302, %v5449_v44  ;;  %v13043_v27 = vmul.f32 0.5, %v12947_v41  ;;  %v7133_v25 = vadd.f32 1.0, %v7709_v18 }
 0x41b   :  { %16498 = vst [vmem:[#allocation78_spill] sm:$0xff] %v16497_v34  ;;  %v7708_v35 = vclamps-f32 %v16500_v11, 1.0  ;;  %v6428_v14 = vsub.f32 1.0, %v6427_v57  ;;  %v3125_v16 = vmul.f32 2.1237322e-06, %v13022_v51  ;;  %v13055_v44 = vmul.f32 %v4694_v60, %v12722_v42  ;;  %v899_v11 = vpop.permute.xlu1 %898  ;;  %v16502_v42 = vld [vmem:[#allocation89_spill] sm:$0xff] }
 0x41c   :  { %16499 = vst [vmem:[#allocation174_spill] sm:$0xff] %v13043_v27  ;;  %v5463_v41 = vadd.f32 0.4994258, %v5462_v53  ;;  %v5418_v18 = vmul.f32 %v5417_v23, %v12972_v28  ;;  %v6379_v46 = vadd.f32 0.014752088, %v6378_v0  ;;  %v4707_v48 = vmul.f32 %v13032_v29, %v12969_v26 }
 0x41d   :  { %16501 = vst [vmem:[#allocation5_spill] sm:$0xff] %v13051_v36  ;;  %v6412_v34 = vadd.f32 0.18741608, %v6411_v10  ;;  %v3163_v45 = vmul.f32 %v13029_v39, %v13029_v39  ;;  %v6937_v13 = vadd.f32 0.001143296, %v6936_v31  ;;  %v13064_v43 = vadd.f32 %v11898_v49, %v809_v30 }
 0x41e   :  { %v6365_v57 = vmul.f32 2.1237322e-06, %v12953_v3  ;;  %v7261_v60 = vmul.f32 %v7133_v25, %v16502_v42  ;;  %v7132_v53 = vadd.f32 1.0, %v7708_v35  ;;  %v4715_v23 = vand.u32 2147483647, %v12969_v26 }
 0x41f   :  { %v6429_v0 = vmul.f32 %v13003_v50, %v6428_v14  ;;  %v3126_v9 = vadd.f32 0.00028619796, %v3125_v16  ;;  %v13070_v63 = vadd.f32 %v12865_v22, %v899_v11  ;;  %v4717_v10 = vand.u32 2147483648, %v12969_v26  ;;  %v16504_v11 = vld [vmem:[#allocation69_spill] sm:$0xff] }
 0x420   :  { %v5464_v31 = vmul.f32 %v5463_v41, %v12863_v32  ;;  %v5419_v36 = vadd.f32 0.014752088, %v5418_v18  ;;  %v6380_v27 = vmul.f32 %v6379_v46, %v12953_v3  ;;  %7426 = vmatpush.msra.mxu1 %v7261_v60  ;;  %v5451_v49 = vmul.f32 %v5450_v33, %v12863_v32  ;;  %v829_v60 = vpop.permute.xlu0 %828 }
 0x421   :  { %v6413_v30 = vmul.f32 %v6412_v34, %v12732_v61  ;;  %v13077_v25 = vmin.f32 %v3163_v45, 16.0  ;;  %v6938_v14 = vmul.f32 %v6937_v13, %v13011_v17  ;;  %v4708_v16 = vsub.f32 1.0, %v4707_v48 }
 0x422   :  { %v6366_v35 = vadd.f32 0.00028619796, %v6365_v57  ;;  %v13081_v22 = vmul.f32 0.70710677, %v13064_v43  ;;  %v7260_v42 = vmul.f32 %v7132_v53, %v16504_v11  ;;  %vm4712_vm11 = vweird.f32 %v13032_v29 }
 0x423   :  { %16503 = vst [vmem:[#allocation89_spill] sm:$0xff] %v13077_v25  ;;  %v6430_v46 = vadd.f32 %v13003_v50, %v6429_v0  ;;  %vm6432_vm12 = vweird.f32 %v13003_v50  ;;  %v3127_v33 = vmul.f32 %v3126_v9, %v13022_v51  ;;  %v13089_v61 = vmul.f32 0.70710677, %v13070_v63 }
 0x424   :  { %v13091_v34 = vadd.f32 1.0, %v5464_v31  ;;  %v6437_v48 = vand.u32 2147483648, %v12942_v58  ;;  %v5420_v41 = vmul.f32 %v5419_v36, %v12972_v28  ;;  %v6381_v18 = vadd.f32 0.112945676, %v6380_v27  ;;  %7427 = vmatpush.msra.mxu1 %v7260_v42 }
 0x425   :  { %vm6431_vm13 = vweird.f32 %v12942_v58  ;;  %v6435_v45 = vand.u32 2147483647, %v12942_v58  ;;  %v3165_v13 = vmul.f32 2.1237322e-06, %v13077_v25  ;;  %v6939_v57 = vadd.f32 0.014752088, %v6938_v14 }
 0x426   :  { %16505 = vst [vmem:[#allocation69_spill] sm:$0xff] %v13091_v34  ;;  %v4709_v9 = vmul.f32 %v13032_v29, %v4708_v16  ;;  %v6414_v53 = vadd.f32 1.1283791, %v6413_v30  ;;  %vm13101_vm14 = vmor %vm6431_vm13, %vm6432_vm12  ;;  %v6367_v36 = vmul.f32 %v6366_v35, %v12953_v3  ;;  %v6163_v27 = vmul.f32 %v13081_v22, %v13081_v22 }
 0x427   :  { %v6434_v58 = vsel %vm13101_vm14, %v13003_v50, %v6430_v46  ;;  %v3128_v31 = vadd.f32 0.0036580483, %v3127_v33  ;;  %v5405_v14 = vmul.f32 2.1237322e-06, %v12972_v28  ;;  %v6883_v30 = vmul.f32 %v13089_v61, %v13089_v61 }
 0x428   :  { %v6438_v16 = vor.u32 1.1754944e-38, %v6437_v48  ;;  %v5421_v11 = vadd.f32 0.112945676, %v5420_v41  ;;  %v6382_v42 = vmul.f32 %v6381_v18, %v12953_v3  ;;  %v13116_v32 = vadd.f32 %v12111_v8, %v829_v60 }
 0x429   :  { %7946 = vrcp.f32 %v13091_v34  ;;  %vm6436_vm15 = vcmp.eq.f32.partialorder %v6435_v45, 8.507059e+37  ;;  %v3166_v35 = vadd.f32 0.00028619796, %v3165_v13  ;;  %v6940_v0 = vmul.f32 %v6939_v57, %v13011_v17 }
 0x42a   :  { %v6415_v50 = vmul.f32 %v6414_v53, %v12696_v47  ;;  %v6439_v46 = vsel %vm6436_vm15, %v6438_v16, %v6434_v58  ;;  %v6368_v33 = vadd.f32 0.0036580483, %v6367_v36  ;;  %v13121_v7 = vmin.f32 %v6163_v27, 16.0  ;;  %v1698_v47 = vpop.f32.mrf.mxu3 }
 0x42b   :  { %v4710_v48 = vadd.f32 %v13032_v29, %v4709_v9  ;;  %v3129_v41 = vmul.f32 %v3128_v31, %v13022_v51  ;;  %v5406_v18 = vadd.f32 0.00028619796, %v5405_v14  ;;  %v13125_v20 = vmin.f32 %v6883_v30, 16.0 }
 0x42c   :  { %vm4711_vm1 = vweird.f32 %v12969_v26  ;;  %v5422_v8 = vmul.f32 %v5421_v11, %v12972_v28  ;;  %v6383_v45 = vadd.f32 0.4994258, %v6382_v42  ;;  %v13130_v13 = vmul.f32 0.70710677, %v13116_v32 }
 0x42d   :  { %vm13132_vm2 = vcmp.eq.f32.partialorder %v4715_v23, 8.507059e+37  ;;  %v6440_v57 = vmul.f32 %v6439_v46, %v6415_v50  ;;  %v3167_v60 = vmul.f32 %v3166_v35, %v13077_v25  ;;  %v6941_v9 = vadd.f32 0.112945676, %v6940_v0  ;;  %vm13139_vm3 = vmor %vm4711_vm1, %vm4712_vm11 }
 0x42e   :  { %v4718_v26 = vor.u32 1.1754944e-38, %v4717_v10  ;;  %v13143_v36 = vadd.f32 0.18741608, %v5451_v49  ;;  %v6369_v27 = vmul.f32 %v6368_v33, %v12953_v3  ;;  %v6176_v23 = vmul.f32 3.8918573e-05, %v13121_v7 }
 0x42f   :  { %v13147_v58 = vpop.eup %7946  ;;  %v4714_v31 = vsel %vm13139_vm3, %v13032_v29, %v4710_v48  ;;  %v3130_v14 = vadd.f32 0.05243302, %v3129_v41  ;;  %v5407_v30 = vmul.f32 %v5406_v18, %v12972_v28  ;;  %v6896_v16 = vmul.f32 3.8918573e-05, %v13125_v20  ;;  %v16515_v41 = vld [vmem:[#allocation50_spill] sm:$0xff] }
 0x430   :  { %16512 = vst [vmem:[#allocation175_spill] sm:$0xff] %v13143_v36  ;;  %v5423_v11 = vadd.f32 0.4994258, %v5422_v8  ;;  %v6384_v10 = vmul.f32 %v6383_v45, %v12953_v3  ;;  %v6925_v49 = vmul.f32 2.1237322e-06, %v13011_v17  ;;  %v6323_v42 = vmul.f32 %v13130_v13, %v13130_v13 }
 0x431   :  { %16513 = vst [vmem:[#allocation176_spill] sm:$0xff] %v13147_v58  ;;  %v7770_v35 = vclamps-f32 %v6440_v57, 1.0  ;;  %v13159_v0 = vmul.f32 0.5, %v12896_v1  ;;  %v3168_v50 = vadd.f32 0.0036580483, %v3167_v60  ;;  %v6942_v29 = vmul.f32 %v6941_v9, %v13011_v17 }
 0x432   :  { %v4719_v46 = vsel %vm13132_vm2, %v4718_v26, %v4714_v31  ;;  %v6370_v33 = vadd.f32 0.05243302, %v6369_v27  ;;  %v6177_v48 = vadd.f32 0.001143296, %v6176_v23  ;;  %v7707_v18 = vclamps-f32 %v16515_v41, 1.0 }
 0x433   :  { %16514 = vst [vmem:[#allocation177_spill] sm:$0xff] %v13159_v0  ;;  %v5467_v8 = vmul.f32 %v13147_v58, %v13091_v34  ;;  %v3131_v45 = vmul.f32 %v3130_v14, %v13022_v51  ;;  %v5408_v53 = vadd.f32 0.0036580483, %v5407_v30  ;;  %v6897_v57 = vadd.f32 0.001143296, %v6896_v16 }
 0x434   :  { %v5424_v1 = vmul.f32 %v5423_v11, %v12972_v28  ;;  %v13169_v36 = vadd.f32 1.0, %v6384_v10  ;;  %v6926_v60 = vadd.f32 0.00028619796, %v6925_v49  ;;  %v13171_v9 = vmin.f32 %v6323_v42, 16.0 }
 0x435   :  { %v7194_v26 = vadd.f32 1.0, %v7770_v35  ;;  %v3169_v27 = vmul.f32 %v3168_v50, %v13077_v25  ;;  %v6943_v23 = vadd.f32 0.4994258, %v6942_v29  ;;  %v6165_v31 = vmul.f32 2.1237322e-06, %v13121_v7 }
 0x436   :  { %v6371_v41 = vmul.f32 %v6370_v33, %v12953_v3  ;;  %v6178_v14 = vmul.f32 %v6177_v48, %v13121_v7  ;;  %v6885_v30 = vmul.f32 2.1237322e-06, %v13125_v20  ;;  %v7131_v16 = vadd.f32 1.0, %v7707_v18 }
 0x437   :  { %v3132_v11 = vadd.f32 0.18741608, %v3131_v45  ;;  %v5409_v10 = vmul.f32 %v5408_v53, %v12972_v28  ;;  %v6898_v49 = vmul.f32 %v6897_v57, %v13125_v20  ;;  %v13181_v42 = vadd.f32 %v1698_v47, %v12878_v2  ;;  %v1416_v53 = vpop.f32.mrf.mxu0  ;;  %v16517_v2 = vld [vmem:[#allocation74_spill] sm:$0xff] }
 0x438   :  { %v13183_v35 = vadd.f32 1.0, %v5424_v1  ;;  %7948 = vrcp.f32 %v13169_v36  ;;  %v6927_v50 = vmul.f32 %v6926_v60, %v13011_v17  ;;  %v6336_v29 = vmul.f32 3.8918573e-05, %v13171_v9 }
 0x439   :  { %v7322_v33 = vmul.f32 %v7194_v26, %v12984_v19  ;;  %v3170_v48 = vadd.f32 0.05243302, %v3169_v27  ;;  %v6944_v18 = vmul.f32 %v6943_v23, %v13011_v17  ;;  %v6166_v45 = vadd.f32 0.00028619796, %v6165_v31  ;;  %v16518_v27 = vld [vmem:[#allocation24_spill] sm:$0xff] }
 0x43a   :  { %16516 = vst [vmem:[#allocation50_spill] sm:$0xff] %v13183_v35  ;;  %v6372_v34 = vadd.f32 0.18741608, %v6371_v41  ;;  %v6179_v57 = vadd.f32 0.014752088, %v6178_v14  ;;  %v7259_v47 = vmul.f32 %v7131_v16, %v16517_v2  ;;  %v5468_v1 = vsub.f32 1.0, %v5467_v8 }
 0x43b   :  { %v6886_v0 = vadd.f32 0.00028619796, %v6885_v30  ;;  %v3133_v38 = vmul.f32 %v3132_v11, %v13022_v51  ;;  %v6899_v54 = vadd.f32 0.014752088, %v6898_v49  ;;  %v13193_v60 = vmul.f32 0.70710677, %v13181_v42 }
 0x43c   :  { %7950 = vrcp.f32 %v13183_v35  ;;  %v6928_v19 = vadd.f32 0.0036580483, %v6927_v50  ;;  %v6337_v26 = vadd.f32 0.001143296, %v6336_v29  ;;  %v13197_v23 = vadd.f32 %v1416_v53, %v16518_v27  ;;  %7428 = vmatpush.msra.mxu1 %v7259_v47 }
 0x43d   :  { %v13200_v31 = vmul.f32 %v4719_v46, %v13055_v44  ;;  %v3171_v41 = vmul.f32 %v3170_v48, %v13077_v25  ;;  %v13203_v8 = vadd.f32 1.0, %v6944_v18  ;;  %v6167_v14 = vmul.f32 %v6166_v45, %v13121_v7 }
 0x43e   :  { %7473 = vmatpush.msrb.mxu1 %v7322_v33  ;;  %v13206_v30 = vpop.eup %7948  ;;  %v5410_v16 = vadd.f32 0.05243302, %v5409_v10  ;;  %v6373_v11 = vmul.f32 %v6372_v34, %v12953_v3  ;;  %v6180_v49 = vmul.f32 %v6179_v57, %v13121_v7  ;;  %v6887_v50 = vmul.f32 %v6886_v0, %v13125_v20 }
 0x43f   :  { %16519 = vst [vmem:[#allocation74_spill] sm:$0xff] %v13200_v31  ;;  %v3134_v29 = vadd.f32 1.1283791, %v3133_v38  ;;  %v13212_v44 = vmul.f32 0.5, %v13009_v4  ;;  %v6900_v46 = vmul.f32 %v6899_v54, %v13125_v20  ;;  %v6963_v48 = vmul.f32 %v13193_v60, %v13193_v60 }
 0x440   :  { %v13218_v33 = vmul.f32 %v13147_v58, %v5468_v1  ;;  %v6929_v10 = vmul.f32 %v6928_v19, %v13011_v17  ;;  %v6338_v3 = vmul.f32 %v6337_v26, %v13171_v9  ;;  %v13223_v34 = vmul.f32 0.70710677, %v13197_v23 }
 0x441   :  { %16520 = vst [vmem:[#allocation24_spill] sm:$0xff] %v13212_v44  ;;  %v6387_v38 = vmul.f32 %v13206_v30, %v13169_v36  ;;  %v3172_v4 = vadd.f32 0.18741608, %v3171_v41  ;;  %7952 = vrcp.f32 %v13203_v8  ;;  %v6168_v54 = vadd.f32 0.0036580483, %v6167_v14 }
 0x442   :  { %16521 = vst [vmem:[#allocation178_spill] sm:$0xff] %v13218_v33  ;;  %v13228_v0 = vpop.eup %7950  ;;  %v13231_v18 = vmul.f32 %v5410_v16, %v12972_v28  ;;  %v6374_v45 = vadd.f32 1.1283791, %v6373_v11  ;;  %v6181_v53 = vadd.f32 0.112945676, %v6180_v49  ;;  %v13234_v2 = vmul.f32 %v3134_v29, %v12967_v21 }
 0x443   :  { %16522 = vst [vmem:[#allocation179_spill] sm:$0xff] %v13228_v0  ;;  %v6888_v57 = vadd.f32 0.0036580483, %v6887_v50  ;;  %v6901_v47 = vadd.f32 0.112945676, %v6900_v46  ;;  %v13237_v19 = vmin.f32 %v6963_v48, 16.0  ;;  %v3203_v14 = vmul.f32 %v13223_v34, %v13223_v34  ;;  %v874_v48 = vpop.permute.xlu2 %873 }
 0x444   :  { %16523 = vst [vmem:[#allocation180_spill] sm:$0xff] %v13231_v18  ;;  %v6325_v1 = vmul.f32 2.1237322e-06, %v13171_v9  ;;  %v13240_v26 = vmul.f32 0.5, %v12937_v24  ;;  %v6930_v27 = vadd.f32 0.05243302, %v6929_v10  ;;  %v13246_v16 = vmul.f32 %v13228_v0, %v13183_v35 }
 0x445   :  { %16524 = vst [vmem:[#allocation181_spill] sm:$0xff] %v13234_v2  ;;  %v6339_v41 = vadd.f32 0.014752088, %v6338_v3  ;;  %v6388_v11 = vsub.f32 1.0, %v6387_v38  ;;  %v3173_v21 = vmul.f32 %v3172_v4, %v13077_v25  ;;  %v6169_v49 = vmul.f32 %v6168_v54, %v13121_v7  ;;  %v894_v54 = vpop.permute.xlu1 %893 }
 0x446   :  { %16525 = vst [vmem:[#allocation182_spill] sm:$0xff] %v13240_v26  ;;  %v13251_v50 = vmul.f32 %v6374_v45, %v12910_v5  ;;  %v6395_v24 = vand.u32 2147483647, %v13169_v36  ;;  %v6182_v29 = vmul.f32 %v6181_v53, %v13121_v7  ;;  %v6889_v46 = vmul.f32 %v6888_v57, %v13125_v20 }
 0x447   :  { %16526 = vst [vmem:[#allocation183_spill] sm:$0xff] %v13246_v16  ;;  %v13256_v10 = vpop.eup %7952  ;;  %v6397_v3 = vand.u32 2147483648, %v13169_v36  ;;  %v6902_v38 = vmul.f32 %v6901_v47, %v13125_v20  ;;  %v6326_v35 = vadd.f32 0.00028619796, %v6325_v1  ;;  %v6976_v4 = vmul.f32 3.8918573e-05, %v13237_v19 }
 0x448   :  { %vm6391_vm4 = vweird.f32 %v13169_v36  ;;  %v6931_v5 = vmul.f32 %v6930_v27, %v13011_v17  ;;  %v6340_v45 = vmul.f32 %v6339_v41, %v13171_v9  ;;  %v13264_v53 = vmin.f32 %v3203_v14, 16.0 }
 0x449   :  { %v6389_v57 = vmul.f32 %v13206_v30, %v6388_v11  ;;  %v3174_v28 = vadd.f32 1.1283791, %v3173_v21  ;;  %v6170_v0 = vadd.f32 0.05243302, %v6169_v49  ;;  %v13268_v18 = vadd.f32 %v12605_v56, %v874_v48 }
 0x44a   :  { %v6947_v47 = vmul.f32 %v13256_v10, %v13203_v8  ;;  %v6183_v1 = vadd.f32 0.4994258, %v6182_v29  ;;  %v6890_v58 = vadd.f32 0.05243302, %v6889_v46  ;;  %v13273_v33 = vadd.f32 %v12816_v62, %v894_v54  ;;  %v824_v29 = vpop.permute.xlu0 %823 }
 0x44b   :  { %vm13275_vm6 = vcmp.eq.f32.partialorder %v6395_v24, 8.507059e+37  ;;  %v6398_v41 = vor.u32 1.1754944e-38, %v6397_v3  ;;  %v6903_v14 = vadd.f32 0.4994258, %v6902_v38  ;;  %v6327_v11 = vmul.f32 %v6326_v35, %v13171_v9 }
 0x44c   :  { %v6977_v21 = vadd.f32 0.001143296, %v6976_v4  ;;  %vm6392_vm7 = vweird.f32 %v13206_v30  ;;  %v6932_v56 = vadd.f32 0.18741608, %v6931_v5  ;;  %v6341_v49 = vadd.f32 0.112945676, %v6340_v45 }
 0x44d   :  { %v3205_v48 = vmul.f32 2.1237322e-06, %v13264_v53  ;;  %v6390_v46 = vadd.f32 %v13206_v30, %v6389_v57  ;;  %v13284_v62 = vmul.f32 %v3174_v28, %v13029_v39  ;;  %v6171_v24 = vmul.f32 %v6170_v0, %v13121_v7  ;;  %vm13304_vm11 = vmor %vm6391_vm4, %vm6392_vm7 }
 0x44e   :  { %v13288_v3 = vmul.f32 0.70710677, %v13268_v18  ;;  %v6948_v38 = vsub.f32 1.0, %v6947_v47  ;;  %v6184_v35 = vmul.f32 %v6183_v1, %v13121_v7  ;;  %v6891_v4 = vmul.f32 %v6890_v58, %v13125_v20 }
 0x44f   :  { %16529 = vst [vmem:[#allocation184_spill] sm:$0xff] %v13284_v62  ;;  %v13293_v54 = vmul.f32 0.70710677, %v13273_v33  ;;  %v6904_v5 = vmul.f32 %v6903_v14, %v13125_v20  ;;  %v6328_v45 = vadd.f32 0.0036580483, %v6327_v11  ;;  %v6978_v57 = vmul.f32 %v6977_v21, %v13237_v19 }
 0x450   :  { %v13298_v28 = vadd.f32 %v12062_v37, %v824_v29  ;;  %v6933_v58 = vmul.f32 %v6932_v56, %v13011_v17  ;;  %v13310_v0 = vmul.f32 0.5, %v13064_v43  ;;  %v6342_v47 = vmul.f32 %v6341_v49, %v13171_v9 }
 0x451   :  { %v3206_v1 = vadd.f32 0.00028619796, %v3205_v48  ;;  %v6394_v37 = vsel %vm13304_vm11, %v13206_v30, %v6390_v46  ;;  %v6172_v14 = vadd.f32 0.18741608, %v6171_v24  ;;  %v13317_v11 = vmul.f32 0.5, %v13070_v63 }
 0x452   :  { %16532 = vst [vmem:[#allocation185_spill] sm:$0xff] %v13310_v0  ;;  %v6683_v36 = vmul.f32 %v13288_v3, %v13288_v3  ;;  %v6949_v21 = vmul.f32 %v13256_v10, %v6948_v38  ;;  %v13322_v17 = vadd.f32 1.0, %v6184_v35  ;;  %v6892_v43 = vadd.f32 0.18741608, %v6891_v4 }
 0x453   :  { %16533 = vst [vmem:[#allocation186_spill] sm:$0xff] %v13317_v11  ;;  %v6843_v56 = vmul.f32 %v13293_v54, %v13293_v54  ;;  %v13326_v49 = vadd.f32 1.0, %v6904_v5  ;;  %v6329_v48 = vmul.f32 %v6328_v45, %v13171_v9  ;;  %v6979_v30 = vadd.f32 0.014752088, %v6978_v57 }
 0x454   :  { %v13330_v29 = vmul.f32 0.70710677, %v13298_v28  ;;  %v6399_v63 = vsel %vm13275_vm6, %v6398_v41, %v6394_v37  ;;  %v6934_v46 = vadd.f32 1.1283791, %v6933_v58  ;;  %v6343_v24 = vadd.f32 0.4994258, %v6342_v47 }
 0x455   :  { %v3207_v38 = vmul.f32 %v3206_v1, %v13264_v53  ;;  %vm6952_vm12 = vweird.f32 %v13256_v10  ;;  %v6957_v35 = vand.u32 2147483648, %v13203_v8  ;;  %v6173_v4 = vmul.f32 %v6172_v14, %v13121_v7 }
 0x456   :  { %v13338_v5 = vmin.f32 %v6683_v36, 16.0  ;;  %v6950_v45 = vadd.f32 %v13256_v10, %v6949_v21  ;;  %7954 = vrcp.f32 %v13322_v17  ;;  %v6893_v57 = vmul.f32 %v6892_v43, %v13125_v20 }
 0x457   :  { %v13343_v27 = vmin.f32 %v6843_v56, 16.0  ;;  %7956 = vrcp.f32 %v13326_v49  ;;  %v6330_v41 = vadd.f32 0.05243302, %v6329_v48  ;;  %v6980_v39 = vmul.f32 %v6979_v30, %v13237_v19 }
 0x458   :  { %v6283_v58 = vmul.f32 %v13330_v29, %v13330_v29  ;;  %vm6951_vm13 = vweird.f32 %v13203_v8  ;;  %v6955_v7 = vand.u32 2147483647, %v13203_v8  ;;  %v6344_v47 = vmul.f32 %v6343_v24, %v13171_v9 }
 0x459   :  { %v3208_v1 = vadd.f32 0.0036580483, %v3207_v38  ;;  %vm13354_vm14 = vmor %vm6951_vm13, %vm6952_vm12  ;;  %v6174_v37 = vadd.f32 1.1283791, %v6173_v4  ;;  %v13359_v14 = vmul.f32 0.5, %v13116_v32  ;;  %v13362_v36 = vmul.f32 0.5, %v13197_v23  ;;  %v1701_v23 = vpop.f32.mrf.mxu3 }
 0x45a   :  { %v6696_v21 = vmul.f32 3.8918573e-05, %v13338_v5  ;;  %v13366_v8 = vmul.f32 %v6399_v63, %v13251_v50  ;;  %v6954_v43 = vsel %vm13354_vm14, %v13256_v10, %v6950_v45  ;;  %v6958_v56 = vor.u32 1.1754944e-38, %v6957_v35 }
 0x45b   :  { %16536 = vst [vmem:[#allocation187_spill] sm:$0xff] %v13359_v14  ;;  %v6856_v48 = vmul.f32 3.8918573e-05, %v13343_v27  ;;  %v6894_v30 = vadd.f32 1.1283791, %v6893_v57  ;;  %v6331_v24 = vmul.f32 %v6330_v41, %v13171_v9  ;;  %v13373_v38 = vmin.f32 %v6283_v58, 16.0 }
 0x45c   :  { %16537 = vst [vmem:[#allocation188_spill] sm:$0xff] %v13362_v36  ;;  %v6981_v32 = vadd.f32 0.112945676, %v6980_v39  ;;  %v13375_v4 = vpop.eup %7954  ;;  %v6935_v16 = vmul.f32 %v6934_v46, %v12959_v55  ;;  %vm6956_vm15 = vcmp.eq.f32.partialorder %v6955_v7, 8.507059e+37  ;;  %v13378_v50 = vadd.f32 1.0, %v6344_v47 }
 0x45d   :  { %v3209_v63 = vmul.f32 %v3208_v1, %v13264_v53  ;;  %v13381_v10 = vpop.eup %7956  ;;  %v6959_v35 = vsel %vm6956_vm15, %v6958_v56, %v6954_v43  ;;  %v13384_v45 = vmul.f32 %v6174_v37, %v13081_v22  ;;  %v6965_v57 = vmul.f32 2.1237322e-06, %v13237_v19 }
 0x45e   :  { %v6697_v41 = vadd.f32 0.001143296, %v6696_v21  ;;  %v6195_v39 = vand.u32 2147483647, %v13322_v17  ;;  %v6197_v58 = vand.u32 2147483648, %v13322_v17  ;;  %v13390_v55 = vadd.f32 %v1701_v23, %v12824_v40 }
 0x45f   :  { %v6857_v20 = vadd.f32 0.001143296, %v6856_v48  ;;  %v13393_v46 = vmul.f32 %v6894_v30, %v13089_v61  ;;  %v6332_v7 = vadd.f32 0.18741608, %v6331_v24  ;;  %v6982_v47 = vmul.f32 %v6981_v32, %v13237_v19 }
 0x460   :  { %v6296_v22 = vmul.f32 3.8918573e-05, %v13373_v38  ;;  %v6187_v1 = vmul.f32 %v13375_v4, %v13322_v17  ;;  %v6907_v37 = vmul.f32 %v13381_v10, %v13326_v49  ;;  %7958 = vrcp.f32 %v13378_v50 }
 0x461   :  { %v3210_v21 = vadd.f32 0.05243302, %v3209_v63  ;;  %v13402_v43 = vmul.f32 %v6959_v35, %v6935_v16  ;;  %v6917_v40 = vand.u32 2147483648, %v13326_v49  ;;  %v6966_v61 = vadd.f32 0.00028619796, %v6965_v57 }
 0x462   :  { %v6698_v56 = vmul.f32 %v6697_v41, %v13338_v5  ;;  %v6915_v48 = vand.u32 2147483647, %v13326_v49  ;;  %v6685_v30 = vmul.f32 2.1237322e-06, %v13338_v5  ;;  %v6858_v24 = vmul.f32 %v6857_v20, %v13343_v27 }
 0x463   :  { %16538 = vst [vmem:[#allocation189_spill] sm:$0xff] %v13402_v43  ;;  %v13410_v32 = vmul.f32 0.70710677, %v13390_v55  ;;  %v6333_v23 = vmul.f32 %v6332_v7, %v13171_v9  ;;  %v6983_v11 = vadd.f32 0.4994258, %v6982_v47  ;;  %v6188_v35 = vsub.f32 1.0, %v6187_v1 }
 0x464   :  { %v6845_v16 = vmul.f32 2.1237322e-06, %v13343_v27  ;;  %v6297_v63 = vadd.f32 0.001143296, %v6296_v22  ;;  %v13414_v26 = vor.u32 1.1754944e-38, %v6197_v58  ;;  %v6908_v57 = vsub.f32 1.0, %v6907_v37 }
 0x465   :  { %v3211_v41 = vmul.f32 %v3210_v21, %v13264_v53  ;;  %v13417_v43 = vor.u32 1.1754944e-38, %v6917_v40  ;;  %v13420_v31 = vmul.f32 0.5, %v13181_v42  ;;  %v6967_v20 = vmul.f32 %v6966_v61, %v13237_v19 }
 0x466   :  { %v6699_v0 = vadd.f32 0.014752088, %v6698_v56  ;;  %v13423_v2 = vpop.eup %7958  ;;  %vm6191_vm1 = vweird.f32 %v13322_v17  ;;  %vm6192_vm2 = vweird.f32 %v13375_v4  ;;  %v6686_v9 = vadd.f32 0.00028619796, %v6685_v30 }
 0x467   :  { %16539 = vst [vmem:[#allocation190_spill] sm:$0xff] %v13420_v31  ;;  %v6859_v58 = vadd.f32 0.014752088, %v6858_v24  ;;  %v7003_v7 = vmul.f32 %v13410_v32, %v13410_v32  ;;  %vm6911_vm3 = vweird.f32 %v13326_v49  ;;  %v6334_v47 = vadd.f32 1.1283791, %v6333_v23  ;;  %v1419_v23 = vpop.f32.mrf.mxu0  ;;  %vm13473_vm11 = vmor %vm6191_vm1, %vm6192_vm2 }
 0x468   :  { %v6984_v42 = vmul.f32 %v6983_v11, %v13237_v19  ;;  %v6846_v22 = vadd.f32 0.00028619796, %v6845_v16  ;;  %v6298_v1 = vmul.f32 %v6297_v63, %v13373_v38  ;;  %v6189_v37 = vmul.f32 %v13375_v4, %v6188_v35  ;;  %v794_v11 = vpop.permute.xlu2 %793 }
 0x469   :  { %v6909_v21 = vmul.f32 %v13381_v10, %v6908_v57  ;;  %vm6912_vm4 = vweird.f32 %v13381_v10  ;;  %v3212_v40 = vadd.f32 0.18741608, %v3211_v41  ;;  %v6347_v61 = vmul.f32 %v13423_v2, %v13378_v50 }
 0x46a   :  { %v6968_v56 = vadd.f32 0.0036580483, %v6967_v20  ;;  %v6700_v30 = vmul.f32 %v6699_v0, %v13338_v5  ;;  %v6285_v24 = vmul.f32 2.1237322e-06, %v13373_v38  ;;  %v6355_v16 = vand.u32 2147483647, %v13378_v50  ;;  %vm13487_vm12 = vmor %vm6911_vm3, %vm6912_vm4 }
 0x46b   :  { %v6687_v63 = vmul.f32 %v6686_v9, %v13338_v5  ;;  %v6860_v35 = vmul.f32 %v6859_v58, %v13343_v27  ;;  %v13442_v57 = vmin.f32 %v7003_v7, 16.0  ;;  %vm13444_vm6 = vcmp.eq.f32.partialorder %v6195_v39, 8.507059e+37  ;;  %v16544_v58 = vld [vmem:[#allocation15_spill] sm:$0xff]  ;;  %v16546_v7 = vld [vmem:[#allocation46_spill] sm:$0xff] }
 0x46c   :  { %v6357_v20 = vand.u32 2147483648, %v13378_v50  ;;  %v13449_v31 = vadd.f32 1.0, %v6984_v42  ;;  %v6847_v0 = vmul.f32 %v6846_v22, %v13343_v27  ;;  %v6299_v44 = vadd.f32 0.014752088, %v6298_v1 }
 0x46d   :  { %v6190_v62 = vadd.f32 %v13375_v4, %v6189_v37  ;;  %v6910_v36 = vadd.f32 %v13381_v10, %v6909_v21  ;;  %vm13454_vm7 = vcmp.eq.f32.partialorder %v6915_v48, 8.507059e+37  ;;  %v13459_v39 = vadd.f32 %v1419_v23, %v16544_v58 }
 0x46e   :  { %v13462_v51 = vadd.f32 %v16546_v7, %v794_v11  ;;  %v6348_v25 = vsub.f32 1.0, %v6347_v61  ;;  %v6969_v42 = vmul.f32 %v6968_v56, %v13237_v19  ;;  %v6701_v14 = vadd.f32 0.112945676, %v6700_v30 }
 0x46f   :  { %16545 = vst [vmem:[#allocation15_spill] sm:$0xff] %v13459_v39  ;;  %v6286_v22 = vadd.f32 0.00028619796, %v6285_v24  ;;  %v13466_v1 = vmul.f32 %v6334_v47, %v13130_v13  ;;  %v6688_v37 = vadd.f32 0.0036580483, %v6687_v63  ;;  %v3213_v61 = vmul.f32 %v3212_v40, %v13264_v53 }
 0x470   :  { %v6861_v21 = vadd.f32 0.112945676, %v6860_v35  ;;  %v7016_v48 = vmul.f32 3.8918573e-05, %v13442_v57  ;;  %7960 = vrcp.f32 %v13449_v31  ;;  %v6848_v56 = vadd.f32 0.0036580483, %v6847_v0 }
 0x471   :  { %v6300_v13 = vmul.f32 %v6299_v44, %v13373_v38  ;;  %v6194_v47 = vsel %vm13473_vm11, %v13375_v4, %v6190_v62  ;;  %vm6351_vm13 = vweird.f32 %v13378_v50  ;;  %v13493_v40 = vmul.f32 0.70710677, %v13459_v39 }
 0x472   :  { %v13496_v30 = vmul.f32 0.70710677, %v13462_v51  ;;  %v6914_v44 = vsel %vm13487_vm12, %v13381_v10, %v6910_v36  ;;  %v6349_v62 = vmul.f32 %v13423_v2, %v6348_v25  ;;  %v6970_v4 = vadd.f32 0.05243302, %v6969_v42 }
 0x473   :  { %16551 = vst [vmem:[#allocation46_spill] sm:$0xff] %v13493_v40  ;;  %v6702_v49 = vmul.f32 %v6701_v14, %v13338_v5  ;;  %v6689_v24 = vmul.f32 %v6688_v37, %v13338_v5  ;;  %v6862_v11 = vmul.f32 %v6861_v21, %v13343_v27  ;;  %v6287_v63 = vmul.f32 %v6286_v22, %v13373_v38 }
 0x474   :  { %v7017_v35 = vadd.f32 0.001143296, %v7016_v48  ;;  %vm13506_vm14 = vcmp.eq.f32.partialorder %v6355_v16, 8.507059e+37  ;;  %v6358_v58 = vor.u32 1.1754944e-38, %v6357_v20  ;;  %v3214_v7 = vadd.f32 1.1283791, %v3213_v61  ;;  %v889_v61 = vpop.permute.xlu1 %888 }
 0x475   :  { %v6849_v36 = vmul.f32 %v6848_v56, %v13343_v27  ;;  %v6301_v10 = vadd.f32 0.112945676, %v6300_v13  ;;  %v6199_v25 = vsel %vm13444_vm6, %v13414_v26, %v6194_v47  ;;  %vm6352_vm15 = vweird.f32 %v13423_v2 }
 0x476   :  { %v3243_v14 = vmul.f32 %v13493_v40, %v13493_v40  ;;  %v6043_v16 = vmul.f32 %v13496_v30, %v13496_v30  ;;  %v13519_v42 = vpop.eup %7960  ;;  %v6919_v20 = vsel %vm13454_vm7, %v13417_v43, %v6914_v44  ;;  %v6350_v22 = vadd.f32 %v13423_v2, %v6349_v62  ;;  %vm13541_vm1 = vmor %vm6351_vm13, %vm6352_vm15 }
 0x477   :  { %v6971_v37 = vmul.f32 %v6970_v4, %v13237_v19  ;;  %v6703_v41 = vadd.f32 0.4994258, %v6702_v49  ;;  %v6690_v26 = vadd.f32 0.05243302, %v6689_v24  ;;  %v6863_v21 = vadd.f32 0.4994258, %v6862_v11 }
 0x478   :  { %v6288_v48 = vadd.f32 0.0036580483, %v6287_v63  ;;  %v7018_v23 = vmul.f32 %v7017_v35, %v13442_v57  ;;  %v13528_v56 = vmul.f32 %v6199_v25, %v13384_v45  ;;  %v13531_v13 = vmul.f32 %v3214_v7, %v13223_v34  ;;  %v819_v35 = vpop.permute.xlu0 %818 }
 0x479   :  { %v6850_v47 = vadd.f32 0.05243302, %v6849_v36  ;;  %v6302_v43 = vmul.f32 %v6301_v10, %v13373_v38  ;;  %v13535_v9 = vmul.f32 %v6919_v20, %v13393_v46  ;;  %v6987_v45 = vmul.f32 %v13519_v42, %v13449_v31  ;;  %v1704_v20 = vpop.f32.mrf.mxu3 }
 0x47a   :  { %16554 = vst [vmem:[#allocation191_spill] sm:$0xff] %v13528_v56  ;;  %v13547_v44 = vmin.f32 %v3243_v14, 16.0  ;;  %v13549_v34 = vmin.f32 %v6043_v16, 16.0  ;;  %v6354_v46 = vsel %vm13541_vm1, %v13423_v2, %v6350_v22  ;;  %v6972_v62 = vadd.f32 0.18741608, %v6971_v37 }
 0x47b   :  { %16555 = vst [vmem:[#allocation192_spill] sm:$0xff] %v13535_v9  ;;  %v6704_v4 = vmul.f32 %v6703_v41, %v13338_v5  ;;  %v13556_v50 = vadd.f32 %v12760_v6, %v889_v61  ;;  %v6691_v49 = vmul.f32 %v6690_v26, %v13338_v5  ;;  %v6864_v24 = vmul.f32 %v6863_v21, %v13343_v27 }
 0x47c   :  { %16558 = vst [vmem:[#allocation193_spill] sm:$0xff] %v13547_v44  ;;  %v6289_v11 = vmul.f32 %v6288_v48, %v13373_v38  ;;  %v7019_v63 = vadd.f32 0.014752088, %v7018_v23  ;;  %v13562_v7 = vmul.f32 0.5, %v13268_v18  ;;  %v13565_v36 = vmul.f32 0.5, %v13273_v33 }
 0x47d   :  { %v6851_v2 = vmul.f32 %v6850_v47, %v13343_v27  ;;  %v6303_v10 = vadd.f32 0.4994258, %v6302_v43  ;;  %v6359_v6 = vsel %vm13506_vm14, %v6358_v58, %v6354_v46  ;;  %v6988_v25 = vsub.f32 1.0, %v6987_v45 }
 0x47e   :  { %16559 = vst [vmem:[#allocation194_spill] sm:$0xff] %v13562_v7  ;;  %v3245_v14 = vmul.f32 2.1237322e-06, %v13547_v44  ;;  %v6056_v16 = vmul.f32 3.8918573e-05, %v13549_v34  ;;  %v6973_v22 = vmul.f32 %v6972_v62, %v13237_v19  ;;  %v13573_v37 = vadd.f32 1.0, %v6704_v4 }
 0x47f   :  { %16560 = vst [vmem:[#allocation195_spill] sm:$0xff] %v13565_v36  ;;  %v13576_v18 = vmul.f32 0.70710677, %v13556_v50  ;;  %v13579_v33 = vadd.f32 %v12003_v59, %v819_v35  ;;  %v6692_v41 = vadd.f32 0.18741608, %v6691_v49  ;;  %v13581_v26 = vadd.f32 1.0, %v6864_v24 }
 0x480   :  { %v6290_v0 = vadd.f32 0.05243302, %v6289_v11  ;;  %v7020_v58 = vmul.f32 %v7019_v63, %v13442_v57  ;;  %v6852_v21 = vadd.f32 0.18741608, %v6851_v2  ;;  %v13585_v48 = vmul.f32 0.5, %v13298_v28 }
 0x481   :  { %v6304_v19 = vmul.f32 %v6303_v10, %v13373_v38  ;;  %v13589_v23 = vadd.f32 %v1704_v20, %v11862_v15  ;;  %v13592_v61 = vmul.f32 %v6359_v6, %v13466_v1  ;;  %v6989_v59 = vmul.f32 %v13519_v42, %v6988_v25  ;;  %v1422_v20 = vpop.f32.mrf.mxu0 }
 0x482   :  { %v3246_v47 = vadd.f32 0.00028619796, %v3245_v14  ;;  %v6057_v43 = vadd.f32 0.001143296, %v6056_v16  ;;  %v6974_v17 = vadd.f32 1.1283791, %v6973_v22  ;;  %7962 = vrcp.f32 %v13573_v37 }
 0x483   :  { %v6803_v45 = vmul.f32 %v13576_v18, %v13576_v18  ;;  %v13599_v28 = vmul.f32 0.70710677, %v13579_v33  ;;  %v6693_v46 = vmul.f32 %v6692_v41, %v13338_v5  ;;  %7964 = vrcp.f32 %v13581_v26 }
 0x484   :  { %v6291_v15 = vmul.f32 %v6290_v0, %v13373_v38  ;;  %v7021_v1 = vadd.f32 0.112945676, %v7020_v58  ;;  %v6995_v62 = vand.u32 2147483647, %v13449_v31  ;;  %v6853_v4 = vmul.f32 %v6852_v21, %v13343_v27 }
 0x485   :  { %v13606_v49 = vadd.f32 1.0, %v6304_v19  ;;  %v13609_v24 = vmul.f32 0.70710677, %v13589_v23  ;;  %v6990_v11 = vadd.f32 %v13519_v42, %v6989_v59  ;;  %vm6992_vm2 = vweird.f32 %v13519_v42 }
 0x486   :  { %v3247_v5 = vmul.f32 %v3246_v47, %v13547_v44  ;;  %v6058_v63 = vmul.f32 %v6057_v43, %v13549_v34  ;;  %v6975_v35 = vmul.f32 %v6974_v17, %v13193_v60  ;;  %v6997_v2 = vand.u32 2147483648, %v13449_v31 }
 0x487   :  { %v13617_v10 = vmin.f32 %v6803_v45, 16.0  ;;  %v6243_v27 = vmul.f32 %v13599_v28, %v13599_v28  ;;  %vm6991_vm3 = vweird.f32 %v13449_v31  ;;  %v6694_v6 = vadd.f32 1.1283791, %v6693_v46 }
 0x488   :  { %v6292_v25 = vadd.f32 0.18741608, %v6291_v15  ;;  %v7022_v14 = vmul.f32 %v7021_v1, %v13442_v57  ;;  %v13623_v16 = vpop.eup %7962  ;;  %vm13625_vm4 = vmor %vm6991_vm3, %vm6992_vm2  ;;  %vm13629_vm6 = vcmp.eq.f32.partialorder %v6995_v62, 8.507059e+37  ;;  %v6854_v22 = vadd.f32 1.1283791, %v6853_v4 }
 0x489   :  { %7966 = vrcp.f32 %v13606_v49  ;;  %v7043_v31 = vmul.f32 %v13609_v24, %v13609_v24  ;;  %v13636_v41 = vpop.eup %7964  ;;  %v6994_v0 = vsel %vm13625_vm4, %v13519_v42, %v6990_v11  ;;  %v6717_v58 = vand.u32 2147483648, %v13573_v37 }
 0x48a   :  { %v3248_v21 = vadd.f32 0.0036580483, %v3247_v5  ;;  %v6059_v19 = vadd.f32 0.014752088, %v6058_v63  ;;  %v6998_v59 = vor.u32 1.1754944e-38, %v6997_v2  ;;  %v13644_v17 = vmin.f32 %v6243_v27, 16.0 }
 0x48b   :  { %v7005_v47 = vmul.f32 2.1237322e-06, %v13442_v57  ;;  %v6816_v43 = vmul.f32 3.8918573e-05, %v13617_v10  ;;  %v13647_v45 = vmul.f32 %v6694_v6, %v13288_v3  ;;  %v6715_v46 = vand.u32 2147483647, %v13573_v37 }
 0x48c   :  { %v6293_v15 = vmul.f32 %v6292_v25, %v13373_v38  ;;  %v7023_v1 = vadd.f32 0.4994258, %v7022_v14  ;;  %v6999_v42 = vsel %vm13629_vm6, %v6998_v59, %v6994_v0  ;;  %v6707_v62 = vmul.f32 %v13623_v16, %v13573_v37 }
 0x48d   :  { %v6867_v4 = vmul.f32 %v13636_v41, %v13581_v26  ;;  %v13657_v11 = vmin.f32 %v7043_v31, 16.0  ;;  %v13659_v5 = vor.u32 1.1754944e-38, %v6717_v58  ;;  %v13662_v3 = vmul.f32 %v6854_v22, %v13293_v54 }
 0x48e   :  { %v6877_v63 = vand.u32 2147483648, %v13581_v26  ;;  %v6060_v38 = vmul.f32 %v6059_v19, %v13549_v34  ;;  %v3249_v27 = vmul.f32 %v3248_v21, %v13547_v44  ;;  %v7006_v6 = vadd.f32 0.00028619796, %v7005_v47 }
 0x48f   :  { %v13666_v2 = vpop.eup %7966  ;;  %v6817_v25 = vadd.f32 0.001143296, %v6816_v43  ;;  %v6256_v14 = vmul.f32 3.8918573e-05, %v13644_v17  ;;  %v13670_v60 = vmul.f32 %v6999_v42, %v6975_v35  ;;  %v6875_v31 = vand.u32 2147483647, %v13581_v26 }
 0x490   :  { %v7024_v54 = vmul.f32 %v7023_v1, %v13442_v57  ;;  %v6045_v22 = vmul.f32 2.1237322e-06, %v13549_v34  ;;  %v6708_v0 = vsub.f32 1.0, %v6707_v62  ;;  %v6868_v58 = vsub.f32 1.0, %v6867_v4  ;;  %v16566_v43 = vld [vmem:[#allocation33_spill] sm:$0xff] }
 0x491   :  { %16565 = vst [vmem:[#allocation196_spill] sm:$0xff] %v13670_v60  ;;  %v6294_v19 = vadd.f32 1.1283791, %v6293_v15  ;;  %v7056_v59 = vmul.f32 3.8918573e-05, %v13657_v11  ;;  %vm6711_vm7 = vweird.f32 %v13573_v37  ;;  %v13677_v21 = vor.u32 1.1754944e-38, %v6877_v63 }
 0x492   :  { %v6307_v47 = vmul.f32 %v13666_v2, %v13606_v49  ;;  %v6061_v35 = vadd.f32 0.112945676, %v6060_v38  ;;  %v13682_v42 = vadd.f32 %v1422_v20, %v16566_v43  ;;  %vm6871_vm11 = vweird.f32 %v13581_v26 }
 0x493   :  { %v3250_v1 = vadd.f32 0.05243302, %v3249_v27  ;;  %v7007_v62 = vmul.f32 %v7006_v6, %v13442_v57  ;;  %v6818_v15 = vmul.f32 %v6817_v25, %v13617_v10  ;;  %v6257_v4 = vadd.f32 0.001143296, %v6256_v14 }
 0x494   :  { %16567 = vst [vmem:[#allocation33_spill] sm:$0xff] %v13682_v42  ;;  %vm6712_vm12 = vweird.f32 %v13623_v16  ;;  %v13688_v39 = vadd.f32 1.0, %v7024_v54  ;;  %v6046_v63 = vadd.f32 0.00028619796, %v6045_v22  ;;  %v6805_v40 = vmul.f32 2.1237322e-06, %v13617_v10 }
 0x495   :  { %v6709_v38 = vmul.f32 %v13623_v16, %v6708_v0  ;;  %v6869_v20 = vmul.f32 %v13636_v41, %v6868_v58  ;;  %v13694_v43 = vmul.f32 %v6294_v19, %v13330_v29  ;;  %v7057_v27 = vadd.f32 0.001143296, %v7056_v59  ;;  %vm13727_vm1 = vmor %vm6711_vm7, %vm6712_vm12 }
 0x496   :  { %v6308_v7 = vsub.f32 1.0, %v6307_v47  ;;  %v6062_v6 = vmul.f32 %v6061_v35, %v13549_v34  ;;  %v6245_v25 = vmul.f32 2.1237322e-06, %v13644_v17  ;;  %v13699_v14 = vmul.f32 0.70710677, %v13682_v42 }
 0x497   :  { %v13702_v54 = vmul.f32 0.5, %v13390_v55  ;;  %v7008_v22 = vadd.f32 0.0036580483, %v7007_v62  ;;  %v6819_v36 = vadd.f32 0.014752088, %v6818_v15  ;;  %v6258_v0 = vmul.f32 %v6257_v4, %v13644_v17 }
 0x498   :  { %vm13705_vm13 = vcmp.eq.f32.partialorder %v6715_v46, 8.507059e+37  ;;  %vm13709_vm14 = vcmp.eq.f32.partialorder %v6875_v31, 8.507059e+37  ;;  %v3251_v19 = vmul.f32 %v3250_v1, %v13547_v44  ;;  %7968 = vrcp.f32 %v13688_v39 }
 0x499   :  { %16568 = vst [vmem:[#allocation197_spill] sm:$0xff] %v13702_v54  ;;  %v6047_v59 = vmul.f32 %v6046_v63, %v13549_v34  ;;  %v6806_v55 = vadd.f32 0.00028619796, %v6805_v40  ;;  %v6710_v47 = vadd.f32 %v13623_v16, %v6709_v38  ;;  %v6870_v35 = vadd.f32 %v13636_v41, %v6869_v20 }
 0x49a   :  { %vm6872_vm15 = vweird.f32 %v13636_v41  ;;  %v7058_v46 = vmul.f32 %v7057_v27, %v13657_v11  ;;  %v6309_v31 = vmul.f32 %v13666_v2, %v6308_v7  ;;  %v6063_v62 = vadd.f32 0.4994258, %v6062_v6 }
 0x49b   :  { %v6246_v15 = vadd.f32 0.00028619796, %v6245_v25  ;;  %v3283_v1 = vmul.f32 %v13699_v14, %v13699_v14  ;;  %vm6311_vm2 = vweird.f32 %v13606_v49  ;;  %v7009_v4 = vmul.f32 %v7008_v22, %v13442_v57  ;;  %vm13736_vm3 = vmor %vm6871_vm11, %vm6872_vm15 }
 0x49c   :  { %v6820_v63 = vmul.f32 %v6819_v36, %v13617_v10  ;;  %v6259_v7 = vadd.f32 0.014752088, %v6258_v0  ;;  %v6315_v20 = vand.u32 2147483647, %v13606_v49  ;;  %v3252_v37 = vadd.f32 0.18741608, %v3251_v19 }
 0x49d   :  { %v6048_v27 = vadd.f32 0.0036580483, %v6047_v59  ;;  %v6807_v6 = vmul.f32 %v6806_v55, %v13617_v10  ;;  %v6714_v25 = vsel %vm13727_vm1, %v13623_v16, %v6710_v47  ;;  %v6874_v36 = vsel %vm13736_vm3, %v13636_v41, %v6870_v35 }
 0x49e   :  { %vm6312_vm4 = vweird.f32 %v13666_v2  ;;  %v7059_v26 = vadd.f32 0.014752088, %v7058_v46  ;;  %v13749_v22 = vpop.eup %7968  ;;  %v6310_v0 = vadd.f32 %v13666_v2, %v6309_v31  ;;  %v6064_v19 = vmul.f32 %v6063_v62, %v13549_v34 }
 0x49f   :  { %v6247_v59 = vmul.f32 %v6246_v15, %v13644_v17  ;;  %v13754_v55 = vmin.f32 %v3283_v1, 16.0  ;;  %v6317_v40 = vand.u32 2147483648, %v13606_v49  ;;  %v7010_v16 = vadd.f32 0.05243302, %v7009_v4  ;;  %vm13774_vm7 = vmor %vm6311_vm2, %vm6312_vm4  ;;  %v16586_v1 = vld [vmem:[#allocation120_spill] sm:$0xff] }
 0x4a0   :  { %v6821_v47 = vadd.f32 0.112945676, %v6820_v63  ;;  %v6260_v38 = vmul.f32 %v6259_v7, %v13644_v17  ;;  %vm13758_vm6 = vcmp.eq.f32.partialorder %v6315_v20, 8.507059e+37  ;;  %v3253_v35 = vmul.f32 %v3252_v37, %v13547_v44 }
 0x4a1   :  { %16577 = vst [vmem:[#allocation198_spill] sm:$0xff] %v13754_v55  ;;  %v6049_v46 = vmul.f32 %v6048_v27, %v13549_v34  ;;  %v6808_v31 = vadd.f32 0.0036580483, %v6807_v6  ;;  %v6719_v62 = vsel %vm13705_vm13, %v13659_v5, %v6714_v25  ;;  %v6879_v15 = vsel %vm13709_vm14, %v13677_v21, %v6874_v36  ;;  %v859_v27 = vpop.permute.xlu2 %858 }
 0x4a2   :  { %v7027_v4 = vmul.f32 %v13749_v22, %v13688_v39  ;;  %v7060_v63 = vmul.f32 %v7059_v26, %v13657_v11  ;;  %v6314_v5 = vsel %vm13774_vm7, %v13666_v2, %v6310_v0  ;;  %v13784_v58 = vadd.f32 1.0, %v6064_v19  ;;  %v884_v26 = vpop.permute.xlu1 %883 }
 0x4a3   :  { %v6248_v21 = vadd.f32 0.0036580483, %v6247_v59  ;;  %v3285_v29 = vmul.f32 2.1237322e-06, %v13754_v55  ;;  %v6318_v7 = vor.u32 1.1754944e-38, %v6317_v40  ;;  %v7011_v49 = vmul.f32 %v7010_v16, %v13442_v57  ;;  %v814_v16 = vpop.permute.xlu0 %813 }
 0x4a4   :  { %v6822_v20 = vmul.f32 %v6821_v47, %v13617_v10  ;;  %v6261_v37 = vadd.f32 0.112945676, %v6260_v38  ;;  %v13790_v6 = vmul.f32 %v6719_v62, %v13647_v45  ;;  %v13792_v25 = vadd.f32 1.1283791, %v3253_v35 }
 0x4a5   :  { %v6050_v36 = vadd.f32 0.05243302, %v6049_v46  ;;  %v6809_v2 = vmul.f32 %v6808_v31, %v13617_v10  ;;  %v13796_v0 = vmul.f32 %v6879_v15, %v13662_v3  ;;  %v6319_v19 = vsel %vm13758_vm6, %v6318_v7, %v6314_v5 }
 0x4a6   :  { %16582 = vst [vmem:[#allocation199_spill] sm:$0xff] %v13790_v6  ;;  %v7028_v59 = vsub.f32 1.0, %v7027_v4  ;;  %v7061_v40 = vadd.f32 0.112945676, %v7060_v63  ;;  %7970 = vrcp.f32 %v13784_v58  ;;  %v6249_v45 = vmul.f32 %v6248_v21, %v13644_v17 }
 0x4a7   :  { %16583 = vst [vmem:[#allocation200_spill] sm:$0xff] %v13792_v25  ;;  %v3286_v47 = vadd.f32 0.00028619796, %v3285_v29  ;;  %v13803_v38 = vadd.f32 %v12431_v52, %v859_v27  ;;  %v7012_v35 = vadd.f32 0.18741608, %v7011_v49  ;;  %v6262_v31 = vmul.f32 %v6261_v37, %v13644_v17 }
 0x4a8   :  { %16584 = vst [vmem:[#allocation201_spill] sm:$0xff] %v13796_v0  ;;  %v6823_v46 = vadd.f32 0.4994258, %v6822_v20  ;;  %v13807_v3 = vadd.f32 %v12710_v12, %v884_v26  ;;  %v13810_v41 = vmul.f32 0.5, %v13462_v51  ;;  %v6051_v62 = vmul.f32 %v6050_v36, %v13549_v34 }
 0x4a9   :  { %v6810_v15 = vadd.f32 0.05243302, %v6809_v2  ;;  %v13814_v4 = vadd.f32 %v16586_v1, %v814_v16  ;;  %v13817_v63 = vmul.f32 %v6319_v19, %v13694_v43  ;;  %v13820_v52 = vmul.f32 0.5, %v13556_v50 }
 0x4aa   :  { %16585 = vst [vmem:[#allocation202_spill] sm:$0xff] %v13810_v41  ;;  %v13823_v5 = vmul.f32 0.5, %v13579_v33  ;;  %v7062_v12 = vmul.f32 %v7061_v40, %v13657_v11  ;;  %v7029_v51 = vmul.f32 %v13749_v22, %v7028_v59  ;;  %v6250_v21 = vadd.f32 0.05243302, %v6249_v45  ;;  %v804_v25 = vpop.permute.xlu1 %803  ;;  %v16597_v41 = vld [vmem:[#allocation28_spill] sm:$0xff] }
 0x4ab   :  { %16587 = vst [vmem:[#allocation120_spill] sm:$0xff] %v13820_v52  ;;  %v3287_v29 = vmul.f32 %v3286_v47, %v13754_v55  ;;  %v13829_v7 = vmul.f32 0.70710677, %v13803_v38  ;;  %v7013_v49 = vmul.f32 %v7012_v35, %v13442_v57  ;;  %v6824_v43 = vmul.f32 %v6823_v46, %v13617_v10 }
 0x4ac   :  { %v6263_v20 = vadd.f32 0.4994258, %v6262_v31  ;;  %v13834_v50 = vmul.f32 0.70710677, %v13807_v3  ;;  %v13836_v33 = vpop.eup %7970  ;;  %vm7031_vm11 = vweird.f32 %v13688_v39  ;;  %v6052_v37 = vadd.f32 0.18741608, %v6051_v62 }
 0x4ad   :  { %v6811_v27 = vmul.f32 %v6810_v15, %v13617_v10  ;;  %v13841_v36 = vmul.f32 0.70710677, %v13814_v4  ;;  %vm7032_vm12 = vweird.f32 %v13749_v22  ;;  %v7037_v57 = vand.u32 2147483648, %v13688_v39 }
 0x4ae   :  { %v7045_v2 = vmul.f32 2.1237322e-06, %v13657_v11  ;;  %v7063_v26 = vadd.f32 0.4994258, %v7062_v12  ;;  %v7030_v19 = vadd.f32 %v13749_v22, %v7029_v51  ;;  %v6251_v59 = vmul.f32 %v6250_v21, %v13644_v17  ;;  %vm13865_vm13 = vmor %vm7031_vm11, %vm7032_vm12 }
 0x4af   :  { %v3288_v40 = vadd.f32 0.0036580483, %v3287_v29  ;;  %v6563_v16 = vmul.f32 %v13829_v7, %v13829_v7  ;;  %v6067_v45 = vmul.f32 %v13836_v33, %v13784_v58  ;;  %v13852_v47 = vadd.f32 1.0, %v6824_v43 }
 0x4b0   :  { %v6264_v35 = vmul.f32 %v6263_v20, %v13644_v17  ;;  %v6763_v46 = vmul.f32 %v13834_v50, %v13834_v50  ;;  %v7035_v31 = vand.u32 2147483647, %v13688_v39  ;;  %v6053_v62 = vmul.f32 %v6052_v37, %v13549_v34 }
 0x4b1   :  { %v6812_v15 = vadd.f32 0.18741608, %v6811_v27  ;;  %v6203_v1 = vmul.f32 %v13841_v36, %v13841_v36  ;;  %v7014_v12 = vadd.f32 1.1283791, %v7013_v49  ;;  %v7038_v21 = vor.u32 1.1754944e-38, %v7037_v57 }
 0x4b2   :  { %v7046_v29 = vadd.f32 0.00028619796, %v7045_v2  ;;  %v7064_v43 = vmul.f32 %v7063_v26, %v13657_v11  ;;  %v7034_v34 = vsel %vm13865_vm13, %v13749_v22, %v7030_v19  ;;  %v6252_v20 = vadd.f32 0.18741608, %v6251_v59 }
 0x4b3   :  { %v3289_v37 = vmul.f32 %v3288_v40, %v13754_v55  ;;  %v13874_v49 = vmin.f32 %v6563_v16, 16.0  ;;  %v6068_v27 = vsub.f32 1.0, %v6067_v45  ;;  %7972 = vrcp.f32 %v13852_v47 }
 0x4b4   :  { %v13877_v39 = vadd.f32 1.0, %v6264_v35  ;;  %v13879_v42 = vmin.f32 %v6763_v46, 16.0  ;;  %vm7036_vm14 = vcmp.eq.f32.partialorder %v7035_v31, 8.507059e+37  ;;  %v6054_v57 = vadd.f32 1.1283791, %v6053_v62 }
 0x4b5   :  { %v6813_v2 = vmul.f32 %v6812_v15, %v13617_v10  ;;  %v13882_v26 = vmin.f32 %v6203_v1, 16.0  ;;  %v7015_v22 = vmul.f32 %v7014_v12, %v13410_v32  ;;  %v7039_v19 = vsel %vm7036_vm14, %v7038_v21, %v7034_v34 }
 0x4b6   :  { %v7047_v59 = vmul.f32 %v7046_v29, %v13657_v11  ;;  %v13886_v40 = vadd.f32 1.0, %v7064_v43  ;;  %v6075_v16 = vand.u32 2147483647, %v13784_v58  ;;  %v6077_v45 = vand.u32 2147483648, %v13784_v58 }
 0x4b7   :  { %v6253_v35 = vmul.f32 %v6252_v20, %v13644_v17  ;;  %v6576_v46 = vmul.f32 3.8918573e-05, %v13874_v49  ;;  %v6069_v31 = vmul.f32 %v13836_v33, %v6068_v27  ;;  %7974 = vrcp.f32 %v13877_v39  ;;  %v779_v20 = vpop.permute.xlu2 %778 }
 0x4b8   :  { %v3290_v10 = vadd.f32 0.05243302, %v3289_v37  ;;  %v6776_v32 = vmul.f32 3.8918573e-05, %v13879_v42  ;;  %v13896_v62 = vmul.f32 %v6054_v57, %v13496_v30  ;;  %vm6071_vm15 = vweird.f32 %v13784_v58 }
 0x4b9   :  { %v6814_v15 = vadd.f32 1.1283791, %v6813_v2  ;;  %v6216_v1 = vmul.f32 3.8918573e-05, %v13882_v26  ;;  %v13900_v12 = vpop.eup %7972  ;;  %v13902_v17 = vmul.f32 %v7039_v19, %v7015_v22  ;;  %v6837_v51 = vand.u32 2147483648, %v13852_v47 }
 0x4ba   :  { %v7048_v21 = vadd.f32 0.0036580483, %v7047_v59  ;;  %7976 = vrcp.f32 %v13886_v40  ;;  %vm13906_vm1 = vcmp.eq.f32.partialorder %v6075_v16, 8.507059e+37  ;;  %v6078_v30 = vor.u32 1.1754944e-38, %v6077_v45 }
 0x4bb   :  { %16590 = vst [vmem:[#allocation203_spill] sm:$0xff] %v13902_v17  ;;  %v6254_v43 = vadd.f32 1.1283791, %v6253_v35  ;;  %v6577_v34 = vadd.f32 0.001143296, %v6576_v46  ;;  %v6070_v37 = vadd.f32 %v13836_v33, %v6069_v31  ;;  %vm6072_vm2 = vweird.f32 %v13836_v33  ;;  %v16593_v31 = vld [vmem:[#allocation38_spill] sm:$0xff] }
 0x4bc   :  { %v3291_v27 = vmul.f32 %v3290_v10, %v13754_v55  ;;  %v6777_v57 = vadd.f32 0.001143296, %v6776_v32  ;;  %v13914_v2 = vmul.f32 %v6814_v15, %v13576_v18  ;;  %v6827_v22 = vmul.f32 %v13900_v12, %v13852_v47  ;;  %vm13930_vm3 = vmor %vm6071_vm15, %vm6072_vm2 }
 0x4bd   :  { %v6565_v19 = vmul.f32 2.1237322e-06, %v13874_v49  ;;  %v6217_v59 = vadd.f32 0.001143296, %v6216_v1  ;;  %v13919_v16 = vpop.eup %7974  ;;  %v13922_v35 = vor.u32 1.1754944e-38, %v6837_v51  ;;  %v7049_v46 = vmul.f32 %v7048_v21, %v13657_v11 }
 0x4be   :  { %v13926_v10 = vadd.f32 %v16593_v31, %v779_v20  ;;  %v13935_v32 = vmul.f32 %v6254_v43, %v13599_v28  ;;  %v13938_v15 = vmul.f32 0.5, %v13589_v23  ;;  %v6578_v1 = vmul.f32 %v6577_v34, %v13874_v49 }
 0x4bf   :  { %v6765_v51 = vmul.f32 2.1237322e-06, %v13879_v42  ;;  %v6074_v58 = vsel %vm13930_vm3, %v13836_v33, %v6070_v37  ;;  %v6275_v20 = vand.u32 2147483647, %v13877_v39  ;;  %v3292_v31 = vadd.f32 0.18741608, %v3291_v27 }
 0x4c0   :  { %v13942_v21 = vpop.eup %7976  ;;  %v6778_v45 = vmul.f32 %v6777_v57, %v13879_v42  ;;  %v6828_v28 = vsub.f32 1.0, %v6827_v22  ;;  %v6267_v23 = vmul.f32 %v13919_v16, %v13877_v39  ;;  %v6566_v43 = vadd.f32 0.00028619796, %v6565_v19  ;;  %v1425_v19 = vpop.f32.mrf.mxu0 }
 0x4c1   :  { %v6218_v34 = vmul.f32 %v6217_v59, %v13882_v26  ;;  %vm6832_vm4 = vweird.f32 %v13900_v12  ;;  %v6277_v6 = vand.u32 2147483648, %v13877_v39  ;;  %v7050_v52 = vadd.f32 0.05243302, %v7049_v46  ;;  %v16596_v46 = vld [vmem:[#allocation109_spill] sm:$0xff] }
 0x4c2   :  { %v13955_v33 = vmul.f32 0.70710677, %v13926_v10  ;;  %vm6831_vm6 = vweird.f32 %v13852_v47  ;;  %v7067_v37 = vmul.f32 %v13942_v21, %v13886_v40  ;;  %v6579_v27 = vadd.f32 0.014752088, %v6578_v1 }
 0x4c3   :  { %v6766_v57 = vadd.f32 0.00028619796, %v6765_v51  ;;  %v6205_v22 = vmul.f32 2.1237322e-06, %v13882_v26  ;;  %v6079_v59 = vsel %vm13906_vm1, %v6078_v30, %v6074_v58  ;;  %v3293_v18 = vmul.f32 %v3292_v31, %v13754_v55  ;;  %vm14002_vm12 = vmor %vm6831_vm6, %vm6832_vm4 }
 0x4c4   :  { %v6779_v0 = vadd.f32 0.014752088, %v6778_v45  ;;  %v13965_v9 = vadd.f32 %v16596_v46, %v804_v25  ;;  %v6829_v44 = vmul.f32 %v13900_v12, %v6828_v28  ;;  %v6268_v54 = vsub.f32 1.0, %v6267_v23 }
 0x4c5   :  { %v6567_v60 = vmul.f32 %v6566_v43, %v13874_v49  ;;  %v6219_v17 = vadd.f32 0.014752088, %v6218_v34  ;;  %v13969_v1 = vor.u32 1.1754944e-38, %v6277_v6  ;;  %v7051_v51 = vmul.f32 %v7050_v52, %v13657_v11 }
 0x4c6   :  { %v13973_v56 = vadd.f32 %v1425_v19, %v16597_v41  ;;  %v5923_v29 = vmul.f32 %v13955_v33, %v13955_v33  ;;  %v7068_v30 = vsub.f32 1.0, %v7067_v37  ;;  %v6580_v25 = vmul.f32 %v6579_v27, %v13874_v49  ;;  %v879_v37 = vpop.permute.xlu0 %878 }
 0x4c7   :  { %v6767_v45 = vmul.f32 %v6766_v57, %v13879_v42  ;;  %v6206_v58 = vadd.f32 0.00028619796, %v6205_v22  ;;  %v13980_v31 = vmul.f32 %v6079_v59, %v13896_v62  ;;  %vm6271_vm7 = vweird.f32 %v13877_v39 }
 0x4c8   :  { %16598 = vst [vmem:[#allocation38_spill] sm:$0xff] %v13973_v56  ;;  %v3294_v6 = vadd.f32 1.1283791, %v3293_v18  ;;  %v6780_v52 = vmul.f32 %v6779_v0, %v13879_v42  ;;  %v13985_v41 = vmul.f32 0.70710677, %v13965_v9  ;;  %v6830_v28 = vadd.f32 %v13900_v12, %v6829_v44 }
 0x4c9   :  { %v6269_v23 = vmul.f32 %v13919_v16, %v6268_v54  ;;  %v6568_v43 = vadd.f32 0.0036580483, %v6567_v60  ;;  %v6220_v34 = vmul.f32 %v6219_v17, %v13882_v26  ;;  %vm6272_vm11 = vweird.f32 %v13919_v16 }
 0x4ca   :  { %v7052_v62 = vadd.f32 0.18741608, %v7051_v51  ;;  %v13992_v27 = vmul.f32 0.70710677, %v13973_v56  ;;  %v13994_v57 = vmin.f32 %v5923_v29, 16.0  ;;  %v7069_v0 = vmul.f32 %v13942_v21, %v7068_v30  ;;  %v16606_v51 = vld [vmem:[#allocation75_spill] sm:$0xff]  ;;  %vm14048_vm1 = vmor %vm6271_vm7, %vm6272_vm11 }
 0x4cb   :  { %v6581_v22 = vadd.f32 0.112945676, %v6580_v25  ;;  %v6768_v19 = vadd.f32 0.0036580483, %v6767_v45  ;;  %v6207_v44 = vmul.f32 %v6206_v58, %v13882_v26  ;;  %v16602_v54 = vand.u32 2147483647, %v13852_v47 }
 0x4cc   :  { %16599 = vst [vmem:[#allocation109_spill] sm:$0xff] %v13992_v27  ;;  %v14013_v59 = vmul.f32 %v3294_v6, %v13699_v14  ;;  %v6781_v18 = vadd.f32 0.112945676, %v6780_v52  ;;  %v6123_v46 = vmul.f32 %v13985_v41, %v13985_v41  ;;  %v14018_v29 = vadd.f32 %v16606_v51, %v879_v37 }
 0x4cd   :  { %vm14008_vm13 = vcmp.eq.f32.partialorder %v16602_v54, 8.507059e+37  ;;  %v6834_v30 = vsel %vm14002_vm12, %v13900_v12, %v6830_v28  ;;  %v6270_v47 = vadd.f32 %v13919_v16, %v6269_v23  ;;  %vm14024_vm14 = vcmp.eq.f32.partialorder %v6275_v20, 8.507059e+37 }
 0x4ce   :  { %16605 = vst [vmem:[#allocation28_spill] sm:$0xff] %v14013_v59  ;;  %v6569_v14 = vmul.f32 %v6568_v43, %v13874_v49  ;;  %v6221_v45 = vadd.f32 0.112945676, %v6220_v34  ;;  %v7053_v58 = vmul.f32 %v7052_v62, %v13657_v11  ;;  %vm7072_vm15 = vweird.f32 %v13942_v21 }
 0x4cf   :  { %v3323_v6 = vmul.f32 %v13992_v27, %v13992_v27  ;;  %v5936_v52 = vmul.f32 3.8918573e-05, %v13994_v57  ;;  %v7070_v12 = vadd.f32 %v13942_v21, %v7069_v0  ;;  %v6582_v28 = vmul.f32 %v6581_v22, %v13874_v49 }
 0x4d0   :  { %v6769_v20 = vmul.f32 %v6768_v19, %v13879_v42  ;;  %v6208_v23 = vadd.f32 0.0036580483, %v6207_v44  ;;  %v7077_v37 = vand.u32 2147483648, %v13886_v40  ;;  %v6782_v43 = vmul.f32 %v6781_v18, %v13879_v42 }
 0x4d1   :  { %v14039_v34 = vmin.f32 %v6123_v46, 16.0  ;;  %v14042_v11 = vmul.f32 0.70710677, %v14018_v29  ;;  %vm7071_vm2 = vweird.f32 %v13886_v40  ;;  %v7075_v0 = vand.u32 2147483647, %v13886_v40 }
 0x4d2   :  { %v6570_v22 = vadd.f32 0.05243302, %v6569_v14  ;;  %v6222_v19 = vmul.f32 %v6221_v45, %v13882_v26  ;;  %v6274_v44 = vsel %vm14048_vm1, %v13919_v16, %v6270_v47  ;;  %v7054_v60 = vadd.f32 1.1283791, %v7053_v58  ;;  %vm14060_vm3 = vmor %vm7071_vm2, %vm7072_vm15 }
 0x4d3   :  { %v14064_v54 = vmin.f32 %v3323_v6, 16.0  ;;  %v5937_v18 = vadd.f32 0.001143296, %v5936_v52  ;;  %v7074_v40 = vsel %vm14060_vm3, %v13942_v21, %v7070_v12  ;;  %v6583_v46 = vadd.f32 0.4994258, %v6582_v28 }
 0x4d4   :  { %v6770_v51 = vadd.f32 0.05243302, %v6769_v20  ;;  %v6209_v14 = vmul.f32 %v6208_v23, %v13882_v26  ;;  %v7078_v45 = vor.u32 1.1754944e-38, %v7077_v37  ;;  %v6783_v16 = vadd.f32 0.4994258, %v6782_v43 }
 0x4d5   :  { %16613 = vst [vmem:[#allocation75_spill] sm:$0xff] %v14064_v54  ;;  %v6136_v47 = vmul.f32 3.8918573e-05, %v14039_v34  ;;  %v6723_v58 = vmul.f32 %v14042_v11, %v14042_v11  ;;  %v6839_v6 = vsel %vm14008_vm13, %v13922_v35, %v6834_v30  ;;  %vm7076_vm4 = vcmp.eq.f32.partialorder %v7075_v0, 8.507059e+37 }
 0x4d6   :  { %v6571_v52 = vmul.f32 %v6570_v22, %v13874_v49  ;;  %v6223_v62 = vadd.f32 0.4994258, %v6222_v19  ;;  %v6279_v21 = vsel %vm14024_vm14, %v13969_v1, %v6274_v44  ;;  %v7055_v12 = vmul.f32 %v7054_v60, %v13609_v24 }
 0x4d7   :  { %v7079_v28 = vsel %vm7076_vm4, %v7078_v45, %v7074_v40  ;;  %v5938_v20 = vmul.f32 %v5937_v18, %v13994_v57  ;;  %v6584_v23 = vmul.f32 %v6583_v46, %v13874_v49  ;;  %v6771_v37 = vmul.f32 %v6770_v51, %v13879_v42  ;;  %v844_v18 = vpop.permute.xlu2 %843 }
 0x4d8   :  { %v6210_v43 = vadd.f32 0.05243302, %v6209_v14  ;;  %v3325_v35 = vmul.f32 2.1237322e-06, %v14064_v54  ;;  %v14086_v17 = vmul.f32 %v6839_v6, %v13914_v2  ;;  %v6784_v30 = vmul.f32 %v6783_v16, %v13879_v42  ;;  %v1428_v6 = vpop.f32.mrf.mxu0 }
 0x4d9   :  { %v6137_v0 = vadd.f32 0.001143296, %v6136_v47  ;;  %v14089_v25 = vmin.f32 %v6723_v58, 16.0  ;;  %v14092_v24 = vmul.f32 %v6279_v21, %v13935_v32  ;;  %v7080_v1 = vmul.f32 %v7079_v28, %v7055_v12 }
 0x4da   :  { %16614 = vst [vmem:[#allocation204_spill] sm:$0xff] %v14086_v17  ;;  %v6572_v22 = vadd.f32 0.18741608, %v6571_v52  ;;  %v6224_v19 = vmul.f32 %v6223_v62, %v13882_v26  ;;  %v14096_v44 = vmul.f32 0.5, %v13803_v38  ;;  %v14099_v60 = vmul.f32 0.5, %v13807_v3  ;;  %v16617_v52 = vld [vmem:[#allocation143_spill] sm:$0xff] }
 0x4db   :  { %v5925_v2 = vmul.f32 2.1237322e-06, %v13994_v57  ;;  %v5939_v39 = vadd.f32 0.014752088, %v5938_v20  ;;  %v14102_v40 = vadd.f32 1.0, %v6584_v23  ;;  %v6211_v32 = vmul.f32 %v6210_v43, %v13882_v26 }
 0x4dc   :  { %16615 = vst [vmem:[#allocation205_spill] sm:$0xff] %v14096_v44  ;;  %v6772_v46 = vadd.f32 0.18741608, %v6771_v37  ;;  %v3326_v51 = vadd.f32 0.00028619796, %v3325_v35  ;;  %v14105_v14 = vadd.f32 1.0, %v6784_v30  ;;  %v6138_v38 = vmul.f32 %v6137_v0, %v14039_v34 }
 0x4dd   :  { %16616 = vst [vmem:[#allocation206_spill] sm:$0xff] %v14099_v60  ;;  %v14108_v45 = vmul.f32 0.5, %v13814_v4  ;;  %v6736_v3 = vmul.f32 3.8918573e-05, %v14089_v25  ;;  %v7786_v16 = vclamps-f32 %v7080_v1, 1.0  ;;  %v6573_v47 = vmul.f32 %v6572_v22, %v13874_v49  ;;  %v16619_v35 = vld [vmem:[#allocation18_spill] sm:$0xff] }
 0x4de   :  { %v14113_v58 = vadd.f32 1.0, %v6224_v19  ;;  %v14116_v62 = vadd.f32 %v16617_v52, %v844_v18  ;;  %v14119_v21 = vmul.f32 0.5, %v13926_v10  ;;  %v5926_v12 = vadd.f32 0.00028619796, %v5925_v2 }
 0x4df   :  { %v5940_v4 = vmul.f32 %v5939_v39, %v13994_v57  ;;  %v6125_v28 = vmul.f32 2.1237322e-06, %v14039_v34  ;;  %7978 = vrcp.f32 %v14102_v40  ;;  %v6773_v20 = vmul.f32 %v6772_v46, %v13879_v42 }
 0x4e0   :  { %16618 = vst [vmem:[#allocation143_spill] sm:$0xff] %v14116_v62  ;;  %v6212_v23 = vadd.f32 0.18741608, %v6211_v32  ;;  %v3327_v49 = vmul.f32 %v3326_v51, %v14064_v54  ;;  %7980 = vrcp.f32 %v14105_v14  ;;  %v6139_v37 = vadd.f32 0.014752088, %v6138_v38 }
 0x4e1   :  { %v6737_v43 = vadd.f32 0.001143296, %v6736_v3  ;;  %v14128_v30 = vadd.f32 %v1428_v6, %v16619_v35  ;;  %v7210_v10 = vadd.f32 1.0, %v7786_v16  ;;  %v6574_v0 = vadd.f32 1.1283791, %v6573_v47 }
 0x4e2   :  { %7982 = vrcp.f32 %v14113_v58  ;;  %v14132_v1 = vmul.f32 0.70710677, %v14116_v62  ;;  %v6597_v22 = vand.u32 2147483648, %v14102_v40  ;;  %v5927_v42 = vmul.f32 %v5926_v12, %v13994_v57 }
 0x4e3   :  { %v5941_v19 = vadd.f32 0.112945676, %v5940_v4  ;;  %v6126_v2 = vadd.f32 0.00028619796, %v6125_v28  ;;  %v6774_v39 = vadd.f32 1.1283791, %v6773_v20  ;;  %v6213_v18 = vmul.f32 %v6212_v23, %v13882_v26 }
 0x4e4   :  { %v3328_v46 = vadd.f32 0.0036580483, %v3327_v49  ;;  %v6725_v32 = vmul.f32 2.1237322e-06, %v14089_v25  ;;  %v6140_v51 = vmul.f32 %v6139_v37, %v14039_v34  ;;  %v6738_v38 = vmul.f32 %v6737_v43, %v14089_v25 }
 0x4e5   :  { %v14141_v3 = vmul.f32 0.70710677, %v14128_v30  ;;  %v7769_v16 = vclamps-f32 %v13366_v8, 1.0  ;;  %v14144_v47 = vpop.eup %7978  ;;  %v14147_v6 = vmul.f32 %v7210_v10, %v13938_v15  ;;  %v14150_v52 = vmul.f32 %v6574_v0, %v13829_v7 }
 0x4e6   :  { %v6443_v12 = vmul.f32 %v14132_v1, %v14132_v1  ;;  %v14155_v4 = vpop.eup %7980  ;;  %v14157_v28 = vor.u32 1.1754944e-38, %v6597_v22  ;;  %v5928_v20 = vadd.f32 0.0036580483, %v5927_v42  ;;  %v5942_v8 = vmul.f32 %v5941_v19, %v13994_v57 }
 0x4e7   :  { %v6127_v23 = vmul.f32 %v6126_v2, %v14039_v34  ;;  %v6214_v15 = vadd.f32 1.1283791, %v6213_v18  ;;  %v3329_v7 = vmul.f32 %v3328_v46, %v14064_v54  ;;  %v6726_v37 = vadd.f32 0.00028619796, %v6725_v32  ;;  %v16620_v18 = vld [vmem:[#allocation177_spill] sm:$0xff] }
 0x4e8   :  { %v14161_v49 = vpop.eup %7982  ;;  %v7193_v43 = vadd.f32 1.0, %v7769_v16  ;;  %v14165_v35 = vmul.f32 %v6774_v39, %v13834_v50  ;;  %v6141_v10 = vadd.f32 0.112945676, %v6140_v51  ;;  %v6739_v0 = vadd.f32 0.014752088, %v6738_v38 }
 0x4e9   :  { %v3363_v22 = vmul.f32 %v14141_v3, %v14141_v3  ;;  %v6587_v42 = vmul.f32 %v14144_v47, %v14102_v40  ;;  %v6787_v19 = vmul.f32 %v14155_v4, %v14105_v14  ;;  %v14173_v2 = vmin.f32 %v6443_v12, 16.0 }
 0x4ea   :  { %v7321_v46 = vmul.f32 %v7193_v43, %v16620_v18  ;;  %v6227_v32 = vmul.f32 %v14161_v49, %v14113_v58  ;;  %v5929_v50 = vmul.f32 %v5928_v20, %v13994_v57  ;;  %v5943_v39 = vadd.f32 0.4994258, %v5942_v8 }
 0x4eb   :  { %v6128_v51 = vadd.f32 0.0036580483, %v6127_v23  ;;  %v6795_v38 = vand.u32 2147483647, %v14105_v14  ;;  %v6797_v16 = vand.u32 2147483648, %v14105_v14  ;;  %v6727_v56 = vmul.f32 %v6726_v37, %v14089_v25 }
 0x4ec   :  { %v3330_v26 = vadd.f32 0.05243302, %v3329_v7  ;;  %7474 = vmatpush.msrb.mxu1 %v7321_v46  ;;  %v14183_v12 = vmul.f32 %v6214_v15, %v13841_v36  ;;  %v6142_v43 = vmul.f32 %v6141_v10, %v14039_v34  ;;  %v6740_v18 = vmul.f32 %v6739_v0, %v14089_v25 }
 0x4ed   :  { %v14187_v62 = vmin.f32 %v3363_v22, 16.0  ;;  %v6588_v20 = vsub.f32 1.0, %v6587_v42  ;;  %vm6592_vm6 = vweird.f32 %v14144_v47  ;;  %v6788_v8 = vsub.f32 1.0, %v6787_v19 }
 0x4ee   :  { %v6456_v23 = vmul.f32 3.8918573e-05, %v14173_v2  ;;  %vm6591_vm7 = vweird.f32 %v14102_v40  ;;  %v6228_v7 = vsub.f32 1.0, %v6227_v32  ;;  %v5930_v37 = vadd.f32 0.05243302, %v5929_v50 }
 0x4ef   :  { %v5944_v46 = vmul.f32 %v5943_v39, %v13994_v57  ;;  %v6129_v36 = vmul.f32 %v6128_v51, %v14039_v34  ;;  %vm6791_vm11 = vweird.f32 %v14105_v14  ;;  %v14195_v15 = vor.u32 1.1754944e-38, %v6797_v16  ;;  %vm14243_vm3 = vmor %vm6591_vm7, %vm6592_vm6 }
 0x4f0   :  { %v6235_v10 = vand.u32 2147483647, %v14113_v58  ;;  %v3331_v0 = vmul.f32 %v3330_v26, %v14064_v54  ;;  %v6728_v22 = vadd.f32 0.0036580483, %v6727_v56  ;;  %vm6231_vm12 = vweird.f32 %v14113_v58 }
 0x4f1   :  { %v6143_v42 = vadd.f32 0.4994258, %v6142_v43  ;;  %v6741_v19 = vadd.f32 0.112945676, %v6740_v18  ;;  %v3365_v32 = vmul.f32 2.1237322e-06, %v14187_v62  ;;  %v6589_v50 = vmul.f32 %v14144_v47, %v6588_v20 }
 0x4f2   :  { %v6789_v39 = vmul.f32 %v14155_v4, %v6788_v8  ;;  %v6237_v51 = vand.u32 2147483648, %v14113_v58  ;;  %v6457_v27 = vadd.f32 0.001143296, %v6456_v23  ;;  %v6229_v16 = vmul.f32 %v14161_v49, %v6228_v7 }
 0x4f3   :  { %v5931_v44 = vmul.f32 %v5930_v37, %v13994_v57  ;;  %v14206_v59 = vadd.f32 1.0, %v5944_v46  ;;  %v6130_v56 = vadd.f32 0.05243302, %v6129_v36  ;;  %v3332_v26 = vadd.f32 0.18741608, %v3331_v0 }
 0x4f4   :  { %v14209_v43 = vmul.f32 0.5, %v13965_v9  ;;  %v14212_v18 = vmul.f32 0.5, %v14018_v29  ;;  %v6729_v20 = vmul.f32 %v6728_v22, %v14089_v25  ;;  %v16622_v8 = vand.u32 2147483647, %v14102_v40 }
 0x4f5   :  { %vm6792_vm14 = vweird.f32 %v14155_v4  ;;  %v6144_v7 = vmul.f32 %v6143_v42, %v14039_v34  ;;  %v6742_v37 = vmul.f32 %v6741_v19, %v14089_v25  ;;  %v3366_v46 = vadd.f32 0.00028619796, %v3365_v32  ;;  %v869_v42 = vpop.permute.xlu1 %868 }
 0x4f6   :  { %16621 = vst [vmem:[#allocation18_spill] sm:$0xff] %v14212_v18  ;;  %vm14217_vm13 = vcmp.eq.f32.partialorder %v16622_v8, 8.507059e+37  ;;  %v6590_v9 = vadd.f32 %v14144_v47, %v6589_v50  ;;  %v6790_v29 = vadd.f32 %v14155_v4, %v6789_v39  ;;  %vm14226_vm15 = vcmp.eq.f32.partialorder %v6795_v38, 8.507059e+37  ;;  %v799_v8 = vpop.permute.xlu0 %798  ;;  %vm14253_vm4 = vmor %vm6791_vm11, %vm6792_vm14  ;;  %v16636_v38 = vld [vmem:[#allocation72_spill] sm:$0xff] }
 0x4f7   :  { %vm6232_vm1 = vweird.f32 %v14161_v49  ;;  %vm14231_vm2 = vcmp.eq.f32.partialorder %v6235_v10, 8.507059e+37  ;;  %v6458_v22 = vmul.f32 %v6457_v27, %v14173_v2  ;;  %v6230_v19 = vadd.f32 %v14161_v49, %v6229_v16 }
 0x4f8   :  { %v5932_v32 = vadd.f32 0.18741608, %v5931_v44  ;;  %7984 = vrcp.f32 %v14206_v59  ;;  %v6131_v50 = vmul.f32 %v6130_v56, %v14039_v34  ;;  %v6238_v10 = vor.u32 1.1754944e-38, %v6237_v51  ;;  %v16633_v51 = vld [vmem:[#allocation163_spill] sm:$0xff]  ;;  %vm14273_vm6 = vmor %vm6231_vm12, %vm6232_vm1 }
 0x4f9   :  { %v6730_v39 = vadd.f32 0.05243302, %v6729_v20  ;;  %v6445_v27 = vmul.f32 2.1237322e-06, %v14173_v2  ;;  %v7768_v16 = vclamps-f32 %v13592_v61, 1.0  ;;  %v14257_v40 = vadd.f32 1.0, %v6144_v7 }
 0x4fa   :  { %v6743_v56 = vadd.f32 0.4994258, %v6742_v37  ;;  %v3367_v18 = vmul.f32 %v3366_v46, %v14187_v62  ;;  %v14261_v20 = vadd.f32 %v16633_v51, %v869_v42  ;;  %v6594_v61 = vsel %vm14243_vm3, %v14144_v47, %v6590_v9 }
 0x4fb   :  { %v6794_v14 = vsel %vm14253_vm4, %v14155_v4, %v6790_v29  ;;  %v3333_v37 = vmul.f32 %v3332_v26, %v14064_v54  ;;  %v6459_v46 = vadd.f32 0.014752088, %v6458_v22  ;;  %v6234_v42 = vsel %vm14273_vm6, %v14161_v49, %v6230_v19 }
 0x4fc   :  { %v5933_v47 = vmul.f32 %v5932_v32, %v13994_v57  ;;  %v6132_v9 = vadd.f32 0.18741608, %v6131_v50  ;;  %v14283_v4 = vadd.f32 %v16636_v38, %v799_v8  ;;  %v6731_v29 = vmul.f32 %v6730_v39, %v14089_v25  ;;  %v16638_v50 = vld [vmem:[#allocation187_spill] sm:$0xff] }
 0x4fd   :  { %v6446_v58 = vadd.f32 0.00028619796, %v6445_v27  ;;  %v7192_v44 = vadd.f32 1.0, %v7768_v16  ;;  %v3216_v51 = vmul.f32 3.8918573e-05, %v13264_v53  ;;  %7986 = vrcp.f32 %v14257_v40 }
 0x4fe   :  { %v14287_v60 = vpop.eup %7984  ;;  %v6744_v26 = vmul.f32 %v6743_v56, %v14089_v25  ;;  %v3368_v22 = vadd.f32 0.0036580483, %v3367_v18  ;;  %v14292_v49 = vmul.f32 0.70710677, %v14261_v20  ;;  %v6599_v57 = vsel %vm14217_vm13, %v14157_v28, %v6594_v61 }
 0x4ff   :  { %v14298_v19 = vmul.f32 0.5, %v14128_v30  ;;  %v6460_v32 = vmul.f32 %v6459_v46, %v14173_v2  ;;  %v7320_v39 = vmul.f32 %v7192_v44, %v16638_v50  ;;  %v6799_v27 = vsel %vm14226_vm15, %v14195_v15, %v6794_v14 }
 0x500   :  { %v6239_v18 = vsel %vm14231_vm2, %v6238_v10, %v6234_v42  ;;  %v6133_v8 = vmul.f32 %v6132_v9, %v14039_v34  ;;  %v14309_v16 = vmul.f32 0.70710677, %v14283_v4  ;;  %v5947_v30 = vmul.f32 %v14287_v60, %v14206_v59 }
 0x501   :  { %16637 = vst [vmem:[#allocation177_spill] sm:$0xff] %v14298_v19  ;;  %v6732_v28 = vadd.f32 0.18741608, %v6731_v29  ;;  %v6447_v23 = vmul.f32 %v6446_v58, %v14173_v2  ;;  %7475 = vmatpush.msrb.mxu1 %v7320_v39  ;;  %v3217_v56 = vadd.f32 0.001143296, %v3216_v51  ;;  %v14314_v7 = vadd.f32 1.0, %v6744_v26  ;;  %v1431_v51 = vpop.f32.mrf.mxu0 }
 0x502   :  { %v5934_v61 = vadd.f32 1.1283791, %v5933_v47  ;;  %v3369_v15 = vmul.f32 %v3368_v22, %v14187_v62  ;;  %v6643_v36 = vmul.f32 %v14292_v49, %v14292_v49  ;;  %v14320_v34 = vmul.f32 %v6599_v57, %v14150_v52 }
 0x503   :  { %v14323_v0 = vmul.f32 %v6799_v27, %v14165_v35  ;;  %v14325_v10 = vadd.f32 1.1283791, %v3333_v37  ;;  %v6461_v14 = vadd.f32 0.112945676, %v6460_v32  ;;  %v14327_v46 = vpop.eup %7986  ;;  %v14330_v42 = vmul.f32 %v6239_v18, %v14183_v12 }
 0x504   :  { %16639 = vst [vmem:[#allocation163_spill] sm:$0xff] %v14320_v34  ;;  %v5957_v47 = vand.u32 2147483648, %v14206_v59  ;;  %v6134_v9 = vadd.f32 1.1283791, %v6133_v8  ;;  %v6083_v38 = vmul.f32 %v14309_v16, %v14309_v16  ;;  %v5948_v29 = vsub.f32 1.0, %v5947_v30  ;;  %v16642_v30 = vld [vmem:[#allocation35_spill] sm:$0xff] }
 0x505   :  { %16640 = vst [vmem:[#allocation72_spill] sm:$0xff] %v14323_v0  ;;  %v6733_v52 = vmul.f32 %v6732_v28, %v14089_v25  ;;  %v6448_v58 = vadd.f32 0.0036580483, %v6447_v23  ;;  %v3218_v35 = vmul.f32 %v3217_v56, %v13264_v53  ;;  %v14338_v37 = vmul.f32 %v5934_v61, %v13955_v33 }
 0x506   :  { %16641 = vst [vmem:[#allocation187_spill] sm:$0xff] %v14325_v10  ;;  %7988 = vrcp.f32 %v14314_v7  ;;  %v3370_v44 = vadd.f32 0.05243302, %v3369_v15  ;;  %v14341_v12 = vmin.f32 %v6643_v36, 16.0  ;;  %vm5951_vm7 = vweird.f32 %v14206_v59 }
 0x507   :  { %v5955_v26 = vand.u32 2147483647, %v14206_v59  ;;  %v6147_v22 = vmul.f32 %v14327_v46, %v14257_v40  ;;  %v6157_v25 = vand.u32 2147483648, %v14257_v40  ;;  %v6462_v57 = vmul.f32 %v6461_v14, %v14173_v2 }
 0x508   :  { %v14349_v32 = vor.u32 1.1754944e-38, %v5957_v47  ;;  %v14352_v33 = vmul.f32 %v6134_v9, %v13985_v41  ;;  %v14354_v50 = vmin.f32 %v6083_v38, 16.0  ;;  %v3219_v39 = vadd.f32 0.014752088, %v3218_v35 }
 0x509   :  { %v5949_v27 = vmul.f32 %v14287_v60, %v5948_v29  ;;  %v6734_v18 = vadd.f32 1.1283791, %v6733_v52  ;;  %v6449_v8 = vmul.f32 %v6448_v58, %v14173_v2  ;;  %v14359_v28 = vadd.f32 %v1431_v51, %v16642_v30 }
 0x50a   :  { %v6155_v23 = vand.u32 2147483647, %v14257_v40  ;;  %v3371_v56 = vmul.f32 %v3370_v44, %v14187_v62  ;;  %v6645_v61 = vmul.f32 2.1237322e-06, %v14341_v12  ;;  %v3220_v41 = vmul.f32 %v3219_v39, %v13264_v53 }
 0x50b   :  { %v6148_v15 = vsub.f32 1.0, %v6147_v22  ;;  %v14365_v36 = vor.u32 1.1754944e-38, %v6157_v25  ;;  %v6463_v14 = vadd.f32 0.4994258, %v6462_v57  ;;  %v6656_v47 = vmul.f32 3.8918573e-05, %v14341_v12 }
 0x50c   :  { %v14368_v9 = vpop.eup %7988  ;;  %vm5952_vm11 = vweird.f32 %v14287_v60  ;;  %v6085_v38 = vmul.f32 2.1237322e-06, %v14354_v50  ;;  %v6096_v29 = vmul.f32 3.8918573e-05, %v14354_v50  ;;  %v3221_v52 = vadd.f32 0.112945676, %v3220_v41 }
 0x50d   :  { %v5950_v58 = vadd.f32 %v14287_v60, %v5949_v27  ;;  %vm14374_vm12 = vcmp.eq.f32.partialorder %v5955_v26, 8.507059e+37  ;;  %v14379_v44 = vmul.f32 %v6734_v18, %v14042_v11  ;;  %v6450_v51 = vadd.f32 0.05243302, %v6449_v8  ;;  %v16645_v11 = vld [vmem:[#allocation89_spill] sm:$0xff]  ;;  %vm14395_vm14 = vmor %vm5951_vm7, %vm5952_vm11 }
 0x50e   :  { %v14382_v22 = vmul.f32 0.70710677, %v14359_v28  ;;  %vm6151_vm13 = vweird.f32 %v14257_v40  ;;  %v6757_v25 = vand.u32 2147483648, %v14314_v7  ;;  %v3372_v57 = vadd.f32 0.18741608, %v3371_v56 }
 0x50f   :  { %v6646_v39 = vadd.f32 0.00028619796, %v6645_v61  ;;  %v3222_v30 = vmul.f32 %v3221_v52, %v13264_v53  ;;  %v6747_v26 = vmul.f32 %v14368_v9, %v14314_v7  ;;  %v6464_v27 = vmul.f32 %v6463_v14, %v14173_v2 }
 0x510   :  { %v6657_v41 = vadd.f32 0.001143296, %v6656_v47  ;;  %v3176_v18 = vmul.f32 3.8918573e-05, %v16645_v11  ;;  %v6149_v56 = vmul.f32 %v14327_v46, %v6148_v15  ;;  %v6086_v61 = vadd.f32 0.00028619796, %v6085_v38 }
 0x511   :  { %v6097_v52 = vadd.f32 0.001143296, %v6096_v29  ;;  %v3223_v10 = vadd.f32 0.4994258, %v3222_v30  ;;  %v5954_v14 = vsel %vm14395_vm14, %v14287_v60, %v5950_v58  ;;  %vm6152_vm15 = vweird.f32 %v14327_v46  ;;  %v16650_v30 = vld [vmem:[#allocation30_spill] sm:$0xff] }
 0x512   :  { %v6451_v47 = vmul.f32 %v6450_v51, %v14173_v2  ;;  %v3403_v59 = vmul.f32 %v14382_v22, %v14382_v22  ;;  %vm14407_vm1 = vcmp.eq.f32.partialorder %v6155_v23, 8.507059e+37  ;;  %v3373_v15 = vmul.f32 %v3372_v57, %v14187_v62  ;;  %vm14437_vm3 = vmor %vm6151_vm13, %vm6152_vm15 }
 0x513   :  { %v6647_v38 = vmul.f32 %v6646_v39, %v14341_v12  ;;  %v3224_v29 = vmul.f32 %v3223_v10, %v13264_v53  ;;  %v3136_v8 = vmul.f32 3.8918573e-05, %v16650_v30  ;;  %v6748_v60 = vsub.f32 1.0, %v6747_v26 }
 0x514   :  { %v14415_v58 = vadd.f32 1.0, %v6464_v27  ;;  %v6658_v51 = vmul.f32 %v6657_v41, %v14341_v12  ;;  %v3177_v34 = vadd.f32 0.001143296, %v3176_v18  ;;  %v6150_v0 = vadd.f32 %v14327_v46, %v6149_v56 }
 0x515   :  { %v6087_v23 = vmul.f32 %v6086_v61, %v14354_v50  ;;  %v6098_v17 = vmul.f32 %v6097_v52, %v14354_v50  ;;  %v14421_v54 = vadd.f32 1.0, %v3224_v29  ;;  %vm6751_vm2 = vweird.f32 %v14314_v7  ;;  %v789_v61 = vpop.permute.xlu1 %788 }
 0x516   :  { %v6755_v53 = vand.u32 2147483647, %v14314_v7  ;;  %v14425_v10 = vor.u32 1.1754944e-38, %v6757_v25  ;;  %v6452_v57 = vadd.f32 0.18741608, %v6451_v47  ;;  %v14427_v39 = vmin.f32 %v3403_v59, 16.0 }
 0x517   :  { %v5959_v26 = vsel %vm14374_vm12, %v14349_v32, %v5954_v14  ;;  %v6648_v27 = vadd.f32 0.0036580483, %v6647_v38  ;;  %7990 = vrcp.f32 %v14421_v54  ;;  %v3137_v41 = vadd.f32 0.001143296, %v3136_v8  ;;  %v16654_v8 = vld [vmem:[#allocation44_spill] sm:$0xff] }
 0x518   :  { %v6749_v25 = vmul.f32 %v14368_v9, %v6748_v60  ;;  %7992 = vrcp.f32 %v14415_v58  ;;  %v6659_v56 = vadd.f32 0.014752088, %v6658_v51  ;;  %v3178_v32 = vmul.f32 %v3177_v34, %v16645_v11 }
 0x519   :  { %v6154_v35 = vsel %vm14437_vm3, %v14327_v46, %v6150_v0  ;;  %v3374_v52 = vadd.f32 1.1283791, %v3373_v15  ;;  %v6088_v14 = vadd.f32 0.0036580483, %v6087_v23  ;;  %v6099_v47 = vadd.f32 0.014752088, %v6098_v17 }
 0x51a   :  { %v14448_v40 = vmul.f32 %v5959_v26, %v14338_v37  ;;  %v6453_v59 = vmul.f32 %v6452_v57, %v14173_v2  ;;  %v14452_v38 = vmul.f32 0.5, %v14261_v20  ;;  %v3405_v29 = vmul.f32 2.1237322e-06, %v14427_v39 }
 0x51b   :  { %vm6752_vm4 = vweird.f32 %v14368_v9  ;;  %v6649_v34 = vmul.f32 %v6648_v27, %v14341_v12  ;;  %v14458_v60 = vadd.f32 %v16654_v8, %v789_v61  ;;  %v3138_v0 = vmul.f32 %v3137_v41, %v16650_v30 }
 0x51c   :  { %16653 = vst [vmem:[#allocation35_spill] sm:$0xff] %v14452_v38  ;;  %v6159_v17 = vsel %vm14407_vm1, %v14365_v36, %v6154_v35  ;;  %v6750_v2 = vadd.f32 %v14368_v9, %v6749_v25  ;;  %v6660_v20 = vmul.f32 %v6659_v56, %v14341_v12  ;;  %v3179_v46 = vadd.f32 0.014752088, %v3178_v32  ;;  %vm14487_vm6 = vmor %vm6751_vm2, %vm6752_vm4 }
 0x51d   :  { %v7991_v37 = vpop.eup %7990  ;;  %v14467_v15 = vmul.f32 %v3374_v52, %v14141_v3  ;;  %v14470_v51 = vmul.f32 0.5, %v14283_v4  ;;  %v6089_v23 = vmul.f32 %v6088_v14, %v14354_v50  ;;  %v6100_v57 = vmul.f32 %v6099_v47, %v14354_v50 }
 0x51e   :  { %v14474_v26 = vpop.eup %7992  ;;  %v6454_v19 = vadd.f32 1.1283791, %v6453_v59  ;;  %v14477_v36 = vmul.f32 0.5, %v14359_v28  ;;  %v3406_v27 = vadd.f32 0.00028619796, %v3405_v29  ;;  %v3227_v41 = vmul.f32 %v7991_v37, %v14421_v54 }
 0x51f   :  { %16655 = vst [vmem:[#allocation89_spill] sm:$0xff] %v14467_v15  ;;  %v14481_v18 = vmul.f32 %v6159_v17, %v14352_v33  ;;  %vm14491_vm7 = vcmp.eq.f32.partialorder %v6755_v53, 8.507059e+37  ;;  %v6650_v28 = vadd.f32 0.05243302, %v6649_v34  ;;  %v14496_v25 = vmul.f32 0.70710677, %v14458_v60 }
 0x520   :  { %16656 = vst [vmem:[#allocation30_spill] sm:$0xff] %v14477_v36  ;;  %v3139_v56 = vadd.f32 0.014752088, %v3138_v0  ;;  %v6754_v33 = vsel %vm14487_vm6, %v14368_v9, %v6750_v2  ;;  %v6661_v61 = vadd.f32 0.112945676, %v6660_v20  ;;  %v3228_v32 = vsub.f32 1.0, %v3227_v41 }
 0x521   :  { %v3180_v7 = vmul.f32 %v3179_v46, %v16645_v11  ;;  %v6467_v35 = vmul.f32 %v14474_v26, %v14415_v58  ;;  %v6090_v53 = vadd.f32 0.05243302, %v6089_v23  ;;  %v6101_v52 = vadd.f32 0.112945676, %v6100_v57 }
 0x522   :  { %v3237_v14 = vand.u32 2147483648, %v14421_v54  ;;  %v3407_v47 = vmul.f32 %v3406_v27, %v14427_v39  ;;  %v3229_v59 = vmul.f32 %v7991_v37, %v3228_v32  ;;  %vm3232_vm11 = vweird.f32 %v7991_v37 }
 0x523   :  { %v3235_v29 = vand.u32 2147483647, %v14421_v54  ;;  %v14508_v34 = vmul.f32 %v6454_v19, %v14132_v1  ;;  %v6651_v9 = vmul.f32 %v6650_v28, %v14341_v12  ;;  %v6003_v8 = vmul.f32 %v14496_v25, %v14496_v25 }
 0x524   :  { %v3140_v0 = vmul.f32 %v3139_v56, %v16650_v30  ;;  %v6662_v17 = vmul.f32 %v6661_v61, %v14341_v12  ;;  %v3230_v2 = vadd.f32 %v7991_v37, %v3229_v59  ;;  %vm3231_vm12 = vweird.f32 %v14421_v54  ;;  %v16661_v61 = vld [vmem:[#allocation71_spill] sm:$0xff] }
 0x525   :  { %v3181_v20 = vadd.f32 0.112945676, %v3180_v7  ;;  %v6468_v46 = vsub.f32 1.0, %v6467_v35  ;;  %v6091_v23 = vmul.f32 %v6090_v53, %v14354_v50  ;;  %v6102_v57 = vmul.f32 %v6101_v52, %v14354_v50  ;;  %vm3233_vm13 = vmor %vm3231_vm12, %vm3232_vm11 }
 0x526   :  { %v3238_v1 = vor.u32 1.1754944e-38, %v3237_v14  ;;  %v3408_v19 = vadd.f32 0.0036580483, %v3407_v47  ;;  %v3234_v27 = vsel %vm3233_vm13, %v7991_v37, %v3230_v2  ;;  %vm3236_vm14 = vcmp.eq.f32.partialorder %v3235_v29, 8.507059e+37  ;;  %v864_v29 = vpop.permute.xlu0 %863 }
 0x527   :  { %v3182_v41 = vmul.f32 %v3181_v20, %v16645_v11  ;;  %v6652_v3 = vadd.f32 0.18741608, %v6651_v9  ;;  %v3141_v56 = vadd.f32 0.112945676, %v3140_v0  ;;  %v3096_v32 = vmul.f32 3.8918573e-05, %v16661_v61 }
 0x528   :  { %v3239_v28 = vsel %vm3236_vm14, %v3238_v1, %v3234_v27  ;;  %v6759_v54 = vsel %vm14491_vm7, %v14425_v10, %v6754_v33  ;;  %v6663_v7 = vadd.f32 0.4994258, %v6662_v17  ;;  %v6469_v52 = vmul.f32 %v14474_v26, %v6468_v46 }
 0x529   :  { %v3240_v35 = vmul.f32 %v3239_v28, %v13531_v13  ;;  %v3183_v53 = vadd.f32 0.4994258, %v3182_v41  ;;  %vm6471_vm15 = vweird.f32 %v14415_v58  ;;  %v6092_v37 = vadd.f32 0.18741608, %v6091_v23  ;;  %v16662_v23 = vld [vmem:[#allocation158_spill] sm:$0xff]  ;;  %v16663_v41 = vld [vmem:[#allocation188_spill] sm:$0xff] }
 0x52a   :  { %v14526_v14 = vmin.f32 %v6003_v8, 16.0  ;;  %v6103_v47 = vadd.f32 0.4994258, %v6102_v57  ;;  %v3409_v59 = vmul.f32 %v3408_v19, %v14427_v39  ;;  %v6475_v10 = vand.u32 2147483647, %v14415_v58 }
 0x52b   :  { %v7690_v9 = vclamps-f32 %v3240_v35, 1.0  ;;  %v3184_v0 = vmul.f32 %v3183_v53, %v16645_v11  ;;  %v6653_v4 = vmul.f32 %v6652_v3, %v14341_v12  ;;  %v3142_v13 = vmul.f32 %v3141_v56, %v16650_v30 }
 0x52c   :  { %v3097_v33 = vadd.f32 0.001143296, %v3096_v32  ;;  %v6477_v17 = vand.u32 2147483648, %v14415_v58  ;;  %v6664_v2 = vmul.f32 %v6663_v7, %v14341_v12  ;;  %v6470_v46 = vadd.f32 %v14474_v26, %v6469_v52 }
 0x52d   :  { %v7114_v8 = vadd.f32 1.0, %v7690_v9  ;;  %v14535_v20 = vadd.f32 1.0, %v3184_v0  ;;  %vm6472_vm1 = vweird.f32 %v14474_v26  ;;  %v6093_v11 = vmul.f32 %v6092_v37, %v14354_v50 }
 0x52e   :  { %v1672_v57 = vadd.f32 %v16662_v23, %v864_v29  ;;  %v6104_v1 = vmul.f32 %v6103_v47, %v14354_v50  ;;  %v3410_v19 = vadd.f32 0.05243302, %v3409_v59  ;;  %v6005_v27 = vmul.f32 2.1237322e-06, %v14526_v14  ;;  %vm14551_vm2 = vmor %vm6471_vm15, %vm6472_vm1  ;;  %v16671_v23 = vld [vmem:[#allocation150_spill] sm:$0xff] }
 0x52f   :  { %v7242_v3 = vmul.f32 %v7114_v8, %v16663_v41  ;;  %v6654_v28 = vadd.f32 1.1283791, %v6653_v4  ;;  %v6016_v12 = vmul.f32 3.8918573e-05, %v14526_v14  ;;  %v3143_v56 = vadd.f32 0.4994258, %v3142_v13 }
 0x530   :  { %v3098_v32 = vmul.f32 %v3097_v33, %v16661_v61  ;;  %v14547_v7 = vmul.f32 %v6759_v54, %v14379_v44  ;;  %vm14555_vm3 = vcmp.eq.f32.partialorder %v6475_v10, 8.507059e+37  ;;  %v14559_v53 = vadd.f32 1.0, %v6664_v2  ;;  %v16670_v13 = vld [vmem:[#allocation172_spill] sm:$0xff] }
 0x531   :  { %7373 = vmatpush.msrb.mxu2 %v7242_v3  ;;  %7994 = vrcp.f32 %v14535_v20  ;;  %v6474_v44 = vsel %vm14551_vm2, %v14474_v26, %v6470_v46  ;;  %v6478_v54 = vor.u32 1.1754944e-38, %v6477_v17  ;;  %v6094_v52 = vadd.f32 1.1283791, %v6093_v11 }
 0x532   :  { %16664 = vst [vmem:[#allocation44_spill] sm:$0xff] %v14547_v7  ;;  %v14566_v58 = vmul.f32 0.5, %v14458_v60  ;;  %v14568_v37 = vadd.f32 1.0, %v6104_v1  ;;  %v3411_v47 = vmul.f32 %v3410_v19, %v14427_v39  ;;  %v6006_v59 = vadd.f32 0.00028619796, %v6005_v27 }
 0x533   :  { %v14571_v29 = vmul.f32 0.5, %v1672_v57  ;;  %v14574_v9 = vmul.f32 %v6654_v28, %v14292_v49  ;;  %v6017_v0 = vadd.f32 0.001143296, %v6016_v12  ;;  %v3144_v10 = vmul.f32 %v3143_v56, %v16650_v30  ;;  %v1434_v56 = vpop.f32.mrf.mxu0 }
 0x534   :  { %v3099_v4 = vadd.f32 0.014752088, %v3098_v32  ;;  %v6479_v26 = vsel %vm14555_vm3, %v6478_v54, %v6474_v44  ;;  %7996 = vrcp.f32 %v14559_v53  ;;  %v6677_v60 = vand.u32 2147483648, %v14559_v53 }
 0x535   :  { %16669 = vst [vmem:[#allocation71_spill] sm:$0xff] %v14571_v29  ;;  %v3056_v33 = vmul.f32 3.8918573e-05, %v16670_v13  ;;  %v14584_v2 = vmul.f32 %v6094_v52, %v14309_v16  ;;  %v14586_v49 = vmul.f32 0.70710677, %v1672_v57  ;;  %v14588_v8 = vadd.f32 1.0, %v3144_v10 }
 0x536   :  { %7998 = vrcp.f32 %v14568_v37  ;;  %v3100_v46 = vmul.f32 %v3099_v4, %v16661_v61  ;;  %v3016_v1 = vmul.f32 3.8918573e-05, %v16671_v23  ;;  %v14594_v19 = vmul.f32 %v6479_v26, %v14508_v34 }
 0x537   :  { %v7995_v30 = vpop.eup %7994  ;;  %v3057_v11 = vadd.f32 0.001143296, %v3056_v33  ;;  %v6007_v27 = vmul.f32 %v6006_v59, %v14526_v14  ;;  %8000 = vrcp.f32 %v14588_v8  ;;  %v14599_v57 = vor.u32 1.1754944e-38, %v6677_v60  ;;  %v16673_v60 = vld [vmem:[#allocation32_spill] sm:$0xff] }
 0x538   :  { %16672 = vst [vmem:[#allocation158_spill] sm:$0xff] %v14594_v19  ;;  %v3187_v16 = vmul.f32 %v7995_v30, %v14535_v20  ;;  %v6018_v28 = vmul.f32 %v6017_v0, %v14526_v14  ;;  %v14604_v12 = vadd.f32 0.18741608, %v3411_v47  ;;  %v6603_v34 = vmul.f32 %v14586_v49, %v14586_v49  ;;  %v16675_v19 = vld [vmem:[#allocation128_spill] sm:$0xff] }
 0x539   :  { %v3101_v35 = vadd.f32 0.112945676, %v3100_v46  ;;  %v3195_v44 = vand.u32 2147483647, %v14535_v20  ;;  %v3197_v54 = vand.u32 2147483648, %v14535_v20  ;;  %v3058_v52 = vmul.f32 %v3057_v11, %v16670_v13 }
 0x53a   :  { %v3188_v32 = vsub.f32 1.0, %v3187_v16  ;;  %v14608_v50 = vpop.eup %7996  ;;  %v3017_v59 = vadd.f32 0.001143296, %v3016_v1  ;;  %v6008_v10 = vadd.f32 0.0036580483, %v6007_v27  ;;  %vm3192_vm4 = vweird.f32 %v7995_v30 }
 0x53b   :  { %v3102_v47 = vmul.f32 %v3101_v35, %v16661_v61  ;;  %v6019_v26 = vadd.f32 0.014752088, %v6018_v28  ;;  %v14617_v33 = vadd.f32 %v1434_v56, %v16673_v60  ;;  %v7767_v46 = vclamps-f32 %v13817_v63, 1.0 }
 0x53c   :  { %v3189_v4 = vmul.f32 %v7995_v30, %v3188_v32  ;;  %v14614_v0 = vpop.eup %7998  ;;  %v3059_v16 = vadd.f32 0.014752088, %v3058_v52  ;;  %v14620_v3 = vmin.f32 %v6603_v34, 16.0  ;;  %vm3191_vm6 = vweird.f32 %v14535_v20 }
 0x53d   :  { %v8001_v41 = vpop.eup %8000  ;;  %v3103_v11 = vadd.f32 0.4994258, %v3102_v47  ;;  %vm3193_vm7 = vmor %vm3191_vm6, %vm3192_vm4  ;;  %vm3196_vm11 = vcmp.eq.f32.partialorder %v3195_v44, 8.507059e+37  ;;  %v3198_v1 = vor.u32 1.1754944e-38, %v3197_v54  ;;  %v3018_v28 = vmul.f32 %v3017_v59, %v16671_v23  ;;  %v16674_v47 = vld [vmem:[#allocation184_spill] sm:$0xff] }
 0x53e   :  { %v3190_v17 = vadd.f32 %v7995_v30, %v3189_v4  ;;  %v3147_v27 = vmul.f32 %v8001_v41, %v14588_v8  ;;  %v3155_v56 = vand.u32 2147483647, %v14588_v8  ;;  %v7191_v35 = vadd.f32 1.0, %v7767_v46 }
 0x53f   :  { %v3104_v63 = vmul.f32 %v3103_v11, %v16661_v61  ;;  %v3157_v4 = vand.u32 2147483648, %v14588_v8  ;;  %v3060_v20 = vmul.f32 %v3059_v16, %v16670_v13  ;;  %v2976_v59 = vmul.f32 3.8918573e-05, %v16675_v19 }
 0x540   :  { %v3194_v32 = vsel %vm3193_vm7, %v7995_v30, %v3190_v17  ;;  %v3148_v34 = vsub.f32 1.0, %v3147_v27  ;;  %v7319_v54 = vmul.f32 %v7191_v35, %v13585_v48  ;;  %vm3152_vm12 = vweird.f32 %v8001_v41 }
 0x541   :  { %v3199_v52 = vsel %vm3196_vm11, %v3198_v1, %v3194_v32  ;;  %v14630_v44 = vadd.f32 1.0, %v3104_v63  ;;  %v3061_v30 = vadd.f32 0.112945676, %v3060_v20  ;;  %v3019_v29 = vadd.f32 0.014752088, %v3018_v28 }
 0x542   :  { %v3200_v60 = vmul.f32 %v3199_v52, %v16674_v47  ;;  %v3149_v17 = vmul.f32 %v8001_v41, %v3148_v34  ;;  %v6667_v61 = vmul.f32 %v14608_v50, %v14559_v53  ;;  %v6020_v46 = vmul.f32 %v6019_v26, %v14526_v14  ;;  %7476 = vmatpush.msrb.mxu1 %v7319_v54  ;;  %v16676_v34 = vld [vmem:[#allocation24_spill] sm:$0xff] }
 0x543   :  { %8002 = vrcp.f32 %v14630_v44  ;;  %vm3151_vm13 = vweird.f32 %v14588_v8  ;;  %v3062_v48 = vmul.f32 %v3061_v30, %v16670_v13  ;;  %v3020_v1 = vmul.f32 %v3019_v29, %v16671_v23 }
 0x544   :  { %v7689_v11 = vclamps-f32 %v3200_v60, 1.0  ;;  %v3150_v16 = vadd.f32 %v8001_v41, %v3149_v17  ;;  %v14642_v27 = vmul.f32 0.70710677, %v14617_v33  ;;  %vm3153_vm14 = vmor %vm3151_vm13, %vm3152_vm12  ;;  %v3158_v32 = vor.u32 1.1754944e-38, %v3157_v4  ;;  %v16677_v17 = vld [vmem:[#allocation181_spill] sm:$0xff] }
 0x545   :  { %v2977_v63 = vadd.f32 0.001143296, %v2976_v59  ;;  %v6605_v26 = vmul.f32 2.1237322e-06, %v14620_v3  ;;  %vm3156_vm15 = vcmp.eq.f32.partialorder %v3155_v56, 8.507059e+37  ;;  %v6668_v54 = vsub.f32 1.0, %v6667_v61 }
 0x546   :  { %v7113_v28 = vadd.f32 1.0, %v7689_v11  ;;  %v3154_v35 = vsel %vm3153_vm14, %v8001_v41, %v3150_v16  ;;  %v3063_v52 = vadd.f32 0.4994258, %v3062_v48  ;;  %v3021_v8 = vadd.f32 0.112945676, %v3020_v1 }
 0x547   :  { %v3159_v47 = vsel %vm3156_vm15, %v3158_v32, %v3154_v35  ;;  %v2978_v60 = vmul.f32 %v2977_v63, %v16675_v19  ;;  %v6009_v29 = vmul.f32 %v6008_v10, %v14526_v14  ;;  %v6107_v59 = vmul.f32 %v14614_v0, %v14568_v37 }
 0x548   :  { %v7241_v20 = vmul.f32 %v7113_v28, %v16676_v34  ;;  %v3160_v30 = vmul.f32 %v3159_v47, %v16677_v17  ;;  %v3064_v11 = vmul.f32 %v3063_v52, %v16670_v13  ;;  %v6616_v41 = vmul.f32 3.8918573e-05, %v14620_v3  ;;  %v16678_v34 = vld [vmem:[#allocation117_spill] sm:$0xff] }
 0x549   :  { %v8003_v4 = vpop.eup %8002  ;;  %v3022_v56 = vmul.f32 %v3021_v8, %v16671_v23  ;;  %v2979_v16 = vadd.f32 0.014752088, %v2978_v60  ;;  %v6021_v48 = vadd.f32 0.112945676, %v6020_v46  ;;  %v6606_v10 = vadd.f32 0.00028619796, %v6605_v26 }
 0x54a   :  { %7374 = vmatpush.msrb.mxu2 %v7241_v20  ;;  %v7688_v1 = vclamps-f32 %v3160_v30, 1.0  ;;  %v3107_v61 = vmul.f32 %v8003_v4, %v14630_v44  ;;  %v14655_v28 = vadd.f32 1.0, %v3064_v11  ;;  %v3443_v13 = vmul.f32 %v14642_v27, %v14642_v27  ;;  %v16679_v26 = vld [vmem:[#allocation174_spill] sm:$0xff] }
 0x54b   :  { %v3023_v32 = vadd.f32 0.4994258, %v3022_v56  ;;  %v2980_v63 = vmul.f32 %v2979_v16, %v16675_v19  ;;  %v2936_v20 = vmul.f32 3.8918573e-05, %v16678_v34  ;;  %v6617_v47 = vadd.f32 0.001143296, %v6616_v41 }
 0x54c   :  { %v7112_v35 = vadd.f32 1.0, %v7688_v1  ;;  %v3108_v52 = vsub.f32 1.0, %v3107_v61  ;;  %8004 = vrcp.f32 %v14655_v28  ;;  %v3115_v46 = vand.u32 2147483647, %v14630_v44 }
 0x54d   :  { %v3117_v8 = vand.u32 2147483648, %v14630_v44  ;;  %v3024_v60 = vmul.f32 %v3023_v32, %v16671_v23  ;;  %vm3112_vm1 = vweird.f32 %v8003_v4  ;;  %v2981_v11 = vadd.f32 0.112945676, %v2980_v63 }
 0x54e   :  { %v7240_v17 = vmul.f32 %v7112_v35, %v16679_v26  ;;  %v3109_v30 = vmul.f32 %v8003_v4, %v3108_v52  ;;  %v6669_v56 = vmul.f32 %v14608_v50, %v6668_v54  ;;  %v6108_v16 = vsub.f32 1.0, %v6107_v59 }
 0x54f   :  { %v6010_v1 = vadd.f32 0.05243302, %v6009_v29  ;;  %v6022_v61 = vmul.f32 %v6021_v48, %v14526_v14  ;;  %vm3111_vm2 = vweird.f32 %v14630_v44  ;;  %v14669_v41 = vadd.f32 1.0, %v3024_v60 }
 0x550   :  { %7375 = vmatpush.msrb.mxu2 %v7240_v17  ;;  %v3110_v38 = vadd.f32 %v8003_v4, %v3109_v30  ;;  %v2937_v15 = vadd.f32 0.001143296, %v2936_v20  ;;  %v6607_v23 = vmul.f32 %v6606_v10, %v14620_v3  ;;  %v14672_v32 = vmin.f32 %v3443_v13, 16.0  ;;  %vm3113_vm3 = vmor %vm3111_vm2, %vm3112_vm1 }
 0x551   :  { %v3118_v35 = vor.u32 1.1754944e-38, %v3117_v8  ;;  %v2982_v63 = vmul.f32 %v2981_v11, %v16675_v19  ;;  %v6618_v29 = vmul.f32 %v6617_v47, %v14620_v3  ;;  %vm3116_vm4 = vcmp.eq.f32.partialorder %v3115_v46, 8.507059e+37  ;;  %v16680_v8 = vld [vmem:[#allocation5_spill] sm:$0xff] }
 0x552   :  { %v8005_v54 = vpop.eup %8004  ;;  %v3114_v59 = vsel %vm3113_vm3, %v8003_v4, %v3110_v38  ;;  %8006 = vrcp.f32 %v14669_v41  ;;  %v14679_v44 = vmul.f32 %v14604_v12, %v14427_v39  ;;  %v6011_v48 = vmul.f32 %v6010_v1, %v14526_v14 }
 0x553   :  { %v3119_v10 = vsel %vm3116_vm4, %v3118_v35, %v3114_v59  ;;  %v3067_v13 = vmul.f32 %v8005_v54, %v14655_v28  ;;  %v14684_v52 = vadd.f32 %v14608_v50, %v6669_v56  ;;  %v6023_v20 = vadd.f32 0.4994258, %v6022_v61 }
 0x554   :  { %v3120_v60 = vmul.f32 %v3119_v10, %v16680_v8  ;;  %v2938_v38 = vmul.f32 %v2937_v15, %v16678_v34  ;;  %v6109_v4 = vmul.f32 %v14614_v0, %v6108_v16  ;;  %v3445_v47 = vmul.f32 2.1237322e-06, %v14672_v32 }
 0x555   :  { %v3068_v46 = vsub.f32 1.0, %v3067_v13  ;;  %v2983_v12 = vadd.f32 0.4994258, %v2982_v63  ;;  %v6608_v26 = vadd.f32 0.0036580483, %v6607_v23  ;;  %v3077_v11 = vand.u32 2147483648, %v14655_v28 }
 0x556   :  { %v6619_v17 = vadd.f32 0.014752088, %v6618_v29  ;;  %v7687_v30 = vclamps-f32 %v3120_v60, 1.0  ;;  %vm3072_vm6 = vweird.f32 %v8005_v54  ;;  %v3075_v56 = vand.u32 2147483647, %v14655_v28  ;;  %v16681_v13 = vld [vmem:[#allocation105_spill] sm:$0xff] }
 0x557   :  { %v3069_v1 = vmul.f32 %v8005_v54, %v3068_v46  ;;  %v2984_v61 = vmul.f32 %v2983_v12, %v16675_v19  ;;  %vm6672_vm7 = vweird.f32 %v14608_v50  ;;  %v14694_v15 = vadd.f32 0.18741608, %v6011_v48 }
 0x558   :  { %v8007_v35 = vpop.eup %8006  ;;  %v6024_v16 = vmul.f32 %v6023_v20, %v14526_v14  ;;  %v7111_v59 = vadd.f32 1.0, %v7687_v30  ;;  %v2939_v63 = vadd.f32 0.014752088, %v2938_v38  ;;  %v3446_v23 = vadd.f32 0.00028619796, %v3445_v47  ;;  %v784_v47 = vpop.permute.xlu0 %783 }
 0x559   :  { %v3070_v29 = vadd.f32 %v8005_v54, %v3069_v1  ;;  %vm3071_vm11 = vweird.f32 %v14655_v28  ;;  %v3027_v10 = vmul.f32 %v8007_v35, %v14669_v41  ;;  %vm6671_vm12 = vweird.f32 %v14559_v53  ;;  %v854_v30 = vpop.permute.xlu1 %853 }
 0x55a   :  { %vm6112_vm13 = vweird.f32 %v14614_v0  ;;  %v6609_v19 = vmul.f32 %v6608_v26, %v14620_v3  ;;  %v7239_v8 = vmul.f32 %v7111_v59, %v16681_v13  ;;  %vm3073_vm14 = vmor %vm3071_vm11, %vm3072_vm6  ;;  %v3078_v48 = vor.u32 1.1754944e-38, %v3077_v11  ;;  %v16682_v11 = vld [vmem:[#allocation102_spill] sm:$0xff] }
 0x55b   :  { %v14704_v20 = vadd.f32 1.0, %v2984_v61  ;;  %v6620_v60 = vmul.f32 %v6619_v17, %v14620_v3  ;;  %v3074_v38 = vsel %vm3073_vm14, %v8005_v54, %v3070_v29  ;;  %vm3076_vm15 = vcmp.eq.f32.partialorder %v3075_v56, 8.507059e+37  ;;  %vm14733_vm11 = vmor %vm6671_vm12, %vm6672_vm7 }
 0x55c   :  { %v3028_v28 = vsub.f32 1.0, %v3027_v10  ;;  %vm6111_vm1 = vweird.f32 %v14568_v37  ;;  %7376 = vmatpush.msrb.mxu2 %v7239_v8  ;;  %v3079_v46 = vsel %vm3076_vm15, %v3078_v48, %v3074_v38  ;;  %v3037_v12 = vand.u32 2147483648, %v14669_v41  ;;  %v16683_v10 = vld [vmem:[#allocation41_spill] sm:$0xff]  ;;  %v16684_v38 = vld [vmem:[#allocation152_spill] sm:$0xff] }
 0x55d   :  { %8008 = vrcp.f32 %v14704_v20  ;;  %v2940_v26 = vmul.f32 %v2939_v63, %v16678_v34  ;;  %v3080_v1 = vmul.f32 %v3079_v46, %v16682_v11  ;;  %vm3032_vm2 = vweird.f32 %v8007_v35  ;;  %vm14761_vm12 = vmor %vm6111_vm1, %vm6112_vm13 }
 0x55e   :  { %v3029_v61 = vmul.f32 %v8007_v35, %v3028_v28  ;;  %v3035_v54 = vand.u32 2147483647, %v14669_v41  ;;  %v14714_v17 = vadd.f32 %v14614_v0, %v6109_v4  ;;  %v14716_v56 = vadd.f32 1.0, %v6024_v16 }
 0x55f   :  { %v6610_v59 = vadd.f32 0.05243302, %v6609_v19  ;;  %v3447_v29 = vmul.f32 %v3446_v23, %v14672_v32  ;;  %v14720_v13 = vadd.f32 %v16683_v10, %v784_v47  ;;  %v7686_v8 = vclamps-f32 %v3080_v1, 1.0  ;;  %v16686_v19 = vld [vmem:[#allocation108_spill] sm:$0xff] }
 0x560   :  { %v3030_v63 = vadd.f32 %v8007_v35, %v3029_v61  ;;  %vm3031_vm3 = vweird.f32 %v14669_v41  ;;  %v6621_v48 = vadd.f32 0.112945676, %v6620_v60  ;;  %v14724_v28 = vadd.f32 %v16684_v38, %v854_v30  ;;  %v16689_v60 = vld [vmem:[#allocation57_spill] sm:$0xff] }
 0x561   :  { %vm3033_vm4 = vmor %vm3031_vm3, %vm3032_vm2  ;;  %v3038_v46 = vor.u32 1.1754944e-38, %v3037_v12  ;;  %v2941_v4 = vadd.f32 0.112945676, %v2940_v26  ;;  %v7110_v11 = vadd.f32 1.0, %v7686_v8  ;;  %vm3036_vm6 = vcmp.eq.f32.partialorder %v3035_v54, 8.507059e+37  ;;  %v16690_v26 = vld [vmem:[#allocation171_spill] sm:$0xff] }
 0x562   :  { %16685 = vst [vmem:[#allocation188_spill] sm:$0xff] %v14724_v28  ;;  %v3034_v16 = vsel %vm3033_vm4, %v8007_v35, %v3030_v63  ;;  %v2896_v7 = vmul.f32 3.8918573e-05, %v16686_v19  ;;  %8010 = vrcp.f32 %v14716_v56  ;;  %v6611_v47 = vmul.f32 %v6610_v59, %v14620_v3 }
 0x563   :  { %v8009_v23 = vpop.eup %8008  ;;  %v3448_v1 = vadd.f32 0.0036580483, %v3447_v29  ;;  %v3039_v61 = vsel %vm3036_vm6, %v3038_v46, %v3034_v16  ;;  %v14738_v35 = vmul.f32 0.70710677, %v14720_v13  ;;  %v7238_v12 = vmul.f32 %v7110_v11, %v16689_v60 }
 0x564   :  { %v3040_v30 = vmul.f32 %v3039_v61, %v16690_v26  ;;  %v2987_v54 = vmul.f32 %v8009_v23, %v14704_v20  ;;  %v6674_v59 = vsel %vm14733_vm11, %v14608_v50, %v14684_v52  ;;  %v16691_v29 = vand.u32 2147483647, %v14559_v53  ;;  %v16704_v61 = vld [vmem:[#allocation20_spill] sm:$0xff] }
 0x565   :  { %v16694_v8 = vand.u32 2147483648, %v14568_v37  ;;  %v3414_v38 = vadd.f32 1.1283791, %v14679_v44  ;;  %v2942_v46 = vmul.f32 %v2941_v4, %v16678_v34  ;;  %v6622_v53 = vmul.f32 %v6621_v48, %v14620_v3  ;;  %7377 = vmatpush.msrb.mxu2 %v7238_v12 }
 0x566   :  { %vm14749_vm7 = vcmp.eq.f32.partialorder %v16691_v29, 8.507059e+37  ;;  %v14767_v50 = vmul.f32 0.70710677, %v14724_v28  ;;  %v7685_v52 = vclamps-f32 %v3040_v30, 1.0  ;;  %v2897_v16 = vadd.f32 0.001143296, %v2896_v7 }
 0x567   :  { %v6118_v63 = vor.u32 1.1754944e-38, %v16694_v8  ;;  %v6114_v44 = vsel %vm14761_vm12, %v14614_v0, %v14714_v17  ;;  %v16697_v4 = vand.u32 2147483647, %v14568_v37  ;;  %v6013_v48 = vmul.f32 %v14694_v15, %v14526_v14 }
 0x568   :  { %v3449_v41 = vmul.f32 %v3448_v1, %v14672_v32  ;;  %v2988_v60 = vsub.f32 1.0, %v2987_v54  ;;  %v6612_v12 = vadd.f32 0.18741608, %v6611_v47  ;;  %v5963_v7 = vmul.f32 %v14738_v35, %v14738_v35  ;;  %v14786_v17 = vpop.eup %8010  ;;  %v16700_v1 = vld [vmem:[#allocation165_spill] sm:$0xff] }
 0x569   :  { %vm14775_vm14 = vcmp.eq.f32.partialorder %v16697_v4, 8.507059e+37  ;;  %v2995_v26 = vand.u32 2147483647, %v14704_v20  ;;  %v2997_v0 = vand.u32 2147483648, %v14704_v20  ;;  %v7109_v37 = vadd.f32 1.0, %v7685_v52 }
 0x56a   :  { %v2989_v30 = vmul.f32 %v8009_v23, %v2988_v60  ;;  %vm2992_vm13 = vweird.f32 %v8009_v23  ;;  %v2943_v29 = vadd.f32 0.4994258, %v2942_v46  ;;  %v6623_v8 = vadd.f32 0.4994258, %v6622_v53 }
 0x56b   :  { %v6523_v14 = vmul.f32 %v14767_v50, %v14767_v50  ;;  %v7766_v15 = vclamps-f32 %v14092_v24, 1.0  ;;  %v2898_v47 = vmul.f32 %v2897_v16, %v16686_v19  ;;  %v7237_v54 = vmul.f32 %v7109_v37, %v16700_v1 }
 0x56c   :  { %v2990_v11 = vadd.f32 %v8009_v23, %v2989_v30  ;;  %vm2991_vm15 = vweird.f32 %v14704_v20  ;;  %v2944_v4 = vmul.f32 %v2943_v29, %v16678_v34  ;;  %v6027_v52 = vmul.f32 %v14786_v17, %v14716_v56 }
 0x56d   :  { %v3450_v60 = vadd.f32 0.05243302, %v3449_v41  ;;  %v14797_v46 = vmin.f32 %v5963_v7, 16.0  ;;  %vm2993_vm1 = vmor %vm2991_vm15, %vm2992_vm13  ;;  %v2998_v53 = vor.u32 1.1754944e-38, %v2997_v0  ;;  %7378 = vmatpush.msrb.mxu2 %v7237_v54  ;;  %vm2996_vm2 = vcmp.eq.f32.partialorder %v2995_v26, 8.507059e+37  ;;  %v16701_v7 = vld [vmem:[#allocation151_spill] sm:$0xff] }
 0x56e   :  { %v2994_v28 = vsel %vm2993_vm1, %v8009_v23, %v2990_v11  ;;  %v14799_v24 = vadd.f32 1.0, %v2944_v4  ;;  %v7190_v16 = vadd.f32 1.0, %v7766_v15  ;;  %v6679_v20 = vsel %vm14749_vm7, %v14599_v57, %v6674_v59  ;;  %v1437_v59 = vpop.f32.mrf.mxu0 }
 0x56f   :  { %v6613_v34 = vmul.f32 %v6612_v12, %v14620_v3  ;;  %v6624_v37 = vmul.f32 %v6623_v8, %v14620_v3  ;;  %v2999_v30 = vsel %vm2996_vm2, %v2998_v53, %v2994_v28  ;;  %v14806_v41 = vmin.f32 %v6523_v14, 16.0 }
 0x570   :  { %v3000_v29 = vmul.f32 %v2999_v30, %v16701_v7  ;;  %8012 = vrcp.f32 %v14799_v24  ;;  %v2899_v23 = vadd.f32 0.014752088, %v2898_v47  ;;  %v6119_v26 = vsel %vm14775_vm14, %v6118_v63, %v6114_v44 }
 0x571   :  { %v6014_v0 = vadd.f32 1.1283791, %v6013_v48  ;;  %v6037_v15 = vand.u32 2147483648, %v14716_v56  ;;  %v3451_v57 = vmul.f32 %v3450_v60, %v14672_v32  ;;  %v6028_v10 = vsub.f32 1.0, %v6027_v52 }
 0x572   :  { %v5976_v3 = vmul.f32 3.8918573e-05, %v14797_v46  ;;  %v7684_v28 = vclamps-f32 %v3000_v29, 1.0  ;;  %v7318_v12 = vmul.f32 %v7190_v16, %v13823_v5  ;;  %v14817_v8 = vmul.f32 %v3414_v38, %v14382_v22  ;;  %v774_v29 = vpop.permute.xlu1 %773 }
 0x573   :  { %v6614_v14 = vadd.f32 1.1283791, %v6613_v34  ;;  %v14819_v47 = vadd.f32 1.0, %v6624_v37  ;;  %v14822_v63 = vmul.f32 0.5, %v14617_v33  ;;  %v6525_v44 = vmul.f32 2.1237322e-06, %v14806_v41 }
 0x574   :  { %16702 = vst [vmem:[#allocation172_spill] sm:$0xff] %v14817_v8  ;;  %v14826_v48 = vadd.f32 %v1437_v59, %v16704_v61  ;;  %v7108_v1 = vadd.f32 1.0, %v7684_v28  ;;  %7477 = vmatpush.msrb.mxu1 %v7318_v12  ;;  %v2900_v54 = vmul.f32 %v2899_v23, %v16686_v19  ;;  %v14830_v5 = vmul.f32 %v6679_v20, %v14574_v9  ;;  %v16707_v20 = vld [vmem:[#allocation146_spill] sm:$0xff]  ;;  %v16708_v23 = vld [vmem:[#allocation84_spill] sm:$0xff] }
 0x575   :  { %16703 = vst [vmem:[#allocation150_spill] sm:$0xff] %v14822_v63  ;;  %v14833_v22 = vmul.f32 %v6119_v26, %v14584_v2  ;;  %v14836_v38 = vmul.f32 %v6014_v0, %v14496_v25  ;;  %v6035_v33 = vand.u32 2147483647, %v14716_v56  ;;  %v6029_v4 = vmul.f32 %v14786_v17, %v6028_v10  ;;  %v16709_v0 = vld [vmem:[#allocation85_spill] sm:$0xff]  ;;  %v16719_v63 = vld [vmem:[#allocation122_spill] sm:$0xff] }
 0x576   :  { %16705 = vst [vmem:[#allocation32_spill] sm:$0xff] %v14830_v5  ;;  %v8013_v11 = vpop.eup %8012  ;;  %v14840_v52 = vor.u32 1.1754944e-38, %v6037_v15  ;;  %v3452_v60 = vadd.f32 0.18741608, %v3451_v57  ;;  %v5977_v53 = vadd.f32 0.001143296, %v5976_v3  ;;  %v14843_v16 = vmul.f32 %v6614_v14, %v14586_v49 }
 0x577   :  { %v6536_v9 = vmul.f32 3.8918573e-05, %v14806_v41  ;;  %v7236_v2 = vmul.f32 %v7108_v1, %v16707_v20  ;;  %v2947_v34 = vmul.f32 %v8013_v11, %v14799_v24  ;;  %8014 = vrcp.f32 %v14819_v47  ;;  %v16710_v1 = vld [vmem:[#allocation36_spill] sm:$0xff] }
 0x578   :  { %16706 = vst [vmem:[#allocation184_spill] sm:$0xff] %v14843_v16  ;;  %v6526_v25 = vadd.f32 0.00028619796, %v6525_v44  ;;  %v14850_v37 = vmul.f32 0.70710677, %v14826_v48  ;;  %vm6032_vm3 = vweird.f32 %v14786_v17  ;;  %v6637_v7 = vand.u32 2147483648, %v14819_v47 }
 0x579   :  { %v2901_v30 = vadd.f32 0.112945676, %v2900_v54  ;;  %7379 = vmatpush.msrb.mxu2 %v7236_v2  ;;  %v2948_v49 = vsub.f32 1.0, %v2947_v34  ;;  %v2856_v26 = vmul.f32 3.8918573e-05, %v16708_v23  ;;  %v5978_v57 = vmul.f32 %v5977_v53, %v14797_v46 }
 0x57a   :  { %v2816_v15 = vmul.f32 3.8918573e-05, %v16709_v0  ;;  %v2955_v59 = vand.u32 2147483647, %v14799_v24  ;;  %v2957_v10 = vand.u32 2147483648, %v14799_v24  ;;  %vm6031_vm4 = vweird.f32 %v14716_v56 }
 0x57b   :  { %v2902_v3 = vmul.f32 %v2901_v30, %v16686_v19  ;;  %v2949_v28 = vmul.f32 %v8013_v11, %v2948_v49  ;;  %vm2952_vm6 = vweird.f32 %v8013_v11  ;;  %v2857_v12 = vadd.f32 0.001143296, %v2856_v26  ;;  %vm14897_vm13 = vmor %vm6031_vm4, %vm6032_vm3 }
 0x57c   :  { %v2817_v14 = vadd.f32 0.001143296, %v2816_v15  ;;  %v6537_v44 = vadd.f32 0.001143296, %v6536_v9  ;;  %v5965_v61 = vmul.f32 2.1237322e-06, %v14797_v46  ;;  %v14863_v54 = vadd.f32 %v16710_v1, %v774_v29 }
 0x57d   :  { %v2903_v20 = vadd.f32 0.4994258, %v2902_v3  ;;  %v2950_v53 = vadd.f32 %v8013_v11, %v2949_v28  ;;  %vm2951_vm11 = vweird.f32 %v14799_v24  ;;  %v2858_v2 = vmul.f32 %v2857_v12, %v16708_v23  ;;  %v14868_v30 = vpop.eup %8014  ;;  %v16713_v28 = vld [vmem:[#allocation73_spill] sm:$0xff] }
 0x57e   :  { %v2818_v34 = vmul.f32 %v2817_v14, %v16709_v0  ;;  %v5979_v49 = vadd.f32 0.014752088, %v5978_v57  ;;  %v3483_v26 = vmul.f32 %v14850_v37, %v14850_v37  ;;  %vm2953_vm7 = vmor %vm2951_vm11, %vm2952_vm6  ;;  %v2958_v9 = vor.u32 1.1754944e-38, %v2957_v10 }
 0x57f   :  { %v2904_v15 = vmul.f32 %v2903_v20, %v16686_v19  ;;  %vm14873_vm12 = vcmp.eq.f32.partialorder %v6035_v33, 8.507059e+37  ;;  %v2954_v3 = vsel %vm2953_vm7, %v8013_v11, %v2950_v53  ;;  %vm2956_vm14 = vcmp.eq.f32.partialorder %v2955_v59, 8.507059e+37  ;;  %v16714_v19 = vld [vmem:[#allocation129_spill] sm:$0xff] }
 0x580   :  { %v2859_v24 = vadd.f32 0.014752088, %v2858_v2  ;;  %v2776_v12 = vmul.f32 3.8918573e-05, %v16713_v28  ;;  %v6030_v14 = vadd.f32 %v14786_v17, %v6029_v4  ;;  %v14880_v57 = vmul.f32 0.70710677, %v14863_v54 }
 0x581   :  { %v2959_v1 = vsel %vm2956_vm14, %v2958_v9, %v2954_v3  ;;  %v14882_v5 = vadd.f32 1.0, %v2904_v15  ;;  %v6527_v10 = vmul.f32 %v6526_v25, %v14806_v41  ;;  %v2819_v36 = vadd.f32 0.014752088, %v2818_v34  ;;  %v16717_v4 = vld [vmem:[#allocation19_spill] sm:$0xff] }
 0x582   :  { %v2960_v33 = vmul.f32 %v2959_v1, %v16714_v19  ;;  %v2860_v20 = vmul.f32 %v2859_v24, %v16708_v23  ;;  %v6538_v11 = vmul.f32 %v6537_v44, %v14806_v41  ;;  %v5966_v59 = vadd.f32 0.00028619796, %v5965_v61 }
 0x583   :  { %v14888_v53 = vmin.f32 %v3483_v26, 16.0  ;;  %8016 = vrcp.f32 %v14882_v5  ;;  %v5980_v2 = vmul.f32 %v5979_v49, %v14797_v46  ;;  %v2777_v15 = vadd.f32 0.001143296, %v2776_v12 }
 0x584   :  { %v7683_v9 = vclamps-f32 %v2960_v33, 1.0  ;;  %v3453_v44 = vmul.f32 %v3452_v60, %v14672_v32  ;;  %v5883_v61 = vmul.f32 %v14880_v57, %v14880_v57  ;;  %v2861_v34 = vadd.f32 0.112945676, %v2860_v20 }
 0x585   :  { %v2820_v26 = vmul.f32 %v2819_v36, %v16709_v0  ;;  %v6034_v49 = vsel %vm14897_vm13, %v14786_v17, %v6030_v14  ;;  %v14908_v3 = vor.u32 1.1754944e-38, %v6637_v7  ;;  %v6528_v24 = vadd.f32 0.0036580483, %v6527_v10 }
 0x586   :  { %v7107_v56 = vadd.f32 1.0, %v7683_v9  ;;  %v6539_v12 = vadd.f32 0.014752088, %v6538_v11  ;;  %v5967_v1 = vmul.f32 %v5966_v59, %v14797_v46  ;;  %v3485_v19 = vmul.f32 2.1237322e-06, %v14888_v53 }
 0x587   :  { %v2862_v60 = vmul.f32 %v2861_v34, %v16708_v23  ;;  %v5981_v33 = vadd.f32 0.112945676, %v5980_v2  ;;  %v2821_v8 = vadd.f32 0.112945676, %v2820_v26  ;;  %v2778_v36 = vmul.f32 %v2777_v15, %v16713_v28 }
 0x588   :  { %v7235_v20 = vmul.f32 %v7107_v56, %v16717_v4  ;;  %v6039_v17 = vsel %vm14873_vm12, %v14840_v52, %v6034_v49  ;;  %v3454_v7 = vadd.f32 1.1283791, %v3453_v44  ;;  %v14918_v14 = vmin.f32 %v5883_v61, 16.0 }
 0x589   :  { %v8017_v16 = vpop.eup %8016  ;;  %v2863_v10 = vadd.f32 0.4994258, %v2862_v60  ;;  %v6627_v11 = vmul.f32 %v14868_v30, %v14819_v47  ;;  %v2822_v4 = vmul.f32 %v2821_v8, %v16709_v0  ;;  %v2779_v2 = vadd.f32 0.014752088, %v2778_v36 }
 0x58a   :  { %7380 = vmatpush.msrb.mxu2 %v7235_v20  ;;  %v2907_v59 = vmul.f32 %v8017_v16, %v14882_v5  ;;  %v6529_v9 = vmul.f32 %v6528_v24, %v14806_v41  ;;  %v6540_v15 = vmul.f32 %v6539_v12, %v14806_v41  ;;  %v5968_v25 = vadd.f32 0.0036580483, %v5967_v1 }
 0x58b   :  { %v2864_v52 = vmul.f32 %v2863_v10, %v16708_v23  ;;  %v5982_v29 = vmul.f32 %v5981_v33, %v14797_v46  ;;  %v3486_v44 = vadd.f32 0.00028619796, %v3485_v19  ;;  %v2823_v34 = vadd.f32 0.4994258, %v2822_v4  ;;  %v16718_v33 = vld [vmem:[#allocation81_spill] sm:$0xff] }
 0x58c   :  { %v2908_v61 = vsub.f32 1.0, %v2907_v59  ;;  %v5896_v26 = vmul.f32 3.8918573e-05, %v14918_v14  ;;  %v2915_v49 = vand.u32 2147483647, %v14882_v5  ;;  %v2917_v56 = vand.u32 2147483648, %v14882_v5 }
 0x58d   :  { %v14931_v8 = vadd.f32 1.0, %v2864_v52  ;;  %vm2912_vm15 = vweird.f32 %v8017_v16  ;;  %v2824_v24 = vmul.f32 %v2823_v34, %v16709_v0  ;;  %v2780_v12 = vmul.f32 %v2779_v2, %v16713_v28 }
 0x58e   :  { %v2909_v60 = vmul.f32 %v8017_v16, %v2908_v61  ;;  %v6530_v23 = vadd.f32 0.05243302, %v6529_v9  ;;  %v6541_v1 = vadd.f32 0.112945676, %v6540_v15  ;;  %v5969_v19 = vmul.f32 %v5968_v25, %v14797_v46 }
 0x58f   :  { %v2736_v20 = vmul.f32 3.8918573e-05, %v16718_v33  ;;  %v3487_v36 = vmul.f32 %v3486_v44, %v14888_v53  ;;  %vm2911_vm1 = vweird.f32 %v14882_v5  ;;  %8018 = vrcp.f32 %v14931_v8 }
 0x590   :  { %v2910_v10 = vadd.f32 %v8017_v16, %v2909_v60  ;;  %v6628_v59 = vsub.f32 1.0, %v6627_v11  ;;  %v5983_v4 = vadd.f32 0.4994258, %v5982_v29  ;;  %v5897_v52 = vadd.f32 0.001143296, %v5896_v26  ;;  %vm2913_vm2 = vmor %vm2911_vm1, %vm2912_vm15 }
 0x591   :  { %v2918_v0 = vor.u32 1.1754944e-38, %v2917_v56  ;;  %vm2916_vm3 = vcmp.eq.f32.partialorder %v2915_v49, 8.507059e+37  ;;  %v14940_v2 = vadd.f32 1.0, %v2824_v24  ;;  %v2781_v9 = vadd.f32 0.112945676, %v2780_v12 }
 0x592   :  { %v2914_v61 = vsel %vm2913_vm2, %v8017_v16, %v2910_v10  ;;  %v6531_v15 = vmul.f32 %v6530_v23, %v14806_v41  ;;  %v6542_v25 = vmul.f32 %v6541_v1, %v14806_v41  ;;  %v2737_v34 = vadd.f32 0.001143296, %v2736_v20 }
 0x593   :  { %v2919_v44 = vsel %vm2916_vm3, %v2918_v0, %v2914_v61  ;;  %v5970_v60 = vadd.f32 0.05243302, %v5969_v19  ;;  %v3488_v5 = vadd.f32 0.0036580483, %v3487_v36  ;;  %8020 = vrcp.f32 %v14940_v2 }
 0x594   :  { %v2920_v55 = vmul.f32 %v2919_v44, %v16719_v63  ;;  %v14947_v11 = vmul.f32 %v3454_v7, %v14642_v27  ;;  %v14950_v16 = vmul.f32 0.5, %v14720_v13  ;;  %v5984_v29 = vmul.f32 %v5983_v4, %v14797_v46  ;;  %v16720_v4 = vld [vmem:[#allocation116_spill] sm:$0xff] }
 0x595   :  { %v5898_v26 = vmul.f32 %v5897_v52, %v14918_v14  ;;  %v8019_v49 = vpop.eup %8018  ;;  %v14955_v56 = vmul.f32 %v6039_v17, %v14836_v38  ;;  %v6629_v24 = vmul.f32 %v14868_v30, %v6628_v59  ;;  %v2782_v63 = vmul.f32 %v2781_v9, %v16713_v28 }
 0x596   :  { %v7682_v12 = vclamps-f32 %v2920_v55, 1.0  ;;  %v6532_v23 = vadd.f32 0.18741608, %v6531_v15  ;;  %v6543_v1 = vadd.f32 0.4994258, %v6542_v25  ;;  %v2867_v27 = vmul.f32 %v8019_v49, %v14931_v8 }
 0x597   :  { %v2738_v13 = vmul.f32 %v2737_v34, %v16718_v33  ;;  %vm6631_vm4 = vweird.f32 %v14819_v47  ;;  %vm6632_vm6 = vweird.f32 %v14868_v30  ;;  %v5971_v7 = vmul.f32 %v5970_v60, %v14797_v46 }
 0x598   :  { %v3489_v38 = vmul.f32 %v3488_v5, %v14888_v53  ;;  %v7106_v17 = vadd.f32 1.0, %v7682_v12  ;;  %v14965_v19 = vadd.f32 1.0, %v5984_v29  ;;  %v14968_v55 = vmul.f32 0.5, %v14826_v48  ;;  %vm15000_vm15 = vmor %vm6631_vm4, %vm6632_vm6 }
 0x599   :  { %v5899_v20 = vadd.f32 0.014752088, %v5898_v26  ;;  %v2868_v36 = vsub.f32 1.0, %v2867_v27  ;;  %v8021_v10 = vpop.eup %8020  ;;  %v14971_v59 = vadd.f32 %v14868_v30, %v6629_v24  ;;  %v2875_v0 = vand.u32 2147483647, %v14931_v8 }
 0x59a   :  { %v7234_v52 = vmul.f32 %v7106_v17, %v16720_v4  ;;  %v2783_v61 = vadd.f32 0.4994258, %v2782_v63  ;;  %v6533_v9 = vmul.f32 %v6532_v23, %v14806_v41  ;;  %v6544_v15 = vmul.f32 %v6543_v1, %v14806_v41  ;;  %v16721_v41 = vld [vmem:[#allocation14_spill] sm:$0xff] }
 0x59b   :  { %v2877_v25 = vand.u32 2147483648, %v14931_v8  ;;  %v2739_v44 = vadd.f32 0.014752088, %v2738_v13  ;;  %v5972_v48 = vadd.f32 0.18741608, %v5971_v7  ;;  %v2869_v60 = vmul.f32 %v8019_v49, %v2868_v36 }
 0x59c   :  { %v3490_v34 = vadd.f32 0.05243302, %v3489_v38  ;;  %7381 = vmatpush.msrb.mxu2 %v7234_v52  ;;  %vm2872_vm11 = vweird.f32 %v8019_v49  ;;  %8022 = vrcp.f32 %v14965_v19  ;;  %v5900_v5 = vmul.f32 %v5899_v20, %v14918_v14  ;;  %v16729_v20 = vld [vmem:[#allocation27_spill] sm:$0xff] }
 0x59d   :  { %v2827_v29 = vmul.f32 %v8021_v10, %v14940_v2  ;;  %v2784_v26 = vmul.f32 %v2783_v61, %v16713_v28  ;;  %v2870_v24 = vadd.f32 %v8019_v49, %v2869_v60  ;;  %vm2871_vm7 = vweird.f32 %v14931_v8 }
 0x59e   :  { %vm2876_vm12 = vcmp.eq.f32.partialorder %v2875_v0, 8.507059e+37  ;;  %v2696_v12 = vmul.f32 3.8918573e-05, %v16721_v41  ;;  %v16722_v63 = vand.u32 2147483647, %v14819_v47  ;;  %vm2873_vm13 = vmor %vm2871_vm7, %vm2872_vm11  ;;  %v2878_v1 = vor.u32 1.1754944e-38, %v2877_v25 }
 0x59f   :  { %v2828_v27 = vsub.f32 1.0, %v2827_v29  ;;  %v14990_v13 = vadd.f32 1.0, %v2784_v26  ;;  %v2740_v7 = vmul.f32 %v2739_v44, %v16718_v33  ;;  %v2874_v28 = vsel %vm2873_vm13, %v8019_v49, %v2870_v24  ;;  %v16727_v47 = vld [vmem:[#allocation107_spill] sm:$0xff] }
 0x5a0   :  { %vm14986_vm14 = vcmp.eq.f32.partialorder %v16722_v63, 8.507059e+37  ;;  %v2835_v38 = vand.u32 2147483647, %v14940_v2  ;;  %v2837_v8 = vand.u32 2147483648, %v14940_v2  ;;  %v7765_v17 = vclamps-f32 %v14330_v42, 1.0 }
 0x5a1   :  { %v2879_v36 = vsel %vm2876_vm12, %v2878_v1, %v2874_v28  ;;  %v2829_v4 = vmul.f32 %v8021_v10, %v2828_v27  ;;  %vm2832_vm1 = vweird.f32 %v8021_v10  ;;  %8024 = vrcp.f32 %v14990_v13 }
 0x5a2   :  { %v6634_v49 = vsel %vm15000_vm15, %v14868_v30, %v14971_v59  ;;  %v6534_v52 = vadd.f32 1.1283791, %v6533_v9  ;;  %v15009_v42 = vadd.f32 1.0, %v6544_v15  ;;  %v5901_v0 = vadd.f32 0.112945676, %v5900_v5  ;;  %v15011_v61 = vpop.eup %8022 }
 0x5a3   :  { %v2880_v25 = vmul.f32 %v2879_v36, %v16727_v47  ;;  %v2830_v44 = vadd.f32 %v8021_v10, %v2829_v4  ;;  %vm2831_vm2 = vweird.f32 %v14940_v2  ;;  %v2741_v60 = vadd.f32 0.112945676, %v2740_v7  ;;  %v15021_v7 = vpop.permute.xlu0 %848 }
 0x5a4   :  { %v5973_v29 = vmul.f32 %v5972_v48, %v14797_v46  ;;  %v3491_v26 = vmul.f32 %v3490_v34, %v14888_v53  ;;  %vm2833_vm3 = vmor %vm2831_vm2, %vm2832_vm1  ;;  %v2838_v24 = vor.u32 1.1754944e-38, %v2837_v8  ;;  %v7189_v63 = vadd.f32 1.0, %v7765_v17  ;;  %v16728_v48 = vld [vmem:[#allocation83_spill] sm:$0xff] }
 0x5a5   :  { %v7681_v30 = vclamps-f32 %v2880_v25, 1.0  ;;  %v2834_v59 = vsel %vm2833_vm3, %v8021_v10, %v2830_v44  ;;  %vm2836_vm4 = vcmp.eq.f32.partialorder %v2835_v38, 8.507059e+37  ;;  %v2697_v9 = vadd.f32 0.001143296, %v2696_v12  ;;  %v16747_v8 = vld [vmem:[#allocation7_spill] sm:$0xff] }
 0x5a6   :  { %v5987_v15 = vmul.f32 %v15011_v61, %v14965_v19  ;;  %v5885_v5 = vmul.f32 2.1237322e-06, %v14918_v14  ;;  %v5902_v1 = vmul.f32 %v5901_v0, %v14918_v14  ;;  %v2839_v2 = vsel %vm2836_vm4, %v2838_v24, %v2834_v59  ;;  %v16731_v59 = vld [vmem:[#allocation54_spill] sm:$0xff] }
 0x5a7   :  { %v8025_v27 = vpop.eup %8024  ;;  %v7105_v46 = vadd.f32 1.0, %v7681_v30  ;;  %v2840_v34 = vmul.f32 %v2839_v2, %v16728_v48  ;;  %v7317_v28 = vmul.f32 %v7189_v63, %v14108_v45  ;;  %v2742_v10 = vmul.f32 %v2741_v60, %v16718_v33  ;;  %v16730_v63 = vld [vmem:[#allocation191_spill] sm:$0xff] }
 0x5a8   :  { %v15029_v12 = vsel %vm14986_vm14, %v14908_v3, %v6634_v49  ;;  %v15032_v38 = vmul.f32 %v6534_v52, %v14767_v50  ;;  %v2787_v17 = vmul.f32 %v8025_v27, %v14990_v13  ;;  %v2698_v45 = vmul.f32 %v2697_v9, %v16721_v41 }
 0x5a9   :  { %v7233_v36 = vmul.f32 %v7105_v46, %v16729_v20  ;;  %v7680_v4 = vclamps-f32 %v2840_v34, 1.0  ;;  %7478 = vmatpush.msrb.mxu1 %v7317_v28  ;;  %v2743_v0 = vadd.f32 0.4994258, %v2742_v10  ;;  %8026 = vrcp.f32 %v15009_v42  ;;  %v16733_v28 = vld [vmem:[#allocation60_spill] sm:$0xff] }
 0x5aa   :  { %v5974_v3 = vadd.f32 1.1283791, %v5973_v29  ;;  %v15040_v49 = vadd.f32 0.18741608, %v3491_v26  ;;  %v5988_v50 = vsub.f32 1.0, %v5987_v15  ;;  %v2788_v44 = vsub.f32 1.0, %v2787_v17 }
 0x5ab   :  { %v5886_v52 = vadd.f32 0.00028619796, %v5885_v5  ;;  %v5903_v47 = vadd.f32 0.4994258, %v5902_v1  ;;  %7382 = vmatpush.msrb.mxu2 %v7233_v36  ;;  %v7104_v25 = vadd.f32 1.0, %v7680_v4  ;;  %v2744_v24 = vmul.f32 %v2743_v0, %v16718_v33  ;;  %v16732_v5 = vld [vmem:[#allocation6_spill] sm:$0xff]  ;;  %v764_v36 = vpop.permute.xlu1 %763 }
 0x5ac   :  { %v2795_v60 = vand.u32 2147483647, %v14990_v13  ;;  %v7764_v30 = vclamps-f32 %v16730_v63, 1.0  ;;  %vm2792_vm6 = vweird.f32 %v8025_v27  ;;  %v2797_v2 = vand.u32 2147483648, %v14990_v13 }
 0x5ad   :  { %v7232_v9 = vmul.f32 %v7104_v25, %v16731_v59  ;;  %v2699_v29 = vadd.f32 0.014752088, %v2698_v45  ;;  %v2789_v26 = vmul.f32 %v8025_v27, %v2788_v44  ;;  %v15047_v46 = vadd.f32 1.0, %v2744_v24  ;;  %v769_v45 = vpop.permute.xlu0 %768 }
 0x5ae   :  { %v7188_v15 = vadd.f32 1.0, %v7764_v30  ;;  %v2656_v1 = vmul.f32 3.8918573e-05, %v16732_v5  ;;  %v15051_v48 = vmul.f32 %v5974_v3, %v14738_v35  ;;  %v5904_v34 = vmul.f32 %v5903_v47, %v14918_v14  ;;  %v16734_v47 = vld [vmem:[#allocation185_spill] sm:$0xff] }
 0x5af   :  { %7383 = vmatpush.msrb.mxu2 %v7232_v9  ;;  %v2700_v33 = vmul.f32 %v2699_v29, %v16721_v41  ;;  %v2616_v10 = vmul.f32 3.8918573e-05, %v16733_v28  ;;  %v15056_v17 = vpop.eup %8026  ;;  %v5995_v20 = vand.u32 2147483647, %v14965_v19  ;;  %v2790_v4 = vadd.f32 %v8025_v27, %v2789_v26  ;;  %v16736_v9 = vld [vmem:[#allocation34_spill] sm:$0xff] }
 0x5b0   :  { %vm2791_vm11 = vweird.f32 %v14990_v13  ;;  %8028 = vrcp.f32 %v15047_v46  ;;  %v5989_v35 = vmul.f32 %v15011_v61, %v5988_v50  ;;  %v5887_v0 = vmul.f32 %v5886_v52, %v14918_v14  ;;  %v16735_v13 = vld [vmem:[#allocation31_spill] sm:$0xff] }
 0x5b1   :  { %vm2793_vm7 = vmor %vm2791_vm11, %vm2792_vm6  ;;  %v2798_v3 = vor.u32 1.1754944e-38, %v2797_v2  ;;  %v7316_v25 = vmul.f32 %v7188_v15, %v16734_v47  ;;  %vm5991_vm12 = vweird.f32 %v14965_v19  ;;  %vm2796_vm14 = vcmp.eq.f32.partialorder %v2795_v60, 8.507059e+37  ;;  %v16737_v2 = vld [vmem:[#allocation64_spill] sm:$0xff] }
 0x5b2   :  { %v2794_v44 = vsel %vm2793_vm7, %v8025_v27, %v2790_v4  ;;  %v2701_v24 = vadd.f32 0.112945676, %v2700_v33  ;;  %v2657_v63 = vadd.f32 0.001143296, %v2656_v1  ;;  %v15066_v30 = vadd.f32 1.0, %v5904_v34 }
 0x5b3   :  { %v15069_v59 = vadd.f32 %v16735_v13, %v764_v36  ;;  %v2799_v50 = vsel %vm2796_vm14, %v2798_v3, %v2794_v44  ;;  %7479 = vmatpush.msrb.mxu1 %v7316_v25  ;;  %v2617_v52 = vadd.f32 0.001143296, %v2616_v10  ;;  %v15072_v29 = vadd.f32 %v16736_v9, %v769_v45 }
 0x5b4   :  { %v2800_v26 = vmul.f32 %v2799_v50, %v16737_v2  ;;  %v2702_v15 = vmul.f32 %v2701_v24, %v16721_v41  ;;  %v2658_v27 = vmul.f32 %v2657_v63, %v16732_v5  ;;  %vm5992_vm13 = vweird.f32 %v15011_v61  ;;  %v16740_v50 = vld [vmem:[#allocation149_spill] sm:$0xff] }
 0x5b5   :  { %v5997_v60 = vand.u32 2147483648, %v14965_v19  ;;  %v5888_v1 = vadd.f32 0.0036580483, %v5887_v0  ;;  %v2618_v34 = vmul.f32 %v2617_v52, %v16733_v28  ;;  %v5990_v36 = vadd.f32 %v15011_v61, %v5989_v35  ;;  %vm15109_vm1 = vmor %vm5991_vm12, %vm5992_vm13 }
 0x5b6   :  { %v8029_v33 = vpop.eup %8028  ;;  %v7679_v10 = vclamps-f32 %v2800_v26, 1.0  ;;  %v2703_v4 = vadd.f32 0.4994258, %v2702_v15  ;;  %v2659_v45 = vadd.f32 0.014752088, %v2658_v27  ;;  %8030 = vrcp.f32 %v15066_v30  ;;  %v16742_v26 = vld [vmem:[#allocation62_spill] sm:$0xff] }
 0x5b7   :  { %v15083_v3 = vmul.f32 0.70710677, %v15069_v59  ;;  %v2747_v47 = vmul.f32 %v8029_v33, %v15047_v46  ;;  %v2619_v25 = vadd.f32 0.014752088, %v2618_v34  ;;  %v15087_v44 = vmul.f32 0.70710677, %v15072_v29 }
 0x5b8   :  { %v7103_v0 = vadd.f32 1.0, %v7679_v10  ;;  %v2704_v24 = vmul.f32 %v2703_v4, %v16721_v41  ;;  %v2660_v63 = vmul.f32 %v2659_v45, %v16732_v5  ;;  %vm15091_vm15 = vcmp.eq.f32.partialorder %v5995_v20, 8.507059e+37 }
 0x5b9   :  { %v5889_v13 = vmul.f32 %v5888_v1, %v14918_v14  ;;  %v15098_v52 = vadd.f32 %v16740_v50, %v15021_v7  ;;  %v2748_v9 = vsub.f32 1.0, %v2747_v47  ;;  %v2620_v2 = vmul.f32 %v2619_v25, %v16733_v28  ;;  %v1440_v7 = vpop.f32.mrf.mxu0 }
 0x5ba   :  { %v7231_v15 = vmul.f32 %v7103_v0, %v16742_v26  ;;  %v2757_v27 = vand.u32 2147483648, %v15047_v46  ;;  %v15103_v41 = vadd.f32 1.0, %v2704_v24  ;;  %v2661_v34 = vadd.f32 0.112945676, %v2660_v63 }
 0x5bb   :  { %16741 = vst [vmem:[#allocation128_spill] sm:$0xff] %v15098_v52  ;;  %v2749_v1 = vmul.f32 %v8029_v33, %v2748_v9  ;;  %vm2752_vm2 = vweird.f32 %v8029_v33  ;;  %v2755_v10 = vand.u32 2147483647, %v15047_v46  ;;  %v2621_v4 = vadd.f32 0.112945676, %v2620_v2 }
 0x5bc   :  { %v5994_v45 = vsel %vm15109_vm1, %v15011_v61, %v5990_v36  ;;  %v5803_v47 = vmul.f32 %v15083_v3, %v15083_v3  ;;  %v5843_v19 = vmul.f32 %v15087_v44, %v15087_v44  ;;  %7384 = vmatpush.msrb.mxu2 %v7231_v15  ;;  %8032 = vrcp.f32 %v15103_v41  ;;  %v15122_v25 = vpop.eup %8030  ;;  %v16746_v36 = vld [vmem:[#allocation37_spill] sm:$0xff] }
 0x5bd   :  { %v2750_v0 = vadd.f32 %v8029_v33, %v2749_v1  ;;  %vm2751_vm3 = vweird.f32 %v15047_v46  ;;  %v2662_v24 = vmul.f32 %v2661_v34, %v16732_v5  ;;  %v2622_v63 = vmul.f32 %v2621_v4, %v16733_v28 }
 0x5be   :  { %v5890_v50 = vadd.f32 0.05243302, %v5889_v13  ;;  %v15128_v61 = vmul.f32 0.70710677, %v15098_v52  ;;  %v15131_v9 = vadd.f32 %v1440_v7, %v16746_v36  ;;  %vm2753_vm4 = vmor %vm2751_vm3, %vm2752_vm2  ;;  %v2758_v2 = vor.u32 1.1754944e-38, %v2757_v27  ;;  %v16751_v52 = vld [vmem:[#allocation202_spill] sm:$0xff] }
 0x5bf   :  { %v2754_v26 = vsel %vm2753_vm4, %v8029_v33, %v2750_v0  ;;  %vm2756_vm6 = vcmp.eq.f32.partialorder %v2755_v10, 8.507059e+37  ;;  %v2663_v15 = vadd.f32 0.4994258, %v2662_v24  ;;  %v2623_v20 = vadd.f32 0.4994258, %v2622_v63 }
 0x5c0   :  { %16745 = vst [vmem:[#allocation24_spill] sm:$0xff] %v15128_v61  ;;  %v5998_v1 = vor.u32 1.1754944e-38, %v5997_v60  ;;  %v5907_v46 = vmul.f32 %v15122_v25, %v15066_v30  ;;  %v15136_v34 = vmin.f32 %v5803_v47, 16.0  ;;  %v2759_v13 = vsel %vm2756_vm6, %v2758_v2, %v2754_v26 }
 0x5c1   :  { %v15138_v4 = vmin.f32 %v5843_v19, 16.0  ;;  %v2760_v23 = vmul.f32 %v2759_v13, %v16747_v8  ;;  %v2664_v7 = vmul.f32 %v2663_v15, %v16732_v5  ;;  %v2624_v36 = vmul.f32 %v2623_v20, %v16733_v28  ;;  %v16748_v15 = vld [vmem:[#allocation79_spill] sm:$0xff] }
 0x5c2   :  { %v8033_v27 = vpop.eup %8032  ;;  %v5999_v33 = vsel %vm15091_vm15, %v5998_v1, %v5994_v45  ;;  %v5891_v60 = vmul.f32 %v5890_v50, %v14918_v14  ;;  %v6483_v10 = vmul.f32 %v15128_v61, %v15128_v61  ;;  %v7763_v47 = vclamps-f32 %v14481_v18, 1.0 }
 0x5c3   :  { %v15150_v19 = vmul.f32 0.70710677, %v15131_v9  ;;  %v7678_v0 = vclamps-f32 %v2760_v23, 1.0  ;;  %v2707_v8 = vmul.f32 %v8033_v27, %v15103_v41  ;;  %v15153_v5 = vadd.f32 1.0, %v2664_v7 }
 0x5c4   :  { %v5908_v28 = vsub.f32 1.0, %v5907_v46  ;;  %v5816_v24 = vmul.f32 3.8918573e-05, %v15136_v34  ;;  %v15156_v35 = vadd.f32 1.0, %v2624_v36  ;;  %v7187_v45 = vadd.f32 1.0, %v7763_v47 }
 0x5c5   :  { %v5856_v63 = vmul.f32 3.8918573e-05, %v15138_v4  ;;  %v7102_v50 = vadd.f32 1.0, %v7678_v0  ;;  %v2708_v2 = vsub.f32 1.0, %v2707_v8  ;;  %8034 = vrcp.f32 %v15153_v5 }
 0x5c6   :  { %v15161_v18 = vmul.f32 %v5999_v33, %v15051_v48  ;;  %v5892_v23 = vadd.f32 0.18741608, %v5891_v60  ;;  %v2717_v26 = vand.u32 2147483648, %v15103_v41  ;;  %8036 = vrcp.f32 %v15156_v35 }
 0x5c7   :  { %v7230_v20 = vmul.f32 %v7102_v50, %v16748_v15  ;;  %v2709_v1 = vmul.f32 %v8033_v27, %v2708_v2  ;;  %vm2712_vm11 = vweird.f32 %v8033_v27  ;;  %v2715_v46 = vand.u32 2147483647, %v15103_v41 }
 0x5c8   :  { %v5909_v13 = vmul.f32 %v15122_v25, %v5908_v28  ;;  %v15168_v7 = vmin.f32 %v6483_v10, 16.0  ;;  %v3523_v36 = vmul.f32 %v15150_v19, %v15150_v19  ;;  %v7315_v48 = vmul.f32 %v7187_v45, %v14209_v43 }
 0x5c9   :  { %v5817_v33 = vadd.f32 0.001143296, %v5816_v24  ;;  %v5857_v60 = vadd.f32 0.001143296, %v5856_v63  ;;  %7385 = vmatpush.msrb.mxu2 %v7230_v20  ;;  %v2710_v47 = vadd.f32 %v8033_v27, %v2709_v1  ;;  %vm2711_vm7 = vweird.f32 %v15103_v41 }
 0x5ca   :  { %v5893_v0 = vmul.f32 %v5892_v23, %v14918_v14  ;;  %vm2713_vm12 = vmor %vm2711_vm7, %vm2712_vm11  ;;  %v2718_v50 = vor.u32 1.1754944e-38, %v2717_v26  ;;  %7480 = vmatpush.msrb.mxu1 %v7315_v48  ;;  %v7762_v10 = vclamps-f32 %v14833_v22, 1.0  ;;  %vm5912_vm14 = vweird.f32 %v15122_v25  ;;  %v16749_v26 = vld [vmem:[#allocation13_spill] sm:$0xff] }
 0x5cb   :  { %v8035_v28 = vpop.eup %8034  ;;  %v5917_v43 = vand.u32 2147483648, %v15066_v30  ;;  %v2714_v24 = vsel %vm2713_vm12, %v8033_v27, %v2710_v47  ;;  %vm2716_vm13 = vcmp.eq.f32.partialorder %v2715_v46, 8.507059e+37  ;;  %v15180_v63 = vadd.f32 %v15122_v25, %v5909_v13 }
 0x5cc   :  { %v8037_v45 = vpop.eup %8036  ;;  %v15182_v41 = vmin.f32 %v3523_v36, 16.0  ;;  %v2719_v14 = vsel %vm2716_vm13, %v2718_v50, %v2714_v24  ;;  %v2667_v2 = vmul.f32 %v8035_v28, %v15153_v5  ;;  %vm5911_vm15 = vweird.f32 %v15066_v30 }
 0x5cd   :  { %v5818_v22 = vmul.f32 %v5817_v33, %v15136_v34  ;;  %v5858_v23 = vmul.f32 %v5857_v60, %v15138_v4  ;;  %v2720_v15 = vmul.f32 %v2719_v14, %v16749_v26  ;;  %v2627_v27 = vmul.f32 %v8037_v45, %v15156_v35  ;;  %vm15205_vm13 = vmor %vm5911_vm15, %vm5912_vm14 }
 0x5ce   :  { %v2668_v20 = vsub.f32 1.0, %v2667_v2  ;;  %v2675_v1 = vand.u32 2147483647, %v15153_v5  ;;  %v2677_v46 = vand.u32 2147483648, %v15153_v5  ;;  %v7186_v13 = vadd.f32 1.0, %v7762_v10 }
 0x5cf   :  { %v7677_v36 = vclamps-f32 %v2720_v15, 1.0  ;;  %v2628_v48 = vsub.f32 1.0, %v2627_v27  ;;  %v2635_v47 = vand.u32 2147483647, %v15156_v35  ;;  %v7761_v50 = vclamps-f32 %v13980_v31, 1.0  ;;  %v16750_v15 = vld [vmem:[#allocation100_spill] sm:$0xff] }
 0x5d0   :  { %v2669_v24 = vmul.f32 %v8035_v28, %v2668_v20  ;;  %vm2672_vm1 = vweird.f32 %v8035_v28  ;;  %v2637_v33 = vand.u32 2147483648, %v15156_v35  ;;  %v7314_v60 = vmul.f32 %v7186_v13, %v14470_v51 }
 0x5d1   :  { %v7101_v14 = vadd.f32 1.0, %v7677_v36  ;;  %v2629_v26 = vmul.f32 %v8037_v45, %v2628_v48  ;;  %vm2632_vm2 = vweird.f32 %v8037_v45  ;;  %v7185_v2 = vadd.f32 1.0, %v7761_v50 }
 0x5d2   :  { %v2670_v8 = vadd.f32 %v8035_v28, %v2669_v24  ;;  %vm2671_vm3 = vweird.f32 %v15153_v5  ;;  %vm2631_vm4 = vweird.f32 %v15156_v35  ;;  %7481 = vmatpush.msrb.mxu1 %v7314_v60  ;;  %v7760_v10 = vclamps-f32 %v14955_v56, 1.0 }
 0x5d3   :  { %v7229_v31 = vmul.f32 %v7101_v14, %v16750_v15  ;;  %vm2673_vm6 = vmor %vm2671_vm3, %vm2672_vm1  ;;  %v2678_v27 = vor.u32 1.1754944e-38, %v2677_v46  ;;  %v2630_v20 = vadd.f32 %v8037_v45, %v2629_v26  ;;  %v7313_v61 = vmul.f32 %v7185_v2, %v16751_v52  ;;  %v16754_v52 = vld [vmem:[#allocation104_spill] sm:$0xff] }
 0x5d4   :  { %v2674_v51 = vsel %vm2673_vm6, %v8035_v28, %v2670_v8  ;;  %vm2676_vm11 = vcmp.eq.f32.partialorder %v2675_v1, 8.507059e+37  ;;  %vm2633_vm7 = vmor %vm2631_vm4, %vm2632_vm2  ;;  %v2638_v13 = vor.u32 1.1754944e-38, %v2637_v33  ;;  %v7184_v36 = vadd.f32 1.0, %v7760_v10 }
 0x5d5   :  { %v5859_v48 = vadd.f32 0.014752088, %v5858_v23  ;;  %7386 = vmatpush.msrb.mxu2 %v7229_v31  ;;  %v2679_v5 = vsel %vm2676_vm11, %v2678_v27, %v2674_v51  ;;  %v2634_v50 = vsel %vm2633_vm7, %v8037_v45, %v2630_v20  ;;  %vm2636_vm12 = vcmp.eq.f32.partialorder %v2635_v47, 8.507059e+37  ;;  %7482 = vmatpush.msrb.mxu1 %v7313_v61  ;;  %v16755_v23 = vld [vmem:[#allocation94_spill] sm:$0xff]  ;;  %v16758_v20 = vld [vmem:[#allocation96_spill] sm:$0xff] }
 0x5d6   :  { %v5894_v35 = vadd.f32 1.1283791, %v5893_v0  ;;  %v2680_v8 = vmul.f32 %v2679_v5, %v16754_v52  ;;  %v2639_v28 = vsel %vm2636_vm12, %v2638_v13, %v2634_v50  ;;  %v7312_v1 = vmul.f32 %v7184_v36, %v14566_v58  ;;  %v16759_v51 = vld [vmem:[#allocation90_spill] sm:$0xff] }
 0x5d7   :  { %v5914_v45 = vsel %vm15205_vm13, %v15122_v25, %v15180_v63  ;;  %v3525_v61 = vmul.f32 2.1237322e-06, %v15182_v41  ;;  %v5819_v0 = vadd.f32 0.014752088, %v5818_v22  ;;  %v2640_v46 = vmul.f32 %v2639_v28, %v16755_v23  ;;  %v16757_v25 = vld [vmem:[#allocation136_spill] sm:$0xff] }
 0x5d8   :  { %v3493_v47 = vmul.f32 %v15040_v49, %v14888_v53  ;;  %v5918_v24 = vor.u32 1.1754944e-38, %v5917_v43  ;;  %v6496_v33 = vmul.f32 3.8918573e-05, %v15168_v7  ;;  %v7676_v60 = vclamps-f32 %v2680_v8, 1.0  ;;  %7483 = vmatpush.msrb.mxu1 %v7312_v1  ;;  %v16760_v8 = vld [vmem:[#allocation10_spill] sm:$0xff] }
 0x5d9   :  { %v16756_v58 = vand.u32 2147483647, %v15066_v30  ;;  %v5860_v14 = vmul.f32 %v5859_v48, %v15138_v4  ;;  %v7675_v26 = vclamps-f32 %v2640_v46, 1.0  ;;  %v7737_v63 = vclamps-f32 %v16757_v25, 1.0 }
 0x5da   :  { %v6485_v22 = vmul.f32 2.1237322e-06, %v15168_v7  ;;  %v7100_v10 = vadd.f32 1.0, %v7676_v60  ;;  %v7759_v15 = vclamps-f32 %v15161_v18, 1.0  ;;  %v5895_v49 = vmul.f32 %v5894_v35, %v14880_v57  ;;  %v7340_v57 = vld [vmem:[%s15815_s3 + $0x8] sm:$0xff] }
 0x5db   :  { %vm5916_vm14 = vcmp.eq.f32.partialorder %v16756_v58, 8.507059e+37  ;;  %v3526_v43 = vadd.f32 0.00028619796, %v3525_v61  ;;  %v5820_v31 = vmul.f32 %v5819_v0, %v15136_v34  ;;  %v7099_v27 = vadd.f32 1.0, %v7675_v26  ;;  %v16761_v35 = vld [vmem:[#allocation45_spill] sm:$0xff] }
 0x5dc   :  { %v5919_v2 = vsel %vm5916_vm14, %v5918_v24, %v5914_v45  ;;  %v7228_v30 = vmul.f32 %v7100_v10, %v16758_v20  ;;  %v7736_v13 = vclamps-f32 %v16759_v51, 1.0  ;;  %v7183_v36 = vadd.f32 1.0, %v7759_v15  ;;  %v16765_v15 = vld [vmem:[#allocation39_spill] sm:$0xff]  ;;  %v16766_v20 = vld [vmem:[#allocation70_spill] sm:$0xff] }
 0x5dd   :  { %v7758_v48 = vclamps-f32 %v14448_v40, 1.0  ;;  %v5920_v5 = vmul.f32 %v5919_v2, %v5895_v49  ;;  %v6497_v50 = vadd.f32 0.001143296, %v6496_v33  ;;  %v5861_v56 = vadd.f32 0.112945676, %v5860_v14  ;;  %v16762_v33 = vld [vmem:[#allocation123_spill] sm:$0xff] }
 0x5de   :  { %v7161_v52 = vadd.f32 1.0, %v7737_v63  ;;  %7387 = vmatpush.msrb.mxu2 %v7228_v30  ;;  %v7227_v18 = vmul.f32 %v7099_v27, %v16760_v8  ;;  %v7735_v28 = vclamps-f32 %v16761_v35, 1.0  ;;  %v7311_v1 = vmul.f32 %v7183_v36, %v14950_v16  ;;  %v16763_v63 = vld [vmem:[#allocation126_spill] sm:$0xff]  ;;  %v16764_v2 = vld [vmem:[#allocation124_spill] sm:$0xff]  ;;  %v16768_v8 = vld [vmem:[#allocation113_spill] sm:$0xff] }
 0x5df   :  { %v7182_v45 = vadd.f32 1.0, %v7758_v48  ;;  %v6547_v61 = vmul.f32 %v15056_v17, %v15009_v42  ;;  %v15239_v40 = vadd.f32 1.1283791, %v3493_v47  ;;  %v3527_v0 = vmul.f32 %v3526_v43, %v15182_v41  ;;  %v16769_v35 = vld [vmem:[#allocation111_spill] sm:$0xff] }
 0x5e0   :  { %v5821_v23 = vadd.f32 0.112945676, %v5820_v31  ;;  %v1805_v46 = vmul.f32 0.5, %v14863_v54  ;;  %7388 = vmatpush.msrb.mxu2 %v7227_v18  ;;  %v7160_v24 = vadd.f32 1.0, %v7736_v13  ;;  %v7734_v60 = vclamps-f32 %v16762_v33, 1.0  ;;  %7484 = vmatpush.msrb.mxu1 %v7311_v1  ;;  %v16767_v13 = vld [vmem:[#allocation110_spill] sm:$0xff] }
 0x5e1   :  { %v7310_v58 = vmul.f32 %v7182_v45, %v14119_v21  ;;  %v6486_v14 = vadd.f32 0.00028619796, %v6485_v22  ;;  %v5862_v16 = vmul.f32 %v5861_v56, %v15138_v4  ;;  %7389 = vmatmul.f32.vlgmr.msrb.gmra.mxu2 %v7340_v57  ;;  %v7757_v26 = vclamps-f32 %v5920_v5, 1.0  ;;  %v16770_v33 = vld [vmem:[#allocation114_spill] sm:$0xff] }
 0x5e2   :  { %v3536_v47 = vmul.f32 3.8918573e-05, %v15182_v41  ;;  %v6498_v25 = vmul.f32 %v6497_v50, %v15168_v7  ;;  %7433 = vmatpush.msra.mxu2 %v16763_v63  ;;  %v7289_v54 = vmul.f32 %v7161_v52, %v16764_v2  ;;  %v7159_v10 = vadd.f32 1.0, %v7735_v28  ;;  %v16772_v2 = vld [vmem:[#allocation103_spill] sm:$0xff] }
 0x5e3   :  { %v7733_v49 = vclamps-f32 %v16765_v15, 1.0  ;;  %7485 = vmatpush.msrb.mxu1 %v7310_v58  ;;  %v3528_v43 = vadd.f32 0.0036580483, %v3527_v0  ;;  %v5822_v21 = vmul.f32 %v5821_v23, %v15136_v34  ;;  %v7181_v22 = vadd.f32 1.0, %v7757_v26  ;;  %v16771_v58 = vld [vmem:[#allocation76_spill] sm:$0xff]  ;;  %v16773_v15 = vld [vmem:[#allocation51_spill] sm:$0xff] }
 0x5e4   :  { %v3537_v31 = vadd.f32 0.001143296, %v3536_v47  ;;  %v5805_v27 = vmul.f32 2.1237322e-06, %v15136_v34  ;;  %7434 = vmatpush.msra.mxu2 %v7289_v54  ;;  %v7288_v30 = vmul.f32 %v7160_v24, %v16766_v20  ;;  %v7158_v51 = vadd.f32 1.0, %v7734_v60 }
 0x5e5   :  { %v7732_v36 = vclamps-f32 %v16767_v13, 1.0  ;;  %v5845_v48 = vmul.f32 2.1237322e-06, %v15138_v4  ;;  %v5863_v5 = vadd.f32 0.4994258, %v5862_v16  ;;  %v7309_v50 = vmul.f32 %v7181_v22, %v1805_v46 }
 0x5e6   :  { %v3538_v56 = vmul.f32 %v3537_v31, %v15182_v41  ;;  %v6548_v52 = vsub.f32 1.0, %v6547_v61  ;;  %7435 = vmatpush.msra.mxu2 %v7288_v30  ;;  %v7287_v18 = vmul.f32 %v7159_v10, %v16768_v8  ;;  %v7157_v57 = vadd.f32 1.0, %v7733_v49 }
 0x5e7   :  { %v7731_v28 = vclamps-f32 %v16769_v35, 1.0  ;;  %v6499_v1 = vadd.f32 0.014752088, %v6498_v25  ;;  %v3529_v45 = vmul.f32 %v3528_v43, %v15182_v41  ;;  %v5823_v0 = vadd.f32 0.4994258, %v5822_v21  ;;  %7486 = vmatpush.msrb.mxu1 %v7309_v50 }
 0x5e8   :  { %v3539_v23 = vadd.f32 0.014752088, %v3538_v56  ;;  %v6487_v24 = vmul.f32 %v6486_v14, %v15168_v7  ;;  %7436 = vmatpush.msra.mxu2 %v7287_v18  ;;  %v7286_v46 = vmul.f32 %v7158_v51, %v16770_v33  ;;  %v7156_v60 = vadd.f32 1.0, %v7732_v36  ;;  %v16775_v51 = vld [vmem:[#allocation52_spill] sm:$0xff]  ;;  %v16776_v56 = vld [vmem:[#allocation82_spill] sm:$0xff] }
 0x5e9   :  { %v7730_v61 = vclamps-f32 %v16771_v58, 1.0  ;;  %v5806_v16 = vadd.f32 0.00028619796, %v5805_v27  ;;  %v5846_v26 = vadd.f32 0.00028619796, %v5845_v48  ;;  %v5864_v47 = vmul.f32 %v5863_v5, %v15138_v4  ;;  %v16774_v27 = vld [vmem:[#allocation49_spill] sm:$0xff] }
 0x5ea   :  { %v3540_v63 = vmul.f32 %v3539_v23, %v15182_v41  ;;  %v6549_v25 = vmul.f32 %v15056_v17, %v6548_v52  ;;  %7437 = vmatpush.msra.mxu2 %v7286_v46  ;;  %v7285_v54 = vmul.f32 %v7157_v57, %v16772_v2  ;;  %v7155_v10 = vadd.f32 1.0, %v7731_v28  ;;  %v16777_v18 = vld [vmem:[#allocation74_spill] sm:$0xff]  ;;  %v16778_v23 = vld [vmem:[#allocation99_spill] sm:$0xff] }
 0x5eb   :  { %v7729_v14 = vclamps-f32 %v16773_v15, 1.0  ;;  %v6500_v49 = vmul.f32 %v6499_v1, %v15168_v7  ;;  %v3530_v43 = vadd.f32 0.05243302, %v3529_v45  ;;  %v5824_v21 = vmul.f32 %v5823_v0, %v15136_v34  ;;  %v16779_v46 = vld [vmem:[#allocation98_spill] sm:$0xff] }
 0x5ec   :  { %v3541_v22 = vadd.f32 0.112945676, %v3540_v63  ;;  %v6488_v31 = vadd.f32 0.0036580483, %v6487_v24  ;;  %7438 = vmatpush.msra.mxu2 %v7285_v54  ;;  %v7284_v20 = vmul.f32 %v7156_v60, %v16774_v27  ;;  %v7154_v30 = vadd.f32 1.0, %v7730_v61  ;;  %v16781_v54 = vld [vmem:[#allocation173_spill] sm:$0xff] }
 0x5ed   :  { %v7728_v13 = vclamps-f32 %v16775_v51, 1.0  ;;  %v5807_v36 = vmul.f32 %v5806_v16, %v15136_v34  ;;  %v5847_v48 = vmul.f32 %v5846_v26, %v15138_v4  ;;  %v15274_v5 = vadd.f32 1.0, %v5864_v47  ;;  %v16780_v47 = vld [vmem:[#allocation29_spill] sm:$0xff] }
 0x5ee   :  { %v3542_v50 = vmul.f32 %v3541_v22, %v15182_v41  ;;  %7439 = vmatpush.msra.mxu2 %v7284_v20  ;;  %v7283_v52 = vmul.f32 %v7155_v10, %v16776_v56  ;;  %v7153_v8 = vadd.f32 1.0, %v7729_v14  ;;  %v7727_v57 = vclamps-f32 %v16777_v18, 1.0  ;;  %v16783_v20 = vld [vmem:[#allocation160_spill] sm:$0xff] }
 0x5ef   :  { %v3496_v35 = vmul.f32 3.8918573e-05, %v14888_v53  ;;  %v6501_v28 = vadd.f32 0.112945676, %v6500_v49  ;;  %v3531_v1 = vmul.f32 %v3530_v43, %v15182_v41  ;;  %v15281_v45 = vadd.f32 1.0, %v5824_v21  ;;  %v16782_v21 = vld [vmem:[#allocation86_spill] sm:$0xff] }
 0x5f0   :  { %v3543_v0 = vadd.f32 0.4994258, %v3542_v50  ;;  %7440 = vmatpush.msra.mxu2 %v7283_v52  ;;  %v7282_v24 = vmul.f32 %v7154_v30, %v16778_v23  ;;  %v7152_v33 = vadd.f32 1.0, %v7728_v13  ;;  %v7726_v60 = vclamps-f32 %v16779_v46, 1.0  ;;  %v16784_v50 = vld [vmem:[#allocation66_spill] sm:$0xff] }
 0x5f1   :  { %v3497_v58 = vadd.f32 0.001143296, %v3496_v35  ;;  %v5808_v61 = vadd.f32 0.0036580483, %v5807_v36  ;;  %v5848_v16 = vadd.f32 0.0036580483, %v5847_v48  ;;  %8038 = vrcp.f32 %v15274_v5 }
 0x5f2   :  { %v3544_v26 = vmul.f32 %v3543_v0, %v15182_v41  ;;  %7441 = vmatpush.msra.mxu2 %v7282_v24  ;;  %v7281_v63 = vmul.f32 %v7153_v8, %v16780_v47  ;;  %v7151_v2 = vadd.f32 1.0, %v7727_v57  ;;  %v7725_v10 = vclamps-f32 %v16781_v54, 1.0  ;;  %v16785_v8 = vld [vmem:[#allocation137_spill] sm:$0xff]  ;;  %v16788_v47 = vld [vmem:[#allocation203_spill] sm:$0xff] }
 0x5f3   :  { %v3498_v15 = vmul.f32 %v3497_v58, %v14888_v53  ;;  %v6502_v14 = vmul.f32 %v6501_v28, %v15168_v7  ;;  %v3532_v49 = vadd.f32 0.18741608, %v3531_v1  ;;  %8040 = vrcp.f32 %v15281_v45 }
 0x5f4   :  { %v15292_v43 = vadd.f32 1.0, %v3544_v26  ;;  %7442 = vmatpush.msra.mxu2 %v7281_v63  ;;  %v7280_v22 = vmul.f32 %v7152_v33, %v16782_v21  ;;  %v7150_v27 = vadd.f32 1.0, %v7726_v60  ;;  %v7724_v30 = vclamps-f32 %v16783_v20, 1.0  ;;  %v16787_v33 = vld [vmem:[#allocation59_spill] sm:$0xff] }
 0x5f5   :  { %v3499_v51 = vadd.f32 0.014752088, %v3498_v15  ;;  %v6489_v13 = vmul.f32 %v6488_v31, %v15168_v7  ;;  %v5809_v36 = vmul.f32 %v5808_v61, %v15136_v34  ;;  %v5849_v48 = vmul.f32 %v5848_v16, %v15138_v4 }
 0x5f6   :  { %8042 = vrcp.f32 %v15292_v43  ;;  %7443 = vmatpush.msra.mxu2 %v7280_v22  ;;  %v7279_v56 = vmul.f32 %v7151_v2, %v16784_v50  ;;  %v7149_v52 = vadd.f32 1.0, %v7725_v10  ;;  %v7723_v18 = vclamps-f32 %v16785_v8, 1.0 }
 0x5f7   :  { %v3500_v57 = vmul.f32 %v3499_v51, %v14888_v53  ;;  %v15303_v35 = vpop.eup %8038  ;;  %v15306_v28 = vadd.f32 %v15056_v17, %v6549_v25  ;;  %v16786_v31 = vand.u32 2147483648, %v15009_v42  ;;  %v15314_v0 = vmul.f32 %v15239_v40, %v14850_v37  ;;  %v16789_v37 = vld [vmem:[#allocation166_spill] sm:$0xff] }
 0x5f8   :  { %v6503_v23 = vadd.f32 0.4994258, %v6502_v14  ;;  %v3533_v24 = vmul.f32 %v3532_v49, %v15182_v41  ;;  %7444 = vmatpush.msra.mxu2 %v7279_v56  ;;  %v7278_v46 = vmul.f32 %v7150_v27, %v16787_v33  ;;  %v7148_v60 = vadd.f32 1.0, %v7724_v30  ;;  %v16790_v49 = vld [vmem:[#allocation196_spill] sm:$0xff] }
 0x5f9   :  { %v15310_v1 = vor.u32 1.1754944e-38, %v16786_v31  ;;  %v3501_v58 = vadd.f32 0.112945676, %v3500_v57  ;;  %v15318_v61 = vpop.eup %8040  ;;  %v15321_v25 = vmul.f32 0.5, %v15131_v9  ;;  %v5810_v16 = vadd.f32 0.05243302, %v5809_v36 }
 0x5fa   :  { %v5850_v26 = vadd.f32 0.05243302, %v5849_v48  ;;  %v7785_v63 = vclamps-f32 %v16788_v47, 1.0  ;;  %v6490_v2 = vadd.f32 0.05243302, %v6489_v13  ;;  %7445 = vmatpush.msra.mxu2 %v7278_v46  ;;  %v7277_v40 = vmul.f32 %v7149_v52, %v16789_v37  ;;  %v16791_v27 = vld [vmem:[#allocation148_spill] sm:$0xff] }
 0x5fb   :  { %v7147_v54 = vadd.f32 1.0, %v7723_v18  ;;  %v3502_v41 = vmul.f32 %v3501_v58, %v14888_v53  ;;  %v6504_v15 = vmul.f32 %v6503_v23, %v15168_v7  ;;  %v5867_v14 = vmul.f32 %v15303_v35, %v15274_v5  ;;  %v16792_v52 = vld [vmem:[#allocation125_spill] sm:$0xff] }
 0x5fc   :  { %v8043_v10 = vpop.eup %8042  ;;  %v7784_v9 = vclamps-f32 %v16790_v49, 1.0  ;;  %v3456_v21 = vmul.f32 3.8918573e-05, %v14672_v32  ;;  %v3534_v22 = vadd.f32 1.1283791, %v3533_v24  ;;  %7446 = vmatpush.msra.mxu2 %v7277_v40  ;;  %v7276_v20 = vmul.f32 %v7148_v60, %v16791_v27  ;;  %v16793_v47 = vld [vmem:[#allocation197_spill] sm:$0xff] }
 0x5fd   :  { %v3547_v30 = vmul.f32 %v8043_v10, %v15292_v43  ;;  %v3503_v51 = vadd.f32 0.4994258, %v3502_v41  ;;  %v5811_v13 = vmul.f32 %v5810_v16, %v15136_v34  ;;  %v5851_v36 = vmul.f32 %v5850_v26, %v15138_v4 }
 0x5fe   :  { %v7209_v48 = vadd.f32 1.0, %v7785_v63  ;;  %v3457_v50 = vadd.f32 0.001143296, %v3456_v21  ;;  %v5827_v56 = vmul.f32 %v15318_v61, %v15281_v45  ;;  %7447 = vmatpush.msra.mxu2 %v7276_v20  ;;  %v7275_v8 = vmul.f32 %v7147_v54, %v16792_v52 }
 0x5ff   :  { %v3548_v18 = vsub.f32 1.0, %v3547_v30  ;;  %v3504_v57 = vmul.f32 %v3503_v51, %v14888_v53  ;;  %v5868_v31 = vsub.f32 1.0, %v5867_v14  ;;  %v3557_v23 = vand.u32 2147483648, %v15292_v43  ;;  %v16794_v14 = vld [vmem:[#allocation190_spill] sm:$0xff] }
 0x600   :  { %v7208_v24 = vadd.f32 1.0, %v7784_v9  ;;  %v3458_v33 = vmul.f32 %v3457_v50, %v14672_v32  ;;  %7448 = vmatpush.msra.mxu2 %v7275_v8  ;;  %vm3552_vm15 = vweird.f32 %v8043_v10  ;;  %v3555_v60 = vand.u32 2147483647, %v15292_v43  ;;  %v16795_v50 = vld [vmem:[#allocation189_spill] sm:$0xff] }
 0x601   :  { %v3549_v46 = vmul.f32 %v8043_v10, %v3548_v18  ;;  %v15342_v58 = vadd.f32 1.0, %v3504_v57  ;;  %v15344_v16 = vadd.f32 1.0, %v6504_v15  ;;  %v5852_v26 = vadd.f32 0.18741608, %v5851_v36 }
 0x602   :  { %7493 = vmatpush.msrb.mxu2 %v14147_v6  ;;  %v7337_v53 = vmul.f32 %v7209_v48, %v16793_v47  ;;  %v3459_v63 = vadd.f32 0.014752088, %v3458_v33  ;;  %v5812_v37 = vadd.f32 0.18741608, %v5811_v13  ;;  %vm3551_vm1 = vweird.f32 %v15292_v43 }
 0x603   :  { %v3550_v40 = vadd.f32 %v8043_v10, %v3549_v46  ;;  %8044 = vrcp.f32 %v15342_v58  ;;  %v5869_v54 = vmul.f32 %v15303_v35, %v5868_v31  ;;  %vm3553_vm2 = vmor %vm3551_vm1, %vm3552_vm15  ;;  %v3558_v41 = vor.u32 1.1754944e-38, %v3557_v23 }
 0x604   :  { %7494 = vmatpush.msrb.mxu2 %v7337_v53  ;;  %v7336_v15 = vmul.f32 %v7208_v24, %v16794_v14  ;;  %v3460_v49 = vmul.f32 %v3459_v63, %v14672_v32  ;;  %v3535_v6 = vmul.f32 %v3534_v22, %v15150_v19  ;;  %v5828_v9 = vsub.f32 1.0, %v5827_v56 }
 0x605   :  { %v3554_v21 = vsel %vm3553_vm2, %v8043_v10, %v3550_v40  ;;  %vm3556_vm3 = vcmp.eq.f32.partialorder %v3555_v60, 8.507059e+37  ;;  %v6491_v27 = vmul.f32 %v6490_v2, %v15168_v7  ;;  %v5853_v43 = vmul.f32 %v5852_v26, %v15138_v4 }
 0x606   :  { %v3559_v20 = vsel %vm3556_vm3, %v3558_v41, %v3554_v21  ;;  %7495 = vmatpush.msrb.mxu2 %v7336_v15  ;;  %v3461_v30 = vadd.f32 0.112945676, %v3460_v49  ;;  %8046 = vrcp.f32 %v15344_v16  ;;  %v5813_v51 = vmul.f32 %v5812_v37, %v15136_v34  ;;  %v16800_v37 = vld [vmem:[#allocation182_spill] sm:$0xff] }
 0x607   :  { %v5875_v13 = vand.u32 2147483647, %v15274_v5  ;;  %v3560_v36 = vmul.f32 %v3559_v20, %v3535_v6  ;;  %v5870_v48 = vadd.f32 %v15303_v35, %v5869_v54  ;;  %vm5872_vm4 = vweird.f32 %v15303_v35 }
 0x608   :  { %v5877_v19 = vand.u32 2147483648, %v15274_v5  ;;  %v3462_v2 = vmul.f32 %v3461_v30, %v14672_v32  ;;  %v5829_v4 = vmul.f32 %v15318_v61, %v5828_v9  ;;  %v7783_v56 = vclamps-f32 %v16795_v50, 1.0 }
 0x609   :  { %v8045_v10 = vpop.eup %8044  ;;  %v7698_v22 = vclamps-f32 %v3560_v36, 1.0  ;;  %v3416_v52 = vmul.f32 3.8918573e-05, %v14427_v39  ;;  %v5854_v34 = vadd.f32 1.1283791, %v5853_v43  ;;  %vm5871_vm6 = vweird.f32 %v15274_v5 }
 0x60a   :  { %v3507_v8 = vmul.f32 %v8045_v10, %v15342_v58  ;;  %v3463_v18 = vadd.f32 0.4994258, %v3462_v2  ;;  %vm15368_vm11 = vmor %vm5871_vm6, %vm5872_vm4  ;;  %vm15372_vm7 = vcmp.eq.f32.partialorder %v5875_v13, 8.507059e+37  ;;  %v7207_v24 = vadd.f32 1.0, %v7783_v56 }
 0x60b   :  { %v7122_v23 = vadd.f32 1.0, %v7698_v22  ;;  %v3417_v33 = vadd.f32 0.001143296, %v3416_v52  ;;  %v5874_v46 = vsel %vm15368_vm11, %v15303_v35, %v5870_v48  ;;  %v5878_v60 = vor.u32 1.1754944e-38, %v5877_v19 }
 0x60c   :  { %v3508_v5 = vsub.f32 1.0, %v3507_v8  ;;  %v3464_v26 = vmul.f32 %v3463_v18, %v14672_v32  ;;  %v15380_v47 = vpop.eup %8046  ;;  %v3517_v63 = vand.u32 2147483648, %v15342_v58  ;;  %v7335_v40 = vmul.f32 %v7207_v24, %v16800_v37  ;;  %v16806_v8 = vld [vmem:[#allocation192_spill] sm:$0xff] }
 0x60d   :  { %v7250_v53 = vmul.f32 %v7122_v23, %v15321_v25  ;;  %v3418_v54 = vmul.f32 %v3417_v33, %v14427_v39  ;;  %vm3512_vm12 = vweird.f32 %v8045_v10  ;;  %v3515_v14 = vand.u32 2147483647, %v15342_v58 }
 0x60e   :  { %v3509_v41 = vmul.f32 %v8045_v10, %v3508_v5  ;;  %v15387_v15 = vadd.f32 1.0, %v3464_v26  ;;  %v5835_v35 = vand.u32 2147483647, %v15281_v45  ;;  %v5837_v32 = vand.u32 2147483648, %v15281_v45  ;;  %7496 = vmatpush.msrb.mxu2 %v7335_v40  ;;  %v16807_v40 = vld [vmem:[#allocation186_spill] sm:$0xff] }
 0x60f   :  { %v5879_v49 = vsel %vm15372_vm7, %v5878_v60, %v5874_v46  ;;  %7401 = vmatpush.msrb.mxu3 %v7250_v53  ;;  %v3419_v25 = vadd.f32 0.014752088, %v3418_v54  ;;  %v5855_v6 = vmul.f32 %v5854_v34, %v15087_v44  ;;  %vm3511_vm13 = vweird.f32 %v15342_v58 }
 0x610   :  { %v3510_v9 = vadd.f32 %v8045_v10, %v3509_v41  ;;  %8048 = vrcp.f32 %v15387_v15  ;;  %v5830_v21 = vadd.f32 %v15318_v61, %v5829_v4  ;;  %vm5832_vm14 = vweird.f32 %v15318_v61  ;;  %vm3513_vm15 = vmor %vm3511_vm13, %vm3512_vm12  ;;  %v16803_v4 = vld [vmem:[#allocation193_spill] sm:$0xff] }
 0x611   :  { %v3518_v43 = vor.u32 1.1754944e-38, %v3517_v63  ;;  %v3420_v20 = vmul.f32 %v3419_v25, %v14427_v39  ;;  %vm6552_vm1 = vweird.f32 %v15056_v17  ;;  %v15401_v30 = vadd.f32 0.18741608, %v6491_v27 }
 0x612   :  { %v5880_v13 = vmul.f32 %v5879_v49, %v5855_v6  ;;  %v3514_v44 = vsel %vm3513_vm15, %v8045_v10, %v3510_v9  ;;  %vm3516_vm2 = vcmp.eq.f32.partialorder %v3515_v14, 8.507059e+37  ;;  %v15405_v58 = vmul.f32 %v15380_v47, %v15344_v16  ;;  %v16808_v9 = vld [vmem:[#allocation198_spill] sm:$0xff] }
 0x613   :  { %vm5831_vm3 = vweird.f32 %v15281_v45  ;;  %v3519_v36 = vsel %vm3516_vm2, %v3518_v43, %v3514_v44  ;;  %v3421_v48 = vadd.f32 0.112945676, %v3420_v20  ;;  %vm6551_vm4 = vweird.f32 %v15009_v42 }
 0x614   :  { %v5814_v19 = vadd.f32 1.1283791, %v5813_v51  ;;  %vm15411_vm6 = vmor %vm5831_vm3, %vm5832_vm14  ;;  %v1804_v27 = vmul.f32 0.5, %v15072_v29  ;;  %v3520_v10 = vmul.f32 %v3519_v36, %v15314_v0  ;;  %v3256_v22 = vmul.f32 3.8918573e-05, %v16803_v4 }
 0x615   :  { %v5834_v45 = vsel %vm15411_vm6, %v15318_v61, %v5830_v21  ;;  %vm15421_vm11 = vcmp.eq.f32.partialorder %v5835_v35, 8.507059e+37  ;;  %v5838_v51 = vor.u32 1.1754944e-38, %v5837_v32  ;;  %v3422_v56 = vmul.f32 %v3421_v48, %v14427_v39  ;;  %vm15446_vm12 = vmor %vm6551_vm4, %vm6552_vm1 }
 0x616   :  { %v8049_v52 = vpop.eup %8048  ;;  %v7697_v34 = vclamps-f32 %v3520_v10, 1.0  ;;  %v7782_v18 = vclamps-f32 %v16806_v8, 1.0  ;;  %v7756_v29 = vclamps-f32 %v5880_v13, 1.0  ;;  %v3376_v0 = vmul.f32 3.8918573e-05, %v14187_v62  ;;  %v16814_v8 = vld [vmem:[#allocation201_spill] sm:$0xff] }
 0x617   :  { %v3467_v57 = vmul.f32 %v8049_v52, %v15387_v15  ;;  %v3475_v31 = vand.u32 2147483647, %v15387_v15  ;;  %v3423_v23 = vadd.f32 0.4994258, %v3422_v56  ;;  %v3257_v61 = vadd.f32 0.001143296, %v3256_v22 }
 0x618   :  { %v7121_v24 = vadd.f32 1.0, %v7697_v34  ;;  %v7206_v33 = vadd.f32 1.0, %v7782_v18  ;;  %v7180_v46 = vadd.f32 1.0, %v7756_v29  ;;  %v3377_v60 = vadd.f32 0.001143296, %v3376_v0  ;;  %v16815_v29 = vld [vmem:[#allocation75_spill] sm:$0xff] }
 0x619   :  { %v3468_v5 = vsub.f32 1.0, %v3467_v57  ;;  %v3477_v26 = vand.u32 2147483648, %v15387_v15  ;;  %v3424_v53 = vmul.f32 %v3423_v23, %v14427_v39  ;;  %v3258_v63 = vmul.f32 %v3257_v61, %v16803_v4 }
 0x61a   :  { %v7249_v37 = vmul.f32 %v7121_v24, %v14968_v55  ;;  %v7334_v54 = vmul.f32 %v7206_v33, %v16807_v40  ;;  %v7308_v41 = vmul.f32 %v7180_v46, %v1804_v27  ;;  %v3378_v14 = vmul.f32 %v3377_v60, %v14187_v62 }
 0x61b   :  { %v3469_v35 = vmul.f32 %v8049_v52, %v3468_v5  ;;  %vm3472_vm7 = vweird.f32 %v8049_v52  ;;  %v15436_v32 = vadd.f32 1.0, %v3424_v53  ;;  %v3259_v49 = vadd.f32 0.014752088, %v3258_v63  ;;  %v16816_v53 = vld [vmem:[#allocation150_spill] sm:$0xff] }
 0x61c   :  { %v6508_v25 = vsub.f32 1.0, %v15405_v58  ;;  %v5839_v6 = vsel %vm15421_vm11, %v5838_v51, %v5834_v45  ;;  %7402 = vmatpush.msrb.mxu3 %v7249_v37  ;;  %7497 = vmatpush.msrb.mxu2 %v7334_v54  ;;  %v3379_v39 = vadd.f32 0.014752088, %v3378_v14  ;;  %v3296_v55 = vmul.f32 3.8918573e-05, %v16808_v9  ;;  %v16817_v37 = vld [vmem:[#allocation195_spill] sm:$0xff] }
 0x61d   :  { %v5815_v43 = vmul.f32 %v5814_v19, %v15083_v3  ;;  %v3470_v20 = vadd.f32 %v8049_v52, %v3469_v35  ;;  %vm3471_vm13 = vweird.f32 %v15387_v15  ;;  %8050 = vrcp.f32 %v15436_v32  ;;  %7487 = vmatpush.msrb.mxu1 %v7308_v41 }
 0x61e   :  { %vm3473_vm14 = vmor %vm3471_vm13, %vm3472_vm7  ;;  %v3478_v13 = vor.u32 1.1754944e-38, %v3477_v26  ;;  %v3380_v44 = vmul.f32 %v3379_v39, %v14187_v62  ;;  %v3297_v58 = vadd.f32 0.001143296, %v3296_v55  ;;  %v3260_v36 = vmul.f32 %v3259_v49, %v16803_v4 }
 0x61f   :  { %v6554_v48 = vsel %vm15446_vm12, %v15056_v17, %v15306_v28  ;;  %v5840_v3 = vmul.f32 %v5839_v6, %v5815_v43  ;;  %v3474_v19 = vsel %vm3473_vm14, %v8049_v52, %v3470_v20  ;;  %vm3476_vm15 = vcmp.eq.f32.partialorder %v3475_v31, 8.507059e+37 }
 0x620   :  { %v6493_v15 = vmul.f32 %v15401_v30, %v15168_v7  ;;  %v3479_v2 = vsel %vm3476_vm15, %v3478_v13, %v3474_v19  ;;  %v3381_v27 = vadd.f32 0.112945676, %v3380_v44  ;;  %v3298_v10 = vmul.f32 %v3297_v58, %v16808_v9 }
 0x621   :  { %v6509_v22 = vmul.f32 %v15380_v47, %v6508_v25  ;;  %v1803_v45 = vmul.f32 0.5, %v15069_v59  ;;  %v3480_v50 = vmul.f32 %v3479_v2, %v14947_v11  ;;  %v3435_v51 = vand.u32 2147483647, %v15436_v32 }
 0x622   :  { %v3437_v17 = vand.u32 2147483648, %v15436_v32  ;;  %v3382_v28 = vmul.f32 %v3381_v27, %v14187_v62  ;;  %v3299_v56 = vadd.f32 0.014752088, %v3298_v10  ;;  %v3261_v52 = vadd.f32 0.112945676, %v3260_v36 }
 0x623   :  { %v8051_v34 = vpop.eup %8050  ;;  %v16811_v7 = vand.u32 2147483647, %v15009_v42  ;;  %vm6511_vm2 = vweird.f32 %v15344_v16  ;;  %v7696_v59 = vclamps-f32 %v3480_v50, 1.0  ;;  %v7781_v11 = vclamps-f32 %v16814_v8, 1.0 }
 0x624   :  { %v7755_v18 = vclamps-f32 %v5840_v3, 1.0  ;;  %v3336_v0 = vmul.f32 3.8918573e-05, %v16815_v29  ;;  %v3427_v57 = vmul.f32 %v8051_v34, %v15436_v32  ;;  %vm3432_vm3 = vweird.f32 %v8051_v34 }
 0x625   :  { %vm15471_vm1 = vcmp.eq.f32.partialorder %v16811_v7, 8.507059e+37  ;;  %v3383_v31 = vadd.f32 0.4994258, %v3382_v28  ;;  %v3300_v23 = vmul.f32 %v3299_v56, %v16808_v9  ;;  %v7120_v61 = vadd.f32 1.0, %v7696_v59  ;;  %v16822_v28 = vld [vmem:[#allocation204_spill] sm:$0xff] }
 0x626   :  { %v7205_v42 = vadd.f32 1.0, %v7781_v11  ;;  %v7179_v24 = vadd.f32 1.0, %v7755_v18  ;;  %v3337_v33 = vadd.f32 0.001143296, %v3336_v0  ;;  %v3428_v46 = vsub.f32 1.0, %v3427_v57  ;;  %v16824_v57 = vld [vmem:[#allocation72_spill] sm:$0xff] }
 0x627   :  { %v3384_v60 = vmul.f32 %v3383_v31, %v14187_v62  ;;  %v3301_v5 = vadd.f32 0.112945676, %v3300_v23  ;;  %v3262_v26 = vmul.f32 %v3261_v52, %v16803_v4  ;;  %v7248_v63 = vmul.f32 %v7120_v61, %v16816_v53  ;;  %v16825_v23 = vld [vmem:[#allocation30_spill] sm:$0xff] }
 0x628   :  { %v7333_v40 = vmul.f32 %v7205_v42, %v16817_v37  ;;  %v7307_v54 = vmul.f32 %v7179_v24, %v1803_v45  ;;  %v3338_v41 = vmul.f32 %v3337_v33, %v16815_v29  ;;  %v3429_v14 = vmul.f32 %v8051_v34, %v3428_v46  ;;  %v16826_v42 = vld [vmem:[#allocation120_spill] sm:$0xff] }
 0x629   :  { %v15485_v35 = vadd.f32 1.0, %v3384_v60  ;;  %v3302_v49 = vmul.f32 %v3301_v5, %v16808_v9  ;;  %v3263_v25 = vadd.f32 0.4994258, %v3262_v26  ;;  %v6510_v6 = vadd.f32 %v15380_v47, %v6509_v22  ;;  %7403 = vmatpush.msrb.mxu3 %v7248_v63 }
 0x62a   :  { %vm6512_vm4 = vweird.f32 %v15380_v47  ;;  %v6515_v62 = vand.u32 2147483647, %v15344_v16  ;;  %7498 = vmatpush.msrb.mxu2 %v7333_v40  ;;  %v3339_v39 = vadd.f32 0.014752088, %v3338_v41  ;;  %v6517_v55 = vand.u32 2147483648, %v15344_v16  ;;  %7488 = vmatpush.msrb.mxu1 %v7307_v54  ;;  %v16821_v16 = vld [vmem:[#allocation172_spill] sm:$0xff] }
 0x62b   :  { %v3430_v21 = vadd.f32 %v8051_v34, %v3429_v14  ;;  %vm3431_vm6 = vweird.f32 %v15436_v32  ;;  %8052 = vrcp.f32 %v15485_v35  ;;  %v3438_v43 = vor.u32 1.1754944e-38, %v3437_v17  ;;  %vm15504_vm7 = vmor %vm6511_vm2, %vm6512_vm4  ;;  %v16829_v41 = vld [vmem:[#allocation44_spill] sm:$0xff]  ;;  %v16854_v32 = vld [vmem:[#allocation109_spill] sm:$0xff] }
 0x62c   :  { %vm3433_vm11 = vmor %vm3431_vm6, %vm3432_vm3  ;;  %v3340_v20 = vmul.f32 %v3339_v39, %v16815_v29  ;;  %v3303_v13 = vadd.f32 0.4994258, %v3302_v49  ;;  %v3264_v44 = vmul.f32 %v3263_v25, %v16803_v4  ;;  %v6559_v58 = vsel %vm15471_vm1, %v15310_v1, %v6554_v48  ;;  %v16820_v1 = vld [vmem:[#allocation184_spill] sm:$0xff]  ;;  %v16830_v49 = vld [vmem:[#allocation199_spill] sm:$0xff] }
 0x62d   :  { %v6494_v36 = vadd.f32 1.1283791, %v6493_v15  ;;  %v3434_v3 = vsel %vm3433_vm11, %v8051_v34, %v3430_v21  ;;  %vm3436_vm12 = vcmp.eq.f32.partialorder %v3435_v51, 8.507059e+37  ;;  %v6514_v19 = vsel %vm15504_vm7, %v15380_v47, %v6510_v6 }
 0x62e   :  { %v3439_v4 = vsel %vm3436_vm12, %v3438_v43, %v3434_v3  ;;  %v3341_v2 = vadd.f32 0.112945676, %v3340_v20  ;;  %v3304_v27 = vmul.f32 %v3303_v13, %v16808_v9  ;;  %v15514_v48 = vmul.f32 %v15029_v12, %v16820_v1  ;;  %v16823_v12 = vld [vmem:[#allocation24_spill] sm:$0xff]  ;;  %v16836_v3 = vld [vmem:[#allocation89_spill] sm:$0xff] }
 0x62f   :  { %v6518_v15 = vor.u32 1.1754944e-38, %v6517_v55  ;;  %v3440_v10 = vmul.f32 %v3439_v4, %v16821_v16  ;;  %v15517_v22 = vadd.f32 1.0, %v3264_v44  ;;  %v15520_v45 = vmul.f32 %v6559_v58, %v15032_v38  ;;  %v7343_v55 = vld [vmem:[%s15815_s3 + $0x20] sm:$0xff] }
 0x630   :  { %vm6516_vm13 = vcmp.eq.f32.partialorder %v6515_v62, 8.507059e+37  ;;  %v3342_v50 = vmul.f32 %v3341_v2, %v16815_v29  ;;  %v15523_v47 = vadd.f32 1.0, %v3304_v27  ;;  %v7780_v56 = vclamps-f32 %v16822_v28, 1.0  ;;  %v16833_v62 = vld [vmem:[#allocation206_spill] sm:$0xff]  ;;  %7449 = vmatmul.f32.vlgmr.msra.gmra.mxu2 %v7343_v55 }
 0x631   :  { %v8053_v51 = vpop.eup %8052  ;;  %v6519_v17 = vsel %vm6516_vm13, %v6518_v15, %v6514_v19  ;;  %v7695_v9 = vclamps-f32 %v3440_v10, 1.0  ;;  %8054 = vrcp.f32 %v15517_v22  ;;  %v6495_v52 = vmul.f32 %v6494_v36, %v16823_v12  ;;  %v16837_v15 = vld [vmem:[#allocation32_spill] sm:$0xff]  ;;  %v16839_v12 = vld [vmem:[#allocation18_spill] sm:$0xff] }
 0x632   :  { %v3387_v34 = vmul.f32 %v8053_v51, %v15485_v35  ;;  %v3343_v7 = vadd.f32 0.4994258, %v3342_v50  ;;  %8056 = vrcp.f32 %v15523_v47  ;;  %v3395_v30 = vand.u32 2147483647, %v15485_v35  ;;  %v16838_v50 = vld [vmem:[#allocation163_spill] sm:$0xff] }
 0x633   :  { %v7119_v38 = vadd.f32 1.0, %v7695_v9  ;;  %v3397_v59 = vand.u32 2147483648, %v15485_v35  ;;  %v7204_v8 = vadd.f32 1.0, %v7780_v56  ;;  %v15532_v11 = vmul.f32 %v6519_v17, %v6495_v52  ;;  %v7342_v17 = vld [vmem:[%s15815_s3 + $0x18] sm:$0xff] }
 0x634   :  { %v3388_v18 = vsub.f32 1.0, %v3387_v34  ;;  %v3344_v0 = vmul.f32 %v3343_v7, %v16815_v29  ;;  %v7779_v31 = vclamps-f32 %v16824_v57, 1.0  ;;  %vm3392_vm14 = vweird.f32 %v8053_v51  ;;  %7429 = vmatmul.f32.vlgmr.msra.gmra.mxu1 %v7342_v17  ;;  %v16841_v57 = vld [vmem:[#allocation88_spill] sm:$0xff]  ;;  %v16846_v29 = vld [vmem:[#allocation35_spill] sm:$0xff] }
 0x635   :  { %v7247_v61 = vmul.f32 %v7119_v38, %v16825_v23  ;;  %v7332_v24 = vmul.f32 %v7204_v8, %v16826_v42  ;;  %v3315_v33 = vand.u32 2147483647, %v15523_v47  ;;  %v3317_v5 = vand.u32 2147483648, %v15523_v47  ;;  %v16840_v8 = vld [vmem:[#allocation194_spill] sm:$0xff] }
 0x636   :  { %v3389_v46 = vmul.f32 %v8053_v51, %v3388_v18  ;;  %v15539_v60 = vadd.f32 1.0, %v3344_v0  ;;  %v7203_v26 = vadd.f32 1.0, %v7779_v31  ;;  %vm3391_vm15 = vweird.f32 %v15485_v35 }
 0x637   :  { %v15542_v53 = vpop.eup %8054  ;;  %7404 = vmatpush.msrb.mxu3 %v7247_v61  ;;  %vm15545_vm1 = vcmp.eq.f32.partialorder %v3395_v30, 8.507059e+37  ;;  %v3398_v63 = vor.u32 1.1754944e-38, %v3397_v59  ;;  %7499 = vmatpush.msrb.mxu2 %v7332_v24  ;;  %v3275_v37 = vand.u32 2147483647, %v15517_v22  ;;  %vm3271_vm2 = vweird.f32 %v15517_v22  ;;  %vm3393_vm3 = vmor %vm3391_vm15, %vm3392_vm14 }
 0x638   :  { %v8057_v40 = vpop.eup %8056  ;;  %v3390_v54 = vadd.f32 %v8053_v51, %v3389_v46  ;;  %8058 = vrcp.f32 %v15539_v60  ;;  %v7778_v14 = vclamps-f32 %v16829_v41, 1.0  ;;  %v7777_v25 = vclamps-f32 %v16830_v49, 1.0  ;;  %v16848_v49 = vld [vmem:[#allocation158_spill] sm:$0xff] }
 0x639   :  { %v3307_v35 = vmul.f32 %v8057_v40, %v15523_v47  ;;  %vm3311_vm4 = vweird.f32 %v15523_v47  ;;  %vm15557_vm6 = vcmp.eq.f32.partialorder %v3315_v33, 8.507059e+37  ;;  %v7331_v39 = vmul.f32 %v7203_v26, %v16833_v62  ;;  %v16845_v33 = vld [vmem:[#allocation177_spill] sm:$0xff] }
 0x63a   :  { %v3394_v21 = vsel %vm3393_vm3, %v8053_v51, %v3390_v54  ;;  %v3318_v43 = vor.u32 1.1754944e-38, %v3317_v5  ;;  %v3267_v20 = vmul.f32 %v15542_v53, %v15517_v22  ;;  %v3277_v13 = vand.u32 2147483648, %v15517_v22  ;;  %v16847_v54 = vld [vmem:[#allocation71_spill] sm:$0xff] }
 0x63b   :  { %v3399_v44 = vsel %vm15545_vm1, %v3398_v63, %v3394_v21  ;;  %v3357_v58 = vand.u32 2147483648, %v15539_v60  ;;  %v3308_v36 = vsub.f32 1.0, %v3307_v35  ;;  %vm3312_vm11 = vweird.f32 %v8057_v40  ;;  %7500 = vmatpush.msrb.mxu2 %v7331_v39  ;;  %v16850_v35 = vld [vmem:[#allocation200_spill] sm:$0xff] }
 0x63c   :  { %vm15571_vm7 = vcmp.eq.f32.partialorder %v3275_v37, 8.507059e+37  ;;  %v3400_v19 = vmul.f32 %v3399_v44, %v16836_v3  ;;  %v3268_v4 = vsub.f32 1.0, %v3267_v20  ;;  %v7202_v2 = vadd.f32 1.0, %v7778_v14  ;;  %vm3313_vm13 = vmor %vm3311_vm4, %vm3312_vm11  ;;  %v16851_v39 = vld [vmem:[#allocation28_spill] sm:$0xff] }
 0x63d   :  { %v7201_v27 = vadd.f32 1.0, %v7777_v25  ;;  %v3309_v1 = vmul.f32 %v8057_v40, %v3308_v36  ;;  %v7776_v16 = vclamps-f32 %v16837_v15, 1.0  ;;  %v7775_v10 = vclamps-f32 %v15514_v48, 1.0  ;;  %v16852_v21 = vld [vmem:[#allocation188_spill] sm:$0xff] }
 0x63e   :  { %v7774_v51 = vclamps-f32 %v16838_v50, 1.0  ;;  %v8059_v9 = vpop.eup %8058  ;;  %v7694_v28 = vclamps-f32 %v3400_v19, 1.0  ;;  %v3269_v56 = vmul.f32 %v15542_v53, %v3268_v4  ;;  %vm3272_vm12 = vweird.f32 %v15542_v53 }
 0x63f   :  { %v7330_v52 = vmul.f32 %v7202_v2, %v16839_v12  ;;  %v3347_v34 = vmul.f32 %v8059_v9, %v15539_v60  ;;  %v3310_v7 = vadd.f32 %v8057_v40, %v3309_v1  ;;  %v3278_v38 = vor.u32 1.1754944e-38, %v3277_v13  ;;  %vm3273_vm15 = vmor %vm3271_vm2, %vm3272_vm12  ;;  %v16853_v13 = vld [vmem:[#allocation205_spill] sm:$0xff]  ;;  %v16856_v2 = vld [vmem:[#allocation128_spill] sm:$0xff] }
 0x640   :  { %v7200_v48 = vadd.f32 1.0, %v7776_v16  ;;  %v7118_v30 = vadd.f32 1.0, %v7694_v28  ;;  %v3270_v59 = vadd.f32 %v15542_v53, %v3269_v56  ;;  %v7329_v18 = vmul.f32 %v7201_v27, %v16840_v8  ;;  %v16857_v16 = vld [vmem:[#allocation22_spill] sm:$0xff]  ;;  %v16861_v12 = vld [vmem:[#allocation97_spill] sm:$0xff] }
 0x641   :  { %7501 = vmatpush.msrb.mxu2 %v7330_v52  ;;  %v7199_v0 = vadd.f32 1.0, %v7775_v10  ;;  %v16842_v31 = vand.u32 2147483647, %v16841_v57  ;;  %v3348_v61 = vsub.f32 1.0, %v3347_v34  ;;  %v3314_v42 = vsel %vm3313_vm13, %v8057_v40, %v3310_v7  ;;  %v16862_v52 = vld [vmem:[#allocation77_spill] sm:$0xff]  ;;  %v16864_v34 = vld [vmem:[#allocation43_spill] sm:$0xff] }
 0x642   :  { %v7198_v47 = vadd.f32 1.0, %v7774_v51  ;;  %v7773_v24 = vclamps-f32 %v15520_v45, 1.0  ;;  %v7246_v46 = vmul.f32 %v7118_v30, %v16845_v33  ;;  %v3319_v5 = vsel %vm15557_vm6, %v3318_v43, %v3314_v42  ;;  %v16872_v42 = vld [vmem:[#allocation175_spill] sm:$0xff]  ;;  %v16873_v33 = vld [vmem:[#allocation157_spill] sm:$0xff] }
 0x643   :  { %vm15593_vm14 = vcmp.eq.f32.partialorder %v16842_v31, 8.507059e+37  ;;  %v3274_v26 = vsel %vm3273_vm15, %v15542_v53, %v3270_v59  ;;  %7502 = vmatpush.msrb.mxu2 %v7329_v18  ;;  %v7328_v63 = vmul.f32 %v7200_v48, %v16846_v29  ;;  %v3349_v37 = vmul.f32 %v8059_v9, %v3348_v61  ;;  %v16849_v53 = vld [vmem:[#allocation46_spill] sm:$0xff]  ;;  %v16866_v48 = vld [vmem:[#allocation143_spill] sm:$0xff]  ;;  %v16871_v61 = vld [vmem:[#allocation101_spill] sm:$0xff] }
 0x644   :  { %vm3352_vm1 = vweird.f32 %v8059_v9  ;;  %v3355_v40 = vand.u32 2147483647, %v15539_v60  ;;  %v7327_v22 = vmul.f32 %v7199_v0, %v16847_v54  ;;  %7405 = vmatpush.msrb.mxu3 %v7246_v46  ;;  %v3279_v45 = vsel %vm15571_vm7, %v3278_v38, %v3274_v26  ;;  %v16868_v18 = vld [vmem:[#allocation63_spill] sm:$0xff]  ;;  %v16869_v0 = vld [vmem:[#allocation42_spill] sm:$0xff]  ;;  %v16876_v29 = vld [vmem:[#allocation180_spill] sm:$0xff] }
 0x645   :  { %7503 = vmatpush.msrb.mxu2 %v7328_v63  ;;  %v7197_v41 = vadd.f32 1.0, %v7773_v24  ;;  %v7772_v14 = vclamps-f32 %v15532_v11, 1.0  ;;  %v7771_v25 = vclamps-f32 %v16848_v49, 1.0  ;;  %v3255_v6 = vmul.f32 %v16850_v35, %v16849_v53  ;;  %v16855_v11 = vld [vmem:[#allocation187_spill] sm:$0xff]  ;;  %v16874_v46 = vld [vmem:[#allocation178_spill] sm:$0xff]  ;;  %v16879_v49 = vld [vmem:[#allocation156_spill] sm:$0xff] }
 0x646   :  { %v3350_v62 = vadd.f32 %v8059_v9, %v3349_v37  ;;  %vm3351_vm2 = vweird.f32 %v15539_v60  ;;  %v3320_v55 = vmul.f32 %v3319_v5, %v16851_v39  ;;  %v1821_v43 = vmul.f32 0.5, %v16852_v21  ;;  %v16875_v5 = vld [vmem:[#allocation176_spill] sm:$0xff]  ;;  %v16881_v35 = vld [vmem:[#allocation69_spill] sm:$0xff] }
 0x647   :  { %vm3353_vm3 = vmor %vm3351_vm2, %vm3352_vm1  ;;  %v3358_v20 = vor.u32 1.1754944e-38, %v3357_v58  ;;  %7504 = vmatpush.msrb.mxu2 %v7327_v22  ;;  %v7326_v44 = vmul.f32 %v7198_v47, %v16853_v13  ;;  %v7196_v36 = vadd.f32 1.0, %v7772_v14  ;;  %v3335_v3 = vmul.f32 %v16855_v11, %v16854_v32  ;;  %v16859_v58 = vld [vmem:[#allocation183_spill] sm:$0xff]  ;;  %v16878_v22 = vld [vmem:[#allocation38_spill] sm:$0xff] }
 0x648   :  { %v3354_v19 = vsel %vm3353_vm3, %v8059_v9, %v3350_v62  ;;  %vm3356_vm4 = vcmp.eq.f32.partialorder %v3355_v40, 8.507059e+37  ;;  %v3280_v4 = vmul.f32 %v3279_v45, %v3255_v6  ;;  %v1820_v27 = vmul.f32 0.5, %v16856_v2  ;;  %v16877_v40 = vld [vmem:[#allocation179_spill] sm:$0xff]  ;;  %v16914_v39 = vld [vmem:[#allocation169_spill] sm:$0xff] }
 0x649   :  { %v3359_v1 = vsel %vm3356_vm4, %v3358_v20, %v3354_v19  ;;  %7505 = vmatpush.msrb.mxu2 %v7326_v44  ;;  %v7325_v60 = vmul.f32 %v7197_v41, %v1821_v43  ;;  %v7195_v15 = vadd.f32 1.0, %v7771_v25  ;;  %v16858_v10 = vand.u32 2147483648, %v16857_v16  ;;  %v16880_v25 = vld [vmem:[#allocation40_spill] sm:$0xff]  ;;  %v16885_v13 = vld [vmem:[#allocation11_spill] sm:$0xff] }
 0x64a   :  { %v5428_v51 = vsub.f32 1.0, %v16859_v58  ;;  %v3360_v17 = vmul.f32 %v3359_v1, %v3335_v3  ;;  %v7692_v28 = vclamps-f32 %v3320_v55, 1.0  ;;  %v16863_v9 = vsel %vm12979_vm5, %v16861_v12, %v16862_v52  ;;  %v16884_v55 = vld [vmem:[#allocation33_spill] sm:$0xff]  ;;  %v16887_v3 = vld [vmem:[#allocation12_spill] sm:$0xff]  ;;  %v16894_v58 = vld [vmem:[#allocation134_spill] sm:$0xff] }
 0x64b   :  { %v5678_v50 = vor.u32 1.1754944e-38, %v16858_v10  ;;  %v15633_v7 = vsel %vm15593_vm14, %v16864_v34, %v16863_v9  ;;  %v16865_v38 = vand.u32 2147483647, %v16857_v16  ;;  %v1819_v30 = vmul.f32 0.5, %v16866_v48  ;;  %7506 = vmatpush.msrb.mxu2 %v7325_v60  ;;  %v16892_v60 = vld [vmem:[#allocation15_spill] sm:$0xff]  ;;  %v7341_v52 = vld [vmem:[%s15815_s3 + $0x10] sm:$0xff] }
 0x64c   :  { %v7324_v59 = vmul.f32 %v7196_v36, %v1820_v27  ;;  %v16870_v57 = vsel %vm13038_vm8, %v16868_v18, %v16869_v0  ;;  %v5453_v47 = vmul.f32 %v16872_v42, %v16871_v61  ;;  %v7693_v24 = vclamps-f32 %v3360_v17, 1.0  ;;  %v16886_v36 = vld [vmem:[#allocation139_spill] sm:$0xff]  ;;  %v16895_v17 = vld [vmem:[#allocation50_spill] sm:$0xff]  ;;  %v16897_v48 = vld [vmem:[#allocation17_spill] sm:$0xff] }
 0x64d   :  { %vm5676_vm6 = vcmp.eq.f32.partialorder %v16865_v38, 8.507059e+37  ;;  %v7691_v23 = vclamps-f32 %v3280_v4, 1.0  ;;  %vm5352_vm5 = vweird.f32 %v16873_v33  ;;  %v5470_v26 = vadd.f32 %v16875_v5, %v16874_v46  ;;  %v16888_v4 = vld [vmem:[#allocation154_spill] sm:$0xff]  ;;  %v16893_v10 = vld [vmem:[#allocation95_spill] sm:$0xff]  ;;  %v16896_v38 = vld [vmem:[#allocation16_spill] sm:$0xff] }
 0x64e   :  { %v5679_v31 = vsel %vm5676_vm6, %v5678_v50, %v16870_v57  ;;  %vm5472_vm11 = vweird.f32 %v16875_v5  ;;  %v5412_v63 = vadd.f32 0.18741608, %v16876_v29  ;;  %7507 = vmatpush.msrb.mxu2 %v7324_v59  ;;  %v7323_v37 = vmul.f32 %v7195_v15, %v1819_v30  ;;  %v16898_v59 = vld [vmem:[#allocation23_spill] sm:$0xff]  ;;  %v16899_v18 = vld [vmem:[#allocation25_spill] sm:$0xff]  ;;  %v16900_v0 = vld [vmem:[#allocation92_spill] sm:$0xff] }
 0x64f   :  { %v5429_v54 = vmul.f32 %v16877_v40, %v5428_v51  ;;  %v1741_v45 = vmul.f32 0.5, %v16878_v22  ;;  %v7117_v41 = vadd.f32 1.0, %v7693_v24  ;;  %v7116_v14 = vadd.f32 1.0, %v7692_v28  ;;  %v16903_v42 = vld [vmem:[#allocation130_spill] sm:$0xff]  ;;  %v16909_v22 = vld [vmem:[#allocation91_spill] sm:$0xff] }
 0x650   :  { %vm5351_vm8 = vweird.f32 %v16879_v49  ;;  %v5680_v53 = vmul.f32 %v5679_v31, %v16880_v25  ;;  %vm5471_vm7 = vweird.f32 %v16881_v35  ;;  %v5475_v6 = vand.u32 2147483647, %v16881_v35  ;;  %7508 = vmatpush.msrb.mxu2 %v7323_v37 }
 0x651   :  { %v5477_v62 = vand.u32 2147483648, %v16881_v35  ;;  %vm15657_vm12 = vmor %vm5471_vm7, %vm5472_vm11  ;;  %v1740_v21 = vmul.f32 0.5, %v16884_v55  ;;  %v7245_v43 = vmul.f32 %v7117_v41, %v1741_v45  ;;  %v7115_v20 = vadd.f32 1.0, %v7691_v23 }
 0x652   :  { %v7753_v44 = vclamps-f32 %v16885_v13, 1.0  ;;  %vm5232_vm13 = vweird.f32 %v16886_v36  ;;  %v5454_v32 = vadd.f32 1.1283791, %v5453_v47  ;;  %v5474_v11 = vsel %vm15657_vm12, %v16875_v5, %v5470_v26  ;;  %v16907_v26 = vld [vmem:[#allocation153_spill] sm:$0xff]  ;;  %vm15719_vm11 = vmor %vm5351_vm8, %vm5352_vm5 }
 0x653   :  { %v5413_v19 = vmul.f32 %v5412_v63, %v16887_v3  ;;  %vm5432_vm14 = vweird.f32 %v16877_v40  ;;  %v16889_v2 = vand.u32 2147483647, %v16888_v4  ;;  %v5430_v1 = vadd.f32 %v16877_v40, %v5429_v54  ;;  %7406 = vmatpush.msrb.mxu3 %v7245_v43  ;;  %v16908_v63 = vld [vmem:[#allocation155_spill] sm:$0xff]  ;;  %v16920_v3 = vld [vmem:[#allocation26_spill] sm:$0xff] }
 0x654   :  { %v1739_v15 = vmul.f32 0.5, %v16892_v60  ;;  %v7244_v16 = vmul.f32 %v7116_v14, %v1740_v21  ;;  %v7752_v50 = vclamps-f32 %v16893_v10, 1.0  ;;  %vm5231_vm1 = vweird.f32 %v16894_v58  ;;  %v7346_v14 = vld [vmem:[%s15815_s3 + $0x38] sm:$0xff]  ;;  %v16915_v21 = vld [vmem:[#allocation170_spill] sm:$0xff]  ;;  %v16924_v10 = vld [vmem:[#allocation68_spill] sm:$0xff] }
 0x655   :  { %vm15671_vm15 = vcmp.eq.f32.partialorder %v16889_v2, 8.507059e+37  ;;  %vm5476_vm2 = vcmp.eq.f32.partialorder %v5475_v6, 8.507059e+37  ;;  %v5478_v51 = vor.u32 1.1754944e-38, %v5477_v62  ;;  %vm5431_vm3 = vweird.f32 %v16895_v17  ;;  %v16913_v6 = vld [vmem:[#allocation161_spill] sm:$0xff]  ;;  %7509 = vmatmul.f32.vlgmr.msrb.gmra.mxu2 %v7346_v14  ;;  %v16921_v60 = vld [vmem:[#allocation131_spill] sm:$0xff]  ;;  %vm15755_vm12 = vmor %vm5231_vm1, %vm5232_vm13 }
 0x656   :  { %v5437_v28 = vand.u32 2147483648, %v16895_v17  ;;  %v5435_v56 = vand.u32 2147483647, %v16895_v17  ;;  %7407 = vmatpush.msrb.mxu3 %v7244_v16  ;;  %v7243_v12 = vmul.f32 %v7115_v20, %v1739_v15  ;;  %v7177_v9 = vadd.f32 1.0, %v7753_v44  ;;  %vm15692_vm4 = vmor %vm5431_vm3, %vm5432_vm14  ;;  %v16916_v44 = vld [vmem:[#allocation61_spill] sm:$0xff]  ;;  %v16922_v15 = vld [vmem:[#allocation159_spill] sm:$0xff] }
 0x657   :  { %v7751_v34 = vclamps-f32 %v5680_v53, 1.0  ;;  %v5560_v30 = vmul.f32 %v16897_v48, %v16896_v38  ;;  %v1801_v8 = vmul.f32 0.5, %v16898_v59  ;;  %v5495_v57 = vmul.f32 %v16900_v0, %v16899_v18  ;;  %v16927_v17 = vld [vmem:[#allocation162_spill] sm:$0xff]  ;;  %v16934_v18 = vld [vmem:[#allocation133_spill] sm:$0xff]  ;;  %v16935_v0 = vld [vmem:[#allocation168_spill] sm:$0xff] }
 0x658   :  { %v5479_v31 = vsel %vm5476_vm2, %v5478_v51, %v5474_v11  ;;  %v16904_v47 = vand.u32 2147483647, %v16903_v42  ;;  %v5414_v23 = vadd.f32 1.1283791, %v5413_v19  ;;  %v5434_v46 = vsel %vm15692_vm4, %v16877_v40, %v5430_v1  ;;  %7408 = vmatpush.msrb.mxu3 %v7243_v12  ;;  %v7345_v40 = vld [vmem:[%s15815_s3 + $0x30] sm:$0xff]  ;;  %v16956_v16 = vld [vmem:[#allocation145_spill] sm:$0xff] }
 0x659   :  { %v7176_v5 = vadd.f32 1.0, %v7752_v50  ;;  %v7750_v29 = vclamps-f32 %v16907_v26, 1.0  ;;  %v1800_v37 = vmul.f32 0.5, %v16908_v63  ;;  %v5520_v54 = vmul.f32 %v15633_v7, %v5495_v57  ;;  %7409 = vmatmul.f32.vlgmr.msrb.gmra.mxu3 %v7341_v52  ;;  %v16912_v7 = vld [vmem:[#allocation119_spill] sm:$0xff]  ;;  %7489 = vmatmul.f32.vlgmr.msrb.gmra.mxu1 %v7345_v40  ;;  %v16925_v50 = vld [vmem:[#allocation164_spill] sm:$0xff]  ;;  %v16936_v42 = vld [vmem:[#allocation142_spill] sm:$0xff] }
 0x65a   :  { %vm15698_vm6 = vcmp.eq.f32.partialorder %v16904_v47, 8.507059e+37  ;;  %v5455_v45 = vmul.f32 %v5454_v32, %v16909_v22  ;;  %v5438_v41 = vor.u32 1.1754944e-38, %v5437_v28  ;;  %vm5436_vm7 = vcmp.eq.f32.partialorder %v5435_v56, 8.507059e+37  ;;  %7453 = vmatpush.msra.mxu3 %v16912_v7  ;;  %v16938_v26 = vld [vmem:[#allocation135_spill] sm:$0xff] }
 0x65b   :  { %v7305_v53 = vmul.f32 %v7177_v9, %v1801_v8  ;;  %v7175_v35 = vadd.f32 1.0, %v7751_v34  ;;  %v7749_v62 = vclamps-f32 %v16913_v6, 1.0  ;;  %v5354_v55 = vsel %vm15719_vm11, %v16873_v33, %v16914_v39  ;;  %v16947_v39 = vld [vmem:[#allocation106_spill] sm:$0xff] }
 0x65c   :  { %v1799_v43 = vmul.f32 0.5, %v16915_v21  ;;  %v5480_v20 = vmul.f32 %v5479_v31, %v5455_v45  ;;  %v5439_v13 = vsel %vm5436_vm7, %v5438_v41, %v5434_v46  ;;  %v16917_v32 = vand.u32 2147483647, %v16916_v44  ;;  %v16944_v41 = vld [vmem:[#allocation138_spill] sm:$0xff]  ;;  %v16949_v21 = vld [vmem:[#allocation140_spill] sm:$0xff] }
 0x65d   :  { %v5415_v19 = vmul.f32 %v5414_v23, %v16920_v3  ;;  %7454 = vmatpush.msra.mxu3 %v7305_v53  ;;  %v7304_v4 = vmul.f32 %v7176_v5, %v1800_v37  ;;  %v7174_v2 = vadd.f32 1.0, %v7750_v29  ;;  %v7748_v1 = vclamps-f32 %v5560_v30, 1.0  ;;  %v16932_v30 = vld [vmem:[#allocation147_spill] sm:$0xff]  ;;  %v16939_v29 = vld [vmem:[#allocation144_spill] sm:$0xff]  ;;  %v16941_v37 = vld [vmem:[#allocation141_spill] sm:$0xff] }
 0x65e   :  { %vm15732_vm5 = vcmp.eq.f32.partialorder %v16917_v32, 8.507059e+37  ;;  %v5375_v33 = vmul.f32 %v16922_v15, %v16921_v60  ;;  %v16926_v51 = vsel %vm12561_vm10, %v16924_v10, %v16925_v50  ;;  %v16928_v56 = vand.u32 2147483647, %v16879_v49  ;;  %v16957_v50 = vld [vmem:[#allocation65_spill] sm:$0xff] }
 0x65f   :  { %v5399_v28 = vsel %vm15671_vm15, %v16927_v17, %v16926_v51  ;;  %v16929_v12 = vand.u32 2147483648, %v16879_v49  ;;  %v5440_v34 = vmul.f32 %v5439_v13, %v5415_v19  ;;  %7455 = vmatpush.msra.mxu3 %v7304_v4  ;;  %v7303_v38 = vmul.f32 %v7175_v35, %v1799_v43  ;;  %v16933_v49 = vld [vmem:[#allocation121_spill] sm:$0xff]  ;;  %v16950_v13 = vld [vmem:[#allocation8_spill] sm:$0xff] }
 0x660   :  { %vm5356_vm8 = vcmp.eq.f32.partialorder %v16928_v56, 8.507059e+37  ;;  %v7173_v48 = vadd.f32 1.0, %v7749_v62  ;;  %v7747_v27 = vclamps-f32 %v5520_v54, 1.0  ;;  %v5234_v59 = vsel %vm15755_vm12, %v16886_v36, %v16932_v30  ;;  %v16946_v62 = vld [vmem:[#allocation47_spill] sm:$0xff] }
 0x661   :  { %v5358_v52 = vor.u32 1.1754944e-38, %v16929_v12  ;;  %v1797_v8 = vmul.f32 0.5, %v16933_v49  ;;  %v5335_v57 = vmul.f32 %v16935_v0, %v16934_v18  ;;  %v5400_v61 = vmul.f32 %v5399_v28, %v5375_v33  ;;  %7456 = vmatpush.msra.mxu3 %v7303_v38  ;;  %v16955_v33 = vld [vmem:[#allocation118_spill] sm:$0xff]  ;;  %v16958_v12 = vld [vmem:[#allocation80_spill] sm:$0xff]  ;;  %v16961_v49 = vld [vmem:[#allocation127_spill] sm:$0xff] }
 0x662   :  { %v7302_v47 = vmul.f32 %v7174_v2, %v16936_v42  ;;  %v7172_v23 = vadd.f32 1.0, %v7748_v1  ;;  %v7746_v46 = vclamps-f32 %v5480_v20, 1.0  ;;  %v16940_v63 = vsel %vm12303_vm0, %v16938_v26, %v16939_v29  ;;  %v16952_v2 = vld [vmem:[#allocation87_spill] sm:$0xff]  ;;  %v16960_v38 = vld [vmem:[#allocation48_spill] sm:$0xff] }
 0x663   :  { %v5359_v31 = vsel %vm5356_vm8, %v5358_v52, %v5354_v55  ;;  %v5279_v36 = vsel %vm15698_vm6, %v16941_v37, %v16940_v63  ;;  %v16942_v54 = vand.u32 2147483647, %v16894_v58  ;;  %v16943_v22 = vand.u32 2147483648, %v16894_v58  ;;  %v16948_v55 = vld [vmem:[#allocation112_spill] sm:$0xff]  ;;  %v16953_v1 = vld [vmem:[#allocation55_spill] sm:$0xff]  ;;  %v16959_v52 = vld [vmem:[#allocation58_spill] sm:$0xff] }
 0x664   :  { %v1796_v14 = vmul.f32 0.5, %v16944_v41  ;;  %v5360_v40 = vmul.f32 %v5359_v31, %v5335_v57  ;;  %7457 = vmatpush.msra.mxu3 %v7302_v47  ;;  %v7301_v25 = vmul.f32 %v7173_v48, %v1797_v8  ;;  %v7171_v7 = vadd.f32 1.0, %v7747_v27  ;;  %v16962_v31 = vld [vmem:[#allocation132_spill] sm:$0xff]  ;;  %v16964_v37 = vld [vmem:[#allocation21_spill] sm:$0xff] }
 0x665   :  { %vm5236_vm10 = vcmp.eq.f32.partialorder %v16942_v54, 8.507059e+37  ;;  %v5238_v45 = vor.u32 1.1754944e-38, %v16943_v22  ;;  %v7745_v53 = vclamps-f32 %v5440_v34, 1.0  ;;  %v16945_v35 = vand.u32 2147483648, %v16916_v44 }
 0x666   :  { %v5320_v24 = vmul.f32 %v16947_v39, %v16946_v62  ;;  %v5255_v43 = vmul.f32 %v16949_v21, %v16948_v55  ;;  %v1795_v58 = vmul.f32 0.5, %v16950_v13  ;;  %7458 = vmatpush.msra.mxu3 %v7301_v25  ;;  %v7300_v32 = vmul.f32 %v7172_v23, %v1796_v14  ;;  %v16966_v25 = vld [vmem:[#allocation67_spill] sm:$0xff]  ;;  %v7370_v62 = vpop.f32.mrf.mxu1  ;;  %v7351_v39 = vpop.permute.xlu2 %7350 }
 0x667   :  { %v5198_v6 = vor.u32 1.1754944e-38, %v16945_v35  ;;  %v5239_v20 = vsel %vm5236_vm10, %v5238_v45, %v5234_v59  ;;  %v7170_v3 = vadd.f32 1.0, %v7746_v46  ;;  %v7744_v19 = vclamps-f32 %v5400_v61, 1.0  ;;  %v16963_v46 = vld [vmem:[#allocation53_spill] sm:$0xff]  ;;  %v16965_v45 = vld [vmem:[#allocation115_spill] sm:$0xff] }
 0x668   :  { %v16954_v60 = vsel %vm11198_vm9, %v16952_v2, %v16953_v1  ;;  %v5280_v15 = vmul.f32 %v5279_v36, %v5255_v43  ;;  %v5215_v10 = vmul.f32 %v16956_v16, %v16955_v33  ;;  %v1794_v51 = vmul.f32 0.5, %v16957_v50  ;;  %7459 = vmatpush.msra.mxu3 %v7300_v32 }
 0x669   :  { %v5199_v44 = vsel %vm15732_vm5, %v5198_v6, %v16954_v60  ;;  %v7299_v17 = vmul.f32 %v7171_v7, %v1795_v58  ;;  %v7169_v28 = vadd.f32 1.0, %v7745_v53  ;;  %v7743_v56 = vclamps-f32 %v5360_v40, 1.0  ;;  %v7344_v6 = vld [vmem:[%s15815_s3 + $0x28] sm:$0xff] }
 0x66a   :  { %v5175_v9 = vmul.f32 %v16959_v52, %v16958_v12  ;;  %v5240_v34 = vmul.f32 %v5239_v20, %v5215_v10  ;;  %v1793_v48 = vmul.f32 0.5, %v16960_v38  ;;  %v7298_v27 = vmul.f32 %v7170_v3, %v1794_v51 }
 0x66b   :  { %7460 = vmatpush.msra.mxu3 %v7299_v17  ;;  %v7168_v11 = vadd.f32 1.0, %v7744_v19  ;;  %v7742_v30 = vclamps-f32 %v5320_v24, 1.0  ;;  %v1792_v8 = vmul.f32 0.5, %v16961_v49  ;;  %v7167_v0 = vadd.f32 1.0, %v7743_v56  ;;  %v7390_v24 = vpop.f32.mrf.mxu2 }
 0x66c   :  { %v5200_v59 = vmul.f32 %v5199_v44, %v5175_v9  ;;  %v7297_v18 = vmul.f32 %v7169_v28, %v1793_v48  ;;  %v7741_v57 = vclamps-f32 %v5280_v15, 1.0  ;;  %v1791_v61 = vmul.f32 0.5, %v16962_v31 }
 0x66d   :  { %7461 = vmatpush.msra.mxu3 %v7298_v27  ;;  %v7296_v42 = vmul.f32 %v7168_v11, %v1792_v8  ;;  %v7166_v47 = vadd.f32 1.0, %v7742_v30  ;;  %v7740_v23 = vclamps-f32 %v5240_v34, 1.0  ;;  %v1790_v5 = vmul.f32 0.5, %v16963_v46 }
 0x66e   :  { %v7295_v26 = vmul.f32 %v7167_v0, %v1791_v61  ;;  %v7165_v29 = vadd.f32 1.0, %v7741_v57  ;;  %v7739_v63 = vclamps-f32 %v5200_v59, 1.0  ;;  %v1789_v36 = vmul.f32 0.5, %v16964_v37 }
 0x66f   :  { %7462 = vmatpush.msra.mxu3 %v7297_v18  ;;  %v7294_v54 = vmul.f32 %v7166_v47, %v1790_v5  ;;  %v7164_v22 = vadd.f32 1.0, %v7740_v23  ;;  %v1788_v41 = vmul.f32 0.5, %v16965_v45  ;;  %v1787_v7 = vmul.f32 0.5, %v16966_v25 }
 0x670   :  { %v7293_v14 = vmul.f32 %v7165_v29, %v1789_v36  ;;  %v7163_v40 = vadd.f32 1.0, %v7739_v63  ;;  %v7371_v55 = vadd.f32 %v7370_v62, %v7351_v39  ;;  %vm7513_vm9 = vcmask 64512  }
 0x671   :  { %7463 = vmatpush.msra.mxu3 %v7296_v42  ;;  %v7292_v53 = vmul.f32 %v7164_v22, %v1788_v41 }
 0x672   :  { %v7291_v35 = vmul.f32 %v7163_v40, %v1787_v7  ;;  %v7391_v43 = vadd.f32 %v7390_v24, %v7371_v55 }
 0x673   :  { %7464 = vmatpush.msra.mxu3 %v7295_v26 }
 0x675   :  { %7465 = vmatpush.msra.mxu3 %v7294_v54 }
 0x677   :  { %7466 = vmatpush.msra.mxu3 %v7293_v14 }
 0x679   :  { %7467 = vmatpush.msra.mxu3 %v7292_v53 }
 0x67b   :  { %7468 = vmatpush.msra.mxu3 %v7291_v35 }
 0x67c   :  { %7469 = vmatmul.f32.vlgmr.msra.gmra.mxu3 %v7344_v6 }
 0x6b1   :  { %v7430_v13 = vpop.f32.mrf.mxu1 }
 0x6b3   :  { %v7450_v58 = vpop.f32.mrf.mxu2 }
 0x6d6   :  { %v7490_v4 = vpop.f32.mrf.mxu1 }
 0x6d8   :  { %v7510_v1 = vpop.f32.mrf.mxu2 }
 0x6dc   :  { %v7410_v21 = vpop.f32.mrf.mxu3 }
 0x6dd   :  { %v7411_v20 = vadd.f32 %v7410_v21, %v7391_v43 }
 0x6df   :  { %v7431_v32 = vadd.f32 %v7430_v13, %v7411_v20 }
 0x6e1   :  { %v7451_v3 = vadd.f32 %v7450_v58, %v7431_v32 }
 0x6ff   :  { %v7470_v19 = vpop.f32.mrf.mxu3 }
 0x700   :  { %v7471_v2 = vadd.f32 %v7470_v19, %v7451_v3 }
 0x702   :  { %v7491_v60 = vadd.f32 %v7490_v4, %v7471_v2 }
 0x704   :  { %v7511_v44 = vadd.f32 %v7510_v1, %v7491_v60 }
 0x706   :  { %7514 = vst.msk [vmem:[#allocation2] sm:$0xff] %vm7513_vm9, %v7511_v44 }
 0x707   :  { %7525 = dma.vmem_to_hbm [thread:$0]  %s7521_s1, 128, %s7523_s10, [#allocation3]  }
 0x708   :  { %8084 = dma.done.wait [#allocation3], 128  }
 0x709   :  { %8085 = vsyncadd [#allocation3], 4294967168 }
 0x70a   :  { %7530 = vsyncpa [#allocation3], 1 }

</bundles_post_ra>
